<compile_context>
chip_gen: v6e
topology: v6e:2x2x1
jax: 0.10.0
libtpu: 0.0.40
codegen_flags: <defaults>
</compile_context>

<pallas_src>
import math
import functools

import jax
import jax.numpy as jnp
from jax import lax
from jax.experimental import pallas as pl
from jax.experimental.pallas import tpu as pltpu


def _round_up(x, m):
    return ((x + m - 1) // m) * m


# ----------------------------------------------------------------------------
# Pallas kernel 1: lane-dense skinny GEMM with fused scale + ReLU epilogue.
#   a: (N, K)  weights, N = Cout <= 8, K = Cin*k*k <= 216   (bf16)
#   b: (K, M)  im2col patches, M = B*spatial on the lane axis (bf16)
#   out: (N, M) -> unmasked full-lane stores; f32 accumulation on the MXU.
# ----------------------------------------------------------------------------
def _matmul_kernel(a_ref, b_ref, o_ref, *, relu, scale, out_dtype):
    acc = jnp.dot(a_ref[...], b_ref[...], preferred_element_type=jnp.float32)
    if scale != 1.0:
        acc = acc * scale
    if relu:
        acc = jnp.maximum(acc, 0.0)
    o_ref[...] = acc.astype(out_dtype)


def matmul_pallas(a, b, *, relu=False, scale=1.0, out_dtype=jnp.float32,
                  tm_max=2048):
    """a: (N, K), b: (K, M) -> relu(scale * (a @ b)) with (N, M) lane-dense."""
    N, K = a.shape
    K2, M = b.shape
    assert K == K2
    a = a.astype(jnp.bfloat16)
    b = b.astype(jnp.bfloat16)
    Mp128 = _round_up(M, 128)
    if Mp128 <= tm_max:
        tm = Mp128                       # single full-extent block
    else:
        tm = tm_max
        # keep >= 4 grid steps so both v7x TensorCores get pipeline depth
        while pl.cdiv(Mp128, tm) < 4 and tm > 512:
            tm //= 2
    Mp = _round_up(M, tm)
    if Mp != M:
        b = jnp.pad(b, ((0, 0), (0, Mp - M)))     # pad only M, never K/N
    out = pl.pallas_call(
        functools.partial(_matmul_kernel, relu=relu, scale=float(scale),
                          out_dtype=out_dtype),
        out_shape=jax.ShapeDtypeStruct((N, Mp), out_dtype),
        grid=(Mp // tm,),
        in_specs=[pl.BlockSpec((N, K), lambda i: (0, 0)),
                  pl.BlockSpec((K, tm), lambda i: (0, i))],
        out_specs=pl.BlockSpec((N, tm), lambda i: (0, i)),
        compiler_params=pltpu.CompilerParams(
            dimension_semantics=("parallel",)),
    )(a, b)
    return out[:, :M]


# ----------------------------------------------------------------------------
# Pallas kernel 2: cost volume  (_build_volume_2d, stride=1)
#   cost[b, d, h, w] = sum_c |feat_l[b,c,h,w] - feat_r[b,c,h,w-d]|   (w >= d)
#                      sum_c |feat_l[b,c,h,w]|                       (w <  d)
#   feat_r is zero-padded on the left ONCE; each disparity is a static
#   lane-offset slice.  All maxdisp results are written in one lane-dense
#   (maxdisp, H*W) store.
# ----------------------------------------------------------------------------
def _cost_volume_kernel(l_ref, rpad_ref, o_ref, *, maxdisp, width):
    fl = l_ref[0].astype(jnp.float32)       # (C, H, W)
    frp = rpad_ref[0].astype(jnp.float32)   # (C, H, W + maxdisp - 1)
    outs = []
    for d in range(maxdisp):
        off = maxdisp - 1 - d
        shifted = frp[:, :, off:off + width]          # feat_r[..., w-d], 0 if w<d
        outs.append(jnp.sum(jnp.abs(fl - shifted), axis=0))   # (H, W)
    stacked = jnp.stack(outs, axis=0)                  # (maxdisp, H, W)
    H, W = outs[0].shape
    o_ref[0] = stacked.reshape(maxdisp, H * W).astype(o_ref.dtype)


def build_volume_2d(feat_l, feat_r, maxdisp):
    B, C, H, W = feat_l.shape
    feat_r_pad = jnp.pad(feat_r, ((0, 0), (0, 0), (0, 0), (maxdisp - 1, 0)))
    out = pl.pallas_call(
        functools.partial(_cost_volume_kernel, maxdisp=maxdisp, width=W),
        out_shape=jax.ShapeDtypeStruct((B, maxdisp, H * W), jnp.bfloat16),
        grid=(B,),
        in_specs=[pl.BlockSpec((1, C, H, W), lambda b: (b, 0, 0, 0)),
                  pl.BlockSpec((1, C, H, W + maxdisp - 1),
                               lambda b: (b, 0, 0, 0))],
        out_specs=pl.BlockSpec((1, maxdisp, H * W), lambda b: (b, 0, 0)),
        compiler_params=pltpu.CompilerParams(
            dimension_semantics=("parallel",)),
    )(feat_l, feat_r_pad)
    return out.reshape(B, maxdisp, H, W)


# ----------------------------------------------------------------------------
# Pallas kernel 3: warped cost volume (_build_volume_2d3, stride=1)
#   For candidate j (shift s_j = -maxdisp+1+j):
#     x_src(b,h,w) = w - wflow(b,h,w) + s_j
#     warped       = horizontal bilinear sample of feat_r at x_src (zero pad)
#     cost[:,j]    = sum_c |feat_l - warped|
#   The one-hot interpolation matrix is built ONCE over a padded source axis
#   Wp = W + 2*(maxdisp-1) (two VPU selects total); every shift is a static
#   lane-offset slice of it, contracted against feat_r on the MXU in bf16.
#   All 2*maxdisp-1 results are written in one lane-dense (J, H*W) store.
# ----------------------------------------------------------------------------
def _warp_cost_kernel(l_ref, r_ref, f_ref, o_ref, *, maxdisp):
    fl = l_ref[0].astype(jnp.float32)   # (H, C, W)
    fr = r_ref[0].astype(jnp.bfloat16)  # (H, C, W)
    flow = f_ref[0]                     # (H, W) f32
    H, C, W = fl.shape
    P = maxdisp - 1
    J = 2 * maxdisp - 1
    Wp = W + 2 * P

    w_idx = lax.broadcasted_iota(jnp.int32, (H, W), 1).astype(jnp.float32)
    base = w_idx - flow                                  # x_src at shift 0
    x0f = jnp.floor(base)
    frac = (base - x0f)[:, :, None]                      # (H, W, 1)
    x0p = x0f.astype(jnp.int32)[:, :, None] + P          # padded source index
    vp = lax.broadcasted_iota(jnp.int32, (H, W, Wp), 2)
    # built once; shifts below are free lane-offset slices of this matrix
    wmat = (jnp.where(vp == x0p, 1.0 - frac, 0.0)
            + jnp.where(vp == x0p + 1, frac, 0.0)).astype(jnp.bfloat16)

    outs = []
    for j in range(J):
        off = 2 * P - j                                  # = (maxdisp-1) - s_j
        wm_j = wmat[:, :, off:off + W]                   # (H, W, W)
        warped = jnp.einsum('hcv,hwv->hcw', fr, wm_j,
                            preferred_element_type=jnp.float32)  # (H, C, W)
        outs.append(jnp.sum(jnp.abs(fl - warped), axis=1))       # (H, W)
    stacked = jnp.stack(outs, axis=0)                    # (J, H, W)
    o_ref[0] = stacked.reshape(J, H * W).astype(o_ref.dtype)


def build_volume_2d3(feat_l, feat_r, maxdisp, wflow):
    B, C, H, W = feat_l.shape
    J = 2 * maxdisp - 1
    fl_t = feat_l.transpose(0, 2, 1, 3)        # (B, H, C, W)
    fr_t = feat_r.transpose(0, 2, 1, 3)
    flow = wflow[:, 0].astype(jnp.float32)     # (B, H, W)
    out = pl.pallas_call(
        functools.partial(_warp_cost_kernel, maxdisp=maxdisp),
        out_shape=jax.ShapeDtypeStruct((B, J, H * W), jnp.bfloat16),
        grid=(B,),
        in_specs=[pl.BlockSpec((1, H, C, W), lambda b: (b, 0, 0, 0)),
                  pl.BlockSpec((1, H, C, W), lambda b: (b, 0, 0, 0)),
                  pl.BlockSpec((1, H, W), lambda b: (b, 0, 0))],
        out_specs=pl.BlockSpec((1, J, H * W), lambda b: (b, 0, 0)),
        compiler_params=pltpu.CompilerParams(
            dimension_semantics=("parallel",)),
    )(fl_t, fr_t, flow)
    return out.reshape(B, J, H, W)


# ----------------------------------------------------------------------------
# Pallas kernel 4: fused softmax(-cost) + disparityregression2
#   out[b,0,h,w] = scale * sum_d softmax(-cost, axis=1)[b,d,h,w] * (start + d)
#   lane-dense (B, D, H*W) layout; EUP approximate reciprocal; upsample
#   pre-scale (img_H / Hs) folded into the epilogue.
# ----------------------------------------------------------------------------
def _disp_regression_kernel(cost_ref, o_ref, *, start, scale):
    c = cost_ref[0]                                       # (D, HW)
    x = -c
    m = jnp.max(x, axis=0, keepdims=True)
    e = jnp.exp(x - m)
    s = jnp.sum(e, axis=0, keepdims=True)                 # (1, HW)
    disp = start + lax.broadcasted_iota(jnp.int32, c.shape, 0).astype(jnp.float32)
    num = jnp.sum(e * disp, axis=0, keepdims=True)
    o_ref[0] = num * pl.reciprocal(s, approx=True) * scale


def disp_regression(cost, start, scale):
    B, D, H, W = cost.shape
    HW = H * W
    cost_f = cost.astype(jnp.float32).reshape(B, D, HW)
    out = pl.pallas_call(
        functools.partial(_disp_regression_kernel,
                          start=float(start), scale=float(scale)),
        out_shape=jax.ShapeDtypeStruct((B, 1, HW), jnp.float32),
        grid=(B,),
        in_specs=[pl.BlockSpec((1, D, HW), lambda b: (b, 0, 0))],
        out_specs=pl.BlockSpec((1, 1, HW), lambda b: (b, 0, 0)),
        compiler_params=pltpu.CompilerParams(
            dimension_semantics=("parallel",)),
    )(cost_f)
    return out.reshape(B, 1, H, W)


# ----------------------------------------------------------------------------
# Convolutions as bf16 im2col + lane-dense Pallas matmul.
# Patches are built directly in (K, M) layout so the 9x/27x-expanded tensor
# never needs an extra transpose pass, and in bf16 so it costs half the bytes.
# ----------------------------------------------------------------------------
def conv2d_im2col(x, w, stride=1, padding=1, relu=False, scale=1.0,
                  out_dtype=jnp.bfloat16):
    """x: (B, Cin, H, W), w: (Cout, Cin, kh, kw)."""
    B, Cin, H, W = x.shape
    Cout, _, kh, kw = w.shape
    xt = x.astype(jnp.bfloat16).transpose(1, 0, 2, 3)        # (Cin, B, H, W)
    xp = jnp.pad(xt, ((0, 0), (0, 0), (padding, padding), (padding, padding)))
    Ho = (H + 2 * padding - kh) // stride + 1
    Wo = (W + 2 * padding - kw) // stride + 1
    cols = []
    for i in range(kh):
        for j in range(kw):
            cols.append(xp[:, :, i:i + stride * (Ho - 1) + 1:stride,
                              j:j + stride * (Wo - 1) + 1:stride])
    p = jnp.stack(cols, axis=1).reshape(Cin * kh * kw, B * Ho * Wo)   # (K, M)
    wm = w.reshape(Cout, Cin * kh * kw).astype(jnp.bfloat16)          # (N, K)
    out = matmul_pallas(wm, p, relu=relu, scale=scale, out_dtype=out_dtype)
    return out.reshape(Cout, B, Ho, Wo).transpose(1, 0, 2, 3)


def conv3d_im2col(x, w, relu=False, scale=1.0, out_dtype=jnp.bfloat16):
    """x: (B, Cin, D, H, W), w: (Cout, Cin, 3, 3, 3), stride 1, pad 1."""
    B, Cin, D, H, W = x.shape
    Cout = w.shape[0]
    xt = x.astype(jnp.bfloat16).transpose(1, 0, 2, 3, 4)     # (Cin, B, D, H, W)
    xp = jnp.pad(xt, ((0, 0), (0, 0), (1, 1), (1, 1), (1, 1)))
    cols = []
    for kd in range(3):
        for kh in range(3):
            for kw_ in range(3):
                cols.append(xp[:, :, kd:kd + D, kh:kh + H, kw_:kw_ + W])
    p = jnp.stack(cols, axis=1).reshape(Cin * 27, B * D * H * W)      # (K, M)
    wm = w.reshape(Cout, Cin * 27).astype(jnp.bfloat16)               # (N, K)
    out = matmul_pallas(wm, p, relu=relu, scale=scale, out_dtype=out_dtype)
    return out.reshape(Cout, B, D, H, W).transpose(1, 0, 2, 3, 4)


# ----------------------------------------------------------------------------
# Stand-in sub-networks (see TODO(synk) at top).  ReLU / BN scale are fused
# into the Pallas matmul epilogue; all intermediate activations are bf16.
# ----------------------------------------------------------------------------
def feature_extraction_apply(ws, x):
    h = conv2d_im2col(x, ws[0], stride=2, relu=True)      # 1/2
    f4 = conv2d_im2col(h, ws[1], stride=2, relu=True)     # 1/4
    f8 = conv2d_im2col(f4, ws[2], stride=2, relu=True)    # 1/8
    f16 = conv2d_im2col(f8, ws[3], stride=2, relu=True)   # 1/16
    return [f16, f8, f4]


def post_3dconvs_apply(ws, x):
    # BatchNorm3d in eval mode with default running stats (mean 0, var 1,
    # weight 1, bias 0) is a scale by 1/sqrt(1+eps), fused into the matmul.
    bn_scale = 1.0 / math.sqrt(1.0 + 1e-5)
    h = conv3d_im2col(x, ws[0], relu=True, scale=bn_scale)
    for w in ws[1:-1]:
        h = conv3d_im2col(h, w, relu=True, scale=bn_scale)
    # last conv feeds softmax regression -> keep f32
    return conv3d_im2col(h, ws[-1], out_dtype=jnp.float32)


def bilinear_resize(x, h, w):
    B, C = x.shape[0], x.shape[1]
    return jax.image.resize(x.astype(jnp.float32), (B, C, h, w),
                            method='bilinear', antialias=False)


# ----------------------------------------------------------------------------
# Parameter init (deterministic; same init law as the PyTorch __init__)
# ----------------------------------------------------------------------------
def init_params(key, args):
    C = args['init_channels']
    keys = list(jax.random.split(key, 32))
    ki = iter(keys)

    def conv2d_w(k, cout, cin, ks=3):
        n = ks * ks * cout
        return jax.random.normal(k, (cout, cin, ks, ks), jnp.float32) * math.sqrt(2.0 / n)

    def conv3d_w(k, cout, cin, ks=3):
        n = ks * ks * ks * cout
        return jax.random.normal(k, (cout, cin, ks, ks, ks), jnp.float32) * math.sqrt(2.0 / n)

    feat = [conv2d_w(next(ki), C, 3),
            conv2d_w(next(ki), C, C),
            conv2d_w(next(ki), C, C),
            conv2d_w(next(ki), C, C)]
    post = []
    for i in range(3):
        ch = args['channels_3d'] * args['growth_rate'][i]
        layers = [conv3d_w(next(ki), ch, 1)]
        for _ in range(args['layers_3d']):
            layers.append(conv3d_w(next(ki), ch, ch))
        layers.append(conv3d_w(next(ki), 1, ch))
        post.append(layers)
    return {'feat': feat, 'post': post}


# ----------------------------------------------------------------------------
# AnyNet forward
# ----------------------------------------------------------------------------
def anynet_forward(params, left, right, args):
    maxdisplist = args['maxdisplist']
    B, _, img_H, img_W = left.shape

    # left + right in one pass per conv layer (halves call count, doubles M)
    lr = jnp.concatenate([left, right], axis=0)
    feats = feature_extraction_apply(params['feat'], lr)
    feats_l = [f[:B] for f in feats]
    feats_r = [f[B:] for f in feats]

    pred = []
    for lvl in range(len(feats_l)):
        fl, fr = feats_l[lvl], feats_r[lvl]
        Hs, Ws = fl.shape[2], fl.shape[3]
        if lvl > 0:
            wflow = bilinear_resize(pred[lvl - 1], Hs, Ws) * Hs / img_H
            cost = build_volume_2d3(fl, fr, maxdisplist[lvl], wflow)
        else:
            cost = build_volume_2d(fl, fr, maxdisplist[0])

        cost = cost[:, None]                                  # (B, 1, D, H, W)
        cost = post_3dconvs_apply(params['post'][lvl], cost)
        cost = cost[:, 0]                                     # (B, D, H, W)

        start = 0.0 if lvl == 0 else float(-maxdisplist[lvl] + 1)
        # img_H / Hs pre-upsample scaling is fused into the regression kernel.
        pred_low_res = disp_regression(cost, start, img_H / Hs)   # (B,1,Hs,Ws)
        disp_up = bilinear_resize(pred_low_res, img_H, img_W)
        if lvl == 0:
            pred.append(disp_up)
        else:
            pred.append(disp_up + pred[lvl - 1])

    # with_spn=False: SPN refinement branch skipped (see TODO(synk) above).
    return pred


# ----------------------------------------------------------------------------
if __name__ == "__main__":
    args = dict(init_channels=4,
                maxdisplist=[4, 2, 2],
                spn_init_channels=8,
                nblocks=2,
                layers_3d=1,
                channels_3d=2,
                growth_rate=[4, 1, 1],
                with_spn=False)

    key = jax.random.PRNGKey(0)
    kp, kl, kr = jax.random.split(key, 3)
    params = init_params(kp, args)

    left = jax.random.normal(kl, (2, 3, 64, 64), jnp.float32)
    right = jax.random.normal(kr, (2, 3, 64, 64), jnp.float32)

    fwd = jax.jit(lambda p, l, r: anynet_forward(p, l, r, args))
    preds = fwd(params, left, right)
    preds = jax.block_until_ready(preds)

    assert len(preds) == 3
    for p in preds:
        assert p.shape == (2, 1, 64, 64), p.shape
        assert bool(jnp.all(jnp.isfinite(p)))
    print("KERNEL_OK")
</pallas_src>

<mosaic_0001>
module attributes {stable_mosaic.version = 11 : i64} {
  func.func @_matmul_kernel(%arg0: i32, %arg1: memref<4x27xbf16, #tpu.memory_space<vmem>>, %arg2: memref<27x1024xbf16, #tpu.memory_space<vmem>>, %arg3: memref<4x1024xbf16, #tpu.memory_space<vmem>>) attributes {dimension_semantics = [#tpu.dimension_semantics<parallel>], iteration_bounds = array<i64: 4>, scalar_prefetch = 0 : i64, scratch_operands = 0 : i64, tpu.core_type = #tpu.core_type<tc>, window_params = [{pipeline_mode = #tpu.pipeline_mode<synchronous>, transform_indices = @transform_0, window_bounds = array<i64: 4, 27>}, {transform_indices = @transform_1, window_bounds = array<i64: 27, 1024>}, {transform_indices = @transform_2, window_bounds = array<i64: 4, 1024>}]} {
    %c0 = arith.constant 0 : index
    %c0_0 = arith.constant 0 : index
    %0 = vector.load %arg1[%c0, %c0_0] : memref<4x27xbf16, #tpu.memory_space<vmem>>, vector<4x27xbf16>
    %c0_1 = arith.constant 0 : index
    %c0_2 = arith.constant 0 : index
    %1 = vector.load %arg2[%c0_1, %c0_2] : memref<27x1024xbf16, #tpu.memory_space<vmem>>, vector<27x1024xbf16>
    %cst = arith.constant dense<0.000000e+00> : vector<4x1024xf32>
    %2 = tpu.matmul %0, %1, %cst {dimension_numbers = #tpu.dot_dimension_numbers<[1], [0], [0], [1], [0, 0, 1, 1], [], []>} : vector<4x27xbf16>, vector<27x1024xbf16>, vector<4x1024xf32> -> vector<4x1024xf32>
    %cst_3 = arith.constant 0.000000e+00 : f32
    %3 = vector.broadcast %cst_3 : f32 to vector<4x1024xf32>
    %4 = arith.maximumf %2, %3 : vector<4x1024xf32>
    %5 = arith.truncf %4 : vector<4x1024xf32> to vector<4x1024xbf16>
    %c0_4 = arith.constant 0 : index
    %c0_5 = arith.constant 0 : index
    %6 = vector.load %arg3[%c0_4, %c0_5] : memref<4x1024xbf16, #tpu.memory_space<vmem>>, vector<4x1024xbf16>
    tpu.vector_store %arg3[%c0_4, %c0_5], %5 {strides = array<i32>} : memref<4x1024xbf16, #tpu.memory_space<vmem>>, vector<4x1024xbf16>,
    return
  }
  func.func @transform_0(%arg0: i32) -> (i32, i32) {
    %c0_i32 = arith.constant 0 : i32
    %c0_i32_0 = arith.constant 0 : i32
    %c0_i32_1 = arith.constant 0 : i32
    return %c0_i32, %c0_i32_0 : i32, i32
  }
  func.func @transform_1(%arg0: i32) -> (i32, i32) {
    %c0_i32 = arith.constant 0 : i32
    %c0_i32_0 = arith.constant 0 : i32
    return %c0_i32, %arg0 : i32, i32
  }
  func.func @transform_2(%arg0: i32) -> (i32, i32) {
    %c0_i32 = arith.constant 0 : i32
    %c0_i32_0 = arith.constant 0 : i32
    return %c0_i32, %arg0 : i32, i32
  }
}

module attributes {stable_mosaic.version = 11 : i64} {
  func.func @_matmul_kernel(%arg0: i32, %arg1: memref<4x36xbf16, #tpu.memory_space<vmem>>, %arg2: memref<36x1024xbf16, #tpu.memory_space<vmem>>, %arg3: memref<4x1024xbf16, #tpu.memory_space<vmem>>) attributes {dimension_semantics = [#tpu.dimension_semantics<parallel>], iteration_bounds = array<i64: 1>, scalar_prefetch = 0 : i64, scratch_operands = 0 : i64, tpu.core_type = #tpu.core_type<tc>, window_params = [{pipeline_mode = #tpu.pipeline_mode<synchronous>, transform_indices = @transform_0, window_bounds = array<i64: 4, 36>}, {transform_indices = @transform_1, window_bounds = array<i64: 36, 1024>}, {transform_indices = @transform_2, window_bounds = array<i64: 4, 1024>}]} {
    %c0 = arith.constant 0 : index
    %c0_0 = arith.constant 0 : index
    %0 = vector.load %arg1[%c0, %c0_0] : memref<4x36xbf16, #tpu.memory_space<vmem>>, vector<4x36xbf16>
    %c0_1 = arith.constant 0 : index
    %c0_2 = arith.constant 0 : index
    %1 = vector.load %arg2[%c0_1, %c0_2] : memref<36x1024xbf16, #tpu.memory_space<vmem>>, vector<36x1024xbf16>
    %cst = arith.constant dense<0.000000e+00> : vector<4x1024xf32>
    %2 = tpu.matmul %0, %1, %cst {dimension_numbers = #tpu.dot_dimension_numbers<[1], [0], [0], [1], [0, 0, 1, 1], [], []>} : vector<4x36xbf16>, vector<36x1024xbf16>, vector<4x1024xf32> -> vector<4x1024xf32>
    %cst_3 = arith.constant 0.000000e+00 : f32
    %3 = vector.broadcast %cst_3 : f32 to vector<4x1024xf32>
    %4 = arith.maximumf %2, %3 : vector<4x1024xf32>
    %5 = arith.truncf %4 : vector<4x1024xf32> to vector<4x1024xbf16>
    %c0_4 = arith.constant 0 : index
    %c0_5 = arith.constant 0 : index
    %6 = vector.load %arg3[%c0_4, %c0_5] : memref<4x1024xbf16, #tpu.memory_space<vmem>>, vector<4x1024xbf16>
    tpu.vector_store %arg3[%c0_4, %c0_5], %5 {strides = array<i32>} : memref<4x1024xbf16, #tpu.memory_space<vmem>>, vector<4x1024xbf16>,
    return
  }
  func.func @transform_0(%arg0: i32) -> (i32, i32) {
    %c0_i32 = arith.constant 0 : i32
    %c0_i32_0 = arith.constant 0 : i32
    %c0_i32_1 = arith.constant 0 : i32
    return %c0_i32, %c0_i32_0 : i32, i32
  }
  func.func @transform_1(%arg0: i32) -> (i32, i32) {
    %c0_i32 = arith.constant 0 : i32
    %c0_i32_0 = arith.constant 0 : i32
    return %c0_i32, %arg0 : i32, i32
  }
  func.func @transform_2(%arg0: i32) -> (i32, i32) {
    %c0_i32 = arith.constant 0 : i32
    %c0_i32_0 = arith.constant 0 : i32
    return %c0_i32, %arg0 : i32, i32
  }
}

module attributes {stable_mosaic.version = 11 : i64} {
  func.func @_matmul_kernel(%arg0: i32, %arg1: memref<4x36xbf16, #tpu.memory_space<vmem>>, %arg2: memref<36x256xbf16, #tpu.memory_space<vmem>>, %arg3: memref<4x256xbf16, #tpu.memory_space<vmem>>) attributes {dimension_semantics = [#tpu.dimension_semantics<parallel>], iteration_bounds = array<i64: 1>, scalar_prefetch = 0 : i64, scratch_operands = 0 : i64, tpu.core_type = #tpu.core_type<tc>, window_params = [{pipeline_mode = #tpu.pipeline_mode<synchronous>, transform_indices = @transform_0, window_bounds = array<i64: 4, 36>}, {transform_indices = @transform_1, window_bounds = array<i64: 36, 256>}, {transform_indices = @transform_2, window_bounds = array<i64: 4, 256>}]} {
    %c0 = arith.constant 0 : index
    %c0_0 = arith.constant 0 : index
    %0 = vector.load %arg1[%c0, %c0_0] : memref<4x36xbf16, #tpu.memory_space<vmem>>, vector<4x36xbf16>
    %c0_1 = arith.constant 0 : index
    %c0_2 = arith.constant 0 : index
    %1 = vector.load %arg2[%c0_1, %c0_2] : memref<36x256xbf16, #tpu.memory_space<vmem>>, vector<36x256xbf16>
    %cst = arith.constant dense<0.000000e+00> : vector<4x256xf32>
    %2 = tpu.matmul %0, %1, %cst {dimension_numbers = #tpu.dot_dimension_numbers<[1], [0], [0], [1], [0, 0, 1, 1], [], []>} : vector<4x36xbf16>, vector<36x256xbf16>, vector<4x256xf32> -> vector<4x256xf32>
    %cst_3 = arith.constant 0.000000e+00 : f32
    %3 = vector.broadcast %cst_3 : f32 to vector<4x256xf32>
    %4 = arith.maximumf %2, %3 : vector<4x256xf32>
    %5 = arith.truncf %4 : vector<4x256xf32> to vector<4x256xbf16>
    %c0_4 = arith.constant 0 : index
    %c0_5 = arith.constant 0 : index
    %6 = vector.load %arg3[%c0_4, %c0_5] : memref<4x256xbf16, #tpu.memory_space<vmem>>, vector<4x256xbf16>
    tpu.vector_store %arg3[%c0_4, %c0_5], %5 {strides = array<i32>} : memref<4x256xbf16, #tpu.memory_space<vmem>>, vector<4x256xbf16>,
    return
  }
  func.func @transform_0(%arg0: i32) -> (i32, i32) {
    %c0_i32 = arith.constant 0 : i32
    %c0_i32_0 = arith.constant 0 : i32
    %c0_i32_1 = arith.constant 0 : i32
    return %c0_i32, %c0_i32_0 : i32, i32
  }
  func.func @transform_1(%arg0: i32) -> (i32, i32) {
    %c0_i32 = arith.constant 0 : i32
    %c0_i32_0 = arith.constant 0 : i32
    return %c0_i32, %arg0 : i32, i32
  }
  func.func @transform_2(%arg0: i32) -> (i32, i32) {
    %c0_i32 = arith.constant 0 : i32
    %c0_i32_0 = arith.constant 0 : i32
    return %c0_i32, %arg0 : i32, i32
  }
}

module attributes {stable_mosaic.version = 11 : i64} {
  func.func @_matmul_kernel(%arg0: i32, %arg1: memref<4x36xbf16, #tpu.memory_space<vmem>>, %arg2: memref<36x128xbf16, #tpu.memory_space<vmem>>, %arg3: memref<4x128xbf16, #tpu.memory_space<vmem>>) attributes {dimension_semantics = [#tpu.dimension_semantics<parallel>], iteration_bounds = array<i64: 1>, scalar_prefetch = 0 : i64, scratch_operands = 0 : i64, tpu.core_type = #tpu.core_type<tc>, window_params = [{pipeline_mode = #tpu.pipeline_mode<synchronous>, transform_indices = @transform_0, window_bounds = array<i64: 4, 36>}, {transform_indices = @transform_1, window_bounds = array<i64: 36, 128>}, {transform_indices = @transform_2, window_bounds = array<i64: 4, 128>}]} {
    %c0 = arith.constant 0 : index
    %c0_0 = arith.constant 0 : index
    %0 = vector.load %arg1[%c0, %c0_0] : memref<4x36xbf16, #tpu.memory_space<vmem>>, vector<4x36xbf16>
    %c0_1 = arith.constant 0 : index
    %c0_2 = arith.constant 0 : index
    %1 = vector.load %arg2[%c0_1, %c0_2] : memref<36x128xbf16, #tpu.memory_space<vmem>>, vector<36x128xbf16>
    %cst = arith.constant dense<0.000000e+00> : vector<4x128xf32>
    %2 = tpu.matmul %0, %1, %cst {dimension_numbers = #tpu.dot_dimension_numbers<[1], [0], [0], [1], [0, 0, 1, 1], [], []>} : vector<4x36xbf16>, vector<36x128xbf16>, vector<4x128xf32> -> vector<4x128xf32>
    %cst_3 = arith.constant 0.000000e+00 : f32
    %3 = vector.broadcast %cst_3 : f32 to vector<4x128xf32>
    %4 = arith.maximumf %2, %3 : vector<4x128xf32>
    %5 = arith.truncf %4 : vector<4x128xf32> to vector<4x128xbf16>
    %c0_4 = arith.constant 0 : index
    %c0_5 = arith.constant 0 : index
    %6 = vector.load %arg3[%c0_4, %c0_5] : memref<4x128xbf16, #tpu.memory_space<vmem>>, vector<4x128xbf16>
    tpu.vector_store %arg3[%c0_4, %c0_5], %5 {strides = array<i32>} : memref<4x128xbf16, #tpu.memory_space<vmem>>, vector<4x128xbf16>,
    return
  }
  func.func @transform_0(%arg0: i32) -> (i32, i32) {
    %c0_i32 = arith.constant 0 : i32
    %c0_i32_0 = arith.constant 0 : i32
    %c0_i32_1 = arith.constant 0 : i32
    return %c0_i32, %c0_i32_0 : i32, i32
  }
  func.func @transform_1(%arg0: i32) -> (i32, i32) {
    %c0_i32 = arith.constant 0 : i32
    %c0_i32_0 = arith.constant 0 : i32
    return %c0_i32, %arg0 : i32, i32
  }
  func.func @transform_2(%arg0: i32) -> (i32, i32) {
    %c0_i32 = arith.constant 0 : i32
    %c0_i32_0 = arith.constant 0 : i32
    return %c0_i32, %arg0 : i32, i32
  }
}

module attributes {stable_mosaic.version = 11 : i64} {
  func.func @_cost_volume_kernel(%arg0: i32, %arg1: memref<1x4x4x4xbf16, #tpu.memory_space<vmem>>, %arg2: memref<1x4x4x7xbf16, #tpu.memory_space<vmem>>, %arg3: memref<1x4x16xbf16, #tpu.memory_space<vmem>>) attributes {dimension_semantics = [#tpu.dimension_semantics<parallel>], iteration_bounds = array<i64: 2>, scalar_prefetch = 0 : i64, scratch_operands = 0 : i64, tpu.core_type = #tpu.core_type<tc>, window_params = [{transform_indices = @transform_0, window_bounds = array<i64: 1, 4, 4, 4>}, {transform_indices = @transform_1, window_bounds = array<i64: 1, 4, 4, 7>}, {transform_indices = @transform_2, window_bounds = array<i64: 1, 4, 16>}]} {
    %c0 = arith.constant 0 : index
    %c0_0 = arith.constant 0 : index
    %c0_1 = arith.constant 0 : index
    %c0_2 = arith.constant 0 : index
    %0 = vector.load %arg1[%c0, %c0_0, %c0_1, %c0_2] : memref<1x4x4x4xbf16, #tpu.memory_space<vmem>>, vector<1x4x4x4xbf16>
    %1 = vector.shape_cast %0 : vector<1x4x4x4xbf16> to vector<4x4x4xbf16>
    %2 = arith.extf %1 : vector<4x4x4xbf16> to vector<4x4x4xf32>
    %c0_3 = arith.constant 0 : index
    %c0_4 = arith.constant 0 : index
    %c0_5 = arith.constant 0 : index
    %c0_6 = arith.constant 0 : index
    %3 = vector.load %arg2[%c0_3, %c0_4, %c0_5, %c0_6] : memref<1x4x4x7xbf16, #tpu.memory_space<vmem>>, vector<1x4x4x7xbf16>
    %4 = vector.shape_cast %3 : vector<1x4x4x7xbf16> to vector<4x4x7xbf16>
    %5 = arith.extf %4 : vector<4x4x7xbf16> to vector<4x4x7xf32>
    %6 = vector.extract_strided_slice %5 {offsets = [0, 0, 3], sizes = [4, 4, 4], strides = [1, 1, 1]} : vector<4x4x7xf32> to vector<4x4x4xf32>
    %7 = arith.subf %2, %6 : vector<4x4x4xf32>
    %8 = math.absf %7 : vector<4x4x4xf32>
    %cst = arith.constant dense<0.000000e+00> : vector<4x4xf32>
    %9 = vector.multi_reduction <add>, %8, %cst [0] : vector<4x4x4xf32> to vector<4x4xf32>
    %10 = vector.extract_strided_slice %5 {offsets = [0, 0, 2], sizes = [4, 4, 4], strides = [1, 1, 1]} : vector<4x4x7xf32> to vector<4x4x4xf32>
    %11 = arith.subf %2, %10 : vector<4x4x4xf32>
    %12 = math.absf %11 : vector<4x4x4xf32>
    %cst_7 = arith.constant dense<0.000000e+00> : vector<4x4xf32>
    %13 = vector.multi_reduction <add>, %12, %cst_7 [0] : vector<4x4x4xf32> to vector<4x4xf32>
    %14 = vector.extract_strided_slice %5 {offsets = [0, 0, 1], sizes = [4, 4, 4], strides = [1, 1, 1]} : vector<4x4x7xf32> to vector<4x4x4xf32>
    %15 = arith.subf %2, %14 : vector<4x4x4xf32>
    %16 = math.absf %15 : vector<4x4x4xf32>
    %cst_8 = arith.constant dense<0.000000e+00> : vector<4x4xf32>
    %17 = vector.multi_reduction <add>, %16, %cst_8 [0] : vector<4x4x4xf32> to vector<4x4xf32>
    %18 = vector.extract_strided_slice %5 {offsets = [0, 0, 0], sizes = [4, 4, 4], strides = [1, 1, 1]} : vector<4x4x7xf32> to vector<4x4x4xf32>
    %19 = arith.subf %2, %18 : vector<4x4x4xf32>
    %20 = math.absf %19 : vector<4x4x4xf32>
    %cst_9 = arith.constant dense<0.000000e+00> : vector<4x4xf32>
    %21 = vector.multi_reduction <add>, %20, %cst_9 [0] : vector<4x4x4xf32> to vector<4x4xf32>
    %22 = vector.shape_cast %9 : vector<4x4xf32> to vector<1x4x4xf32>
    %23 = vector.shape_cast %13 : vector<4x4xf32> to vector<1x4x4xf32>
    %24 = vector.shape_cast %17 : vector<4x4xf32> to vector<1x4x4xf32>
    %25 = vector.shape_cast %21 : vector<4x4xf32> to vector<1x4x4xf32>
    %26 = tpu.concatenate %22, %23, %24, %25 in 0 : vector<1x4x4xf32>, vector<1x4x4xf32>, vector<1x4x4xf32>, vector<1x4x4xf32> -> vector<4x4x4xf32>
    %27 = vector.shape_cast %26 : vector<4x4x4xf32> to vector<4x16xf32>
    %28 = arith.truncf %27 : vector<4x16xf32> to vector<4x16xbf16>
    %c0_10 = arith.constant 0 : index
    %c0_11 = arith.constant 0 : index
    %c0_12 = arith.constant 0 : index
    %29 = vector.load %arg3[%c0_10, %c0_11, %c0_12] : memref<1x4x16xbf16, #tpu.memory_space<vmem>>, vector<1x4x16xbf16>
    %30 = vector.shape_cast %29 : vector<1x4x16xbf16> to vector<4x16xbf16>
    %31 = vector.shape_cast %28 : vector<4x16xbf16> to vector<1x4x16xbf16>
    tpu.vector_store %arg3[%c0_10, %c0_11, %c0_12], %31 {strides = array<i32>} : memref<1x4x16xbf16, #tpu.memory_space<vmem>>, vector<1x4x16xbf16>,
    return
  }
  func.func @transform_0(%arg0: i32) -> (i32, i32, i32, i32) {
    %c0_i32 = arith.constant 0 : i32
    %c0_i32_0 = arith.constant 0 : i32
    %c0_i32_1 = arith.constant 0 : i32
    %c0_i32_2 = arith.constant 0 : i32
    return %arg0, %c0_i32, %c0_i32_0, %c0_i32_1 : i32, i32, i32, i32
  }
  func.func @transform_1(%arg0: i32) -> (i32, i32, i32, i32) {
    %c0_i32 = arith.constant 0 : i32
    %c0_i32_0 = arith.constant 0 : i32
    %c0_i32_1 = arith.constant 0 : i32
    %c0_i32_2 = arith.constant 0 : i32
    return %arg0, %c0_i32, %c0_i32_0, %c0_i32_1 : i32, i32, i32, i32
  }
  func.func @transform_2(%arg0: i32) -> (i32, i32, i32) {
    %c0_i32 = arith.constant 0 : i32
    %c0_i32_0 = arith.constant 0 : i32
    %c0_i32_1 = arith.constant 0 : i32
    return %arg0, %c0_i32, %c0_i32_0 : i32, i32, i32
  }
}

module attributes {stable_mosaic.version = 11 : i64} {
  func.func @_matmul_kernel(%arg0: i32, %arg1: memref<8x27xbf16, #tpu.memory_space<vmem>>, %arg2: memref<27x128xbf16, #tpu.memory_space<vmem>>, %arg3: memref<8x128xbf16, #tpu.memory_space<vmem>>) attributes {dimension_semantics = [#tpu.dimension_semantics<parallel>], iteration_bounds = array<i64: 1>, scalar_prefetch = 0 : i64, scratch_operands = 0 : i64, tpu.core_type = #tpu.core_type<tc>, window_params = [{pipeline_mode = #tpu.pipeline_mode<synchronous>, transform_indices = @transform_0, window_bounds = array<i64: 8, 27>}, {transform_indices = @transform_1, window_bounds = array<i64: 27, 128>}, {transform_indices = @transform_2, window_bounds = array<i64: 8, 128>}]} {
    %c0 = arith.constant 0 : index
    %c0_0 = arith.constant 0 : index
    %0 = vector.load %arg1[%c0, %c0_0] : memref<8x27xbf16, #tpu.memory_space<vmem>>, vector<8x27xbf16>
    %c0_1 = arith.constant 0 : index
    %c0_2 = arith.constant 0 : index
    %1 = vector.load %arg2[%c0_1, %c0_2] : memref<27x128xbf16, #tpu.memory_space<vmem>>, vector<27x128xbf16>
    %cst = arith.constant dense<0.000000e+00> : vector<8x128xf32>
    %2 = tpu.matmul %0, %1, %cst {dimension_numbers = #tpu.dot_dimension_numbers<[1], [0], [0], [1], [0, 0, 1, 1], [], []>} : vector<8x27xbf16>, vector<27x128xbf16>, vector<8x128xf32> -> vector<8x128xf32>
    %cst_3 = arith.constant 0.999994993 : f32
    %3 = vector.broadcast %cst_3 : f32 to vector<8x128xf32>
    %4 = arith.mulf %2, %3 : vector<8x128xf32>
    %cst_4 = arith.constant 0.000000e+00 : f32
    %5 = vector.broadcast %cst_4 : f32 to vector<8x128xf32>
    %6 = arith.maximumf %4, %5 : vector<8x128xf32>
    %7 = arith.truncf %6 : vector<8x128xf32> to vector<8x128xbf16>
    %c0_5 = arith.constant 0 : index
    %c0_6 = arith.constant 0 : index
    %8 = vector.load %arg3[%c0_5, %c0_6] : memref<8x128xbf16, #tpu.memory_space<vmem>>, vector<8x128xbf16>
    tpu.vector_store %arg3[%c0_5, %c0_6], %7 {strides = array<i32>} : memref<8x128xbf16, #tpu.memory_space<vmem>>, vector<8x128xbf16>,
    return
  }
  func.func @transform_0(%arg0: i32) -> (i32, i32) {
    %c0_i32 = arith.constant 0 : i32
    %c0_i32_0 = arith.constant 0 : i32
    %c0_i32_1 = arith.constant 0 : i32
    return %c0_i32, %c0_i32_0 : i32, i32
  }
  func.func @transform_1(%arg0: i32) -> (i32, i32) {
    %c0_i32 = arith.constant 0 : i32
    %c0_i32_0 = arith.constant 0 : i32
    return %c0_i32, %arg0 : i32, i32
  }
  func.func @transform_2(%arg0: i32) -> (i32, i32) {
    %c0_i32 = arith.constant 0 : i32
    %c0_i32_0 = arith.constant 0 : i32
    return %c0_i32, %arg0 : i32, i32
  }
}

module attributes {stable_mosaic.version = 11 : i64} {
  func.func @_matmul_kernel(%arg0: i32, %arg1: memref<8x216xbf16, #tpu.memory_space<vmem>>, %arg2: memref<216x128xbf16, #tpu.memory_space<vmem>>, %arg3: memref<8x128xbf16, #tpu.memory_space<vmem>>) attributes {dimension_semantics = [#tpu.dimension_semantics<parallel>], iteration_bounds = array<i64: 1>, scalar_prefetch = 0 : i64, scratch_operands = 0 : i64, tpu.core_type = #tpu.core_type<tc>, window_params = [{pipeline_mode = #tpu.pipeline_mode<synchronous>, transform_indices = @transform_0, window_bounds = array<i64: 8, 216>}, {transform_indices = @transform_1, window_bounds = array<i64: 216, 128>}, {transform_indices = @transform_2, window_bounds = array<i64: 8, 128>}]} {
    %c0 = arith.constant 0 : index
    %c0_0 = arith.constant 0 : index
    %0 = vector.load %arg1[%c0, %c0_0] : memref<8x216xbf16, #tpu.memory_space<vmem>>, vector<8x216xbf16>
    %c0_1 = arith.constant 0 : index
    %c0_2 = arith.constant 0 : index
    %1 = vector.load %arg2[%c0_1, %c0_2] : memref<216x128xbf16, #tpu.memory_space<vmem>>, vector<216x128xbf16>
    %cst = arith.constant dense<0.000000e+00> : vector<8x128xf32>
    %2 = tpu.matmul %0, %1, %cst {dimension_numbers = #tpu.dot_dimension_numbers<[1], [0], [0], [1], [0, 0, 1, 1], [], []>} : vector<8x216xbf16>, vector<216x128xbf16>, vector<8x128xf32> -> vector<8x128xf32>
    %cst_3 = arith.constant 0.999994993 : f32
    %3 = vector.broadcast %cst_3 : f32 to vector<8x128xf32>
    %4 = arith.mulf %2, %3 : vector<8x128xf32>
    %cst_4 = arith.constant 0.000000e+00 : f32
    %5 = vector.broadcast %cst_4 : f32 to vector<8x128xf32>
    %6 = arith.maximumf %4, %5 : vector<8x128xf32>
    %7 = arith.truncf %6 : vector<8x128xf32> to vector<8x128xbf16>
    %c0_5 = arith.constant 0 : index
    %c0_6 = arith.constant 0 : index
    %8 = vector.load %arg3[%c0_5, %c0_6] : memref<8x128xbf16, #tpu.memory_space<vmem>>, vector<8x128xbf16>
    tpu.vector_store %arg3[%c0_5, %c0_6], %7 {strides = array<i32>} : memref<8x128xbf16, #tpu.memory_space<vmem>>, vector<8x128xbf16>,
    return
  }
  func.func @transform_0(%arg0: i32) -> (i32, i32) {
    %c0_i32 = arith.constant 0 : i32
    %c0_i32_0 = arith.constant 0 : i32
    %c0_i32_1 = arith.constant 0 : i32
    return %c0_i32, %c0_i32_0 : i32, i32
  }
  func.func @transform_1(%arg0: i32) -> (i32, i32) {
    %c0_i32 = arith.constant 0 : i32
    %c0_i32_0 = arith.constant 0 : i32
    return %c0_i32, %arg0 : i32, i32
  }
  func.func @transform_2(%arg0: i32) -> (i32, i32) {
    %c0_i32 = arith.constant 0 : i32
    %c0_i32_0 = arith.constant 0 : i32
    return %c0_i32, %arg0 : i32, i32
  }
}

module attributes {stable_mosaic.version = 11 : i64} {
  func.func @_matmul_kernel(%arg0: i32, %arg1: memref<1x216xbf16, #tpu.memory_space<vmem>>, %arg2: memref<216x128xbf16, #tpu.memory_space<vmem>>, %arg3: memref<1x128xf32, #tpu.memory_space<vmem>>) attributes {dimension_semantics = [#tpu.dimension_semantics<parallel>], iteration_bounds = array<i64: 1>, scalar_prefetch = 0 : i64, scratch_operands = 0 : i64, tpu.core_type = #tpu.core_type<tc>, window_params = [{pipeline_mode = #tpu.pipeline_mode<synchronous>, transform_indices = @transform_0, window_bounds = array<i64: 1, 216>}, {transform_indices = @transform_1, window_bounds = array<i64: 216, 128>}, {transform_indices = @transform_2, window_bounds = array<i64: 1, 128>}]} {
    %c0 = arith.constant 0 : index
    %c0_0 = arith.constant 0 : index
    %0 = vector.load %arg1[%c0, %c0_0] : memref<1x216xbf16, #tpu.memory_space<vmem>>, vector<1x216xbf16>
    %c0_1 = arith.constant 0 : index
    %c0_2 = arith.constant 0 : index
    %1 = vector.load %arg2[%c0_1, %c0_2] : memref<216x128xbf16, #tpu.memory_space<vmem>>, vector<216x128xbf16>
    %cst = arith.constant dense<0.000000e+00> : vector<1x128xf32>
    %2 = tpu.matmul %0, %1, %cst {dimension_numbers = #tpu.dot_dimension_numbers<[1], [0], [0], [1], [0, 0, 1, 1], [], []>} : vector<1x216xbf16>, vector<216x128xbf16>, vector<1x128xf32> -> vector<1x128xf32>
    %c0_3 = arith.constant 0 : index
    %c0_4 = arith.constant 0 : index
    %3 = vector.load %arg3[%c0_3, %c0_4] : memref<1x128xf32, #tpu.memory_space<vmem>>, vector<1x128xf32>
    tpu.vector_store %arg3[%c0_3, %c0_4], %2 {strides = array<i32>} : memref<1x128xf32, #tpu.memory_space<vmem>>, vector<1x128xf32>,
    return
  }
  func.func @transform_0(%arg0: i32) -> (i32, i32) {
    %c0_i32 = arith.constant 0 : i32
    %c0_i32_0 = arith.constant 0 : i32
    %c0_i32_1 = arith.constant 0 : i32
    return %c0_i32, %c0_i32_0 : i32, i32
  }
  func.func @transform_1(%arg0: i32) -> (i32, i32) {
    %c0_i32 = arith.constant 0 : i32
    %c0_i32_0 = arith.constant 0 : i32
    return %c0_i32, %arg0 : i32, i32
  }
  func.func @transform_2(%arg0: i32) -> (i32, i32) {
    %c0_i32 = arith.constant 0 : i32
    %c0_i32_0 = arith.constant 0 : i32
    return %c0_i32, %arg0 : i32, i32
  }
}

module attributes {stable_mosaic.version = 11 : i64} {
  func.func @_disp_regression_kernel(%arg0: i32, %arg1: memref<1x4x16xf32, #tpu.memory_space<vmem>>, %arg2: memref<1x1x16xf32, #tpu.memory_space<vmem>>) attributes {dimension_semantics = [#tpu.dimension_semantics<parallel>], iteration_bounds = array<i64: 2>, scalar_prefetch = 0 : i64, scratch_operands = 0 : i64, tpu.core_type = #tpu.core_type<tc>, window_params = [{transform_indices = @transform_0, window_bounds = array<i64: 1, 4, 16>}, {transform_indices = @transform_1, window_bounds = array<i64: 1, 1, 16>}]} {
    %c0 = arith.constant 0 : index
    %c0_0 = arith.constant 0 : index
    %c0_1 = arith.constant 0 : index
    %0 = vector.load %arg1[%c0, %c0_0, %c0_1] : memref<1x4x16xf32, #tpu.memory_space<vmem>>, vector<1x4x16xf32>
    %1 = vector.shape_cast %0 : vector<1x4x16xf32> to vector<4x16xf32>
    %cst = arith.constant 0.000000e+00 : f32
    %2 = vector.broadcast %cst : f32 to vector<4x16xf32>
    %3 = arith.subf %2, %1 : vector<4x16xf32>
    %cst_2 = arith.constant dense<0xFF800000> : vector<16xf32>
    %4 = vector.multi_reduction <maximumf>, %3, %cst_2 [0] : vector<4x16xf32> to vector<16xf32>
    %5 = vector.shape_cast %4 : vector<16xf32> to vector<1x16xf32>
    %6 = vector.broadcast %5 : vector<1x16xf32> to vector<4x16xf32>
    %7 = arith.subf %3, %6 : vector<4x16xf32>
    %8 = math.exp %7 : vector<4x16xf32>
    %cst_3 = arith.constant dense<0.000000e+00> : vector<16xf32>
    %9 = vector.multi_reduction <add>, %8, %cst_3 [0] : vector<4x16xf32> to vector<16xf32>
    %10 = vector.shape_cast %9 : vector<16xf32> to vector<1x16xf32>
    %11 = tpu.iota {dimensions = array<i32: 0>} : vector<4x16xi32>
    %12 = arith.sitofp %11 : vector<4x16xi32> to vector<4x16xf32>
    %cst_4 = arith.constant 0.000000e+00 : f32
    %13 = vector.broadcast %cst_4 : f32 to vector<4x16xf32>
    %14 = arith.addf %13, %12 : vector<4x16xf32>
    %15 = arith.mulf %8, %14 : vector<4x16xf32>
    %cst_5 = arith.constant dense<0.000000e+00> : vector<16xf32>
    %16 = vector.multi_reduction <add>, %15, %cst_5 [0] : vector<4x16xf32> to vector<16xf32>
    %17 = vector.shape_cast %16 : vector<16xf32> to vector<1x16xf32>
    %18 = tpu.reciprocal %10 {approx = true} : vector<1x16xf32> -> vector<1x16xf32>
    %19 = arith.mulf %17, %18 : vector<1x16xf32>
    %cst_6 = arith.constant 1.600000e+01 : f32
    %20 = vector.broadcast %cst_6 : f32 to vector<1x16xf32>
    %21 = arith.mulf %19, %20 : vector<1x16xf32>
    %c0_7 = arith.constant 0 : index
    %c0_8 = arith.constant 0 : index
    %c0_9 = arith.constant 0 : index
    %22 = vector.load %arg2[%c0_7, %c0_8, %c0_9] : memref<1x1x16xf32, #tpu.memory_space<vmem>>, vector<1x1x16xf32>
    %23 = vector.shape_cast %22 : vector<1x1x16xf32> to vector<1x16xf32>
    %24 = vector.shape_cast %21 : vector<1x16xf32> to vector<1x1x16xf32>
    tpu.vector_store %arg2[%c0_7, %c0_8, %c0_9], %24 {strides = array<i32>} : memref<1x1x16xf32, #tpu.memory_space<vmem>>, vector<1x1x16xf32>,
    return
  }
  func.func @transform_0(%arg0: i32) -> (i32, i32, i32) {
    %c0_i32 = arith.constant 0 : i32
    %c0_i32_0 = arith.constant 0 : i32
    %c0_i32_1 = arith.constant 0 : i32
    return %arg0, %c0_i32, %c0_i32_0 : i32, i32, i32
  }
  func.func @transform_1(%arg0: i32) -> (i32, i32, i32) {
    %c0_i32 = arith.constant 0 : i32
    %c0_i32_0 = arith.constant 0 : i32
    %c0_i32_1 = arith.constant 0 : i32
    return %arg0, %c0_i32, %c0_i32_0 : i32, i32, i32
  }
}

module attributes {stable_mosaic.version = 11 : i64} {
  func.func @_warp_cost_kernel(%arg0: i32, %arg1: memref<1x8x4x8xbf16, #tpu.memory_space<vmem>>, %arg2: memref<1x8x4x8xbf16, #tpu.memory_space<vmem>>, %arg3: memref<1x8x8xf32, #tpu.memory_space<vmem>>, %arg4: memref<1x3x64xbf16, #tpu.memory_space<vmem>>) attributes {dimension_semantics = [#tpu.dimension_semantics<parallel>], iteration_bounds = array<i64: 2>, scalar_prefetch = 0 : i64, scratch_operands = 0 : i64, tpu.core_type = #tpu.core_type<tc>, window_params = [{transform_indices = @transform_0, window_bounds = array<i64: 1, 8, 4, 8>}, {transform_indices = @transform_1, window_bounds = array<i64: 1, 8, 4, 8>}, {transform_indices = @transform_2, window_bounds = array<i64: 1, 8, 8>}, {transform_indices = @transform_3, window_bounds = array<i64: 1, 3, 64>}]} {
    %c0 = arith.constant 0 : index
    %c0_0 = arith.constant 0 : index
    %c0_1 = arith.constant 0 : index
    %c0_2 = arith.constant 0 : index
    %0 = vector.load %arg1[%c0, %c0_0, %c0_1, %c0_2] : memref<1x8x4x8xbf16, #tpu.memory_space<vmem>>, vector<1x8x4x8xbf16>
    %1 = vector.shape_cast %0 : vector<1x8x4x8xbf16> to vector<8x4x8xbf16>
    %2 = arith.extf %1 : vector<8x4x8xbf16> to vector<8x4x8xf32>
    %c0_3 = arith.constant 0 : index
    %c0_4 = arith.constant 0 : index
    %c0_5 = arith.constant 0 : index
    %c0_6 = arith.constant 0 : index
    %3 = vector.load %arg2[%c0_3, %c0_4, %c0_5, %c0_6] : memref<1x8x4x8xbf16, #tpu.memory_space<vmem>>, vector<1x8x4x8xbf16>
    %4 = vector.shape_cast %3 : vector<1x8x4x8xbf16> to vector<8x4x8xbf16>
    %c0_7 = arith.constant 0 : index
    %c0_8 = arith.constant 0 : index
    %c0_9 = arith.constant 0 : index
    %5 = vector.load %arg3[%c0_7, %c0_8, %c0_9] : memref<1x8x8xf32, #tpu.memory_space<vmem>>, vector<1x8x8xf32>
    %6 = vector.shape_cast %5 : vector<1x8x8xf32> to vector<8x8xf32>
    %7 = tpu.iota {dimensions = array<i32: 1>} : vector<8x8xi32>
    %8 = arith.sitofp %7 : vector<8x8xi32> to vector<8x8xf32>
    %9 = arith.subf %8, %6 : vector<8x8xf32>
    %10 = math.floor %9 : vector<8x8xf32>
    %11 = arith.subf %9, %10 : vector<8x8xf32>
    %12 = vector.shape_cast %11 : vector<8x8xf32> to vector<8x8x1xf32>
    %13 = arith.fptosi %10 : vector<8x8xf32> to vector<8x8xi32>
    %14 = vector.shape_cast %13 : vector<8x8xi32> to vector<8x8x1xi32>
    %c1_i32 = arith.constant 1 : i32
    %15 = vector.broadcast %c1_i32 : i32 to vector<8x8x1xi32>
    %16 = arith.addi %14, %15 : vector<8x8x1xi32>
    %17 = tpu.iota {dimensions = array<i32: 2>} : vector<8x8x10xi32>
    %18 = vector.broadcast %16 : vector<8x8x1xi32> to vector<8x8x10xi32>
    %19 = arith.cmpi eq, %17, %18 : vector<8x8x10xi32>
    %cst = arith.constant 1.000000e+00 : f32
    %20 = vector.broadcast %cst : f32 to vector<8x8x1xf32>
    %21 = arith.subf %20, %12 : vector<8x8x1xf32>
    %cst_10 = arith.constant 0.000000e+00 : f32
    %22 = vector.shape_cast %21 : vector<8x8x1xf32> to vector<8x8x1xf32>
    %23 = vector.broadcast %22 : vector<8x8x1xf32> to vector<8x8x10xf32>
    %24 = vector.broadcast %cst_10 : f32 to vector<8x8x10xf32>
    %25 = arith.select %19, %23, %24 : vector<8x8x10xi1>, vector<8x8x10xf32>
    %c1_i32_11 = arith.constant 1 : i32
    %26 = vector.broadcast %c1_i32_11 : i32 to vector<8x8x1xi32>
    %27 = arith.addi %16, %26 : vector<8x8x1xi32>
    %28 = vector.broadcast %27 : vector<8x8x1xi32> to vector<8x8x10xi32>
    %29 = arith.cmpi eq, %17, %28 : vector<8x8x10xi32>
    %cst_12 = arith.constant 0.000000e+00 : f32
    %30 = vector.shape_cast %12 : vector<8x8x1xf32> to vector<8x8x1xf32>
    %31 = vector.broadcast %30 : vector<8x8x1xf32> to vector<8x8x10xf32>
    %32 = vector.broadcast %cst_12 : f32 to vector<8x8x10xf32>
    %33 = arith.select %29, %31, %32 : vector<8x8x10xi1>, vector<8x8x10xf32>
    %34 = arith.addf %25, %33 : vector<8x8x10xf32>
    %35 = arith.truncf %34 : vector<8x8x10xf32> to vector<8x8x10xbf16>
    %36 = vector.extract_strided_slice %35 {offsets = [0, 0, 2], sizes = [8, 8, 8], strides = [1, 1, 1]} : vector<8x8x10xbf16> to vector<8x8x8xbf16>
    "tpu.trace_start"() <{level = 10 : i32, message = "hcv,hwv->hcw"}> : () -> ()
    %cst_13 = arith.constant dense<0.000000e+00> : vector<8x4x8xf32>
    %37 = tpu.matmul %4, %36, %cst_13 {dimension_numbers = #tpu.dot_dimension_numbers<[2], [2], [1], [1], [0, 0, 0, 1, 1, 1], [0], [0]>} : vector<8x4x8xbf16>, vector<8x8x8xbf16>, vector<8x4x8xf32> -> vector<8x4x8xf32>
    "tpu.trace_stop"() : () -> ()
    %38 = arith.subf %2, %37 : vector<8x4x8xf32>
    %39 = math.absf %38 : vector<8x4x8xf32>
    %cst_14 = arith.constant dense<0.000000e+00> : vector<8x8xf32>
    %40 = vector.multi_reduction <add>, %39, %cst_14 [1] : vector<8x4x8xf32> to vector<8x8xf32>
    %41 = vector.extract_strided_slice %35 {offsets = [0, 0, 1], sizes = [8, 8, 8], strides = [1, 1, 1]} : vector<8x8x10xbf16> to vector<8x8x8xbf16>
    "tpu.trace_start"() <{level = 10 : i32, message = "hcv,hwv->hcw"}> : () -> ()
    %cst_15 = arith.constant dense<0.000000e+00> : vector<8x4x8xf32>
    %42 = tpu.matmul %4, %41, %cst_15 {dimension_numbers = #tpu.dot_dimension_numbers<[2], [2], [1], [1], [0, 0, 0, 1, 1, 1], [0], [0]>} : vector<8x4x8xbf16>, vector<8x8x8xbf16>, vector<8x4x8xf32> -> vector<8x4x8xf32>
    "tpu.trace_stop"() : () -> ()
    %43 = arith.subf %2, %42 : vector<8x4x8xf32>
    %44 = math.absf %43 : vector<8x4x8xf32>
    %cst_16 = arith.constant dense<0.000000e+00> : vector<8x8xf32>
    %45 = vector.multi_reduction <add>, %44, %cst_16 [1] : vector<8x4x8xf32> to vector<8x8xf32>
    %46 = vector.extract_strided_slice %35 {offsets = [0, 0, 0], sizes = [8, 8, 8], strides = [1, 1, 1]} : vector<8x8x10xbf16> to vector<8x8x8xbf16>
    "tpu.trace_start"() <{level = 10 : i32, message = "hcv,hwv->hcw"}> : () -> ()
    %cst_17 = arith.constant dense<0.000000e+00> : vector<8x4x8xf32>
    %47 = tpu.matmul %4, %46, %cst_17 {dimension_numbers = #tpu.dot_dimension_numbers<[2], [2], [1], [1], [0, 0, 0, 1, 1, 1], [0], [0]>} : vector<8x4x8xbf16>, vector<8x8x8xbf16>, vector<8x4x8xf32> -> vector<8x4x8xf32>
    "tpu.trace_stop"() : () -> ()
    %48 = arith.subf %2, %47 : vector<8x4x8xf32>
    %49 = math.absf %48 : vector<8x4x8xf32>
    %cst_18 = arith.constant dense<0.000000e+00> : vector<8x8xf32>
    %50 = vector.multi_reduction <add>, %49, %cst_18 [1] : vector<8x4x8xf32> to vector<8x8xf32>
    %51 = vector.shape_cast %40 : vector<8x8xf32> to vector<1x8x8xf32>
    %52 = vector.shape_cast %45 : vector<8x8xf32> to vector<1x8x8xf32>
    %53 = vector.shape_cast %50 : vector<8x8xf32> to vector<1x8x8xf32>
    %54 = tpu.concatenate %51, %52, %53 in 0 : vector<1x8x8xf32>, vector<1x8x8xf32>, vector<1x8x8xf32> -> vector<3x8x8xf32>
    %55 = vector.shape_cast %54 : vector<3x8x8xf32> to vector<3x64xf32>
    %56 = arith.truncf %55 : vector<3x64xf32> to vector<3x64xbf16>
    %c0_19 = arith.constant 0 : index
    %c0_20 = arith.constant 0 : index
    %c0_21 = arith.constant 0 : index
    %57 = vector.load %arg4[%c0_19, %c0_20, %c0_21] : memref<1x3x64xbf16, #tpu.memory_space<vmem>>, vector<1x3x64xbf16>
    %58 = vector.shape_cast %57 : vector<1x3x64xbf16> to vector<3x64xbf16>
    %59 = vector.shape_cast %56 : vector<3x64xbf16> to vector<1x3x64xbf16>
    tpu.vector_store %arg4[%c0_19, %c0_20, %c0_21], %59 {strides = array<i32>} : memref<1x3x64xbf16, #tpu.memory_space<vmem>>, vector<1x3x64xbf16>,
    return
  }
  func.func @transform_0(%arg0: i32) -> (i32, i32, i32, i32) {
    %c0_i32 = arith.constant 0 : i32
    %c0_i32_0 = arith.constant 0 : i32
    %c0_i32_1 = arith.constant 0 : i32
    %c0_i32_2 = arith.constant 0 : i32
    return %arg0, %c0_i32, %c0_i32_0, %c0_i32_1 : i32, i32, i32, i32
  }
  func.func @transform_1(%arg0: i32) -> (i32, i32, i32, i32) {
    %c0_i32 = arith.constant 0 : i32
    %c0_i32_0 = arith.constant 0 : i32
    %c0_i32_1 = arith.constant 0 : i32
    %c0_i32_2 = arith.constant 0 : i32
    return %arg0, %c0_i32, %c0_i32_0, %c0_i32_1 : i32, i32, i32, i32
  }
  func.func @transform_2(%arg0: i32) -> (i32, i32, i32) {
    %c0_i32 = arith.constant 0 : i32
    %c0_i32_0 = arith.constant 0 : i32
    %c0_i32_1 = arith.constant 0 : i32
    return %arg0, %c0_i32, %c0_i32_0 : i32, i32, i32
  }
  func.func @transform_3(%arg0: i32) -> (i32, i32, i32) {
    %c0_i32 = arith.constant 0 : i32
    %c0_i32_0 = arith.constant 0 : i32
    %c0_i32_1 = arith.constant 0 : i32
    return %arg0, %c0_i32, %c0_i32_0 : i32, i32, i32
  }
}

module attributes {stable_mosaic.version = 11 : i64} {
  func.func @_matmul_kernel(%arg0: i32, %arg1: memref<2x27xbf16, #tpu.memory_space<vmem>>, %arg2: memref<27x384xbf16, #tpu.memory_space<vmem>>, %arg3: memref<2x384xbf16, #tpu.memory_space<vmem>>) attributes {dimension_semantics = [#tpu.dimension_semantics<parallel>], iteration_bounds = array<i64: 1>, scalar_prefetch = 0 : i64, scratch_operands = 0 : i64, tpu.core_type = #tpu.core_type<tc>, window_params = [{pipeline_mode = #tpu.pipeline_mode<synchronous>, transform_indices = @transform_0, window_bounds = array<i64: 2, 27>}, {transform_indices = @transform_1, window_bounds = array<i64: 27, 384>}, {transform_indices = @transform_2, window_bounds = array<i64: 2, 384>}]} {
    %c0 = arith.constant 0 : index
    %c0_0 = arith.constant 0 : index
    %0 = vector.load %arg1[%c0, %c0_0] : memref<2x27xbf16, #tpu.memory_space<vmem>>, vector<2x27xbf16>
    %c0_1 = arith.constant 0 : index
    %c0_2 = arith.constant 0 : index
    %1 = vector.load %arg2[%c0_1, %c0_2] : memref<27x384xbf16, #tpu.memory_space<vmem>>, vector<27x384xbf16>
    %cst = arith.constant dense<0.000000e+00> : vector<2x384xf32>
    %2 = tpu.matmul %0, %1, %cst {dimension_numbers = #tpu.dot_dimension_numbers<[1], [0], [0], [1], [0, 0, 1, 1], [], []>} : vector<2x27xbf16>, vector<27x384xbf16>, vector<2x384xf32> -> vector<2x384xf32>
    %cst_3 = arith.constant 0.999994993 : f32
    %3 = vector.broadcast %cst_3 : f32 to vector<2x384xf32>
    %4 = arith.mulf %2, %3 : vector<2x384xf32>
    %cst_4 = arith.constant 0.000000e+00 : f32
    %5 = vector.broadcast %cst_4 : f32 to vector<2x384xf32>
    %6 = arith.maximumf %4, %5 : vector<2x384xf32>
    %7 = arith.truncf %6 : vector<2x384xf32> to vector<2x384xbf16>
    %c0_5 = arith.constant 0 : index
    %c0_6 = arith.constant 0 : index
    %8 = vector.load %arg3[%c0_5, %c0_6] : memref<2x384xbf16, #tpu.memory_space<vmem>>, vector<2x384xbf16>
    tpu.vector_store %arg3[%c0_5, %c0_6], %7 {strides = array<i32>} : memref<2x384xbf16, #tpu.memory_space<vmem>>, vector<2x384xbf16>,
    return
  }
  func.func @transform_0(%arg0: i32) -> (i32, i32) {
    %c0_i32 = arith.constant 0 : i32
    %c0_i32_0 = arith.constant 0 : i32
    %c0_i32_1 = arith.constant 0 : i32
    return %c0_i32, %c0_i32_0 : i32, i32
  }
  func.func @transform_1(%arg0: i32) -> (i32, i32) {
    %c0_i32 = arith.constant 0 : i32
    %c0_i32_0 = arith.constant 0 : i32
    return %c0_i32, %arg0 : i32, i32
  }
  func.func @transform_2(%arg0: i32) -> (i32, i32) {
    %c0_i32 = arith.constant 0 : i32
    %c0_i32_0 = arith.constant 0 : i32
    return %c0_i32, %arg0 : i32, i32
  }
}

module attributes {stable_mosaic.version = 11 : i64} {
  func.func @_matmul_kernel(%arg0: i32, %arg1: memref<2x54xbf16, #tpu.memory_space<vmem>>, %arg2: memref<54x384xbf16, #tpu.memory_space<vmem>>, %arg3: memref<2x384xbf16, #tpu.memory_space<vmem>>) attributes {dimension_semantics = [#tpu.dimension_semantics<parallel>], iteration_bounds = array<i64: 1>, scalar_prefetch = 0 : i64, scratch_operands = 0 : i64, tpu.core_type = #tpu.core_type<tc>, window_params = [{pipeline_mode = #tpu.pipeline_mode<synchronous>, transform_indices = @transform_0, window_bounds = array<i64: 2, 54>}, {transform_indices = @transform_1, window_bounds = array<i64: 54, 384>}, {transform_indices = @transform_2, window_bounds = array<i64: 2, 384>}]} {
    %c0 = arith.constant 0 : index
    %c0_0 = arith.constant 0 : index
    %0 = vector.load %arg1[%c0, %c0_0] : memref<2x54xbf16, #tpu.memory_space<vmem>>, vector<2x54xbf16>
    %c0_1 = arith.constant 0 : index
    %c0_2 = arith.constant 0 : index
    %1 = vector.load %arg2[%c0_1, %c0_2] : memref<54x384xbf16, #tpu.memory_space<vmem>>, vector<54x384xbf16>
    %cst = arith.constant dense<0.000000e+00> : vector<2x384xf32>
    %2 = tpu.matmul %0, %1, %cst {dimension_numbers = #tpu.dot_dimension_numbers<[1], [0], [0], [1], [0, 0, 1, 1], [], []>} : vector<2x54xbf16>, vector<54x384xbf16>, vector<2x384xf32> -> vector<2x384xf32>
    %cst_3 = arith.constant 0.999994993 : f32
    %3 = vector.broadcast %cst_3 : f32 to vector<2x384xf32>
    %4 = arith.mulf %2, %3 : vector<2x384xf32>
    %cst_4 = arith.constant 0.000000e+00 : f32
    %5 = vector.broadcast %cst_4 : f32 to vector<2x384xf32>
    %6 = arith.maximumf %4, %5 : vector<2x384xf32>
    %7 = arith.truncf %6 : vector<2x384xf32> to vector<2x384xbf16>
    %c0_5 = arith.constant 0 : index
    %c0_6 = arith.constant 0 : index
    %8 = vector.load %arg3[%c0_5, %c0_6] : memref<2x384xbf16, #tpu.memory_space<vmem>>, vector<2x384xbf16>
    tpu.vector_store %arg3[%c0_5, %c0_6], %7 {strides = array<i32>} : memref<2x384xbf16, #tpu.memory_space<vmem>>, vector<2x384xbf16>,
    return
  }
  func.func @transform_0(%arg0: i32) -> (i32, i32) {
    %c0_i32 = arith.constant 0 : i32
    %c0_i32_0 = arith.constant 0 : i32
    %c0_i32_1 = arith.constant 0 : i32
    return %c0_i32, %c0_i32_0 : i32, i32
  }
  func.func @transform_1(%arg0: i32) -> (i32, i32) {
    %c0_i32 = arith.constant 0 : i32
    %c0_i32_0 = arith.constant 0 : i32
    return %c0_i32, %arg0 : i32, i32
  }
  func.func @transform_2(%arg0: i32) -> (i32, i32) {
    %c0_i32 = arith.constant 0 : i32
    %c0_i32_0 = arith.constant 0 : i32
    return %c0_i32, %arg0 : i32, i32
  }
}

module attributes {stable_mosaic.version = 11 : i64} {
  func.func @_matmul_kernel(%arg0: i32, %arg1: memref<1x54xbf16, #tpu.memory_space<vmem>>, %arg2: memref<54x384xbf16, #tpu.memory_space<vmem>>, %arg3: memref<1x384xf32, #tpu.memory_space<vmem>>) attributes {dimension_semantics = [#tpu.dimension_semantics<parallel>], iteration_bounds = array<i64: 1>, scalar_prefetch = 0 : i64, scratch_operands = 0 : i64, tpu.core_type = #tpu.core_type<tc>, window_params = [{pipeline_mode = #tpu.pipeline_mode<synchronous>, transform_indices = @transform_0, window_bounds = array<i64: 1, 54>}, {transform_indices = @transform_1, window_bounds = array<i64: 54, 384>}, {transform_indices = @transform_2, window_bounds = array<i64: 1, 384>}]} {
    %c0 = arith.constant 0 : index
    %c0_0 = arith.constant 0 : index
    %0 = vector.load %arg1[%c0, %c0_0] : memref<1x54xbf16, #tpu.memory_space<vmem>>, vector<1x54xbf16>
    %c0_1 = arith.constant 0 : index
    %c0_2 = arith.constant 0 : index
    %1 = vector.load %arg2[%c0_1, %c0_2] : memref<54x384xbf16, #tpu.memory_space<vmem>>, vector<54x384xbf16>
    %cst = arith.constant dense<0.000000e+00> : vector<1x384xf32>
    %2 = tpu.matmul %0, %1, %cst {dimension_numbers = #tpu.dot_dimension_numbers<[1], [0], [0], [1], [0, 0, 1, 1], [], []>} : vector<1x54xbf16>, vector<54x384xbf16>, vector<1x384xf32> -> vector<1x384xf32>
    %c0_3 = arith.constant 0 : index
    %c0_4 = arith.constant 0 : index
    %3 = vector.load %arg3[%c0_3, %c0_4] : memref<1x384xf32, #tpu.memory_space<vmem>>, vector<1x384xf32>
    tpu.vector_store %arg3[%c0_3, %c0_4], %2 {strides = array<i32>} : memref<1x384xf32, #tpu.memory_space<vmem>>, vector<1x384xf32>,
    return
  }
  func.func @transform_0(%arg0: i32) -> (i32, i32) {
    %c0_i32 = arith.constant 0 : i32
    %c0_i32_0 = arith.constant 0 : i32
    %c0_i32_1 = arith.constant 0 : i32
    return %c0_i32, %c0_i32_0 : i32, i32
  }
  func.func @transform_1(%arg0: i32) -> (i32, i32) {
    %c0_i32 = arith.constant 0 : i32
    %c0_i32_0 = arith.constant 0 : i32
    return %c0_i32, %arg0 : i32, i32
  }
  func.func @transform_2(%arg0: i32) -> (i32, i32) {
    %c0_i32 = arith.constant 0 : i32
    %c0_i32_0 = arith.constant 0 : i32
    return %c0_i32, %arg0 : i32, i32
  }
}

module attributes {stable_mosaic.version = 11 : i64} {
  func.func @_disp_regression_kernel(%arg0: i32, %arg1: memref<1x3x64xf32, #tpu.memory_space<vmem>>, %arg2: memref<1x1x64xf32, #tpu.memory_space<vmem>>) attributes {dimension_semantics = [#tpu.dimension_semantics<parallel>], iteration_bounds = array<i64: 2>, scalar_prefetch = 0 : i64, scratch_operands = 0 : i64, tpu.core_type = #tpu.core_type<tc>, window_params = [{transform_indices = @transform_0, window_bounds = array<i64: 1, 3, 64>}, {transform_indices = @transform_1, window_bounds = array<i64: 1, 1, 64>}]} {
    %c0 = arith.constant 0 : index
    %c0_0 = arith.constant 0 : index
    %c0_1 = arith.constant 0 : index
    %0 = vector.load %arg1[%c0, %c0_0, %c0_1] : memref<1x3x64xf32, #tpu.memory_space<vmem>>, vector<1x3x64xf32>
    %1 = vector.shape_cast %0 : vector<1x3x64xf32> to vector<3x64xf32>
    %cst = arith.constant 0.000000e+00 : f32
    %2 = vector.broadcast %cst : f32 to vector<3x64xf32>
    %3 = arith.subf %2, %1 : vector<3x64xf32>
    %cst_2 = arith.constant dense<0xFF800000> : vector<64xf32>
    %4 = vector.multi_reduction <maximumf>, %3, %cst_2 [0] : vector<3x64xf32> to vector<64xf32>
    %5 = vector.shape_cast %4 : vector<64xf32> to vector<1x64xf32>
    %6 = vector.broadcast %5 : vector<1x64xf32> to vector<3x64xf32>
    %7 = arith.subf %3, %6 : vector<3x64xf32>
    %8 = math.exp %7 : vector<3x64xf32>
    %cst_3 = arith.constant dense<0.000000e+00> : vector<64xf32>
    %9 = vector.multi_reduction <add>, %8, %cst_3 [0] : vector<3x64xf32> to vector<64xf32>
    %10 = vector.shape_cast %9 : vector<64xf32> to vector<1x64xf32>
    %11 = tpu.iota {dimensions = array<i32: 0>} : vector<3x64xi32>
    %12 = arith.sitofp %11 : vector<3x64xi32> to vector<3x64xf32>
    %cst_4 = arith.constant -1.000000e+00 : f32
    %13 = vector.broadcast %cst_4 : f32 to vector<3x64xf32>
    %14 = arith.addf %13, %12 : vector<3x64xf32>
    %15 = arith.mulf %8, %14 : vector<3x64xf32>
    %cst_5 = arith.constant dense<0.000000e+00> : vector<64xf32>
    %16 = vector.multi_reduction <add>, %15, %cst_5 [0] : vector<3x64xf32> to vector<64xf32>
    %17 = vector.shape_cast %16 : vector<64xf32> to vector<1x64xf32>
    %18 = tpu.reciprocal %10 {approx = true} : vector<1x64xf32> -> vector<1x64xf32>
    %19 = arith.mulf %17, %18 : vector<1x64xf32>
    %cst_6 = arith.constant 8.000000e+00 : f32
    %20 = vector.broadcast %cst_6 : f32 to vector<1x64xf32>
    %21 = arith.mulf %19, %20 : vector<1x64xf32>
    %c0_7 = arith.constant 0 : index
    %c0_8 = arith.constant 0 : index
    %c0_9 = arith.constant 0 : index
    %22 = vector.load %arg2[%c0_7, %c0_8, %c0_9] : memref<1x1x64xf32, #tpu.memory_space<vmem>>, vector<1x1x64xf32>
    %23 = vector.shape_cast %22 : vector<1x1x64xf32> to vector<1x64xf32>
    %24 = vector.shape_cast %21 : vector<1x64xf32> to vector<1x1x64xf32>
    tpu.vector_store %arg2[%c0_7, %c0_8, %c0_9], %24 {strides = array<i32>} : memref<1x1x64xf32, #tpu.memory_space<vmem>>, vector<1x1x64xf32>,
    return
  }
  func.func @transform_0(%arg0: i32) -> (i32, i32, i32) {
    %c0_i32 = arith.constant 0 : i32
    %c0_i32_0 = arith.constant 0 : i32
    %c0_i32_1 = arith.constant 0 : i32
    return %arg0, %c0_i32, %c0_i32_0 : i32, i32, i32
  }
  func.func @transform_1(%arg0: i32) -> (i32, i32, i32) {
    %c0_i32 = arith.constant 0 : i32
    %c0_i32_0 = arith.constant 0 : i32
    %c0_i32_1 = arith.constant 0 : i32
    return %arg0, %c0_i32, %c0_i32_0 : i32, i32, i32
  }
}

module attributes {stable_mosaic.version = 11 : i64} {
  func.func @_warp_cost_kernel(%arg0: i32, %arg1: memref<1x16x4x16xbf16, #tpu.memory_space<vmem>>, %arg2: memref<1x16x4x16xbf16, #tpu.memory_space<vmem>>, %arg3: memref<1x16x16xf32, #tpu.memory_space<vmem>>, %arg4: memref<1x3x256xbf16, #tpu.memory_space<vmem>>) attributes {dimension_semantics = [#tpu.dimension_semantics<parallel>], iteration_bounds = array<i64: 2>, scalar_prefetch = 0 : i64, scratch_operands = 0 : i64, tpu.core_type = #tpu.core_type<tc>, window_params = [{transform_indices = @transform_0, window_bounds = array<i64: 1, 16, 4, 16>}, {transform_indices = @transform_1, window_bounds = array<i64: 1, 16, 4, 16>}, {transform_indices = @transform_2, window_bounds = array<i64: 1, 16, 16>}, {transform_indices = @transform_3, window_bounds = array<i64: 1, 3, 256>}]} {
    %c0 = arith.constant 0 : index
    %c0_0 = arith.constant 0 : index
    %c0_1 = arith.constant 0 : index
    %c0_2 = arith.constant 0 : index
    %0 = vector.load %arg1[%c0, %c0_0, %c0_1, %c0_2] : memref<1x16x4x16xbf16, #tpu.memory_space<vmem>>, vector<1x16x4x16xbf16>
    %1 = vector.shape_cast %0 : vector<1x16x4x16xbf16> to vector<16x4x16xbf16>
    %2 = arith.extf %1 : vector<16x4x16xbf16> to vector<16x4x16xf32>
    %c0_3 = arith.constant 0 : index
    %c0_4 = arith.constant 0 : index
    %c0_5 = arith.constant 0 : index
    %c0_6 = arith.constant 0 : index
    %3 = vector.load %arg2[%c0_3, %c0_4, %c0_5, %c0_6] : memref<1x16x4x16xbf16, #tpu.memory_space<vmem>>, vector<1x16x4x16xbf16>
    %4 = vector.shape_cast %3 : vector<1x16x4x16xbf16> to vector<16x4x16xbf16>
    %c0_7 = arith.constant 0 : index
    %c0_8 = arith.constant 0 : index
    %c0_9 = arith.constant 0 : index
    %5 = vector.load %arg3[%c0_7, %c0_8, %c0_9] : memref<1x16x16xf32, #tpu.memory_space<vmem>>, vector<1x16x16xf32>
    %6 = vector.shape_cast %5 : vector<1x16x16xf32> to vector<16x16xf32>
    %7 = tpu.iota {dimensions = array<i32: 1>} : vector<16x16xi32>
    %8 = arith.sitofp %7 : vector<16x16xi32> to vector<16x16xf32>
    %9 = arith.subf %8, %6 : vector<16x16xf32>
    %10 = math.floor %9 : vector<16x16xf32>
    %11 = arith.subf %9, %10 : vector<16x16xf32>
    %12 = vector.shape_cast %11 : vector<16x16xf32> to vector<16x16x1xf32>
    %13 = arith.fptosi %10 : vector<16x16xf32> to vector<16x16xi32>
    %14 = vector.shape_cast %13 : vector<16x16xi32> to vector<16x16x1xi32>
    %c1_i32 = arith.constant 1 : i32
    %15 = vector.broadcast %c1_i32 : i32 to vector<16x16x1xi32>
    %16 = arith.addi %14, %15 : vector<16x16x1xi32>
    %17 = tpu.iota {dimensions = array<i32: 2>} : vector<16x16x18xi32>
    %18 = vector.broadcast %16 : vector<16x16x1xi32> to vector<16x16x18xi32>
    %19 = arith.cmpi eq, %17, %18 : vector<16x16x18xi32>
    %cst = arith.constant 1.000000e+00 : f32
    %20 = vector.broadcast %cst : f32 to vector<16x16x1xf32>
    %21 = arith.subf %20, %12 : vector<16x16x1xf32>
    %cst_10 = arith.constant 0.000000e+00 : f32
    %22 = vector.shape_cast %21 : vector<16x16x1xf32> to vector<16x16x1xf32>
    %23 = vector.broadcast %22 : vector<16x16x1xf32> to vector<16x16x18xf32>
    %24 = vector.broadcast %cst_10 : f32 to vector<16x16x18xf32>
    %25 = arith.select %19, %23, %24 : vector<16x16x18xi1>, vector<16x16x18xf32>
    %c1_i32_11 = arith.constant 1 : i32
    %26 = vector.broadcast %c1_i32_11 : i32 to vector<16x16x1xi32>
    %27 = arith.addi %16, %26 : vector<16x16x1xi32>
    %28 = vector.broadcast %27 : vector<16x16x1xi32> to vector<16x16x18xi32>
    %29 = arith.cmpi eq, %17, %28 : vector<16x16x18xi32>
    %cst_12 = arith.constant 0.000000e+00 : f32
    %30 = vector.shape_cast %12 : vector<16x16x1xf32> to vector<16x16x1xf32>
    %31 = vector.broadcast %30 : vector<16x16x1xf32> to vector<16x16x18xf32>
    %32 = vector.broadcast %cst_12 : f32 to vector<16x16x18xf32>
    %33 = arith.select %29, %31, %32 : vector<16x16x18xi1>, vector<16x16x18xf32>
    %34 = arith.addf %25, %33 : vector<16x16x18xf32>
    %35 = arith.truncf %34 : vector<16x16x18xf32> to vector<16x16x18xbf16>
    %36 = vector.extract_strided_slice %35 {offsets = [0, 0, 2], sizes = [16, 16, 16], strides = [1, 1, 1]} : vector<16x16x18xbf16> to vector<16x16x16xbf16>
    "tpu.trace_start"() <{level = 10 : i32, message = "hcv,hwv->hcw"}> : () -> ()
    %cst_13 = arith.constant dense<0.000000e+00> : vector<16x4x16xf32>
    %37 = tpu.matmul %4, %36, %cst_13 {dimension_numbers = #tpu.dot_dimension_numbers<[2], [2], [1], [1], [0, 0, 0, 1, 1, 1], [0], [0]>} : vector<16x4x16xbf16>, vector<16x16x16xbf16>, vector<16x4x16xf32> -> vector<16x4x16xf32>
    "tpu.trace_stop"() : () -> ()
    %38 = arith.subf %2, %37 : vector<16x4x16xf32>
    %39 = math.absf %38 : vector<16x4x16xf32>
    %cst_14 = arith.constant dense<0.000000e+00> : vector<16x16xf32>
    %40 = vector.multi_reduction <add>, %39, %cst_14 [1] : vector<16x4x16xf32> to vector<16x16xf32>
    %41 = vector.extract_strided_slice %35 {offsets = [0, 0, 1], sizes = [16, 16, 16], strides = [1, 1, 1]} : vector<16x16x18xbf16> to vector<16x16x16xbf16>
    "tpu.trace_start"() <{level = 10 : i32, message = "hcv,hwv->hcw"}> : () -> ()
    %cst_15 = arith.constant dense<0.000000e+00> : vector<16x4x16xf32>
    %42 = tpu.matmul %4, %41, %cst_15 {dimension_numbers = #tpu.dot_dimension_numbers<[2], [2], [1], [1], [0, 0, 0, 1, 1, 1], [0], [0]>} : vector<16x4x16xbf16>, vector<16x16x16xbf16>, vector<16x4x16xf32> -> vector<16x4x16xf32>
    "tpu.trace_stop"() : () -> ()
    %43 = arith.subf %2, %42 : vector<16x4x16xf32>
    %44 = math.absf %43 : vector<16x4x16xf32>
    %cst_16 = arith.constant dense<0.000000e+00> : vector<16x16xf32>
    %45 = vector.multi_reduction <add>, %44, %cst_16 [1] : vector<16x4x16xf32> to vector<16x16xf32>
    %46 = vector.extract_strided_slice %35 {offsets = [0, 0, 0], sizes = [16, 16, 16], strides = [1, 1, 1]} : vector<16x16x18xbf16> to vector<16x16x16xbf16>
    "tpu.trace_start"() <{level = 10 : i32, message = "hcv,hwv->hcw"}> : () -> ()
    %cst_17 = arith.constant dense<0.000000e+00> : vector<16x4x16xf32>
    %47 = tpu.matmul %4, %46, %cst_17 {dimension_numbers = #tpu.dot_dimension_numbers<[2], [2], [1], [1], [0, 0, 0, 1, 1, 1], [0], [0]>} : vector<16x4x16xbf16>, vector<16x16x16xbf16>, vector<16x4x16xf32> -> vector<16x4x16xf32>
    "tpu.trace_stop"() : () -> ()
    %48 = arith.subf %2, %47 : vector<16x4x16xf32>
    %49 = math.absf %48 : vector<16x4x16xf32>
    %cst_18 = arith.constant dense<0.000000e+00> : vector<16x16xf32>
    %50 = vector.multi_reduction <add>, %49, %cst_18 [1] : vector<16x4x16xf32> to vector<16x16xf32>
    %51 = vector.shape_cast %40 : vector<16x16xf32> to vector<1x16x16xf32>
    %52 = vector.shape_cast %45 : vector<16x16xf32> to vector<1x16x16xf32>
    %53 = vector.shape_cast %50 : vector<16x16xf32> to vector<1x16x16xf32>
    %54 = tpu.concatenate %51, %52, %53 in 0 : vector<1x16x16xf32>, vector<1x16x16xf32>, vector<1x16x16xf32> -> vector<3x16x16xf32>
    %55 = vector.shape_cast %54 : vector<3x16x16xf32> to vector<3x256xf32>
    %56 = arith.truncf %55 : vector<3x256xf32> to vector<3x256xbf16>
    %c0_19 = arith.constant 0 : index
    %c0_20 = arith.constant 0 : index
    %c0_21 = arith.constant 0 : index
    %57 = vector.load %arg4[%c0_19, %c0_20, %c0_21] : memref<1x3x256xbf16, #tpu.memory_space<vmem>>, vector<1x3x256xbf16>
    %58 = vector.shape_cast %57 : vector<1x3x256xbf16> to vector<3x256xbf16>
    %59 = vector.shape_cast %56 : vector<3x256xbf16> to vector<1x3x256xbf16>
    tpu.vector_store %arg4[%c0_19, %c0_20, %c0_21], %59 {strides = array<i32>} : memref<1x3x256xbf16, #tpu.memory_space<vmem>>, vector<1x3x256xbf16>,
    return
  }
  func.func @transform_0(%arg0: i32) -> (i32, i32, i32, i32) {
    %c0_i32 = arith.constant 0 : i32
    %c0_i32_0 = arith.constant 0 : i32
    %c0_i32_1 = arith.constant 0 : i32
    %c0_i32_2 = arith.constant 0 : i32
    return %arg0, %c0_i32, %c0_i32_0, %c0_i32_1 : i32, i32, i32, i32
  }
  func.func @transform_1(%arg0: i32) -> (i32, i32, i32, i32) {
    %c0_i32 = arith.constant 0 : i32
    %c0_i32_0 = arith.constant 0 : i32
    %c0_i32_1 = arith.constant 0 : i32
    %c0_i32_2 = arith.constant 0 : i32
    return %arg0, %c0_i32, %c0_i32_0, %c0_i32_1 : i32, i32, i32, i32
  }
  func.func @transform_2(%arg0: i32) -> (i32, i32, i32) {
    %c0_i32 = arith.constant 0 : i32
    %c0_i32_0 = arith.constant 0 : i32
    %c0_i32_1 = arith.constant 0 : i32
    return %arg0, %c0_i32, %c0_i32_0 : i32, i32, i32
  }
  func.func @transform_3(%arg0: i32) -> (i32, i32, i32) {
    %c0_i32 = arith.constant 0 : i32
    %c0_i32_0 = arith.constant 0 : i32
    %c0_i32_1 = arith.constant 0 : i32
    return %arg0, %c0_i32, %c0_i32_0 : i32, i32, i32
  }
}

module attributes {stable_mosaic.version = 11 : i64} {
  func.func @_matmul_kernel(%arg0: i32, %arg1: memref<2x27xbf16, #tpu.memory_space<vmem>>, %arg2: memref<27x1536xbf16, #tpu.memory_space<vmem>>, %arg3: memref<2x1536xbf16, #tpu.memory_space<vmem>>) attributes {dimension_semantics = [#tpu.dimension_semantics<parallel>], iteration_bounds = array<i64: 1>, scalar_prefetch = 0 : i64, scratch_operands = 0 : i64, tpu.core_type = #tpu.core_type<tc>, window_params = [{pipeline_mode = #tpu.pipeline_mode<synchronous>, transform_indices = @transform_0, window_bounds = array<i64: 2, 27>}, {transform_indices = @transform_1, window_bounds = array<i64: 27, 1536>}, {transform_indices = @transform_2, window_bounds = array<i64: 2, 1536>}]} {
    %c0 = arith.constant 0 : index
    %c0_0 = arith.constant 0 : index
    %0 = vector.load %arg1[%c0, %c0_0] : memref<2x27xbf16, #tpu.memory_space<vmem>>, vector<2x27xbf16>
    %c0_1 = arith.constant 0 : index
    %c0_2 = arith.constant 0 : index
    %1 = vector.load %arg2[%c0_1, %c0_2] : memref<27x1536xbf16, #tpu.memory_space<vmem>>, vector<27x1536xbf16>
    %cst = arith.constant dense<0.000000e+00> : vector<2x1536xf32>
    %2 = tpu.matmul %0, %1, %cst {dimension_numbers = #tpu.dot_dimension_numbers<[1], [0], [0], [1], [0, 0, 1, 1], [], []>} : vector<2x27xbf16>, vector<27x1536xbf16>, vector<2x1536xf32> -> vector<2x1536xf32>
    %cst_3 = arith.constant 0.999994993 : f32
    %3 = vector.broadcast %cst_3 : f32 to vector<2x1536xf32>
    %4 = arith.mulf %2, %3 : vector<2x1536xf32>
    %cst_4 = arith.constant 0.000000e+00 : f32
    %5 = vector.broadcast %cst_4 : f32 to vector<2x1536xf32>
    %6 = arith.maximumf %4, %5 : vector<2x1536xf32>
    %7 = arith.truncf %6 : vector<2x1536xf32> to vector<2x1536xbf16>
    %c0_5 = arith.constant 0 : index
    %c0_6 = arith.constant 0 : index
    %8 = vector.load %arg3[%c0_5, %c0_6] : memref<2x1536xbf16, #tpu.memory_space<vmem>>, vector<2x1536xbf16>
    tpu.vector_store %arg3[%c0_5, %c0_6], %7 {strides = array<i32>} : memref<2x1536xbf16, #tpu.memory_space<vmem>>, vector<2x1536xbf16>,
    return
  }
  func.func @transform_0(%arg0: i32) -> (i32, i32) {
    %c0_i32 = arith.constant 0 : i32
    %c0_i32_0 = arith.constant 0 : i32
    %c0_i32_1 = arith.constant 0 : i32
    return %c0_i32, %c0_i32_0 : i32, i32
  }
  func.func @transform_1(%arg0: i32) -> (i32, i32) {
    %c0_i32 = arith.constant 0 : i32
    %c0_i32_0 = arith.constant 0 : i32
    return %c0_i32, %arg0 : i32, i32
  }
  func.func @transform_2(%arg0: i32) -> (i32, i32) {
    %c0_i32 = arith.constant 0 : i32
    %c0_i32_0 = arith.constant 0 : i32
    return %c0_i32, %arg0 : i32, i32
  }
}

module attributes {stable_mosaic.version = 11 : i64} {
  func.func @_matmul_kernel(%arg0: i32, %arg1: memref<2x54xbf16, #tpu.memory_space<vmem>>, %arg2: memref<54x1536xbf16, #tpu.memory_space<vmem>>, %arg3: memref<2x1536xbf16, #tpu.memory_space<vmem>>) attributes {dimension_semantics = [#tpu.dimension_semantics<parallel>], iteration_bounds = array<i64: 1>, scalar_prefetch = 0 : i64, scratch_operands = 0 : i64, tpu.core_type = #tpu.core_type<tc>, window_params = [{pipeline_mode = #tpu.pipeline_mode<synchronous>, transform_indices = @transform_0, window_bounds = array<i64: 2, 54>}, {transform_indices = @transform_1, window_bounds = array<i64: 54, 1536>}, {transform_indices = @transform_2, window_bounds = array<i64: 2, 1536>}]} {
    %c0 = arith.constant 0 : index
    %c0_0 = arith.constant 0 : index
    %0 = vector.load %arg1[%c0, %c0_0] : memref<2x54xbf16, #tpu.memory_space<vmem>>, vector<2x54xbf16>
    %c0_1 = arith.constant 0 : index
    %c0_2 = arith.constant 0 : index
    %1 = vector.load %arg2[%c0_1, %c0_2] : memref<54x1536xbf16, #tpu.memory_space<vmem>>, vector<54x1536xbf16>
    %cst = arith.constant dense<0.000000e+00> : vector<2x1536xf32>
    %2 = tpu.matmul %0, %1, %cst {dimension_numbers = #tpu.dot_dimension_numbers<[1], [0], [0], [1], [0, 0, 1, 1], [], []>} : vector<2x54xbf16>, vector<54x1536xbf16>, vector<2x1536xf32> -> vector<2x1536xf32>
    %cst_3 = arith.constant 0.999994993 : f32
    %3 = vector.broadcast %cst_3 : f32 to vector<2x1536xf32>
    %4 = arith.mulf %2, %3 : vector<2x1536xf32>
    %cst_4 = arith.constant 0.000000e+00 : f32
    %5 = vector.broadcast %cst_4 : f32 to vector<2x1536xf32>
    %6 = arith.maximumf %4, %5 : vector<2x1536xf32>
    %7 = arith.truncf %6 : vector<2x1536xf32> to vector<2x1536xbf16>
    %c0_5 = arith.constant 0 : index
    %c0_6 = arith.constant 0 : index
    %8 = vector.load %arg3[%c0_5, %c0_6] : memref<2x1536xbf16, #tpu.memory_space<vmem>>, vector<2x1536xbf16>
    tpu.vector_store %arg3[%c0_5, %c0_6], %7 {strides = array<i32>} : memref<2x1536xbf16, #tpu.memory_space<vmem>>, vector<2x1536xbf16>,
    return
  }
  func.func @transform_0(%arg0: i32) -> (i32, i32) {
    %c0_i32 = arith.constant 0 : i32
    %c0_i32_0 = arith.constant 0 : i32
    %c0_i32_1 = arith.constant 0 : i32
    return %c0_i32, %c0_i32_0 : i32, i32
  }
  func.func @transform_1(%arg0: i32) -> (i32, i32) {
    %c0_i32 = arith.constant 0 : i32
    %c0_i32_0 = arith.constant 0 : i32
    return %c0_i32, %arg0 : i32, i32
  }
  func.func @transform_2(%arg0: i32) -> (i32, i32) {
    %c0_i32 = arith.constant 0 : i32
    %c0_i32_0 = arith.constant 0 : i32
    return %c0_i32, %arg0 : i32, i32
  }
}

module attributes {stable_mosaic.version = 11 : i64} {
  func.func @_matmul_kernel(%arg0: i32, %arg1: memref<1x54xbf16, #tpu.memory_space<vmem>>, %arg2: memref<54x1536xbf16, #tpu.memory_space<vmem>>, %arg3: memref<1x1536xf32, #tpu.memory_space<vmem>>) attributes {dimension_semantics = [#tpu.dimension_semantics<parallel>], iteration_bounds = array<i64: 1>, scalar_prefetch = 0 : i64, scratch_operands = 0 : i64, tpu.core_type = #tpu.core_type<tc>, window_params = [{pipeline_mode = #tpu.pipeline_mode<synchronous>, transform_indices = @transform_0, window_bounds = array<i64: 1, 54>}, {transform_indices = @transform_1, window_bounds = array<i64: 54, 1536>}, {transform_indices = @transform_2, window_bounds = array<i64: 1, 1536>}]} {
    %c0 = arith.constant 0 : index
    %c0_0 = arith.constant 0 : index
    %0 = vector.load %arg1[%c0, %c0_0] : memref<1x54xbf16, #tpu.memory_space<vmem>>, vector<1x54xbf16>
    %c0_1 = arith.constant 0 : index
    %c0_2 = arith.constant 0 : index
    %1 = vector.load %arg2[%c0_1, %c0_2] : memref<54x1536xbf16, #tpu.memory_space<vmem>>, vector<54x1536xbf16>
    %cst = arith.constant dense<0.000000e+00> : vector<1x1536xf32>
    %2 = tpu.matmul %0, %1, %cst {dimension_numbers = #tpu.dot_dimension_numbers<[1], [0], [0], [1], [0, 0, 1, 1], [], []>} : vector<1x54xbf16>, vector<54x1536xbf16>, vector<1x1536xf32> -> vector<1x1536xf32>
    %c0_3 = arith.constant 0 : index
    %c0_4 = arith.constant 0 : index
    %3 = vector.load %arg3[%c0_3, %c0_4] : memref<1x1536xf32, #tpu.memory_space<vmem>>, vector<1x1536xf32>
    tpu.vector_store %arg3[%c0_3, %c0_4], %2 {strides = array<i32>} : memref<1x1536xf32, #tpu.memory_space<vmem>>, vector<1x1536xf32>,
    return
  }
  func.func @transform_0(%arg0: i32) -> (i32, i32) {
    %c0_i32 = arith.constant 0 : i32
    %c0_i32_0 = arith.constant 0 : i32
    %c0_i32_1 = arith.constant 0 : i32
    return %c0_i32, %c0_i32_0 : i32, i32
  }
  func.func @transform_1(%arg0: i32) -> (i32, i32) {
    %c0_i32 = arith.constant 0 : i32
    %c0_i32_0 = arith.constant 0 : i32
    return %c0_i32, %arg0 : i32, i32
  }
  func.func @transform_2(%arg0: i32) -> (i32, i32) {
    %c0_i32 = arith.constant 0 : i32
    %c0_i32_0 = arith.constant 0 : i32
    return %c0_i32, %arg0 : i32, i32
  }
}

module attributes {stable_mosaic.version = 11 : i64} {
  func.func @_disp_regression_kernel(%arg0: i32, %arg1: memref<1x3x256xf32, #tpu.memory_space<vmem>>, %arg2: memref<1x1x256xf32, #tpu.memory_space<vmem>>) attributes {dimension_semantics = [#tpu.dimension_semantics<parallel>], iteration_bounds = array<i64: 2>, scalar_prefetch = 0 : i64, scratch_operands = 0 : i64, tpu.core_type = #tpu.core_type<tc>, window_params = [{transform_indices = @transform_0, window_bounds = array<i64: 1, 3, 256>}, {transform_indices = @transform_1, window_bounds = array<i64: 1, 1, 256>}]} {
    %c0 = arith.constant 0 : index
    %c0_0 = arith.constant 0 : index
    %c0_1 = arith.constant 0 : index
    %0 = vector.load %arg1[%c0, %c0_0, %c0_1] : memref<1x3x256xf32, #tpu.memory_space<vmem>>, vector<1x3x256xf32>
    %1 = vector.shape_cast %0 : vector<1x3x256xf32> to vector<3x256xf32>
    %cst = arith.constant 0.000000e+00 : f32
    %2 = vector.broadcast %cst : f32 to vector<3x256xf32>
    %3 = arith.subf %2, %1 : vector<3x256xf32>
    %cst_2 = arith.constant dense<0xFF800000> : vector<256xf32>
    %4 = vector.multi_reduction <maximumf>, %3, %cst_2 [0] : vector<3x256xf32> to vector<256xf32>
    %5 = vector.shape_cast %4 : vector<256xf32> to vector<1x256xf32>
    %6 = vector.broadcast %5 : vector<1x256xf32> to vector<3x256xf32>
    %7 = arith.subf %3, %6 : vector<3x256xf32>
    %8 = math.exp %7 : vector<3x256xf32>
    %cst_3 = arith.constant dense<0.000000e+00> : vector<256xf32>
    %9 = vector.multi_reduction <add>, %8, %cst_3 [0] : vector<3x256xf32> to vector<256xf32>
    %10 = vector.shape_cast %9 : vector<256xf32> to vector<1x256xf32>
    %11 = tpu.iota {dimensions = array<i32: 0>} : vector<3x256xi32>
    %12 = arith.sitofp %11 : vector<3x256xi32> to vector<3x256xf32>
    %cst_4 = arith.constant -1.000000e+00 : f32
    %13 = vector.broadcast %cst_4 : f32 to vector<3x256xf32>
    %14 = arith.addf %13, %12 : vector<3x256xf32>
    %15 = arith.mulf %8, %14 : vector<3x256xf32>
    %cst_5 = arith.constant dense<0.000000e+00> : vector<256xf32>
    %16 = vector.multi_reduction <add>, %15, %cst_5 [0] : vector<3x256xf32> to vector<256xf32>
    %17 = vector.shape_cast %16 : vector<256xf32> to vector<1x256xf32>
    %18 = tpu.reciprocal %10 {approx = true} : vector<1x256xf32> -> vector<1x256xf32>
    %19 = arith.mulf %17, %18 : vector<1x256xf32>
    %cst_6 = arith.constant 4.000000e+00 : f32
    %20 = vector.broadcast %cst_6 : f32 to vector<1x256xf32>
    %21 = arith.mulf %19, %20 : vector<1x256xf32>
    %c0_7 = arith.constant 0 : index
    %c0_8 = arith.constant 0 : index
    %c0_9 = arith.constant 0 : index
    %22 = vector.load %arg2[%c0_7, %c0_8, %c0_9] : memref<1x1x256xf32, #tpu.memory_space<vmem>>, vector<1x1x256xf32>
    %23 = vector.shape_cast %22 : vector<1x1x256xf32> to vector<1x256xf32>
    %24 = vector.shape_cast %21 : vector<1x256xf32> to vector<1x1x256xf32>
    tpu.vector_store %arg2[%c0_7, %c0_8, %c0_9], %24 {strides = array<i32>} : memref<1x1x256xf32, #tpu.memory_space<vmem>>, vector<1x1x256xf32>,
    return
  }
  func.func @transform_0(%arg0: i32) -> (i32, i32, i32) {
    %c0_i32 = arith.constant 0 : i32
    %c0_i32_0 = arith.constant 0 : i32
    %c0_i32_1 = arith.constant 0 : i32
    return %arg0, %c0_i32, %c0_i32_0 : i32, i32, i32
  }
  func.func @transform_1(%arg0: i32) -> (i32, i32, i32) {
    %c0_i32 = arith.constant 0 : i32
    %c0_i32_0 = arith.constant 0 : i32
    %c0_i32_1 = arith.constant 0 : i32
    return %arg0, %c0_i32, %c0_i32_0 : i32, i32, i32
  }
}

</mosaic_0001>

<bundles_post_ra>
// kernel: _lambda_.19
= control target key start
LH: loop header
LB: loop body
LE: loop exit
PB: predicated region body
PF: predicated region fallthrough
CT: control target
= control target key end

     0   :  { %s713_s9 = smov 0   ;;  %s715_s10 = smov 0   ;;  %s812_s0 = inlined_call_operand.vmem [shape: bf16[4,27], index: 0, kind: input, shape index: {}]   ;;  %s813_s1 = inlined_call_operand.vmem [shape: bf16[27,4096], index: 1, kind: input, shape index: {}]   ;;  %s814_s2 = inlined_call_operand.vmem [shape: bf16[4,4096], index: 2, kind: output, shape index: {}]  }
   0x1   :  { %s717_s11 = smov 0  }
   0x2 LB: > { %s606_s12 = sadd.s32 4294967295, %s693_s11   ;;  %s730_s13 = sadd.s32 1, %s693_s11   ;;  %s693_s11 = sphi %s717_s11, %s817_s11   ;;  %s689_s10 = sphi %s715_s10, %s816_s10   ;;  %s685_s9 = sphi %s713_s9, %s815_s9  }
   0x3   : > { %s37_s14 = ssub.s32 %s693_s11, %s730_s13  ;;  %s40_s15 = sadd.s32 1, %s689_s10 }
   0x4   : > { %p38_p0 = scmp.eq.s32.totalorder %s37_s14, 0  ;;  %p47_p1 = scmp.ne.s32.totalorder %s689_s10, %s685_s9 }
   0x5   : > { %p48_p2 = scmp.eq.s32.totalorder %s693_s11, 0  ;;  %p609_p4 = scmp.ge.s32.totalorder %s693_s11, 4 }
   0x6   : > { %s739_s16 = scalar_select %p38_p0, %s689_s10, %s40_s15  }
   0x7   : > { %p49_p3 = por %p48_p2, %p47_p1  ;;  %102 = sbr.rel (%p609_p4) target bundleno = 24 (0x18), region = 20 }
   0xc   : > { %105 = sbr.rel (!%p49_p3) target bundleno = 24 (0x18), region = 24  ;;  %s107_s17 = sand.u32 (%p49_p3), 1, %s689_s10  }
   0xd   : > { %s643_s18 = sshll.u32 (%p49_p3), %s693_s11, 5  ;;  %s610_s19 = sshll.u32 (%p49_p3), %s107_s17, 7 }
   0xe   : > { %s747_s22 = scalar_lea.vmem (%p49_p3), %s813_s1, %s643_s18  ;;  %s109_s23 = scalar_lea.vmem (%p49_p3), [#allocation2], %s610_s19 }
   0xf   : > { %v125_v0 = vld [vmem:[%s747_s22] sm:$0xff] (%p49_p3)  ;;  %v127_v1 = vld [vmem:[%s747_s22 + $0x8] sm:$0xff] (%p49_p3)  ;;  %v129_v2 = vld [vmem:[%s747_s22 + $0x10] sm:$0xff] (%p49_p3) }
  0x10   : > { %126 = vst [vmem:[%s109_s23] sm:$0xff] (%p49_p3), %v125_v0  ;;  %128 = vst [vmem:[%s109_s23 + $0x8] sm:$0xff] (%p49_p3), %v127_v1  ;;  %v131_v3 = vld [vmem:[%s747_s22 + $0x18] sm:$0xff] (%p49_p3)  ;;  %v133_v4 = vld [vmem:[%s747_s22 + $0x80] sm:$0xff] (%p49_p3) }
  0x11   : > { %130 = vst [vmem:[%s109_s23 + $0x10] sm:$0xff] %v129_v2  ;;  %v135_v5 = vld [vmem:[%s747_s22 + $0x88] sm:$0xff]  ;;  %132 = vst [vmem:[%s109_s23 + $0x18] sm:$0xff] %v131_v3  ;;  %v137_v6 = vld [vmem:[%s747_s22 + $0x90] sm:$0xff] }
  0x12   : > { %134 = vst [vmem:[%s109_s23 + $0x20] sm:$0xff] %v133_v4  ;;  %136 = vst [vmem:[%s109_s23 + $0x28] sm:$0xff] %v135_v5  ;;  %v139_v7 = vld [vmem:[%s747_s22 + $0x98] sm:$0xff]  ;;  %v141_v8 = vld [vmem:[%s747_s22 + $0x100] sm:$0xff] }
  0x13   : > { %138 = vst [vmem:[%s109_s23 + $0x30] sm:$0xff] %v137_v6  ;;  %140 = vst [vmem:[%s109_s23 + $0x38] sm:$0xff] %v139_v7  ;;  %v143_v9 = vld [vmem:[%s747_s22 + $0x108] sm:$0xff]  ;;  %v145_v10 = vld [vmem:[%s747_s22 + $0x110] sm:$0xff] }
  0x14   : > { %142 = vst [vmem:[%s109_s23 + $0x40] sm:$0xff] %v141_v8  ;;  %v147_v11 = vld [vmem:[%s747_s22 + $0x118] sm:$0xff]  ;;  %144 = vst [vmem:[%s109_s23 + $0x48] sm:$0xff] %v143_v9  ;;  %v149_v12 = vld [vmem:[%s747_s22 + $0x180] sm:$0xff] }
  0x15   : > { %146 = vst [vmem:[%s109_s23 + $0x50] sm:$0xff] %v145_v10  ;;  %148 = vst [vmem:[%s109_s23 + $0x58] sm:$0xff] %v147_v11  ;;  %v151_v13 = vld [vmem:[%s747_s22 + $0x188] sm:$0xff]  ;;  %v153_v14 = vld [vmem:[%s747_s22 + $0x190] sm:$0xff] }
  0x16   : > { %150 = vst [vmem:[%s109_s23 + $0x60] sm:$0xff] %v149_v12  ;;  %152 = vst [vmem:[%s109_s23 + $0x68] sm:$0xff] %v151_v13  ;;  %v155_v15 = vld [vmem:[%s747_s22 + $0x198] sm:$0xff] }
  0x17   : > { %154 = vst [vmem:[%s109_s23 + $0x70] sm:$0xff] %v153_v14  ;;  %156 = vst [vmem:[%s109_s23 + $0x78] sm:$0xff] %v155_v15 }
  0x18 PF: > { %p613_p5 = scmp.ge.s32.totalorder %s693_s11, 1  ;;  %p161_p6 = scmp.lt.s32.totalorder %s693_s11, 5 }
  0x1a   : > { %p162_p7 = pnand %p613_p5, %p161_p6 }
  0x1b   : > { %s168_s24 = sand.u32 (!%p162_p7), 1, %s685_s9   ;;  %s615_s29 = sshll.u32 (!%p162_p7), %s606_s12, 3 }
  0x1c   : > { %165 = sbr.rel (%p162_p7) target bundleno = 259 (0x103), region = 47  ;;  %s614_s25 = sshll.u32 (!%p162_p7), %s168_s24, 7 }
  0x1d   : > { %s770_s26 = scalar_lea.vmem (!%p162_p7), [#allocation2], %s614_s25  ;;  %p191_p8 = scmp.lt.s32.totalorder (!%p162_p7), %s615_s29, 31 }
  0x21   : > { %vm290_vm0 = vcmask 1044480   ;;  %vm291_vm1 = vcmask 1045504   ;;  %v695_v16 = vmov 65535   ;;  %v696_v18 = vmov 0   ;;  %v206_v19 = vld [vmem:[%s770_s26 + $0x40] sm:$0xff]  ;;  %v207_v22 = vld [vmem:[%s770_s26 + $0x48] sm:$0xff] }
  0x22   : > { %v292_v17 = vsel %vm290_vm0, 4294967295, %v695_v16  ;;  %350 = vmatprep.mubr.bf16.mxu0 %v696_v18  ;;  %391 = vmatprep.mubr.bf16.mxu1 %v696_v18  ;;  %v210_v20 = vld [vmem:[%s770_s26 + $0x60] sm:$0x33]  ;;  %v211_v24 = vld [vmem:[%s770_s26 + $0x68] sm:$0x33]  ;;  %v208_v32 = vld [vmem:[%s770_s26 + $0x50] sm:$0xff]  ;;  %v511_v63 = vlaneseq }
  0x23   : > { %v293_v21 = vsel %vm291_vm1, %v292_v17, 0  ;;  %v626_v23 = vcombine.high %v206_v19, %v210_v20  ;;  %v625_v25 = vcombine.low %v206_v19, %v210_v20  ;;  %v198_v26 = vld [vmem:[%s770_s26] sm:$0xff]  ;;  %v628_v28 = vcombine.high %v207_v22, %v211_v24  ;;  %v199_v30 = vld [vmem:[%s770_s26 + $0x8] sm:$0xff]  ;;  %v212_v36 = vld [vmem:[%s770_s26 + $0x70] sm:$0x33]  ;;  %s819_s29 = smov (!%p191_p8, %s615_s29), 31 }
  0x24   : > { %v202_v27 = vld [vmem:[%s770_s26 + $0x20] sm:$0xff]  ;;  %v627_v29 = vcombine.low %v207_v22, %v211_v24  ;;  %v203_v31 = vld [vmem:[%s770_s26 + $0x28] sm:$0xff]  ;;  %v209_v37 = vld [vmem:[%s770_s26 + $0x58] sm:$0xff]  ;;  %v630_v42 = vcombine.high %v208_v32, %v212_v36  ;;  %v629_v45 = vcombine.low %v208_v32, %v212_v36  ;;  %vm286_vm2 = vcmask 220160   ;;  %s616_s30 = sshll.u32 %s819_s29, 1 }
  0x25   : > { %v298_v33 = vand.u32 %v626_v23, %v293_v21  ;;  %v295_v34 = vand.u32 %v625_v25, %v293_v21  ;;  %v618_v35 = vcombine.high %v198_v26, %v202_v27  ;;  %v213_v38 = vld [vmem:[%s770_s26 + $0x78] sm:$0x33]  ;;  %v304_v39 = vand.u32 %v628_v28, %v293_v21  ;;  %v200_v50 = vld [vmem:[%s770_s26 + $0x10] sm:$0xff]  ;;  %v197_v54 = vld [vmem:[%s812_s0] sm:$0x3]  ;;  %s194_s5 = scalar_lea.vmem %s814_s2, %s616_s30 }
  0x26   : > { %v301_v40 = vand.u32 %v627_v29, %v293_v21  ;;  %v620_v41 = vcombine.high %v199_v30, %v203_v31  ;;  %v632_v43 = vcombine.high %v209_v37, %v213_v38  ;;  %v617_v44 = vcombine.low %v198_v26, %v202_v27  ;;  %v204_v51 = vld [vmem:[%s770_s26 + $0x30] sm:$0xff]  ;;  %v201_v52 = vld [vmem:[%s770_s26 + $0x18] sm:$0xff] }
  0x27   : > { %330 = vmatprep.subr.bf16.mxu0 %v298_v33  ;;  %371 = vmatprep.subr.bf16.mxu1 %v304_v39  ;;  %v619_v46 = vcombine.low %v199_v30, %v203_v31  ;;  %v310_v47 = vand.u32 %v630_v42, %v293_v21  ;;  %v631_v48 = vcombine.low %v209_v37, %v213_v38  ;;  %v205_v53 = vld [vmem:[%s770_s26 + $0x38] sm:$0xff]  ;;  %v697_v61 = vmov 1983009808  }
  0x28   : > { %331 = vmatpush1.bf16.msra.mxu0 %v295_v34  ;;  %372 = vmatpush1.bf16.msra.mxu1 %v301_v40  ;;  %v316_v49 = vand.u32 %v632_v43, %v293_v21  ;;  %v307_v55 = vand.u32 %v629_v45, %v293_v21  ;;  %v622_v57 = vcombine.high %v200_v50, %v204_v51  ;;  %v509_v62 = vunpack.c.l.s4 %v697_v61 }
  0x29   : > { %332 = vmatprep.subr.bf16.mxu0 %v618_v35  ;;  %373 = vmatprep.subr.bf16.mxu1 %v620_v41  ;;  %v313_v56 = vand.u32 %v631_v48, %v293_v21  ;;  %v624_v58 = vcombine.high %v201_v52, %v205_v53  ;;  %v621_v59 = vcombine.low %v200_v50, %v204_v51  ;;  %v512_v1 = vshrl.u32 %v511_v63, 7 }
  0x2a   : > { %v623_v60 = vcombine.low %v201_v52, %v205_v53  ;;  %v510_v0 = vunpack.c.0.s8 %v509_v62 }
  0x2c   : > { %333 = vmatpush1.bf16.msra.mxu0 %v617_v44  ;;  %374 = vmatpush1.bf16.msra.mxu1 %v619_v46  ;;  %v513_v7 = vsub.s32 %v510_v0, %v512_v1 }
  0x2d   : > { %412 = vmatprep.subr.bf16.mxu0 %v310_v47  ;;  %453 = vmatprep.subr.bf16.mxu1 %v316_v49 }
  0x2f   : > { %633 = vmatmul.mubr.msk.bf16.vlgmr.msra.gmra.mxu0 %vm286_vm2, %v197_v54  ;;  %634 = vmatmul.mubr.msk.bf16.vlgmr.msra.gmra.mxu1 %vm286_vm2, %v197_v54 }
  0x30   : > { %413 = vmatpush1.bf16.msra.mxu0 %v307_v55  ;;  %454 = vmatpush1.bf16.msra.mxu1 %v313_v56 }
  0x31   : > { %414 = vmatprep.subr.bf16.mxu0 %v622_v57  ;;  %455 = vmatprep.subr.bf16.mxu1 %v624_v58 }
  0x32   : > { %432 = vmatprep.mubr.bf16.mxu0 %v696_v18  ;;  %473 = vmatprep.mubr.bf16.mxu1 %v696_v18 }
  0x34   : > { %415 = vmatpush1.bf16.msra.mxu0 %v621_v59  ;;  %456 = vmatpush1.bf16.msra.mxu1 %v623_v60 }
  0x37   : > { %635 = vmatmul.mubr.msk.bf16.vlgmr.msra.gmra.mxu0 %vm286_vm2, %v197_v54  ;;  %636 = vmatmul.mubr.msk.bf16.vlgmr.msra.gmra.mxu1 %vm286_vm2, %v197_v54 }
  0xef   : > { %v352_v2 = vpop.f32.mrf.mxu0  ;;  %v393_v3 = vpop.f32.mrf.mxu1 }
  0xf0   : > { %v482_v5 = vmax.f32 %v352_v2, 0.0  ;;  %v484_v9 = vmax.f32 %v393_v3, 0.0 }
  0xf1   : > { %v354_v4 = vpop.f32.mrf.mxu0  ;;  %v395_v8 = vpop.f32.mrf.mxu1 }
  0xf2   : > { %v483_v6 = vmax.f32 %v354_v4, 0.0  ;;  %v485_v10 = vmax.f32 %v395_v8, 0.0 }
  0xf3   : > { %v356_v11 = vpop.f32.mrf.mxu0  ;;  %v397_v13 = vpop.f32.mrf.mxu1 }
  0xf4   : > { %v637_v12 = vpack.c.bf16 %v483_v6, %v482_v5  ;;  %v638_v14 = vpack.c.bf16 %v485_v10, %v484_v9 }
  0xf5   : > { %v357_v15 = vpop.f32.mrf.mxu0  ;;  %v398_v17 = vpop.f32.mrf.mxu1 }
  0xf6   : > { %v514_v16 = vrot.slane %v637_v12, %v513_v7  ;;  %v521_v18 = vrot.slane %v638_v14, %v513_v7 }
  0xf7   : > { %v434_v19 = vpop.f32.mrf.mxu0  ;;  %v475_v20 = vpop.f32.mrf.mxu1 }
  0xf8   : > { %v522_v21 = vcombine.low %v514_v16, %v521_v18  ;;  %v486_v23 = vmax.f32 %v434_v19, 0.0  ;;  %v488_v26 = vmax.f32 %v475_v20, 0.0 }
  0xf9   : > { %v436_v22 = vpop.f32.mrf.mxu0  ;;  %v477_v25 = vpop.f32.mrf.mxu1 }
  0xfa   : > { %v487_v24 = vmax.f32 %v436_v22, 0.0  ;;  %542 = vst [vmem:[%s194_s5] sm:$0xff] %v522_v21  ;;  %v489_v27 = vmax.f32 %v477_v25, 0.0 }
  0xfb   : > { %v438_v28 = vpop.f32.mrf.mxu0  ;;  %v479_v30 = vpop.f32.mrf.mxu1 }
  0xfc   : > { %v639_v29 = vpack.c.bf16 %v487_v24, %v486_v23  ;;  %v640_v31 = vpack.c.bf16 %v489_v27, %v488_v26 }
  0xfd   : > { %v439_v32 = vpop.f32.mrf.mxu0  ;;  %v480_v34 = vpop.f32.mrf.mxu1 }
  0xfe   : > { %v531_v33 = vrot.slane %v639_v29, %v513_v7  ;;  %v538_v35 = vrot.slane %v640_v31, %v513_v7 }
 0x100   : > { %v539_v36 = vcombine.low %v531_v33, %v538_v35 }
 0x102   : > { %543 = vst [vmem:[%s194_s5 + $0x8] sm:$0xff] %v539_v36 }
 0x103 PF: > { %p9_p9 = scmp.ge.s32.totalorder %s730_s13, 6   ;;  %s815_s9 = smov %s689_s10 }
 0x104   : > { %s816_s10 = smov %s739_s16  ;;  %s817_s11 = smov %s730_s13 }
 0x105   :  { %11 = sbr.rel (!%p9_p9) target bundleno = 2 (0x2), region = 86 }

// kernel: _lambda_.20
= control target key start
LH: loop header
LB: loop body
LE: loop exit
PB: predicated region body
PF: predicated region fallthrough
CT: control target
= control target key end

     0   :  { %vm137_vm0 = vcmask 1041408   ;;  %v438_v3 = vmov 0   ;;  %vm133_vm1 = vcmask 293888   ;;  %v439_v50 = vmov 1983009808   ;;  %s540_s1 = inlined_call_operand.vmem [shape: bf16[36,1024], index: 1, kind: input, shape index: {}]   ;;  %s541_s0 = inlined_call_operand.vmem [shape: bf16[4,36], index: 0, kind: input, shape index: {}]   ;;  %s542_s2 = inlined_call_operand.vmem [shape: bf16[4,1024], index: 2, kind: output, shape index: {}]  }
   0x1   :  { %v29_v0 = vld [vmem:[%s540_s1 + $0x80] sm:$0x33]  ;;  %v30_v1 = vld [vmem:[%s540_s1 + $0x88] sm:$0x33]  ;;  %194 = vmatprep.mubr.bf16.mxu0 %v438_v3  ;;  %235 = vmatprep.mubr.bf16.mxu1 %v438_v3  ;;  %v31_v23 = vld [vmem:[%s540_s1 + $0x90] sm:$0x33]  ;;  %v353_v51 = vunpack.c.l.s4 %v439_v50  ;;  %v355_v52 = vlaneseq }
   0x2   :  { %v21_v2 = vld [vmem:[%s540_s1 + $0x40] sm:$0xff]  ;;  %v409_v4 = vcombine.high %v29_v0, %v29_v0  ;;  %v411_v5 = vcombine.high %v30_v1, %v30_v1  ;;  %v408_v6 = vcombine.low %v29_v0, %v29_v0  ;;  %v410_v7 = vcombine.low %v30_v1, %v30_v1  ;;  %v22_v9 = vld [vmem:[%s540_s1 + $0x48] sm:$0xff]  ;;  %v32_v24 = vld [vmem:[%s540_s1 + $0x98] sm:$0x33] }
   0x3   :  { %v25_v8 = vld [vmem:[%s540_s1 + $0x60] sm:$0xff]  ;;  %v26_v10 = vld [vmem:[%s540_s1 + $0x68] sm:$0xff]  ;;  %v413_v27 = vcombine.high %v31_v23, %v31_v23  ;;  %v415_v28 = vcombine.high %v32_v24, %v32_v24  ;;  %v412_v29 = vcombine.low %v31_v23, %v31_v23  ;;  %v414_v30 = vcombine.low %v32_v24, %v32_v24  ;;  %v23_v31 = vld [vmem:[%s540_s1 + $0x50] sm:$0xff] }
   0x4   :  { %v401_v11 = vcombine.high %v21_v2, %v25_v8  ;;  %v403_v12 = vcombine.high %v22_v9, %v26_v10  ;;  %v13_v13 = vld [vmem:[%s540_s1] sm:$0xff]  ;;  %v14_v15 = vld [vmem:[%s540_s1 + $0x8] sm:$0xff]  ;;  %416 = vmatprep.subr.msk.bf16.mxu0 %vm137_vm0, %v409_v4  ;;  %418 = vmatprep.subr.msk.bf16.mxu1 %vm137_vm0, %v411_v5  ;;  %v139_v16 = vsel %vm137_vm0, %v408_v6, 0  ;;  %v145_v17 = vsel %vm137_vm0, %v410_v7, 0  ;;  %v27_v32 = vld [vmem:[%s540_s1 + $0x70] sm:$0xff] }
   0x5   :  { %v17_v14 = vld [vmem:[%s540_s1 + $0x20] sm:$0xff]  ;;  %v18_v18 = vld [vmem:[%s540_s1 + $0x28] sm:$0xff]  ;;  %173 = vmatpush1.bf16.msra.mxu0 %v139_v16  ;;  %214 = vmatpush1.bf16.msra.mxu1 %v145_v17  ;;  %v400_v19 = vcombine.low %v21_v2, %v25_v8  ;;  %v402_v20 = vcombine.low %v22_v9, %v26_v10  ;;  %v24_v33 = vld [vmem:[%s540_s1 + $0x58] sm:$0xff]  ;;  %v151_v36 = vsel %vm137_vm0, %v412_v29, 0  ;;  %v157_v37 = vsel %vm137_vm0, %v414_v30, 0 }
   0x6   :  { %174 = vmatprep.subr.bf16.mxu0 %v401_v11  ;;  %215 = vmatprep.subr.bf16.mxu1 %v403_v12  ;;  %v393_v21 = vcombine.high %v13_v13, %v17_v14  ;;  %v395_v22 = vcombine.high %v14_v15, %v18_v18  ;;  %v392_v25 = vcombine.low %v13_v13, %v17_v14  ;;  %v28_v34 = vld [vmem:[%s540_s1 + $0x78] sm:$0xff]  ;;  %v12_v35 = vld [vmem:[%s541_s0] sm:$0x3]  ;;  %v15_v40 = vld [vmem:[%s540_s1 + $0x10] sm:$0xff]  ;;  %v354_v53 = vunpack.c.0.s8 %v353_v51 }
   0x7   :  { %v394_v26 = vcombine.low %v14_v15, %v18_v18  ;;  %v405_v38 = vcombine.high %v23_v31, %v27_v32  ;;  %v407_v39 = vcombine.high %v24_v33, %v28_v34  ;;  %v19_v41 = vld [vmem:[%s540_s1 + $0x30] sm:$0xff]  ;;  %v16_v42 = vld [vmem:[%s540_s1 + $0x18] sm:$0xff]  ;;  %v404_v44 = vcombine.low %v23_v31, %v27_v32 }
   0x8   :  { %v20_v43 = vld [vmem:[%s540_s1 + $0x38] sm:$0xff]  ;;  %v406_v45 = vcombine.low %v24_v33, %v28_v34  ;;  %v397_v46 = vcombine.high %v15_v40, %v19_v41  ;;  %v396_v48 = vcombine.low %v15_v40, %v19_v41  ;;  %v356_v54 = vshrl.u32 %v355_v52, 7 }
   0x9   :  { %175 = vmatpush1.bf16.msra.mxu0 %v400_v19  ;;  %216 = vmatpush1.bf16.msra.mxu1 %v402_v20  ;;  %v399_v47 = vcombine.high %v16_v42, %v20_v43  ;;  %v398_v49 = vcombine.low %v16_v42, %v20_v43 }
   0xa   :  { %176 = vmatprep.subr.bf16.mxu0 %v393_v21  ;;  %217 = vmatprep.subr.bf16.mxu1 %v395_v22  ;;  %v357_v62 = vsub.s32 %v354_v53, %v356_v54 }
   0xd   :  { %177 = vmatpush1.bf16.msra.mxu0 %v392_v25  ;;  %218 = vmatpush1.bf16.msra.mxu1 %v394_v26 }
   0xe   :  { %420 = vmatprep.subr.msk.bf16.mxu0 %vm137_vm0, %v413_v27  ;;  %422 = vmatprep.subr.msk.bf16.mxu1 %vm137_vm0, %v415_v28 }
  0x10   :  { %417 = vmatmul.mubr.msk.bf16.vlgmr.msra.gmra.mxu0 %vm133_vm1, %v12_v35  ;;  %419 = vmatmul.mubr.msk.bf16.vlgmr.msra.gmra.mxu1 %vm133_vm1, %v12_v35 }
  0x11   :  { %255 = vmatpush1.bf16.msra.mxu0 %v151_v36  ;;  %296 = vmatpush1.bf16.msra.mxu1 %v157_v37 }
  0x12   :  { %256 = vmatprep.subr.bf16.mxu0 %v405_v38  ;;  %297 = vmatprep.subr.bf16.mxu1 %v407_v39 }
  0x13   :  { %276 = vmatprep.mubr.bf16.mxu0 %v438_v3  ;;  %317 = vmatprep.mubr.bf16.mxu1 %v438_v3 }
  0x15   :  { %257 = vmatpush1.bf16.msra.mxu0 %v404_v44  ;;  %298 = vmatpush1.bf16.msra.mxu1 %v406_v45 }
  0x16   :  { %258 = vmatprep.subr.bf16.mxu0 %v397_v46  ;;  %299 = vmatprep.subr.bf16.mxu1 %v399_v47 }
  0x19   :  { %259 = vmatpush1.bf16.msra.mxu0 %v396_v48  ;;  %300 = vmatpush1.bf16.msra.mxu1 %v398_v49 }
  0x1c   :  { %421 = vmatmul.mubr.msk.bf16.vlgmr.msra.gmra.mxu0 %vm133_vm1, %v12_v35  ;;  %423 = vmatmul.mubr.msk.bf16.vlgmr.msra.gmra.mxu1 %vm133_vm1, %v12_v35 }
  0xd0   :  { %v196_v55 = vpop.f32.mrf.mxu0  ;;  %v237_v56 = vpop.f32.mrf.mxu1 }
  0xd1   :  { %v326_v57 = vmax.f32 %v196_v55, 0.0  ;;  %v328_v58 = vmax.f32 %v237_v56, 0.0 }
  0xd2   :  { %v198_v59 = vpop.f32.mrf.mxu0  ;;  %v239_v60 = vpop.f32.mrf.mxu1 }
  0xd3   :  { %v327_v61 = vmax.f32 %v198_v59, 0.0  ;;  %v329_v63 = vmax.f32 %v239_v60, 0.0 }
  0xd4   :  { %v200_v0 = vpop.f32.mrf.mxu0  ;;  %v241_v1 = vpop.f32.mrf.mxu1 }
  0xd5   :  { %v424_v2 = vpack.c.bf16 %v327_v61, %v326_v57  ;;  %v425_v3 = vpack.c.bf16 %v329_v63, %v328_v58 }
  0xd6   :  { %v201_v4 = vpop.f32.mrf.mxu0  ;;  %v242_v5 = vpop.f32.mrf.mxu1 }
  0xd7   :  { %v358_v6 = vrot.slane %v424_v2, %v357_v62  ;;  %v365_v7 = vrot.slane %v425_v3, %v357_v62 }
  0xd9   :  { %v366_v8 = vcombine.low %v358_v6, %v365_v7 }
  0xdb   :  { %386 = vst [vmem:[%s542_s2] sm:$0xff] %v366_v8 }
  0xdc   :  { %v278_v9 = vpop.f32.mrf.mxu0  ;;  %v319_v10 = vpop.f32.mrf.mxu1 }
  0xdd   :  { %v330_v13 = vmax.f32 %v278_v9, 0.0  ;;  %v332_v14 = vmax.f32 %v319_v10, 0.0 }
  0xde   :  { %v280_v11 = vpop.f32.mrf.mxu0  ;;  %v321_v12 = vpop.f32.mrf.mxu1 }
  0xdf   :  { %v331_v15 = vmax.f32 %v280_v11, 0.0  ;;  %v333_v16 = vmax.f32 %v321_v12, 0.0 }
  0xe0   :  { %v282_v17 = vpop.f32.mrf.mxu0  ;;  %v323_v18 = vpop.f32.mrf.mxu1 }
  0xe1   :  { %v426_v19 = vpack.c.bf16 %v331_v15, %v330_v13  ;;  %v427_v20 = vpack.c.bf16 %v333_v16, %v332_v14 }
  0xe2   :  { %v283_v21 = vpop.f32.mrf.mxu0  ;;  %v324_v22 = vpop.f32.mrf.mxu1 }
  0xe3   :  { %v375_v23 = vrot.slane %v426_v19, %v357_v62  ;;  %v382_v24 = vrot.slane %v427_v20, %v357_v62 }
  0xe5   :  { %v383_v25 = vcombine.low %v375_v23, %v382_v24 }
  0xe7   :  { %387 = vst [vmem:[%s542_s2 + $0x8] sm:$0xff] %v383_v25 }

// kernel: _lambda_.21
= control target key start
LH: loop header
LB: loop body
LE: loop exit
PB: predicated region body
PF: predicated region fallthrough
CT: control target
= control target key end

     0   :  { %vm47_vm0 = vcmask 1041408   ;;  %v134_v1 = vmov 0   ;;  %vm43_vm1 = vcmask 293888   ;;  %s171_s1 = inlined_call_operand.vmem [shape: bf16[36,256], index: 1, kind: input, shape index: {}]   ;;  %s172_s0 = inlined_call_operand.vmem [shape: bf16[4,36], index: 0, kind: input, shape index: {}]   ;;  %s173_s2 = inlined_call_operand.vmem [shape: bf16[4,256], index: 2, kind: output, shape index: {}]  }
   0x1   :  { %v17_v0 = vld [vmem:[%s171_s1 + $0x20] sm:$0x33]  ;;  %86 = vmatprep.mubr.bf16.mxu0 %v134_v1  ;;  %v128_v4 = vld [vmem:[%s171_s1 + $0x14] ss:$8 sps:$4 sm:$0xff]   ;;  %v130_v6 = vld [vmem:[%s171_s1 + $0x10] ss:$8 sps:$4 sm:$0xff]  }
   0x2   :  { %v120_v2 = vcombine.high %v17_v0, %v17_v0  ;;  %v119_v3 = vcombine.low %v17_v0, %v17_v0  ;;  %v131_v7 = vld [vmem:[%s171_s1 + $0x4] ss:$8 sps:$4 sm:$0xff]   ;;  %v133_v8 = vld [vmem:[%s171_s1] ss:$8 sps:$4 sm:$0xff]  }
   0x3   :  { %v12_v9 = vld [vmem:[%s172_s0] sm:$0x3] }
   0x4   :  { %121 = vmatprep.subr.msk.bf16.mxu0 %vm47_vm0, %v120_v2  ;;  %v49_v5 = vsel %vm47_vm0, %v119_v3, 0 }
   0x5   :  { %65 = vmatpush1.bf16.msra.mxu0 %v49_v5 }
   0x6   :  { %66 = vmatprep.subr.bf16.mxu0 %v128_v4 }
   0x9   :  { %67 = vmatpush1.bf16.msra.mxu0 %v130_v6 }
   0xa   :  { %68 = vmatprep.subr.bf16.mxu0 %v131_v7 }
   0xd   :  { %69 = vmatpush1.bf16.msra.mxu0 %v133_v8 }
  0x10   :  { %122 = vmatmul.mubr.msk.bf16.vlgmr.msra.gmra.mxu0 %vm43_vm1, %v12_v9 }
  0xd0   :  { %v88_v10 = vpop.f32.mrf.mxu0 }
  0xd1   :  { %v95_v12 = vmax.f32 %v88_v10, 0.0 }
  0xd2   :  { %v90_v11 = vpop.f32.mrf.mxu0 }
  0xd3   :  { %v96_v13 = vmax.f32 %v90_v11, 0.0 }
  0xd4   :  { %v92_v14 = vpop.f32.mrf.mxu0 }
  0xd5   :  { %v123_v15 = vpack.c.bf16 %v96_v13, %v95_v12 }
  0xd6   :  { %v93_v16 = vpop.f32.mrf.mxu0 }
  0xd7   :  { %124 = vst.sshfl [vmem:[%s173_s2] sm:$0x33 pattern:$0x76325410] %v123_v15 }

// kernel: _lambda_.22
= control target key start
LH: loop header
LB: loop body
LE: loop exit
PB: predicated region body
PF: predicated region fallthrough
CT: control target
= control target key end

     0   :  { %vm37_vm0 = vcmask 1041408   ;;  %v111_v0 = vmov 0.0   ;;  %vm112_vm1 = vmmov 0   ;;  %vm33_vm2 = vcmask 293888   ;;  %s143_s1 = inlined_call_operand.vmem [shape: bf16[36,128], index: 1, kind: input, shape index: {}]   ;;  %s144_s0 = inlined_call_operand.vmem [shape: bf16[4,36], index: 0, kind: input, shape index: {}]   ;;  %s145_s2 = inlined_call_operand.vmem [shape: bf16[4,128], index: 2, kind: output, shape index: {}]  }
   0x1   :  { %96 = vmatprep.subr.bf16.mxu0 %v111_v0  ;;  %v108_v1 = vld [vmem:[%s143_s1 + $0x10] ss:$0 sps:$4 sm:$0x33]   ;;  %102 = vmatprep.mubr.msk.bf16.mxu0 %vm112_vm1, %v111_v0  ;;  %v109_v3 = vld [vmem:[%s143_s1 + $0x8] sm:$0xff]   ;;  %v110_v4 = vld [vmem:[%s143_s1] sm:$0xff]  }
   0x2   :  { %v39_v2 = vsel %vm37_vm0, %v108_v1, 0  ;;  %v12_v5 = vld [vmem:[%s144_s0] sm:$0x3] }
   0x3   :  { %97 = vmatpush3.bf16.msra.mxu0 %v39_v2 }
   0x4   :  { %98 = vmatprep.subr.bf16.mxu0 %v111_v0 }
   0x7   :  { %99 = vmatpush3.bf16.msra.mxu0 %v109_v3 }
   0x8   :  { %100 = vmatprep.subr.bf16.mxu0 %v111_v0 }
   0xb   :  { %101 = vmatpush3.bf16.msra.mxu0 %v110_v4 }
   0xe   :  { %103 = vmatmul.mubr.msk.bf16.vlgmr.msra.gmra.mxu0 %vm33_vm2, %v12_v5 }
  0xce   :  { %v75_v6 = vpop.f32.mrf.mxu0 }
  0xcf   :  { %v81_v7 = vmax.f32 %v75_v6, 0.0 }
  0xd0   :  { %v104_v8 = vpop.f32.mrf.mxu0 }
  0xd1   :  { %v82_v9 = vpack.c.bf16 %v81_v7, %v81_v7 }
  0xd2   :  { %v78_v10 = vpop.f32.mrf.mxu0 }
  0xd3   :  { %83 = vst [vmem:[%s145_s2] sm:$0x3] %v82_v9 }
  0xd4   :  { %v105_v11 = vpop.f32.mrf.mxu0 }

// kernel: _lambda_.23
= control target key start
LH: loop header
LB: loop body
LE: loop exit
PB: predicated region body
PF: predicated region fallthrough
CT: control target
= control target key end

     0   :  { %s487_s9 = smov 0   ;;  %s542_s0 = inlined_call_operand.vmem [shape: bf16[2,4,4,4], index: 0, kind: input, shape index: {}]   ;;  %s543_s1 = inlined_call_operand.vmem [shape: bf16[2,4,4,7], index: 1, kind: input, shape index: {}]   ;;  %s544_s2 = inlined_call_operand.vmem [shape: bf16[2,4,16], index: 2, kind: output, shape index: {}]  }
   0x1 LB: > { %s399_s10 = sadd.s32 4294967295, %s461_s9   ;;  %p403_p0 = scmp.ge.s32.totalorder %s461_s9, 1  ;;  %s461_s9 = sphi %s487_s9, %s12_s9  }
   0x2   : > { %p122_p1 = scmp.lt.s32.totalorder %s461_s9, 3 }
   0x4   : > { %p123_p2 = pnand %p403_p0, %p122_p1 }
   0x5   : > { %p148_p3 = scmp.lt.s32.totalorder (!%p123_p2), %s399_s10, 1  ;;  %s463_s18 = smov (!%p123_p2), 127  }
   0x6   : > { %126 = sbr.rel (%p123_p2) target bundleno = 286 (0x11e), region = 28  ;;  %s464_s19 = smov (!%p123_p2), 125  }
   0x7   : > { %s465_s20 = smov (!%p123_p2), 126   ;;  %s468_s21 = smov (!%p123_p2), 8  }
   0x8   : > { %s470_s22 = smov (!%p123_p2), 4   ;;  %s471_s23 = smov (!%p123_p2), 12  }
   0xb   : > { %s546_s10 = smov (!%p148_p3, %s399_s10), 1  ;;  %vm202_vm0 = vcmask 27648   ;;  %v466_v53 = vmov 1983009808   ;;  %vm325_vm1 = vcmask 31744   ;;  %vm327_vm2 = vcmask 64512  }
   0xc   : > { %s411_s11 = sshll.u32 %s546_s10, 3  ;;  %v281_v54 = vunpack.c.l.s4 %v466_v53  ;;  %s408_s24 = sshll.u32 %s546_s10, 1  ;;  %vm329_vm3 = vcmask 97280   ;;  %vm332_vm4 = vcmask 123904  }
   0xd   : > { %s157_s14 = scalar_lea.vmem %s543_s1, %s411_s11  ;;  %s152_s17 = scalar_lea.vmem %s542_s0, %s411_s11 }
   0xe   : > { %v170_v0 = vld [vmem:[%s157_s14] sm:$0x3]  ;;  %v171_v1 = vld [vmem:[%s157_s14 + $0x2] sm:$0x3]  ;;  %v172_v2 = vld [vmem:[%s157_s14 + $0x4] sm:$0x3]  ;;  %s161_s27 = scalar_lea.vmem %s544_s2, %s408_s24 }
   0xf   : > { %v174_v3 = vunpack.c.l.bf16 %v170_v0  ;;  %v175_v4 = vunpack.c.l.bf16 %v171_v1  ;;  %v173_v5 = vld [vmem:[%s157_s14 + $0x6] sm:$0x3]  ;;  %v176_v6 = vunpack.c.l.bf16 %v172_v2  ;;  %v162_v7 = vld [vmem:[%s152_s17] sm:$0x3]  ;;  %v163_v8 = vld [vmem:[%s152_s17 + $0x2] sm:$0x3]  ;;  %v283_v0 = vlaneseq }
  0x10   : > { %v177_v9 = vunpack.c.l.bf16 %v173_v5  ;;  %v166_v10 = vunpack.c.l.bf16 %v162_v7  ;;  %v164_v11 = vld [vmem:[%s152_s17 + $0x4] sm:$0x3]  ;;  %v165_v12 = vld [vmem:[%s152_s17 + $0x6] sm:$0x3]  ;;  %v167_v14 = vunpack.c.l.bf16 %v163_v8 }
  0x11   : > { %v440_v13 = vpack.i.bf16 %v175_v4, %v174_v3  ;;  %v504_v15 = vunpack.c.l.bf16 %v164_v11  ;;  %v506_v16 = vunpack.c.l.bf16 %v165_v12 }
  0x12   : > { %v264_v17 = vsub.f32 %v166_v10, %v174_v3  ;;  %v445_v18 = vpack.i.bf16 %v177_v9, %v176_v6  ;;  %v265_v19 = vsub.f32 %v167_v14, %v175_v4 }
  0x13   : > { %441 = vrot.lane.b32.xlu1 %v440_v13, %s463_s18  ;;  %431 = vrot.lane.b32.xlu0 %v440_v13, %s464_s19  ;;  %v266_v20 = vsub.f32 %v504_v15, %v176_v6  ;;  %v267_v21 = vsub.f32 %v506_v16, %v177_v9 }
  0x14   : > { %v268_v22 = vand.u32 2147483647, %v264_v17  ;;  %v269_v23 = vand.u32 2147483647, %v265_v19 }
  0x15   : > { %v270_v24 = vand.u32 2147483647, %v266_v20  ;;  %v271_v25 = vand.u32 2147483647, %v267_v21  ;;  %v282_v21 = vunpack.c.0.s8 %v281_v54 }
  0x16   : > { %v272_v26 = vsel %vm202_vm0, %v268_v22, 0.0  ;;  %v273_v27 = vsel %vm202_vm0, %v269_v23, 0.0  ;;  %v284_v22 = vshrl.u32 %v283_v0, 7 }
  0x17   : > { %446 = vrot.lane.b32.xlu1 %v445_v18, %s464_s19  ;;  %436 = vrot.lane.b32.xlu0 %v440_v13, %s465_s20  ;;  %v275_v28 = vsel %vm202_vm0, %v270_v24, 0.0  ;;  %v274_v29 = vadd.f32 %v273_v27, %v272_v26  ;;  %v277_v30 = vsel %vm202_vm0, %v271_v25, 0.0 }
  0x19   : > { %v276_v31 = vadd.f32 %v275_v28, %v274_v29 }
  0x1b   : > { %241 = vrot.lane.b32.xlu1 %v176_v6, %s463_s18  ;;  %451 = vrot.lane.b32.xlu0 %v445_v18, %s465_s20  ;;  %v514_v32 = vadd.f32 %v277_v30, %v276_v31  ;;  %v467_v30 = vmov 1934713408  }
  0x1c   : > { %v298_v31 = vunpack.c.l.s4 %v467_v30 }
  0x1f   : > { %243 = vrot.lane.b32.xlu0 %v177_v9, %s463_s18 }
  0x85   : > { %v442_v33 = vpop.permute.xlu1 %441  ;;  %v432_v34 = vpop.permute.xlu0 %431 }
  0x86   : > { %v444_v35 = vunpack.i.h.bf16 %v442_v33  ;;  %v443_v36 = vunpack.i.l.bf16 %v442_v33  ;;  %v434_v37 = vunpack.i.h.bf16 %v432_v34  ;;  %v433_v38 = vunpack.i.l.bf16 %v432_v34 }
  0x88   : > { %v249_v39 = vsub.f32 %v166_v10, %v443_v36  ;;  %v250_v40 = vsub.f32 %v167_v14, %v444_v35  ;;  %v194_v41 = vsub.f32 %v166_v10, %v433_v38  ;;  %v195_v42 = vsub.f32 %v167_v14, %v434_v37 }
  0x89   : > { %v447_v43 = vpop.permute.xlu1 %446  ;;  %v437_v44 = vpop.permute.xlu0 %436  ;;  %v285_v38 = vsub.s32 %v282_v21, %v284_v22 }
  0x8a   : > { %v198_v45 = vand.u32 2147483647, %v194_v41  ;;  %v449_v46 = vunpack.i.h.bf16 %v447_v43  ;;  %v199_v47 = vand.u32 2147483647, %v195_v42  ;;  %v448_v48 = vunpack.i.l.bf16 %v447_v43 }
  0x8b   : > { %v439_v49 = vunpack.i.h.bf16 %v437_v44  ;;  %v438_v50 = vunpack.i.l.bf16 %v437_v44  ;;  %v253_v51 = vand.u32 2147483647, %v249_v39  ;;  %v254_v52 = vand.u32 2147483647, %v250_v40 }
  0x8c   : > { %v196_v55 = vsub.f32 %v504_v15, %v448_v48  ;;  %v197_v56 = vsub.f32 %v506_v16, %v449_v46  ;;  %v203_v61 = vsel %vm202_vm0, %v198_v45, 0.0  ;;  %v204_v62 = vsel %vm202_vm0, %v199_v47, 0.0 }
  0x8d   : > { %v222_v57 = vsub.f32 %v166_v10, %v438_v50  ;;  %v223_v58 = vsub.f32 %v167_v14, %v439_v49  ;;  %v242_v59 = vpop.permute.xlu1 %241  ;;  %v452_v60 = vpop.permute.xlu0 %451  ;;  %v257_v5 = vsel %vm202_vm0, %v253_v51, 0.0  ;;  %v258_v8 = vsel %vm202_vm0, %v254_v52, 0.0 }
  0x8e   : > { %v251_v63 = vsub.f32 %v504_v15, %v242_v59  ;;  %v200_v1 = vand.u32 2147483647, %v196_v55  ;;  %v454_v4 = vunpack.i.h.bf16 %v452_v60  ;;  %v453_v7 = vunpack.i.l.bf16 %v452_v60 }
  0x8f   : > { %v226_v2 = vand.u32 2147483647, %v222_v57  ;;  %v227_v3 = vand.u32 2147483647, %v223_v58  ;;  %v201_v9 = vand.u32 2147483647, %v197_v56  ;;  %v205_v13 = vadd.f32 %v204_v62, %v203_v61 }
  0x90   : > { %v255_v6 = vand.u32 2147483647, %v251_v63  ;;  %v206_v10 = vsel %vm202_vm0, %v200_v1, 0.0  ;;  %v225_v11 = vsub.f32 %v506_v16, %v454_v4  ;;  %v224_v18 = vsub.f32 %v504_v15, %v453_v7 }
  0x91   : > { %v244_v12 = vpop.permute.xlu0 %243  ;;  %v230_v14 = vsel %vm202_vm0, %v226_v2, 0.0  ;;  %v231_v17 = vsel %vm202_vm0, %v227_v3, 0.0  ;;  %v207_v23 = vadd.f32 %v206_v10, %v205_v13  ;;  %v259_v24 = vadd.f32 %v258_v8, %v257_v5 }
  0x92   : > { %v260_v19 = vsel %vm202_vm0, %v255_v6, 0.0  ;;  %v252_v20 = vsub.f32 %v506_v16, %v244_v12  ;;  %v228_v25 = vand.u32 2147483647, %v224_v18  ;;  %v229_v26 = vand.u32 2147483647, %v225_v11 }
  0x93   : > { %v208_v27 = vsel %vm202_vm0, %v201_v9, 0.0  ;;  %v232_v28 = vadd.f32 %v231_v17, %v230_v14  ;;  %v261_v33 = vadd.f32 %v260_v19, %v259_v24  ;;  %v299_v40 = vunpack.c.0.s8 %v298_v31 }
  0x94   : > { %v256_v29 = vand.u32 2147483647, %v252_v20  ;;  %v233_v34 = vsel %vm202_vm0, %v228_v25, 0.0  ;;  %v209_v36 = vadd.f32 %v208_v27, %v207_v23  ;;  %v235_v16 = vsel %vm202_vm0, %v229_v26, 0.0 }
  0x95   : > { %v234_v15 = vadd.f32 %v233_v34, %v232_v28  ;;  %v302_v45 = vsub.s32 %v299_v40, %v284_v22  ;;  %v469_v50 = vmov 0.0  }
  0x96   : > { %v262_v35 = vsel %vm202_vm0, %v256_v29, 0.0 }
  0x97   : > { %v263_v37 = vadd.f32 %v262_v35, %v261_v33  ;;  %v236_v39 = vadd.f32 %v235_v16, %v234_v15 }
  0x99   : > { %v279_v41 = vcombine.low %v209_v36, %v263_v37  ;;  %v287_v42 = vcombine.low %v236_v39, %v514_v32 }
  0x9b   : > { %v286_v43 = vrot.slane %v279_v41, %v285_v38  ;;  %v294_v44 = vrot.slane %v287_v42, %v285_v38 }
  0x9d   : > { %v296_v46 = vcombine.high %v286_v43, %v294_v44  ;;  %v295_v47 = vcombine.low %v286_v43, %v294_v44 }
  0x9f   : > { %v310_v48 = vrot.slane %v296_v46, %v302_v45  ;;  %v303_v49 = vrot.slane %v295_v47, %v302_v45 }
  0xa1   : > { %318 = vrot.lane.b32.xlu0 %v310_v48, %s468_s21  ;;  %v311_v51 = vcombine.high %v303_v49, %v469_v50  ;;  %v312_v52 = vcombine.high %v310_v48, %v469_v50 }
  0xa3   : > { %314 = vrot.lane.b32.xlu1 %v311_v51, %s470_s22 }
  0xa7   : > { %322 = vrot.lane.b32.xlu1 %v312_v52, %s471_s23 }
 0x113   : > { %v319_v54 = vpop.permute.xlu0 %318 }
 0x115   : > { %v315_v53 = vpop.permute.xlu1 %314 }
 0x116   : > { %v326_v32 = vsel %vm325_vm1, %v303_v49, %v315_v53 }
 0x117   : > { %v328_v55 = vsel %vm327_vm2, %v326_v32, %v319_v54 }
 0x119   : > { %v323_v56 = vpop.permute.xlu1 %322 }
 0x11a   : > { %v330_v57 = vsel %vm329_vm3, %v328_v55, %v323_v56 }
 0x11b   : > { %v331_v58 = vpack.c.bf16 %v330_v57, %v330_v57 }
 0x11d   : > { %333 = vst.msk [vmem:[%s161_s27] sm:$0x3] %vm332_vm4, %v331_v58 }
 0x11e PF: > { %s12_s9 = sadd.s32 1, %s461_s9  }
 0x11f   : > { %p9_p4 = scmp.ge.s32.totalorder %s12_s9, 4  }
 0x121   :  { %11 = sbr.rel (!%p9_p4) target bundleno = 1 (0x1), region = 61 }

// kernel: _lambda_.24
= control target key start
LH: loop header
LB: loop body
LE: loop exit
PB: predicated region body
PF: predicated region fallthrough
CT: control target
= control target key end

     0   :  { %vm32_vm0 = vcmask 1044480   ;;  %vm33_vm1 = vcmask 1045504   ;;  %v106_v0 = vmov 0.0   ;;  %v107_v2 = vmov 65535   ;;  %s136_s1 = inlined_call_operand.vmem [shape: bf16[27,128], index: 1, kind: input, shape index: {}]   ;;  %s137_s0 = inlined_call_operand.vmem [shape: bf16[8,27], index: 0, kind: input, shape index: {}]   ;;  %s138_s2 = inlined_call_operand.vmem [shape: bf16[8,128], index: 2, kind: output, shape index: {}]  }
   0x1   :  { %93 = vmatprep.subr.bf16.mxu0 %v106_v0  ;;  %v104_v1 = vld [vmem:[%s136_s1 + $0x8] sm:$0x3f]   ;;  %v34_v3 = vsel %vm32_vm0, 4294967295, %v107_v2  ;;  %vm108_vm2 = vmmov 0   ;;  %v105_v6 = vld [vmem:[%s136_s1] sm:$0xff]   ;;  %vm28_vm3 = vcmask 220160  }
   0x2   :  { %v35_v4 = vsel %vm33_vm1, %v34_v3, 0  ;;  %97 = vmatprep.mubr.msk.bf16.mxu0 %vm108_vm2, %v106_v0  ;;  %v12_v7 = vld [vmem:[%s137_s0] sm:$0xf] }
   0x3   :  { %v37_v5 = vand.u32 %v104_v1, %v35_v4 }
   0x5   :  { %94 = vmatpush3.bf16.msra.mxu0 %v37_v5 }
   0x6   :  { %95 = vmatprep.subr.bf16.mxu0 %v106_v0 }
   0x9   :  { %96 = vmatpush3.bf16.msra.mxu0 %v105_v6 }
   0xc   :  { %98 = vmatmul.mubr.msk.bf16.vlgmr.msra.gmra.mxu0 %vm28_vm3, %v12_v7 }
  0xcc   :  { %v73_v8 = vpop.f32.mrf.mxu0 }
  0xcd   :  { %v79_v9 = vmul.f32 0.999995, %v73_v8 }
  0xce   :  { %v99_v10 = vpop.f32.mrf.mxu0 }
  0xcf   :  { %v80_v11 = vmax.f32 %v79_v9, 0.0 }
  0xd0   :  { %v76_v12 = vpop.f32.mrf.mxu0 }
  0xd1   :  { %v81_v13 = vpack.c.bf16 %v80_v11, %v80_v11 }
  0xd2   :  { %v100_v14 = vpop.f32.mrf.mxu0 }
  0xd3   :  { %82 = vst [vmem:[%s138_s2] sm:$0xf] %v81_v13 }

// kernel: _lambda_.25
= control target key start
LH: loop header
LB: loop body
LE: loop exit
PB: predicated region body
PF: predicated region fallthrough
CT: control target
= control target key end

     0   :  { %v217_v0 = vmov 0   ;;  %vm127_vm0 = vcmask 719872   ;;  %vm131_vm1 = vcmask 1043456   ;;  %s281_s1 = inlined_call_operand.vmem [shape: bf16[216,128], index: 1, kind: input, shape index: {}]   ;;  %s282_s0 = inlined_call_operand.vmem [shape: bf16[8,216], index: 0, kind: input, shape index: {}]   ;;  %s283_s2 = inlined_call_operand.vmem [shape: bf16[8,128], index: 2, kind: output, shape index: {}]  }
   0x1   :  { %135 = vmatprep.subr.bf16.mxu0 %v217_v0  ;;  %v201_v1 = vld [vmem:[%s281_s1 + $0x38] sm:$0xff]   ;;  %v202_v2 = vld [vmem:[%s281_s1 + $0x30] sm:$0xff]   ;;  %v203_v3 = vld [vmem:[%s281_s1 + $0x28] sm:$0xff]  }
   0x2   :  { %136 = vmatpush1.bf16.msra.mxu0 %v201_v1  ;;  %v204_v4 = vld [vmem:[%s281_s1 + $0x20] sm:$0xff]   ;;  %v205_v6 = vld [vmem:[%s281_s1 + $0x18] sm:$0xff]   ;;  %v206_v8 = vld [vmem:[%s281_s1 + $0x10] sm:$0xff]  }
   0x3   :  { %137 = vmatprep.subr.bf16.mxu0 %v217_v0  ;;  %v12_v5 = vld [vmem:[%s282_s0] sm:$0xff]  ;;  %v207_v9 = vld [vmem:[%s281_s1 + $0x8] sm:$0xff]   ;;  %v211_v14 = vld [vmem:[%s281_s1 + $0x58] sm:$0xff]  }
   0x4   :  { %v184_v7 = vcombine.high %v12_v5, %v12_v5  ;;  %v208_v10 = vld [vmem:[%s281_s1] sm:$0xff]   ;;  %v209_v11 = vld [vmem:[%s281_s1 + $0x68] ss:$0 sps:$4 sm:$0xff]   ;;  %v212_v15 = vld [vmem:[%s281_s1 + $0x50] sm:$0xff]   ;;  %v183_v18 = vcombine.low %v12_v5, %v12_v5 }
   0x5   :  { %v133_v12 = vsel %vm131_vm1, %v209_v11, 0  ;;  %v210_v13 = vld [vmem:[%s281_s1 + $0x60] sm:$0xff]   ;;  %v213_v16 = vld [vmem:[%s281_s1 + $0x48] sm:$0xff]  }
   0x6   :  { %138 = vmatpush1.bf16.msra.mxu0 %v202_v2  ;;  %199 = vmatprep.mubr.msk.bf16.mxu0 %vm127_vm0, %v184_v7  ;;  %v214_v17 = vld [vmem:[%s281_s1 + $0x40] sm:$0xff]  }
   0x7   :  { %139 = vmatprep.subr.bf16.mxu0 %v217_v0 }
   0xa   :  { %140 = vmatpush1.bf16.msra.mxu0 %v203_v3 }
   0xb   :  { %141 = vmatprep.subr.bf16.mxu0 %v217_v0 }
   0xe   :  { %142 = vmatpush1.bf16.msra.mxu0 %v204_v4 }
   0xf   :  { %143 = vmatprep.subr.bf16.mxu0 %v217_v0 }
  0x12   :  { %144 = vmatpush1.bf16.msra.mxu0 %v205_v6 }
  0x13   :  { %145 = vmatprep.subr.bf16.mxu0 %v217_v0 }
  0x16   :  { %146 = vmatpush1.bf16.msra.mxu0 %v206_v8 }
  0x17   :  { %147 = vmatprep.subr.bf16.mxu0 %v217_v0 }
  0x1a   :  { %148 = vmatpush1.bf16.msra.mxu0 %v207_v9 }
  0x1b   :  { %149 = vmatprep.subr.bf16.mxu0 %v217_v0 }
  0x1e   :  { %150 = vmatpush1.bf16.msra.mxu0 %v208_v10 }
  0x1f   :  { %155 = vmatprep.subr.bf16.mxu0 %v217_v0 }
  0x22   :  { %156 = vmatpush2.bf16.msra.mxu0 %v133_v12 }
  0x23   :  { %157 = vmatprep.subr.bf16.mxu0 %v217_v0 }
  0x26   :  { %158 = vmatpush2.bf16.msra.mxu0 %v210_v13 }
  0x27   :  { %159 = vmatprep.subr.bf16.mxu0 %v217_v0 }
  0x2a   :  { %160 = vmatpush2.bf16.msra.mxu0 %v211_v14 }
  0x2b   :  { %161 = vmatprep.subr.bf16.mxu0 %v217_v0 }
  0x2e   :  { %162 = vmatpush2.bf16.msra.mxu0 %v212_v15 }
  0x2f   :  { %163 = vmatprep.subr.bf16.mxu0 %v217_v0 }
  0x32   :  { %164 = vmatpush2.bf16.msra.mxu0 %v213_v16 }
  0x33   :  { %165 = vmatprep.subr.bf16.mxu0 %v217_v0 }
  0x36   :  { %166 = vmatpush2.bf16.msra.mxu0 %v214_v17 }
  0x39   :  { %168 = vmatmul.mubr.bf16.vlgmr.msra.gmra.mxu0 %v183_v18 }
  0xf9   :  { %v169_v19 = vpop.f32.mrf.mxu0 }
  0xfa   :  { %v175_v20 = vmul.f32 0.999995, %v169_v19 }
  0xfb   :  { %v171_v21 = vpop.f32.mrf.mxu0 }
  0xfc   :  { %v176_v22 = vmax.f32 %v175_v20, 0.0 }
  0xfd   :  { %v172_v23 = vpop.f32.mrf.mxu0 }
  0xfe   :  { %v177_v24 = vpack.c.bf16 %v176_v22, %v176_v22 }
  0xff   :  { %v173_v25 = vpop.f32.mrf.mxu0 }
 0x100   :  { %178 = vst [vmem:[%s283_s2] sm:$0xf] %v177_v24 }

// kernel: _lambda_.26
= control target key start
LH: loop header
LB: loop body
LE: loop exit
PB: predicated region body
PF: predicated region fallthrough
CT: control target
= control target key end

     0   :  { %v230_v0 = vmov 0   ;;  %v231_v3 = vmov 1966171168   ;;  %v52_v5 = vlaneseq  ;;  %vm145_vm0 = vcmask 719872   ;;  %s295_s1 = inlined_call_operand.vmem [shape: bf16[216,128], index: 1, kind: input, shape index: {}]   ;;  %s296_s0 = inlined_call_operand.vmem [shape: bf16[1,216], index: 0, kind: input, shape index: {}]   ;;  %s297_s2 = inlined_call_operand.vmem [shape: f32[1,128], index: 2, kind: output, shape index: {}]  }
   0x1   :  { %153 = vmatprep.subr.bf16.mxu0 %v230_v0  ;;  %v216_v1 = vld [vmem:[%s295_s1 + $0x38] sm:$0xff]   ;;  %v217_v2 = vld [vmem:[%s295_s1 + $0x30] sm:$0xff]   ;;  %v50_v4 = vunpack.c.l.s4 %v231_v3  ;;  %v218_v6 = vld [vmem:[%s295_s1 + $0x28] sm:$0xff]   ;;  %vm149_vm1 = vcmask 1043456  }
   0x2   :  { %154 = vmatpush1.bf16.msra.mxu0 %v216_v1  ;;  %v53_v8 = vshrl.u32 %v52_v5, 7  ;;  %v219_v9 = vld [vmem:[%s295_s1 + $0x20] sm:$0xff]   ;;  %v220_v11 = vld [vmem:[%s295_s1 + $0x18] sm:$0xff]   ;;  %v221_v15 = vld [vmem:[%s295_s1 + $0x10] sm:$0xff]  }
   0x3   :  { %155 = vmatprep.subr.bf16.mxu0 %v230_v0  ;;  %v51_v7 = vunpack.c.0.s8 %v50_v4  ;;  %v198_v12 = vld.sshfl [vmem:[%s296_s0] sm:$0x11 pattern:$0x75316420]  ;;  %v222_v16 = vld [vmem:[%s295_s1 + $0x8] sm:$0xff]   ;;  %v226_v21 = vld [vmem:[%s295_s1 + $0x58] sm:$0xff]  }
   0x4   :  { %v48_v13 = vcombine.high %v198_v12, %v198_v12  ;;  %v223_v17 = vld [vmem:[%s295_s1] sm:$0xff]   ;;  %v224_v18 = vld [vmem:[%s295_s1 + $0x68] ss:$0 sps:$4 sm:$0xff]   ;;  %v227_v22 = vld [vmem:[%s295_s1 + $0x50] sm:$0xff]  }
   0x5   :  { %v54_v10 = vsub.s32 %v51_v7, %v53_v8  ;;  %v151_v19 = vsel %vm149_vm1, %v224_v18, 0  ;;  %v225_v20 = vld [vmem:[%s295_s1 + $0x60] sm:$0xff]   ;;  %v228_v23 = vld [vmem:[%s295_s1 + $0x48] sm:$0xff]  }
   0x6   :  { %156 = vmatpush1.bf16.msra.mxu0 %v217_v2  ;;  %v229_v24 = vld [vmem:[%s295_s1 + $0x40] sm:$0xff]  }
   0x7   :  { %157 = vmatprep.subr.bf16.mxu0 %v230_v0  ;;  %v62_v14 = vrot.slane %v48_v13, %v54_v10  ;;  %v55_v25 = vrot.slane %v198_v12, %v54_v10 }
   0x9   :  { %213 = vmatprep.mubr.msk.bf16.mxu0 %vm145_vm0, %v62_v14 }
   0xa   :  { %158 = vmatpush1.bf16.msra.mxu0 %v218_v6 }
   0xb   :  { %159 = vmatprep.subr.bf16.mxu0 %v230_v0 }
   0xe   :  { %160 = vmatpush1.bf16.msra.mxu0 %v219_v9 }
   0xf   :  { %161 = vmatprep.subr.bf16.mxu0 %v230_v0 }
  0x12   :  { %162 = vmatpush1.bf16.msra.mxu0 %v220_v11 }
  0x13   :  { %163 = vmatprep.subr.bf16.mxu0 %v230_v0 }
  0x16   :  { %164 = vmatpush1.bf16.msra.mxu0 %v221_v15 }
  0x17   :  { %165 = vmatprep.subr.bf16.mxu0 %v230_v0 }
  0x1a   :  { %166 = vmatpush1.bf16.msra.mxu0 %v222_v16 }
  0x1b   :  { %167 = vmatprep.subr.bf16.mxu0 %v230_v0 }
  0x1e   :  { %168 = vmatpush1.bf16.msra.mxu0 %v223_v17 }
  0x1f   :  { %173 = vmatprep.subr.bf16.mxu0 %v230_v0 }
  0x22   :  { %174 = vmatpush2.bf16.msra.mxu0 %v151_v19 }
  0x23   :  { %175 = vmatprep.subr.bf16.mxu0 %v230_v0 }
  0x26   :  { %176 = vmatpush2.bf16.msra.mxu0 %v225_v20 }
  0x27   :  { %177 = vmatprep.subr.bf16.mxu0 %v230_v0 }
  0x2a   :  { %178 = vmatpush2.bf16.msra.mxu0 %v226_v21 }
  0x2b   :  { %179 = vmatprep.subr.bf16.mxu0 %v230_v0 }
  0x2e   :  { %180 = vmatpush2.bf16.msra.mxu0 %v227_v22 }
  0x2f   :  { %181 = vmatprep.subr.bf16.mxu0 %v230_v0 }
  0x32   :  { %182 = vmatpush2.bf16.msra.mxu0 %v228_v23 }
  0x33   :  { %183 = vmatprep.subr.bf16.mxu0 %v230_v0 }
  0x36   :  { %184 = vmatpush2.bf16.msra.mxu0 %v229_v24 }
  0x39   :  { %186 = vmatmul.mubr.bf16.vlgmr.msra.gmra.mxu0 %v55_v25 }
  0xf9   :  { %v187_v26 = vpop.f32.mrf.mxu0 }
  0xfa   :  { %193 = vst [vmem:[%s297_s2] sm:$0x1] %v187_v26 }
  0xfb   :  { %v189_v27 = vpop.f32.mrf.mxu0 }
  0xfd   :  { %v190_v28 = vpop.f32.mrf.mxu0 }
  0xff   :  { %v191_v29 = vpop.f32.mrf.mxu0 }

// kernel: _lambda_.27
= control target key start
LH: loop header
LB: loop body
LE: loop exit
PB: predicated region body
PF: predicated region fallthrough
CT: control target
= control target key end

     0   :  { %s232_s6 = smov 0   ;;  %s256_s0 = inlined_call_operand.vmem [shape: f32[2,4,16], index: 0, kind: input, shape index: {}]   ;;  %s257_s1 = inlined_call_operand.vmem [shape: f32[2,1,16], index: 1, kind: output, shape index: {}]  }
   0x1 LB: > { %s194_s7 = sadd.s32 4294967295, %s220_s6   ;;  %p198_p0 = scmp.ge.s32.totalorder %s220_s6, 1  ;;  %s220_s6 = sphi %s232_s6, %s11_s6  }
   0x2   : > { %p86_p1 = scmp.lt.s32.totalorder %s220_s6, 3 }
   0x4   : > { %p87_p2 = pnand %p198_p0, %p86_p1 }
   0x5   : > { %p103_p3 = scmp.lt.s32.totalorder (!%p87_p2), %s194_s7, 1 }
   0x6   : > { %90 = sbr.rel (%p87_p2) target bundleno = 80 (0x50), region = 24 }
   0xb   : > { %s259_s7 = smov (!%p103_p3, %s194_s7), 1  ;;  %vm112_vm0 = vcmask 125952   ;;  %v130_v11 = vlaneseq  ;;  %vm145_vm1 = vcmask 122880  }
   0xc   : > { %s199_s8 = sshll.u32 %s259_s7, 2  ;;  %s109_s14 = scalar_lea.vmem %s257_s1, %s259_s7 }
   0xd   : > { %s106_s11 = scalar_lea.vmem %s256_s0, %s199_s8  ;;  %v131_v12 = vshrl.u32 %v130_v11, 7 }
   0xe   : > { %v110_v0 = vld [vmem:[%s106_s11] sm:$0xf] }
   0xf   : > { %v111_v1 = vsub.f32 0.0, %v110_v0  ;;  %v132_v13 = vcvt.s32.f32 %v131_v12 }
  0x11   : > { %v113_v2 = vsel %vm112_vm0, %v111_v1, -inf }
  0x12   : > { %v114_v3 = vrot.slane %v113_v2, 4 }
  0x14   : > { %v115_v4 = vmax.f32 %v113_v2, %v114_v3 }
  0x16   : > { %v116_v5 = vrot.slane %v115_v4, 2 }
  0x18   : > { %v117_v6 = vmax.f32 %v115_v4, %v116_v5 }
  0x1a   : > { %v118_v7 = vrot.slane %v117_v6, 1 }
  0x1c   : > { %v119_v8 = vmax.f32 %v117_v6, %v118_v7 }
  0x1e   : > { %v120_v9 = vsub.f32 %v111_v1, %v119_v8 }
  0x20   : > { %v121_v10 = vmul.f32 1.442695, %v120_v9 }
  0x22   : > { %210 = vpow2.f32 %v121_v10 }
  0x2f   : > { %v211_v14 = vpop.eup %210 }
  0x30   : > { %v123_v15 = vsel %vm112_vm0, %v211_v14, 0.0  ;;  %v134_v16 = vmul.f32 %v211_v14, %v132_v13 }
  0x31   : > { %v124_v17 = vrot.slane %v123_v15, 4 }
  0x32   : > { %v135_v18 = vsel %vm112_vm0, %v134_v16, 0.0 }
  0x33   : > { %v125_v19 = vadd.f32 %v124_v17, %v123_v15  ;;  %v136_v20 = vrot.slane %v135_v18, 4 }
  0x35   : > { %v126_v21 = vrot.slane %v125_v19, 2  ;;  %v137_v23 = vadd.f32 %v136_v20, %v135_v18 }
  0x37   : > { %v127_v22 = vadd.f32 %v126_v21, %v125_v19  ;;  %v138_v26 = vrot.slane %v137_v23, 2 }
  0x39   : > { %v128_v24 = vrot.slane %v127_v22, 1  ;;  %v139_v27 = vadd.f32 %v138_v26, %v137_v23 }
  0x3b   : > { %v129_v25 = vadd.f32 %v128_v24, %v127_v22  ;;  %v140_v28 = vrot.slane %v139_v27, 1 }
  0x3d   : > { %212 = vrcp.f32 %v129_v25  ;;  %v141_v29 = vadd.f32 %v140_v28, %v139_v27 }
  0x4a   : > { %v213_v30 = vpop.eup %212 }
  0x4b   : > { %v143_v31 = vmul.f32 %v213_v30, %v141_v29 }
  0x4d   : > { %v144_v32 = vmul.f32 16.0, %v143_v31 }
  0x4f   : > { %146 = vst.msk [vmem:[%s109_s14] sm:$0x1] %vm145_vm1, %v144_v32 }
  0x50 PF: > { %s11_s6 = sadd.s32 1, %s220_s6  }
  0x51   : > { %p8_p4 = scmp.ge.s32.totalorder %s11_s6, 4  }
  0x53   :  { %10 = sbr.rel (!%p8_p4) target bundleno = 1 (0x1), region = 54 }

// kernel: _lambda_.28
= control target key start
LH: loop header
LB: loop body
LE: loop exit
PB: predicated region body
PF: predicated region fallthrough
CT: control target
= control target key end

     0   :  { %s2300_s12 = smov 0   ;;  %s2695_s0 = inlined_call_operand.vmem [shape: bf16[2,8,4,8], index: 0, kind: input, shape index: {}]   ;;  %s2696_s1 = inlined_call_operand.vmem [shape: bf16[2,8,4,8], index: 1, kind: input, shape index: {}]   ;;  %s2697_s2 = inlined_call_operand.vmem [shape: f32[2,8,8], index: 2, kind: input, shape index: {}]   ;;  %s2698_s3 = inlined_call_operand.vmem [shape: bf16[2,3,64], index: 3, kind: output, shape index: {}]  }
   0x1 LB: > { %s2005_s13 = sadd.s32 4294967295, %s2265_s12   ;;  %p2009_p0 = scmp.ge.s32.totalorder %s2265_s12, 1  ;;  %s2265_s12 = sphi %s2300_s12, %s13_s12  }
   0x2   : > { %p156_p1 = scmp.lt.s32.totalorder %s2265_s12, 3 }
   0x4   : > { %p157_p2 = pnand %p2009_p0, %p156_p1 }
   0x5   : > { %p188_p3 = scmp.lt.s32.totalorder (!%p157_p2), %s2005_s13, 1  ;;  %s2269_s18 = smov (!%p157_p2), 126  }
   0x6   : > { %160 = sbr.rel (%p157_p2) target bundleno = 723 (0x2d3), region = 32  ;;  %s2270_s19 = smov (!%p157_p2), 127  }
   0x7   : > { %s2273_s27 = smov (!%p157_p2), 16   ;;  %s2274_s28 = smov (!%p157_p2), 8  }
   0x8   : > { %s2275_s29 = smov (!%p157_p2), 32   ;;  %s2276_s30 = smov (!%p157_p2), 24  }
   0x9   : > { %s2277_s4 = smov (!%p157_p2), 48   ;;  %s2278_s5 = smov (!%p157_p2), 40  }
   0xa   : > { %s2279_s6 = smov (!%p157_p2), 56  }
   0xb   : > { %v232_v0 = vlaneseq  ;;  %s2700_s13 = smov (!%p188_p3, %s2005_s13), 1  ;;  %v2267_v35 = vmov 0.0   ;;  %vm2268_vm2 = vmmov 0  }
   0xc   : > { %s2014_s14 = sshll.u32 %s2700_s13, 3  ;;  %2092 = vmatprep.subr.bf16.mxu0 %v2267_v35  ;;  %2098 = vmatprep.subr.bf16.mxu1 %v2267_v35  ;;  %s2042_s20 = sshll.u32 %s2700_s13, 4 }
   0xd   : > { %v2310_v1 = vand.u32 127, %v232_v0  ;;  %s201_s17 = scalar_lea.vmem %s2697_s2, %s2014_s14  ;;  %v2317_v3 = vshrl.u32 %v232_v0, 7  ;;  %2094 = vmatprep.mubr.msk.bf16.mxu0 %vm2268_vm2, %v2267_v35  ;;  %2100 = vmatprep.mubr.msk.bf16.mxu1 %vm2268_vm2, %v2267_v35  ;;  %s2396_s23 = scalar_lea.vmem %s2696_s1, %s2042_s20 }
   0xe   : > { %v231_v4 = vld [vmem:[%s201_s17] sm:$0xff]  ;;  %s2572_s26 = scalar_lea.vmem %s2695_s0, %s2042_s20  ;;  %s2015_s7 = sshll.u32 %s2700_s13, 1 }
   0xf   : > { %v234_v2 = vcvt.s32.f32 %v2310_v1  ;;  %v240_v7 = vsub.s32 0, %v2317_v3  ;;  %v247_v10 = vsub.s32 1, %v2317_v3  ;;  %v261_v15 = vsub.s32 3, %v2317_v3  ;;  %s205_s10 = scalar_lea.vmem %s2698_s3, %s2015_s7 }
  0x10   : > { %v254_v17 = vsub.s32 2, %v2317_v3  ;;  %v275_v21 = vsub.s32 5, %v2317_v3  ;;  %v268_v23 = vsub.s32 4, %v2317_v3  ;;  %v289_v27 = vsub.s32 7, %v2317_v3 }
  0x11   : > { %v235_v5 = vsub.f32 %v234_v2, %v231_v4  ;;  %v282_v29 = vsub.s32 6, %v2317_v3 }
  0x13   : > { %v236_v6 = vfloor.f32 %v235_v5 }
  0x15   : > { %v237_v8 = vsub.f32 %v235_v5, %v236_v6  ;;  %v2236_v9 = vtrunc.f32 %v236_v6 }
  0x17   : > { %v241_v11 = vrot.slane %v237_v8, %v240_v7  ;;  %v2237_v12 = vcvt.f32.s32 %v2236_v9  ;;  %v248_v14 = vrot.slane %v237_v8, %v247_v10  ;;  %v262_v20 = vrot.slane %v237_v8, %v261_v15 }
  0x18   : > { %v255_v22 = vrot.slane %v237_v8, %v254_v17  ;;  %v276_v26 = vrot.slane %v237_v8, %v275_v21  ;;  %v269_v28 = vrot.slane %v237_v8, %v268_v23  ;;  %v290_v32 = vrot.slane %v237_v8, %v289_v27 }
  0x19   : > { %243 = vbcast.lane.b32.xlu1 %v241_v11, 256  ;;  %v298_v13 = vrot.slane %v2237_v12, %v240_v7  ;;  %v305_v16 = vrot.slane %v2237_v12, %v247_v10  ;;  %v319_v18 = vrot.slane %v2237_v12, %v261_v15  ;;  %v312_v19 = vrot.slane %v2237_v12, %v254_v17 }
  0x1a   : > { %v333_v24 = vrot.slane %v2237_v12, %v275_v21  ;;  %v326_v25 = vrot.slane %v2237_v12, %v268_v23  ;;  %v347_v30 = vrot.slane %v2237_v12, %v289_v27  ;;  %v340_v31 = vrot.slane %v2237_v12, %v282_v29 }
  0x1b   : > { %300 = vbcast.lane.b32.xlu0 %v298_v13, 256  ;;  %v283_v33 = vrot.slane %v237_v8, %v282_v29 }
  0x1d   : > { %250 = vbcast.lane.b32.xlu1 %v248_v14, 256 }
  0x1f   : > { %307 = vbcast.lane.b32.xlu0 %v305_v16, 256 }
  0x21   : > { %321 = vbcast.lane.b32.xlu1 %v319_v18, 256 }
  0x23   : > { %314 = vbcast.lane.b32.xlu0 %v312_v19, 256 }
  0x25   : > { %264 = vbcast.lane.b32.xlu1 %v262_v20, 256 }
  0x27   : > { %257 = vbcast.lane.b32.xlu0 %v255_v22, 256 }
  0x29   : > { %335 = vbcast.lane.b32.xlu1 %v333_v24, 256 }
  0x2b   : > { %328 = vbcast.lane.b32.xlu0 %v326_v25, 256 }
  0x2d   : > { %278 = vbcast.lane.b32.xlu1 %v276_v26, 256 }
  0x2f   : > { %271 = vbcast.lane.b32.xlu0 %v269_v28, 256 }
  0x31   : > { %349 = vbcast.lane.b32.xlu1 %v347_v30, 256 }
  0x33   : > { %342 = vbcast.lane.b32.xlu0 %v340_v31, 256 }
  0x35   : > { %292 = vbcast.lane.b32.xlu1 %v290_v32, 256 }
  0x37   : > { %285 = vbcast.lane.b32.xlu0 %v283_v33, 256 }
  0x8b   : > { %v244_v34 = vpop.permute.xlu1 %243 }
  0x8c   : > { %v367_v38 = vsub.f32 1.0, %v244_v34 }
  0x8d   : > { %v301_v36 = vpop.permute.xlu0 %300 }
  0x8e   : > { %v351_v37 = vadd.s32 1, %v301_v36 }
  0x8f   : > { %v251_v39 = vpop.permute.xlu1 %250 }
  0x90   : > { %vm359_vm0 = vcmp.eq.s32.totalorder %v2310_v1, %v351_v37  ;;  %v383_v40 = vadd.s32 1, %v351_v37  ;;  %v368_v46 = vsub.f32 1.0, %v251_v39 }
  0x91   : > { %v308_v41 = vpop.permute.xlu0 %307  ;;  %v375_v43 = vsel %vm359_vm0, %v367_v38, 0.0 }
  0x92   : > { %vm391_vm1 = vcmp.eq.s32.totalorder %v2310_v1, %v383_v40  ;;  %v352_v42 = vadd.s32 1, %v308_v41 }
  0x93   : > { %v322_v44 = vpop.permute.xlu1 %321  ;;  %v399_v45 = vsel %vm391_vm1, %v244_v34, 0.0  ;;  %vm426_vm1 = vcmask 64512  }
  0x94   : > { %v384_v47 = vadd.s32 1, %v352_v42  ;;  %v354_v48 = vadd.s32 1, %v322_v44  ;;  %v407_v49 = vadd.f32 %v399_v45, %v375_v43  ;;  %vm360_vm3 = vcmp.eq.s32.totalorder %v2310_v1, %v352_v42 }
  0x95   : > { %v315_v50 = vpop.permute.xlu0 %314  ;;  %v376_v56 = vsel %vm360_vm3, %v368_v46, 0.0  ;;  %vm1762_vm3 = vcmask 1041409  }
  0x96   : > { %vm392_vm4 = vcmp.eq.s32.totalorder %v2310_v1, %v384_v47  ;;  %v386_v51 = vadd.s32 1, %v354_v48  ;;  %v353_v52 = vadd.s32 1, %v315_v50  ;;  %vm362_vm5 = vcmp.eq.s32.totalorder %v2310_v1, %v354_v48 }
  0x97   : > { %v265_v53 = vpop.permute.xlu1 %264  ;;  %v2338_v54 = vpack.c.bf16 %v407_v49, %v407_v49  ;;  %v400_v55 = vsel %vm392_vm4, %v251_v39, 0.0  ;;  %v2401_v49 = vld [vmem:[%s2396_s23] sm:$0x3]  ;;  %vm1765_vm4 = vcmask 1042434  }
  0x98   : > { %v385_v57 = vadd.s32 1, %v353_v52  ;;  %vm394_vm6 = vcmp.eq.s32.totalorder %v2310_v1, %v386_v51  ;;  %v370_v58 = vsub.f32 1.0, %v265_v53  ;;  %vm361_vm7 = vcmp.eq.s32.totalorder %v2310_v1, %v353_v52 }
  0x99   : > { %v402_v59 = vsel %vm394_vm6, %v265_v53, 0.0  ;;  %424 = vrot.lane.b32.xlu0 %v2338_v54, %s2269_s18  ;;  %v258_v60 = vpop.permute.xlu0 %257  ;;  %v408_v61 = vadd.f32 %v400_v55, %v376_v56  ;;  %v2408_v53 = vld [vmem:[%s2396_s23 + $0x2] sm:$0x3]  ;;  %v2417_v56 = vld [vmem:[%s2396_s23 + $0x4] sm:$0x3]  ;;  %vm1771_vm6 = vcmask 1044484  }
  0x9a   : > { %v378_v62 = vsel %vm362_vm5, %v370_v58, 0.0  ;;  %vm393_vm8 = vcmp.eq.s32.totalorder %v2310_v1, %v385_v57  ;;  %v369_v63 = vsub.f32 1.0, %v258_v60  ;;  %vm1768_vm5 = vcmask 1043459  }
  0x9b   : > { %v410_v0 = vadd.f32 %v402_v59, %v378_v62  ;;  %v401_v2 = vsel %vm393_vm8, %v258_v60, 0.0  ;;  %v336_v4 = vpop.permute.xlu1 %335  ;;  %v2345_v5 = vpack.c.bf16 %v408_v61, %v408_v61  ;;  %v2426_v60 = vld [vmem:[%s2396_s23 + $0x6] sm:$0x3]  ;;  %v2435_v62 = vld [vmem:[%s2396_s23 + $0x8] sm:$0x3]  ;;  %vm1777_vm8 = vcmask 1046534  }
  0x9c   : > { %v377_v6 = vsel %vm361_vm7, %v369_v63, 0.0  ;;  %v356_v7 = vadd.s32 1, %v336_v4  ;;  %vm1774_vm7 = vcmask 1045509  }
  0x9d   : > { %v2347_v8 = vpack.c.bf16 %v410_v0, %v410_v0  ;;  %v409_v9 = vadd.f32 %v401_v2, %v377_v6  ;;  %474 = vrot.lane.b32.xlu1 %v2345_v5, %s2269_s18  ;;  %v329_v10 = vpop.permute.xlu0 %328  ;;  %v2444_v2 = vld [vmem:[%s2396_s23 + $0xa] sm:$0x3] }
  0x9e   : > { %v388_v11 = vadd.s32 1, %v356_v7  ;;  %v355_v12 = vadd.s32 1, %v329_v10  ;;  %vm364_vm9 = vcmp.eq.s32.totalorder %v2310_v1, %v356_v7 }
  0x9f   : > { %v2351_v13 = vpack.c.bf16 %v409_v9, %v409_v9  ;;  %v279_v14 = vpop.permute.xlu1 %278  ;;  %v2453_v9 = vld [vmem:[%s2396_s23 + $0xc] sm:$0x3] }
  0xa0   : > { %v387_v15 = vadd.s32 1, %v355_v12  ;;  %vm396_vm10 = vcmp.eq.s32.totalorder %v2310_v1, %v388_v11  ;;  %v372_v16 = vsub.f32 1.0, %v279_v14  ;;  %vm363_vm11 = vcmp.eq.s32.totalorder %v2310_v1, %v355_v12  ;;  %v2462_v12 = vld [vmem:[%s2396_s23 + $0xe] sm:$0x3] }
  0xa1   : > { %v404_v17 = vsel %vm396_vm10, %v279_v14, 0.0  ;;  %v272_v18 = vpop.permute.xlu0 %271  ;;  %523 = vrot.lane.b32.xlu0 %v2351_v13, %s2269_s18  ;;  %572 = vrot.lane.b32.xlu1 %v2347_v8, %s2269_s18  ;;  %vm1909_vm10 = vcmask 130048  }
  0xa2   : > { %v380_v19 = vsel %vm364_vm9, %v372_v16, 0.0  ;;  %vm395_vm12 = vcmp.eq.s32.totalorder %v2310_v1, %v387_v15  ;;  %v371_v20 = vsub.f32 1.0, %v272_v18  ;;  %vm1780_vm9 = vcmask 1047559  }
  0xa3   : > { %v412_v21 = vadd.f32 %v404_v17, %v380_v19  ;;  %v403_v22 = vsel %vm395_vm12, %v272_v18, 0.0  ;;  %v350_v23 = vpop.permute.xlu1 %349  ;;  %vm1913_vm12 = vcmask 261120  }
  0xa4   : > { %v379_v24 = vsel %vm363_vm11, %v371_v20, 0.0  ;;  %v358_v25 = vadd.s32 1, %v350_v23  ;;  %vm1911_vm11 = vcmask 195584  }
  0xa5   : > { %v2361_v26 = vpack.c.bf16 %v412_v21, %v412_v21  ;;  %v411_v27 = vadd.f32 %v403_v22, %v379_v24  ;;  %v343_v28 = vpop.permute.xlu0 %342 }
  0xa6   : > { %v390_v29 = vadd.s32 1, %v358_v25  ;;  %v357_v30 = vadd.s32 1, %v343_v28  ;;  %vm366_vm13 = vcmp.eq.s32.totalorder %v2310_v1, %v358_v25  ;;  %v1322_v28 = vsel %vm426_vm1, %v2338_v54, 0 }
  0xa7   : > { %v2363_v31 = vpack.c.bf16 %v411_v27, %v411_v27  ;;  %v293_v32 = vpop.permute.xlu1 %292  ;;  %670 = vrot.lane.b32.xlu1 %v2361_v26, %s2269_s18 }
  0xa8   : > { %v389_v33 = vadd.s32 1, %v357_v30  ;;  %vm398_vm14 = vcmp.eq.s32.totalorder %v2310_v1, %v390_v29  ;;  %v374_v34 = vsub.f32 1.0, %v293_v32  ;;  %vm365_vm15 = vcmp.eq.s32.totalorder %v2310_v1, %v357_v30 }
  0xa9   : > { %v406_v36 = vsel %vm398_vm14, %v293_v32, 0.0  ;;  %v286_v37 = vpop.permute.xlu0 %285  ;;  %621 = vrot.lane.b32.xlu0 %v2363_v31, %s2269_s18  ;;  %v1365_v29 = vsel %vm426_vm1, %v2345_v5, 0  ;;  %vm1917_vm14 = vcmask 392192  }
  0xaa   : > { %v382_v38 = vsel %vm366_vm13, %v374_v34, 0.0  ;;  %vm397_vm0 = vcmp.eq.s32.totalorder %v2310_v1, %v389_v33  ;;  %v373_v39 = vsub.f32 1.0, %v286_v37  ;;  %v208_v33 = vld [vmem:[%s2572_s26 + $0x2] sm:$0x3]  ;;  %vm1915_vm13 = vcmask 326656  }
  0xab   : > { %v414_v40 = vadd.f32 %v406_v36, %v382_v38  ;;  %v405_v41 = vsel %vm397_vm0, %v286_v37, 0.0  ;;  %v2579_v37 = vunpack.c.l.bf16 %v208_v33  ;;  %vm1922_vm0 = vcmask 517120  }
  0xac   : > { %v381_v42 = vsel %vm365_vm15, %v373_v39, 0.0  ;;  %v209_v39 = vld [vmem:[%s2572_s26 + $0x4] sm:$0x3]  ;;  %vm1919_vm15 = vcmask 457728  }
  0xad   : > { %v2373_v43 = vpack.c.bf16 %v414_v40, %v414_v40  ;;  %v413_v44 = vadd.f32 %v405_v41, %v381_v42 }
  0xaf   : > { %v2375_v45 = vpack.c.bf16 %v413_v44, %v413_v44  ;;  %768 = vrot.lane.b32.xlu1 %v2373_v43, %s2269_s18 }
  0xb1   : > { %719 = vrot.lane.b32.xlu0 %v2375_v45, %s2269_s18  ;;  %v1580_v30 = vsel %vm426_vm1, %v2375_v45, 0 }
  0xb3   : > { %934 = vrot.lane.b32.xlu1 %v2345_v5, %s2270_s19  ;;  %v1451_v5 = vsel %vm426_vm1, %v2347_v8, 0 }
  0xb5   : > { %889 = vrot.lane.b32.xlu0 %v2338_v54, %s2270_s19  ;;  %v1408_v54 = vsel %vm426_vm1, %v2351_v13, 0 }
  0xb7   : > { %1024 = vrot.lane.b32.xlu1 %v2347_v8, %s2270_s19  ;;  %v1537_v8 = vsel %vm426_vm1, %v2361_v26, 0 }
  0xb9   : > { %979 = vrot.lane.b32.xlu0 %v2351_v13, %s2270_s19  ;;  %v1494_v13 = vsel %vm426_vm1, %v2363_v31, 0 }
  0xbb   : > { %1114 = vrot.lane.b32.xlu1 %v2361_v26, %s2270_s19  ;;  %v1623_v26 = vsel %vm426_vm1, %v2373_v43, 0 }
  0xbd   : > { %1069 = vrot.lane.b32.xlu0 %v2363_v31, %s2270_s19  ;;  %v207_v31 = vld [vmem:[%s2572_s26] sm:$0x3] }
  0xbe   : > { %v2575_v32 = vunpack.c.l.bf16 %v207_v31 }
  0xbf   : > { %1204 = vrot.lane.b32.xlu1 %v2373_v43, %s2270_s19 }
  0xc1   : > { %1159 = vrot.lane.b32.xlu0 %v2375_v45, %s2270_s19  ;;  %v2584_v45 = vunpack.c.l.bf16 %v209_v39 }
 0x10b   : > { %v425_v1 = vpop.permute.xlu0 %424 }
 0x10c   : > { %v431_v46 = vsel %vm426_vm1, %v425_v1, 0 }
 0x10d   : > { %2093 = vmatpush3.bf16.xpose.msra.mxu0 %v431_v46 }
 0x10e   : > { %2104 = vmatprep.subr.bf16.mxu0 %v2267_v35 }
 0x10f   : > { %v475_v47 = vpop.permute.xlu1 %474 }
 0x110   : > { %v480_v48 = vsel %vm426_vm1, %v475_v47, 0 }
 0x111   : > { %2099 = vmatpush3.bf16.xpose.msra.mxu1 %v480_v48  ;;  %v210_v48 = vld [vmem:[%s2572_s26 + $0x6] sm:$0x3] }
 0x112   : > { %2110 = vmatprep.subr.bf16.mxu1 %v2267_v35 }
 0x113   : > { %v524_v50 = vpop.permute.xlu0 %523  ;;  %v573_v52 = vpop.permute.xlu1 %572 }
 0x114   : > { %v529_v51 = vsel %vm426_vm1, %v524_v50, 0  ;;  %2095 = vmatmul.mubr.msk.bf16.vlgmr.msra.gmra.mxu0 %vm426_vm1, %v2401_v49  ;;  %v578_v55 = vsel %vm426_vm1, %v573_v52, 0 }
 0x115   : > { %2105 = vmatpush3.bf16.xpose.msra.mxu0 %v529_v51  ;;  %2106 = vmatprep.mubr.msk.bf16.mxu0 %vm2268_vm2, %v2267_v35 }
 0x116   : > { %2116 = vmatprep.subr.bf16.mxu0 %v2267_v35 }
 0x118   : > { %2101 = vmatmul.mubr.msk.bf16.vlgmr.msra.gmra.mxu1 %vm426_vm1, %v2408_v53 }
 0x119   : > { %2111 = vmatpush3.bf16.xpose.msra.mxu1 %v578_v55  ;;  %2112 = vmatprep.mubr.msk.bf16.mxu1 %vm2268_vm2, %v2267_v35  ;;  %v671_v59 = vpop.permute.xlu1 %670 }
 0x11a   : > { %2122 = vmatprep.subr.bf16.mxu1 %v2267_v35  ;;  %v676_v61 = vsel %vm426_vm1, %v671_v59, 0 }
 0x11b   : > { %v622_v57 = vpop.permute.xlu0 %621 }
 0x11c   : > { %v627_v58 = vsel %vm426_vm1, %v622_v57, 0  ;;  %2107 = vmatmul.mubr.msk.bf16.vlgmr.msra.gmra.mxu0 %vm426_vm1, %v2417_v56 }
 0x11d   : > { %2117 = vmatpush3.bf16.xpose.msra.mxu0 %v627_v58  ;;  %2118 = vmatprep.mubr.msk.bf16.mxu0 %vm2268_vm2, %v2267_v35 }
 0x11e   : > { %2128 = vmatprep.subr.bf16.mxu0 %v2267_v35 }
 0x120   : > { %2113 = vmatmul.mubr.msk.bf16.vlgmr.msra.gmra.mxu1 %vm426_vm1, %v2426_v60 }
 0x121   : > { %2123 = vmatpush3.bf16.xpose.msra.mxu1 %v676_v61  ;;  %2124 = vmatprep.mubr.msk.bf16.mxu1 %vm2268_vm2, %v2267_v35  ;;  %v769_v4 = vpop.permute.xlu1 %768  ;;  %v211_v61 = vld [vmem:[%s2572_s26 + $0x8] sm:$0x3] }
 0x122   : > { %2134 = vmatprep.subr.bf16.mxu1 %v2267_v35  ;;  %v774_v6 = vsel %vm426_vm1, %v769_v4, 0 }
 0x123   : > { %v720_v63 = vpop.permute.xlu0 %719 }
 0x124   : > { %v725_v0 = vsel %vm426_vm1, %v720_v63, 0  ;;  %2119 = vmatmul.mubr.msk.bf16.vlgmr.msra.gmra.mxu0 %vm426_vm1, %v2435_v62 }
 0x125   : > { %2129 = vmatpush3.bf16.xpose.msra.mxu0 %v725_v0  ;;  %2130 = vmatprep.mubr.msk.bf16.mxu0 %vm2268_vm2, %v2267_v35  ;;  %v935_v11 = vpop.permute.xlu1 %934 }
 0x126   : > { %2140 = vmatprep.subr.bf16.mxu0 %v2267_v35  ;;  %v937_v14 = vsel %vm426_vm1, %v935_v11, 0 }
 0x127   : > { %v890_v7 = vpop.permute.xlu0 %889 }
 0x128   : > { %2125 = vmatmul.mubr.msk.bf16.vlgmr.msra.gmra.mxu1 %vm426_vm1, %v2444_v2  ;;  %v892_v10 = vsel %vm426_vm1, %v890_v7, 0 }
 0x129   : > { %2135 = vmatpush3.bf16.xpose.msra.mxu1 %v774_v6  ;;  %2136 = vmatprep.mubr.msk.bf16.mxu1 %vm2268_vm2, %v2267_v35  ;;  %v1025_v17 = vpop.permute.xlu1 %1024 }
 0x12a   : > { %2146 = vmatprep.subr.bf16.mxu1 %v2267_v35  ;;  %v1027_v18 = vsel %vm426_vm1, %v1025_v17, 0 }
 0x12b   : > { %v980_v15 = vpop.permute.xlu0 %979 }
 0x12c   : > { %2131 = vmatmul.mubr.msk.bf16.vlgmr.msra.gmra.mxu0 %vm426_vm1, %v2453_v9  ;;  %v982_v16 = vsel %vm426_vm1, %v980_v15, 0  ;;  %v212_v15 = vld [vmem:[%s2572_s26 + $0xa] sm:$0x3] }
 0x12d   : > { %2141 = vmatpush3.bf16.xpose.msra.mxu0 %v892_v10  ;;  %2142 = vmatprep.mubr.msk.bf16.mxu0 %vm2268_vm2, %v2267_v35  ;;  %v1115_v21 = vpop.permute.xlu1 %1114 }
 0x12e   : > { %2152 = vmatprep.subr.bf16.mxu0 %v2267_v35  ;;  %v1117_v22 = vsel %vm426_vm1, %v1115_v21, 0 }
 0x12f   : > { %v1070_v19 = vpop.permute.xlu0 %1069 }
 0x130   : > { %2137 = vmatmul.mubr.msk.bf16.vlgmr.msra.gmra.mxu1 %vm426_vm1, %v2462_v12  ;;  %v1072_v20 = vsel %vm426_vm1, %v1070_v19, 0 }
 0x131   : > { %2147 = vmatpush3.bf16.xpose.msra.mxu1 %v937_v14  ;;  %2148 = vmatprep.mubr.msk.bf16.mxu1 %vm2268_vm2, %v2267_v35  ;;  %v1205_v25 = vpop.permute.xlu1 %1204 }
 0x132   : > { %2158 = vmatprep.subr.bf16.mxu1 %v2267_v35  ;;  %v1207_v27 = vsel %vm426_vm1, %v1205_v25, 0 }
 0x133   : > { %v1160_v23 = vpop.permute.xlu0 %1159 }
 0x134   : > { %2143 = vmatmul.mubr.msk.bf16.vlgmr.msra.gmra.mxu0 %vm426_vm1, %v2401_v49  ;;  %v1162_v24 = vsel %vm426_vm1, %v1160_v23, 0 }
 0x135   : > { %2153 = vmatpush3.bf16.xpose.msra.mxu0 %v982_v16  ;;  %2154 = vmatprep.mubr.msk.bf16.mxu0 %vm2268_vm2, %v2267_v35 }
 0x136   : > { %2164 = vmatprep.subr.bf16.mxu0 %v2267_v35 }
 0x138   : > { %2149 = vmatmul.mubr.msk.bf16.vlgmr.msra.gmra.mxu1 %vm426_vm1, %v2408_v53 }
 0x139   : > { %2159 = vmatpush3.bf16.xpose.msra.mxu1 %v1027_v18  ;;  %2160 = vmatprep.mubr.msk.bf16.mxu1 %vm2268_vm2, %v2267_v35 }
 0x13a   : > { %2170 = vmatprep.subr.bf16.mxu1 %v2267_v35 }
 0x13c   : > { %2155 = vmatmul.mubr.msk.bf16.vlgmr.msra.gmra.mxu0 %vm426_vm1, %v2417_v56 }
 0x13d   : > { %2165 = vmatpush3.bf16.xpose.msra.mxu0 %v1072_v20  ;;  %2166 = vmatprep.mubr.msk.bf16.mxu0 %vm2268_vm2, %v2267_v35 }
 0x13e   : > { %2176 = vmatprep.subr.bf16.mxu0 %v2267_v35 }
 0x140   : > { %2161 = vmatmul.mubr.msk.bf16.vlgmr.msra.gmra.mxu1 %vm426_vm1, %v2426_v60 }
 0x141   : > { %2171 = vmatpush3.bf16.xpose.msra.mxu1 %v1117_v22  ;;  %2172 = vmatprep.mubr.msk.bf16.mxu1 %vm2268_vm2, %v2267_v35 }
 0x142   : > { %2182 = vmatprep.subr.bf16.mxu1 %v2267_v35 }
 0x144   : > { %2167 = vmatmul.mubr.msk.bf16.vlgmr.msra.gmra.mxu0 %vm426_vm1, %v2435_v62 }
 0x145   : > { %2177 = vmatpush3.bf16.xpose.msra.mxu0 %v1162_v24  ;;  %2178 = vmatprep.mubr.msk.bf16.mxu0 %vm2268_vm2, %v2267_v35  ;;  %v2599_v24 = vunpack.c.l.bf16 %v212_v15 }
 0x146   : > { %2188 = vmatprep.subr.bf16.mxu0 %v2267_v35 }
 0x148   : > { %2173 = vmatmul.mubr.msk.bf16.vlgmr.msra.gmra.mxu1 %vm426_vm1, %v2444_v2 }
 0x149   : > { %2183 = vmatpush3.bf16.xpose.msra.mxu1 %v1207_v27  ;;  %2184 = vmatprep.mubr.msk.bf16.mxu1 %vm2268_vm2, %v2267_v35 }
 0x14a   : > { %2194 = vmatprep.subr.bf16.mxu1 %v2267_v35 }
 0x14c   : > { %2179 = vmatmul.mubr.msk.bf16.vlgmr.msra.gmra.mxu0 %vm426_vm1, %v2453_v9 }
 0x14d   : > { %2189 = vmatpush3.bf16.xpose.msra.mxu0 %v1322_v28  ;;  %2190 = vmatprep.mubr.msk.bf16.mxu0 %vm2268_vm2, %v2267_v35 }
 0x14e   : > { %2200 = vmatprep.subr.bf16.mxu0 %v2267_v35 }
 0x150   : > { %2185 = vmatmul.mubr.msk.bf16.vlgmr.msra.gmra.mxu1 %vm426_vm1, %v2462_v12 }
 0x151   : > { %2195 = vmatpush3.bf16.xpose.msra.mxu1 %v1365_v29  ;;  %2196 = vmatprep.mubr.msk.bf16.mxu1 %vm2268_vm2, %v2267_v35 }
 0x152   : > { %2206 = vmatprep.subr.bf16.mxu1 %v2267_v35 }
 0x154   : > { %2191 = vmatmul.mubr.msk.bf16.vlgmr.msra.gmra.mxu0 %vm426_vm1, %v2401_v49 }
 0x155   : > { %2201 = vmatpush3.bf16.xpose.msra.mxu0 %v1408_v54  ;;  %2202 = vmatprep.mubr.msk.bf16.mxu0 %vm2268_vm2, %v2267_v35 }
 0x156   : > { %2212 = vmatprep.subr.bf16.mxu0 %v2267_v35 }
 0x158   : > { %2197 = vmatmul.mubr.msk.bf16.vlgmr.msra.gmra.mxu1 %vm426_vm1, %v2408_v53 }
 0x159   : > { %2207 = vmatpush3.bf16.xpose.msra.mxu1 %v1451_v5  ;;  %2208 = vmatprep.mubr.msk.bf16.mxu1 %vm2268_vm2, %v2267_v35  ;;  %v213_v5 = vld [vmem:[%s2572_s26 + $0xc] sm:$0x3] }
 0x15a   : > { %2218 = vmatprep.subr.bf16.mxu1 %v2267_v35  ;;  %v2604_v39 = vunpack.c.l.bf16 %v213_v5 }
 0x15c   : > { %2203 = vmatmul.mubr.msk.bf16.vlgmr.msra.gmra.mxu0 %vm426_vm1, %v2417_v56  ;;  %v2589_v56 = vunpack.c.l.bf16 %v210_v48 }
 0x15d   : > { %2213 = vmatpush3.bf16.xpose.msra.mxu0 %v1494_v13  ;;  %2214 = vmatprep.mubr.msk.bf16.mxu0 %vm2268_vm2, %v2267_v35 }
 0x15e   : > { %2224 = vmatprep.subr.bf16.mxu0 %v2267_v35 }
 0x160   : > { %2209 = vmatmul.mubr.msk.bf16.vlgmr.msra.gmra.mxu1 %vm426_vm1, %v2426_v60 }
 0x161   : > { %2219 = vmatpush3.bf16.xpose.msra.mxu1 %v1537_v8  ;;  %2220 = vmatprep.mubr.msk.bf16.mxu1 %vm2268_vm2, %v2267_v35 }
 0x162   : > { %2230 = vmatprep.subr.bf16.mxu1 %v2267_v35 }
 0x164   : > { %2215 = vmatmul.mubr.msk.bf16.vlgmr.msra.gmra.mxu0 %vm426_vm1, %v2435_v62 }
 0x165   : > { %2225 = vmatpush3.bf16.xpose.msra.mxu0 %v1580_v30  ;;  %2226 = vmatprep.mubr.msk.bf16.mxu0 %vm2268_vm2, %v2267_v35 }
 0x168   : > { %2221 = vmatmul.mubr.msk.bf16.vlgmr.msra.gmra.mxu1 %vm426_vm1, %v2444_v2 }
 0x169   : > { %2231 = vmatpush3.bf16.xpose.msra.mxu1 %v1623_v26  ;;  %2232 = vmatprep.mubr.msk.bf16.mxu1 %vm2268_vm2, %v2267_v35  ;;  %vm832_vm2 = vcmask 60416  }
 0x16c   : > { %2227 = vmatmul.mubr.msk.bf16.vlgmr.msra.gmra.mxu0 %vm426_vm1, %v2453_v9  ;;  %v2594_v9 = vunpack.c.l.bf16 %v211_v61 }
 0x170   : > { %2233 = vmatmul.mubr.msk.bf16.vlgmr.msra.gmra.mxu1 %vm426_vm1, %v2462_v12 }
 0x1d4   : > { %v467_v34 = vpop.f32.mrf.mxu0 }
 0x1d5   : > { %v816_v36 = vsub.f32 %v2575_v32, %v467_v34 }
 0x1d6   : > { %v2096_v38 = vpop.f32.mrf.mxu0 }
 0x1d7   : > { %v824_v40 = vand.u32 2147483647, %v816_v36 }
 0x1d8   : > { %v470_v41 = vpop.f32.mrf.mxu0  ;;  %v516_v42 = vpop.f32.mrf.mxu1 }
 0x1d9   : > { %v833_v43 = vsel %vm832_vm2, %v824_v40, 0.0  ;;  %v817_v44 = vsub.f32 %v2579_v37, %v516_v42 }
 0x1da   : > { %v834_v1 = vrot.slane %v833_v43, 4  ;;  %v2097_v46 = vpop.f32.mrf.mxu0  ;;  %v2102_v47 = vpop.f32.mrf.mxu1 }
 0x1db   : > { %v825_v49 = vand.u32 2147483647, %v817_v44  ;;  %v214_v46 = vld [vmem:[%s2572_s26 + $0xe] sm:$0x3] }
 0x1dc   : > { %v835_v50 = vadd.f32 %v834_v1, %v833_v43  ;;  %v519_v51 = vpop.f32.mrf.mxu1  ;;  %v565_v52 = vpop.f32.mrf.mxu0 }
 0x1dd   : > { %v840_v53 = vsel %vm832_vm2, %v825_v49, 0.0  ;;  %v818_v55 = vsub.f32 %v2584_v45, %v565_v52 }
 0x1de   : > { %v836_v57 = vrot.slane %v835_v50, 2  ;;  %v841_v58 = vrot.slane %v840_v53, 4  ;;  %v2103_v59 = vpop.f32.mrf.mxu1  ;;  %v2108_v60 = vpop.f32.mrf.mxu0 }
 0x1df   : > { %v826_v62 = vand.u32 2147483647, %v818_v55 }
 0x1e0   : > { %v842_v63 = vadd.f32 %v841_v58, %v840_v53  ;;  %v614_v0 = vpop.f32.mrf.mxu1  ;;  %v568_v2 = vpop.f32.mrf.mxu0  ;;  %v837_v4 = vadd.f32 %v836_v57, %v835_v50  ;;  %v2610_v58 = vunpack.c.l.bf16 %v214_v46 }
 0x1e1   : > { %v847_v6 = vsel %vm832_vm2, %v826_v62, 0.0  ;;  %v819_v7 = vsub.f32 %v2589_v56, %v614_v0 }
 0x1e2   : > { %v843_v10 = vrot.slane %v842_v63, 2  ;;  %v848_v11 = vrot.slane %v847_v6, 4  ;;  %v2114_v12 = vpop.f32.mrf.mxu1  ;;  %v2109_v14 = vpop.f32.mrf.mxu0  ;;  %v838_v21 = vrot.slane %v837_v4, 1 }
 0x1e3   : > { %v827_v16 = vand.u32 2147483647, %v819_v7 }
 0x1e4   : > { %v844_v17 = vadd.f32 %v843_v10, %v842_v63  ;;  %v849_v18 = vadd.f32 %v848_v11, %v847_v6  ;;  %v617_v19 = vpop.f32.mrf.mxu1  ;;  %v663_v20 = vpop.f32.mrf.mxu0  ;;  %v839_v34 = vadd.f32 %v838_v21, %v837_v4 }
 0x1e5   : > { %v854_v22 = vsel %vm832_vm2, %v827_v16, 0.0  ;;  %v820_v23 = vsub.f32 %v2594_v9, %v663_v20 }
 0x1e6   : > { %v845_v25 = vrot.slane %v844_v17, 1  ;;  %v850_v27 = vrot.slane %v849_v18, 2  ;;  %v855_v28 = vrot.slane %v854_v22, 4  ;;  %v2115_v29 = vpop.f32.mrf.mxu1  ;;  %v2120_v54 = vpop.f32.mrf.mxu0 }
 0x1e7   : > { %v828_v13 = vand.u32 2147483647, %v820_v23 }
 0x1e8   : > { %v846_v8 = vadd.f32 %v845_v25, %v844_v17  ;;  %v851_v30 = vadd.f32 %v850_v27, %v849_v18  ;;  %v856_v26 = vadd.f32 %v855_v28, %v854_v22  ;;  %v712_v31 = vpop.f32.mrf.mxu1  ;;  %v666_v33 = vpop.f32.mrf.mxu0 }
 0x1e9   : > { %v861_v36 = vsel %vm832_vm2, %v828_v13, 0.0  ;;  %v821_v38 = vsub.f32 %v2599_v24, %v712_v31 }
 0x1ea   : > { %v1761_v40 = vrot.slane %v846_v8, 7  ;;  %v852_v41 = vrot.slane %v851_v30, 1  ;;  %v857_v42 = vrot.slane %v856_v26, 2  ;;  %v862_v43 = vrot.slane %v861_v36, 4  ;;  %v2126_v44 = vpop.f32.mrf.mxu1  ;;  %v2121_v1 = vpop.f32.mrf.mxu0 }
 0x1eb   : > { %v829_v47 = vand.u32 2147483647, %v821_v38 }
 0x1ec   : > { %v1763_v48 = vsel %vm1762_vm3, %v1761_v40, %v839_v34  ;;  %v853_v49 = vadd.f32 %v852_v41, %v851_v30  ;;  %v858_v50 = vadd.f32 %v857_v42, %v856_v26  ;;  %v863_v51 = vadd.f32 %v862_v43, %v861_v36  ;;  %v715_v52 = vpop.f32.mrf.mxu1  ;;  %v761_v53 = vpop.f32.mrf.mxu0 }
 0x1ed   : > { %v868_v55 = vsel %vm832_vm2, %v829_v47, 0.0  ;;  %v822_v57 = vsub.f32 %v2604_v39, %v761_v53 }
 0x1ee   : > { %v1764_v59 = vrot.slane %v853_v49, 6  ;;  %v859_v60 = vrot.slane %v858_v50, 1  ;;  %v864_v61 = vrot.slane %v863_v51, 2  ;;  %v869_v62 = vrot.slane %v868_v55, 4  ;;  %v2127_v63 = vpop.f32.mrf.mxu1  ;;  %v2132_v0 = vpop.f32.mrf.mxu0 }
 0x1ef   : > { %v830_v2 = vand.u32 2147483647, %v822_v57 }
 0x1f0   : > { %v1766_v4 = vsel %vm1765_vm4, %v1764_v59, %v1763_v48  ;;  %v860_v6 = vadd.f32 %v859_v60, %v858_v50  ;;  %v865_v7 = vadd.f32 %v864_v61, %v863_v51  ;;  %v870_v10 = vadd.f32 %v869_v62, %v868_v55  ;;  %v810_v11 = vpop.f32.mrf.mxu1  ;;  %v764_v12 = vpop.f32.mrf.mxu0 }
 0x1f1   : > { %v875_v14 = vsel %vm832_vm2, %v830_v2, 0.0  ;;  %v823_v15 = vsub.f32 %v2610_v58, %v810_v11 }
 0x1f2   : > { %v1767_v16 = vrot.slane %v860_v6, 5  ;;  %v866_v17 = vrot.slane %v865_v7, 1  ;;  %v871_v18 = vrot.slane %v870_v10, 2  ;;  %v876_v19 = vrot.slane %v875_v14, 4  ;;  %v2138_v20 = vpop.f32.mrf.mxu1  ;;  %v2133_v21 = vpop.f32.mrf.mxu0 }
 0x1f3   : > { %v831_v22 = vand.u32 2147483647, %v823_v15 }
 0x1f4   : > { %v1769_v23 = vsel %vm1768_vm5, %v1767_v16, %v1766_v4  ;;  %v867_v25 = vadd.f32 %v866_v17, %v865_v7  ;;  %v872_v27 = vadd.f32 %v871_v18, %v870_v10  ;;  %v877_v28 = vadd.f32 %v876_v19, %v875_v14  ;;  %v813_v29 = vpop.f32.mrf.mxu1  ;;  %v928_v54 = vpop.f32.mrf.mxu0 }
 0x1f5   : > { %v882_v5 = vsel %vm832_vm2, %v831_v22, 0.0  ;;  %v1249_v18 = vsub.f32 %v2575_v32, %v928_v54 }
 0x1f6   : > { %v1770_v13 = vrot.slane %v867_v25, 4  ;;  %v873_v8 = vrot.slane %v872_v27, 1  ;;  %v878_v30 = vrot.slane %v877_v28, 2  ;;  %v883_v26 = vrot.slane %v882_v5, 4  ;;  %v2139_v31 = vpop.f32.mrf.mxu1  ;;  %v2144_v33 = vpop.f32.mrf.mxu0 }
 0x1f7   : > { %v1257_v25 = vand.u32 2147483647, %v1249_v18 }
 0x1f8   : > { %v1772_v34 = vsel %vm1771_vm6, %v1770_v13, %v1769_v23  ;;  %v874_v36 = vadd.f32 %v873_v8, %v872_v27  ;;  %v879_v38 = vadd.f32 %v878_v30, %v877_v28  ;;  %v884_v40 = vadd.f32 %v883_v26, %v882_v5  ;;  %v973_v41 = vpop.f32.mrf.mxu1  ;;  %v931_v42 = vpop.f32.mrf.mxu0 }
 0x1f9   : > { %v1250_v6 = vsub.f32 %v2579_v37, %v973_v41  ;;  %v1265_v30 = vsel %vm832_vm2, %v1257_v25, 0.0 }
 0x1fa   : > { %v1773_v43 = vrot.slane %v874_v36, 3  ;;  %v880_v44 = vrot.slane %v879_v38, 1  ;;  %v885_v1 = vrot.slane %v884_v40, 2  ;;  %v2150_v46 = vpop.f32.mrf.mxu1  ;;  %v2145_v47 = vpop.f32.mrf.mxu0  ;;  %v1266_v36 = vrot.slane %v1265_v30, 4 }
 0x1fb   : > { %v1258_v15 = vand.u32 2147483647, %v1250_v6 }
 0x1fc   : > { %v1775_v48 = vsel %vm1774_vm7, %v1773_v43, %v1772_v34  ;;  %v881_v49 = vadd.f32 %v880_v44, %v879_v38  ;;  %v886_v50 = vadd.f32 %v885_v1, %v884_v40  ;;  %v976_v51 = vpop.f32.mrf.mxu1  ;;  %v1018_v52 = vpop.f32.mrf.mxu0  ;;  %v1267_v46 = vadd.f32 %v1266_v36, %v1265_v30 }
 0x1fd   : > { %v1272_v21 = vsel %vm832_vm2, %v1258_v15, 0.0  ;;  %v1251_v27 = vsub.f32 %v2584_v45, %v1018_v52 }
 0x1fe   : > { %v1776_v53 = vrot.slane %v881_v49, 2  ;;  %v887_v55 = vrot.slane %v886_v50, 1  ;;  %v2151_v57 = vpop.f32.mrf.mxu1  ;;  %v2156_v59 = vpop.f32.mrf.mxu0  ;;  %v1273_v28 = vrot.slane %v1272_v21, 4 }
 0x1ff   : > { %v1259_v26 = vand.u32 2147483647, %v1251_v27 }
 0x200   : > { %v1778_v60 = vsel %vm1777_vm8, %v1776_v53, %v1775_v48  ;;  %v888_v61 = vadd.f32 %v887_v55, %v886_v50  ;;  %v1063_v62 = vpop.f32.mrf.mxu1  ;;  %v1021_v63 = vpop.f32.mrf.mxu0  ;;  %v1274_v31 = vadd.f32 %v1273_v28, %v1272_v21  ;;  %v2271_v21 = vmov 1983009808  }
 0x201   : > { %v1252_v34 = vsub.f32 %v2589_v56, %v1063_v62  ;;  %v1279_v41 = vsel %vm832_vm2, %v1259_v26, 0.0  ;;  %v1268_v63 = vrot.slane %v1267_v46, 2 }
 0x202   : > { %v1779_v0 = vrot.slane %v888_v61, 1  ;;  %v2162_v2 = vpop.f32.mrf.mxu1  ;;  %v2157_v4 = vpop.f32.mrf.mxu0  ;;  %v1275_v42 = vrot.slane %v1274_v31, 2  ;;  %v1280_v47 = vrot.slane %v1279_v41, 4 }
 0x203   : > { %v1260_v1 = vand.u32 2147483647, %v1252_v34 }
 0x204   : > { %v1066_v7 = vpop.f32.mrf.mxu1  ;;  %v1108_v10 = vpop.f32.mrf.mxu0  ;;  %v2622_v11 = vsel %vm1780_vm9, %v1779_v0, %v1778_v60  ;;  %v1276_v55 = vadd.f32 %v1275_v42, %v1274_v31  ;;  %v1281_v0 = vadd.f32 %v1280_v47, %v1279_v41 }
 0x205   : > { %v1253_v48 = vsub.f32 %v2594_v9, %v1108_v10  ;;  %v1286_v61 = vsel %vm832_vm2, %v1260_v1, 0.0 }
 0x206   : > { %v2163_v12 = vpop.f32.mrf.mxu1  ;;  %v2168_v14 = vpop.f32.mrf.mxu0  ;;  %v1287_v15 = vrot.slane %v1286_v61, 4  ;;  %v1282_v25 = vrot.slane %v1281_v0, 2 }
 0x207   : > { %v1261_v2 = vand.u32 2147483647, %v1253_v48 }
 0x208   : > { %v1153_v16 = vpop.f32.mrf.mxu1  ;;  %v1111_v17 = vpop.f32.mrf.mxu0  ;;  %v1288_v26 = vadd.f32 %v1287_v15, %v1286_v61 }
 0x209   : > { %v1254_v49 = vsub.f32 %v2599_v24, %v1153_v16  ;;  %v1293_v27 = vsel %vm832_vm2, %v1261_v2, 0.0 }
 0x20a   : > { %v2174_v19 = vpop.f32.mrf.mxu1  ;;  %v2169_v20 = vpop.f32.mrf.mxu0  ;;  %v1294_v36 = vrot.slane %v1293_v27, 4 }
 0x20b   : > { %v1262_v4 = vand.u32 2147483647, %v1254_v49 }
 0x20c   : > { %v1156_v22 = vpop.f32.mrf.mxu1  ;;  %v1198_v23 = vpop.f32.mrf.mxu0 }
 0x20d   : > { %v1255_v52 = vsub.f32 %v2604_v39, %v1198_v23  ;;  %v2639_v22 = vunpack.c.l.s4 %v2271_v21  ;;  %v1269_v23 = vadd.f32 %v1268_v63, %v1267_v46  ;;  %v1300_v28 = vsel %vm832_vm2, %v1262_v4, 0.0 }
 0x20e   : > { %v2175_v29 = vpop.f32.mrf.mxu1  ;;  %v2180_v5 = vpop.f32.mrf.mxu0 }
 0x20f   : > { %v1263_v10 = vand.u32 2147483647, %v1255_v52  ;;  %v1270_v42 = vrot.slane %v1269_v23, 1 }
 0x210   : > { %v1243_v13 = vpop.f32.mrf.mxu1  ;;  %v1201_v8 = vpop.f32.mrf.mxu0 }
 0x211   : > { %v1256_v57 = vsub.f32 %v2610_v58, %v1243_v13  ;;  %v1271_v63 = vadd.f32 %v1270_v42, %v1269_v23 }
 0x212   : > { %v2186_v33 = vpop.f32.mrf.mxu1  ;;  %v2181_v54 = vpop.f32.mrf.mxu0 }
 0x213   : > { %v1264_v16 = vand.u32 2147483647, %v1256_v57 }
 0x214   : > { %v1246_v38 = vpop.f32.mrf.mxu1  ;;  %v1358_v40 = vpop.f32.mrf.mxu0 }
 0x215   : > { %v1665_v12 = vsub.f32 %v2575_v32, %v1358_v40  ;;  %v1314_v31 = vsel %vm832_vm2, %v1264_v16, 0.0  ;;  %v1301_v38 = vrot.slane %v1300_v28, 4 }
 0x216   : > { %v2187_v43 = vpop.f32.mrf.mxu1  ;;  %v2192_v44 = vpop.f32.mrf.mxu0  ;;  %v1315_v47 = vrot.slane %v1314_v31, 4 }
 0x217   : > { %v1673_v5 = vand.u32 2147483647, %v1665_v12  ;;  %v1283_v43 = vadd.f32 %v1282_v25, %v1281_v0 }
 0x218   : > { %v1401_v50 = vpop.f32.mrf.mxu1  ;;  %v1361_v51 = vpop.f32.mrf.mxu0  ;;  %v1316_v12 = vadd.f32 %v1315_v47, %v1314_v31 }
 0x219   : > { %v1666_v53 = vsub.f32 %v2579_v37, %v1401_v50  ;;  %v1277_v37 = vrot.slane %v1276_v55, 1  ;;  %v1681_v48 = vsel %vm832_vm2, %v1673_v5, 0.0  ;;  %v1289_v51 = vrot.slane %v1288_v26, 2 }
 0x21a   : > { %v2198_v59 = vpop.f32.mrf.mxu1  ;;  %v2193_v60 = vpop.f32.mrf.mxu0  ;;  %v1682_v2 = vrot.slane %v1681_v48, 4 }
 0x21b   : > { %v1674_v62 = vand.u32 2147483647, %v1666_v53  ;;  %v1278_v30 = vadd.f32 %v1277_v37, %v1276_v55  ;;  %v1295_v59 = vadd.f32 %v1294_v36, %v1293_v27  ;;  %v1302_v60 = vadd.f32 %v1301_v38, %v1300_v28 }
 0x21c   : > { %v1404_v6 = vpop.f32.mrf.mxu1  ;;  %v1444_v7 = vpop.f32.mrf.mxu0  ;;  %v1290_v15 = vadd.f32 %v1289_v51, %v1288_v26  ;;  %v1683_v28 = vadd.f32 %v1682_v2, %v1681_v48 }
 0x21d   : > { %v1667_v14 = vsub.f32 %v2584_v45, %v1444_v7  ;;  %v1688_v19 = vsel %vm832_vm2, %v1674_v62, 0.0  ;;  %v1307_v45 = vsel %vm832_vm2, %v1263_v10, 0.0  ;;  %v1782_v50 = vrot.slane %v1278_v30, 7 }
 0x21e   : > { %v2199_v17 = vpop.f32.mrf.mxu1  ;;  %v2204_v18 = vpop.f32.mrf.mxu0  ;;  %v1689_v33 = vrot.slane %v1688_v19, 4  ;;  %v1308_v44 = vrot.slane %v1307_v45, 4  ;;  %v1284_v10 = vrot.slane %v1283_v43, 1  ;;  %v1303_v21 = vrot.slane %v1302_v60, 2 }
 0x21f   : > { %v1675_v20 = vand.u32 2147483647, %v1667_v14  ;;  %v2653_v37 = vsel %vm1762_vm3, %v1782_v50, %v1271_v63  ;;  %v1291_v26 = vrot.slane %v1290_v15, 1 }
 0x220   : > { %v1487_v32 = vpop.f32.mrf.mxu1  ;;  %v1447_v29 = vpop.f32.mrf.mxu0  ;;  %v1690_v52 = vadd.f32 %v1689_v33, %v1688_v19  ;;  %v1309_v0 = vadd.f32 %v1308_v44, %v1307_v45 }
 0x221   : > { %v1695_v13 = vsel %vm832_vm2, %v1675_v20, 0.0  ;;  %v1668_v8 = vsub.f32 %v2589_v56, %v1487_v32  ;;  %v1296_v20 = vrot.slane %v1295_v59, 2  ;;  %v1292_v51 = vadd.f32 %v1291_v26, %v1290_v15 }
 0x222   : > { %v2210_v54 = vpop.f32.mrf.mxu1  ;;  %v2205_v34 = vpop.f32.mrf.mxu0  ;;  %v1696_v40 = vrot.slane %v1695_v13, 4  ;;  %v1691_v16 = vrot.slane %v1690_v52, 2  ;;  %v1310_v27 = vrot.slane %v1309_v0, 2 }
 0x223   : > { %v1676_v41 = vand.u32 2147483647, %v1668_v8  ;;  %v1297_v38 = vadd.f32 %v1296_v20, %v1295_v59 }
 0x224   : > { %v1490_v1 = vpop.f32.mrf.mxu1  ;;  %v1530_v46 = vpop.f32.mrf.mxu0  ;;  %v1697_v61 = vadd.f32 %v1696_v40, %v1695_v13  ;;  %v2655_v13 = vadd.f32 %v1284_v10, %v1283_v43  ;;  %v1692_v31 = vadd.f32 %v1691_v16, %v1690_v52  ;;  %v1304_v40 = vadd.f32 %v1303_v21, %v1302_v60 }
 0x225   : > { %v1702_v56 = vsel %vm832_vm2, %v1676_v41, 0.0  ;;  %v1669_v49 = vsub.f32 %v2594_v9, %v1530_v46  ;;  %v1311_v44 = vadd.f32 %v1310_v27, %v1309_v0  ;;  %v1684_v1 = vrot.slane %v1683_v28, 2 }
 0x226   : > { %v1703_v53 = vrot.slane %v1702_v56, 4  ;;  %v2211_v55 = vpop.f32.mrf.mxu1  ;;  %v2216_v57 = vpop.f32.mrf.mxu0  ;;  %v1698_v23 = vrot.slane %v1697_v61, 2  ;;  %v1693_v52 = vrot.slane %v1692_v31, 1  ;;  %v1298_v60 = vrot.slane %v1297_v38, 1 }
 0x227   : > { %v1677_v62 = vand.u32 2147483647, %v1669_v49  ;;  %v1685_v0 = vadd.f32 %v1684_v1, %v1683_v28  ;;  %v1312_v10 = vrot.slane %v1311_v44, 1 }
 0x228   : > { %v1704_v4 = vadd.f32 %v1703_v53, %v1702_v56  ;;  %v1573_v6 = vpop.f32.mrf.mxu1  ;;  %v1533_v7 = vpop.f32.mrf.mxu0  ;;  %v1699_v41 = vadd.f32 %v1698_v23, %v1697_v61  ;;  %v1305_v61 = vrot.slane %v1304_v40, 1  ;;  %v1299_v20 = vadd.f32 %v1298_v60, %v1297_v38 }
 0x229   : > { %v1709_v9 = vsel %vm832_vm2, %v1677_v62, 0.0  ;;  %v1670_v14 = vsub.f32 %v2599_v24, %v1573_v6  ;;  %v1317_v24 = vrot.slane %v1316_v12, 2 }
 0x22a   : > { %v1710_v17 = vrot.slane %v1709_v9, 4  ;;  %v2222_v18 = vpop.f32.mrf.mxu1  ;;  %v2217_v19 = vpop.f32.mrf.mxu0  ;;  %v1705_v32 = vrot.slane %v1704_v4, 2  ;;  %v1700_v62 = vrot.slane %v1699_v41, 1  ;;  %v1306_v21 = vadd.f32 %v1305_v61, %v1304_v40 }
 0x22b   : > { %v1678_v25 = vand.u32 2147483647, %v1670_v14  ;;  %v1318_v56 = vadd.f32 %v1317_v24, %v1316_v12  ;;  %v1694_v14 = vadd.f32 %v1693_v52, %v1692_v31  ;;  %v1784_v19 = vrot.slane %v2655_v13, 6 }
 0x22c   : > { %v1711_v29 = vadd.f32 %v1710_v17, %v1709_v9  ;;  %v1576_v45 = vpop.f32.mrf.mxu1  ;;  %v1616_v5 = vpop.f32.mrf.mxu0  ;;  %v1706_v46 = vadd.f32 %v1705_v32, %v1704_v4  ;;  %v1701_v23 = vadd.f32 %v1700_v62, %v1699_v41  ;;  %v1790_v13 = vrot.slane %v1306_v21, 3 }
 0x22d   : > { %v1716_v8 = vsel %vm832_vm2, %v1678_v25, 0.0  ;;  %v1671_v30 = vsub.f32 %v2604_v39, %v1616_v5  ;;  %v1319_v12 = vrot.slane %v1318_v56, 1  ;;  %v1686_v25 = vrot.slane %v1685_v0, 1 }
 0x22e   : > { %v1712_v33 = vrot.slane %v1711_v29, 2  ;;  %v1717_v54 = vrot.slane %v1716_v8, 4  ;;  %v2223_v34 = vpop.f32.mrf.mxu1  ;;  %v2228_v36 = vpop.f32.mrf.mxu0  ;;  %v1707_v2 = vrot.slane %v1706_v46, 1  ;;  %v1313_v45 = vadd.f32 %v1312_v10, %v1311_v44 }
 0x22f   : > { %v1679_v42 = vand.u32 2147483647, %v1671_v30  ;;  %v1320_v5 = vadd.f32 %v1319_v12, %v1318_v56  ;;  %v1798_v34 = vrot.slane %v1701_v23, 6  ;;  %v1687_v36 = vadd.f32 %v1686_v25, %v1685_v0 }
 0x230   : > { %v1718_v43 = vadd.f32 %v1717_v54, %v1716_v8  ;;  %v1659_v47 = vpop.f32.mrf.mxu1  ;;  %v1619_v48 = vpop.f32.mrf.mxu0  ;;  %v1713_v49 = vadd.f32 %v1712_v33, %v1711_v29  ;;  %v1708_v27 = vadd.f32 %v1707_v2, %v1706_v46  ;;  %v1786_v29 = vrot.slane %v1292_v51, 5 }
 0x231   : > { %v1723_v39 = vsel %vm832_vm2, %v1679_v42, 0.0  ;;  %v1672_v50 = vsub.f32 %v2610_v58, %v1659_v47  ;;  %v1796_v8 = vrot.slane %v1694_v14, 7  ;;  %v1785_v33 = vsel %vm1765_vm4, %v1784_v19, %v2653_v37 }
 0x232   : > { %v1719_v53 = vrot.slane %v1718_v43, 2  ;;  %v1724_v55 = vrot.slane %v1723_v39, 4  ;;  %v2234_v57 = vpop.f32.mrf.mxu1  ;;  %v2229_v59 = vpop.f32.mrf.mxu0  ;;  %v1714_v9 = vrot.slane %v1713_v49, 1  ;;  %v1788_v54 = vrot.slane %v1299_v20, 4 }
 0x233   : > { %v1680_v63 = vand.u32 2147483647, %v1672_v50  ;;  %v1800_v38 = vrot.slane %v1708_v27, 5  ;;  %v1787_v42 = vsel %vm1768_vm5, %v1786_v29, %v1785_v33  ;;  %v1792_v1 = vrot.slane %v1313_v45, 2 }
 0x234   : > { %v1720_v4 = vadd.f32 %v1719_v53, %v1718_v43  ;;  %v1725_v6 = vadd.f32 %v1724_v55, %v1723_v39  ;;  %v1662_v7 = vpop.f32.mrf.mxu1  ;;  %v1715_v24 = vadd.f32 %v1714_v9, %v1713_v49  ;;  %v1817_v46 = vunpack.c.0.s8 %v2639_v22 }
 0x235   : > { %v1730_v58 = vsel %vm832_vm2, %v1680_v63, 0.0  ;;  %v1794_v43 = vrot.slane %v1320_v5, 1  ;;  %v1797_v47 = vsel %vm1762_vm3, %v1796_v8, %v1687_v36  ;;  %v1789_v37 = vsel %vm1771_vm6, %v1788_v54, %v1787_v42 }
 0x236   : > { %v1721_v15 = vrot.slane %v1720_v4, 1  ;;  %v1726_v16 = vrot.slane %v1725_v6, 2  ;;  %v1731_v17 = vrot.slane %v1730_v58, 4  ;;  %v2235_v18 = vpop.f32.mrf.mxu1  ;;  %v1802_v44 = vrot.slane %v1715_v24, 4 }
 0x237   : > { %v1799_v49 = vsel %vm1765_vm4, %v1798_v34, %v1797_v47  ;;  %v2272_v50 = vmov 1934713408   ;;  %v1791_v52 = vsel %vm1774_vm7, %v1790_v13, %v1789_v37  ;;  %v1820_v63 = vsub.s32 %v1817_v46, %v2317_v3  ;;  %v1925_v13 = vld [vmem:[%s205_s10] sm:$0x3] }
 0x238   : > { %v1727_v28 = vadd.f32 %v1726_v16, %v1725_v6  ;;  %v1732_v32 = vadd.f32 %v1731_v17, %v1730_v58  ;;  %v1722_v30 = vadd.f32 %v1721_v15, %v1720_v4  ;;  %v1847_v51 = vunpack.c.l.s4 %v2272_v50 }
 0x239   : > { %v1801_v53 = vsel %vm1768_vm5, %v1800_v38, %v1799_v49  ;;  %v1793_v22 = vsel %vm1777_vm8, %v1792_v1, %v1791_v52 }
 0x23a   : > { %v1728_v26 = vrot.slane %v1727_v28, 1  ;;  %v1733_v31 = vrot.slane %v1732_v32, 2  ;;  %v1804_v48 = vrot.slane %v1722_v30, 3  ;;  %v1803_v57 = vsel %vm1771_vm6, %v1802_v44, %v1801_v53 }
 0x23b   : > { %v1795_v61 = vsel %vm1780_vm9, %v1794_v43, %v1793_v22  ;;  %v1848_v0 = vunpack.c.0.s8 %v1847_v51 }
 0x23c   : > { %v1729_v40 = vadd.f32 %v1728_v26, %v1727_v28  ;;  %v1734_v41 = vadd.f32 %v1733_v31, %v1732_v32  ;;  %v1805_v59 = vsel %vm1774_vm7, %v1804_v48, %v1803_v57  ;;  %v1829_v7 = vcombine.high %v1795_v61, %v2267_v35 }
 0x23d   : > { %v1836_v12 = vrot.slane %v1795_v61, %v1820_v63  ;;  %v1851_v9 = vsub.s32 %v1848_v0, %v2317_v3 }
 0x23e   : > { %v1735_v56 = vrot.slane %v1734_v41, 1  ;;  %v1806_v39 = vrot.slane %v1729_v40, 2  ;;  %v1843_v16 = vrot.slane %v1829_v7, %v1820_v63 }
 0x240   : > { %v1736_v55 = vadd.f32 %v1735_v56, %v1734_v41  ;;  %v1807_v62 = vsel %vm1777_vm8, %v1806_v39, %v1805_v59 }
 0x242   : > { %v1808_v60 = vrot.slane %v1736_v55, 1 }
 0x244   : > { %v1809_v2 = vsel %vm1780_vm9, %v1808_v60, %v1807_v62 }
 0x245   : > { %v1813_v4 = vcombine.low %v2622_v11, %v1809_v2  ;;  %v1814_v6 = vcombine.high %v2622_v11, %v1809_v2 }
 0x247   : > { %v1821_v10 = vrot.slane %v1813_v4, %v1820_v63  ;;  %v1828_v58 = vrot.slane %v1814_v6, %v1820_v63 }
 0x249   : > { %v1845_v14 = vcombine.high %v1821_v10, %v1836_v12  ;;  %v1844_v15 = vcombine.low %v1821_v10, %v1836_v12  ;;  %v1860_v19 = vcombine.low %v1828_v58, %v1843_v16  ;;  %v1861_v21 = vcombine.high %v1828_v58, %v1843_v16 }
 0x24b   : > { %v1859_v17 = vrot.slane %v1845_v14, %v1851_v9  ;;  %v1852_v18 = vrot.slane %v1844_v15, %v1851_v9  ;;  %v1868_v11 = vrot.slane %v1860_v19, %v1851_v9  ;;  %v1875_v3 = vrot.slane %v1861_v21, %v1851_v9 }
 0x24d   : > { %1885 = vrot.lane.b32.xlu1 %v1859_v17, %s2273_s27  ;;  %v1876_v20 = vcombine.high %v1852_v18, %v2267_v35  ;;  %v1877_v23 = vcombine.high %v1859_v17, %v2267_v35  ;;  %v1878_v25 = vcombine.high %v1868_v11, %v2267_v35  ;;  %v1879_v27 = vcombine.high %v1875_v3, %v2267_v35 }
 0x24f   : > { %1881 = vrot.lane.b32.xlu0 %v1876_v20, %s2274_s28 }
 0x251   : > { %1893 = vrot.lane.b32.xlu1 %v1868_v11, %s2275_s29 }
 0x253   : > { %1889 = vrot.lane.b32.xlu0 %v1877_v23, %s2276_s30 }
 0x255   : > { %1901 = vrot.lane.b32.xlu1 %v1875_v3, %s2277_s4 }
 0x257   : > { %1897 = vrot.lane.b32.xlu0 %v1878_v25, %s2278_s5 }
 0x25b   : > { %1905 = vrot.lane.b32.xlu0 %v1879_v27, %s2279_s6 }
 0x2bf   : > { %v1886_v28 = vpop.permute.xlu1 %1885 }
 0x2c1   : > { %v1882_v32 = vpop.permute.xlu0 %1881 }
 0x2c2   : > { %v1908_v29 = vsel %vm426_vm1, %v1852_v18, %v1882_v32  ;;  %vm1923_vm1 = vsmask.f32 1280 }
 0x2c3   : > { %v1910_v45 = vsel %vm1909_vm10, %v1908_v29, %v1886_v28  ;;  %v1894_v24 = vpop.permute.xlu1 %1893  ;;  %vm1924_vm2 = vmand %vm1922_vm0, %vm1923_vm1 }
 0x2c5   : > { %v1890_v5 = vpop.permute.xlu0 %1889 }
 0x2c6   : > { %v1912_v8 = vsel %vm1911_vm11, %v1910_v45, %v1890_v5 }
 0x2c7   : > { %v1914_v30 = vsel %vm1913_vm12, %v1912_v8, %v1894_v24  ;;  %v1902_v35 = vpop.permute.xlu1 %1901 }
 0x2c9   : > { %v1898_v26 = vpop.permute.xlu0 %1897 }
 0x2ca   : > { %v1916_v31 = vsel %vm1915_vm13, %v1914_v30, %v1898_v26 }
 0x2cb   : > { %v1918_v33 = vsel %vm1917_vm14, %v1916_v31, %v1902_v35 }
 0x2cd   : > { %v1906_v54 = vpop.permute.xlu0 %1905 }
 0x2ce   : > { %v1920_v34 = vsel %vm1919_vm15, %v1918_v33, %v1906_v54 }
 0x2cf   : > { %v1921_v36 = vpack.c.bf16 %v1920_v34, %v1920_v34 }
 0x2d1   : > { %v1926_v38 = vsel %vm1924_vm2, %v1921_v36, %v1925_v13 }
 0x2d2   : > { %1927 = vst [vmem:[%s205_s10] sm:$0x3] %v1926_v38 }
 0x2d3 PF: > { %s13_s12 = sadd.s32 1, %s2265_s12  }
 0x2d4   : > { %p10_p4 = scmp.ge.s32.totalorder %s13_s12, 4  }
 0x2d6   :  { %12 = sbr.rel (!%p10_p4) target bundleno = 1 (0x1), region = 68 }

// kernel: _lambda_.29
= control target key start
LH: loop header
LB: loop body
LE: loop exit
PB: predicated region body
PF: predicated region fallthrough
CT: control target
= control target key end

     0   :  { %vm54_vm0 = vcmask 1044480   ;;  %vm55_vm1 = vcmask 1045504   ;;  %v223_v0 = vmov 0.0   ;;  %v224_v2 = vmov 65535   ;;  %s267_s1 = inlined_call_operand.vmem [shape: bf16[27,384], index: 1, kind: input, shape index: {}]   ;;  %s268_s0 = inlined_call_operand.vmem [shape: bf16[2,27], index: 0, kind: input, shape index: {}]   ;;  %s269_s2 = inlined_call_operand.vmem [shape: bf16[2,384], index: 2, kind: output, shape index: {}]  }
   0x1   :  { %202 = vmatprep.subr.bf16.mxu1 %v223_v0  ;;  %v215_v1 = vld [vmem:[%s267_s1 + $0x1c] ss:$12 sps:$4 sm:$0x3f]   ;;  %v56_v3 = vsel %vm54_vm0, 4294967295, %v224_v2  ;;  %vm225_vm2 = vmmov 0   ;;  %v226_v10 = vmov 0   ;;  %v164_v17 = vlaneseq }
   0x2   :  { %v57_v4 = vsel %vm55_vm1, %v56_v3, 0  ;;  %v217_v5 = vld [vmem:[%s267_s1 + $0x20] ss:$12 sps:$4 sm:$0x3f]   ;;  %206 = vmatprep.mubr.msk.bf16.mxu1 %vm225_vm2, %v223_v0  ;;  %v219_v9 = vld [vmem:[%s267_s1 + $0x4] ss:$12 sps:$4 sm:$0xff]   ;;  %99 = vmatprep.mubr.bf16.mxu0 %v226_v10 }
   0x3   :  { %v62_v6 = vand.u32 %v215_v1, %v57_v4  ;;  %v218_v7 = vld [vmem:[%s267_s1 + $0x18] ss:$12 sps:$4 sm:$0x3f]   ;;  %v65_v8 = vand.u32 %v217_v5, %v57_v4  ;;  %v221_v12 = vld [vmem:[%s267_s1 + $0x8] ss:$12 sps:$4 sm:$0xff]   ;;  %vm50_vm3 = vcmask 220160  }
   0x4   :  { %v59_v11 = vand.u32 %v218_v7, %v57_v4  ;;  %v222_v13 = vld [vmem:[%s267_s1] ss:$12 sps:$4 sm:$0xff]   ;;  %v227_v15 = vmov 1966171168   ;;  %v165_v20 = vshrl.u32 %v164_v17, 7 }
   0x5   :  { %79 = vmatprep.subr.bf16.mxu0 %v62_v6  ;;  %203 = vmatpush3.bf16.msra.mxu1 %v65_v8  ;;  %v12_v14 = vld [vmem:[%s268_s0] sm:$0x1]  ;;  %v162_v16 = vunpack.c.l.s4 %v227_v15 }
   0x6   :  { %80 = vmatpush1.bf16.msra.mxu0 %v59_v11  ;;  %204 = vmatprep.subr.bf16.mxu1 %v223_v0 }
   0x7   :  { %81 = vmatprep.subr.bf16.mxu0 %v219_v9  ;;  %v163_v19 = vunpack.c.0.s8 %v162_v16 }
   0x9   :  { %205 = vmatpush3.bf16.msra.mxu1 %v221_v12  ;;  %v166_v27 = vsub.s32 %v163_v19, %v165_v20 }
   0xa   :  { %82 = vmatpush1.bf16.msra.mxu0 %v222_v13 }
   0xc   :  { %207 = vmatmul.mubr.msk.bf16.vlgmr.msra.gmra.mxu1 %vm50_vm3, %v12_v14 }
   0xd   :  { %195 = vmatmul.mubr.msk.bf16.vlgmr.msra.gmra.mxu0 %vm50_vm3, %v12_v14 }
  0xcc   :  { %v142_v18 = vpop.f32.mrf.mxu1 }
  0xcd   :  { %v150_v21 = vmul.f32 0.999995, %v142_v18  ;;  %v101_v22 = vpop.f32.mrf.mxu0 }
  0xce   :  { %v148_v23 = vmul.f32 0.999995, %v101_v22  ;;  %v208_v24 = vpop.f32.mrf.mxu1 }
  0xcf   :  { %v153_v25 = vmax.f32 %v150_v21, 0.0  ;;  %v103_v26 = vpop.f32.mrf.mxu0 }
  0xd0   :  { %v149_v28 = vmul.f32 0.999995, %v103_v26  ;;  %v145_v29 = vpop.f32.mrf.mxu1  ;;  %v151_v32 = vmax.f32 %v148_v23, 0.0 }
  0xd1   :  { %v156_v30 = vpack.c.bf16 %v153_v25, %v153_v25  ;;  %v105_v31 = vpop.f32.mrf.mxu0 }
  0xd2   :  { %v152_v33 = vmax.f32 %v149_v28, 0.0  ;;  %v209_v34 = vpop.f32.mrf.mxu1 }
  0xd3   :  { %v106_v35 = vpop.f32.mrf.mxu0  ;;  %v174_v36 = vrot.slane %v156_v30, %v166_v27 }
  0xd4   :  { %v197_v37 = vpack.c.bf16 %v152_v33, %v151_v32 }
  0xd6   :  { %v167_v38 = vrot.slane %v197_v37, %v166_v27 }
  0xd8   :  { %v175_v39 = vcombine.low %v167_v38, %v174_v36 }
  0xda   :  { %198 = vst.sshfl [vmem:[%s269_s2] sm:$0x15 pattern:$0x73625140] %v175_v39 }

// kernel: _lambda_.30
= control target key start
LH: loop header
LB: loop body
LE: loop exit
PB: predicated region body
PF: predicated region fallthrough
CT: control target
= control target key end

     0   :  { %vm87_vm0 = vcmask 1042432   ;;  %v272_v1 = vmov 0.0   ;;  %v273_v2 = vmov 0   ;;  %vm274_vm1 = vmmov 0   ;;  %s330_s1 = inlined_call_operand.vmem [shape: bf16[54,384], index: 1, kind: input, shape index: {}]   ;;  %s331_s0 = inlined_call_operand.vmem [shape: bf16[2,54], index: 0, kind: input, shape index: {}]   ;;  %s332_s2 = inlined_call_operand.vmem [shape: bf16[2,384], index: 2, kind: output, shape index: {}]  }
   0x1   :  { %v25_v0 = vld [vmem:[%s330_s1 + $0x48] sm:$0x77]  ;;  %241 = vmatprep.subr.bf16.mxu1 %v272_v1  ;;  %129 = vmatprep.mubr.bf16.mxu0 %v273_v2  ;;  %v259_v5 = vld [vmem:[%s330_s1 + $0x50] ss:$0 sps:$4 sm:$0x77]   ;;  %vm83_vm2 = vcmask 441344   ;;  %v194_v20 = vlaneseq }
   0x2   :  { %v229_v3 = vcombine.high %v25_v0, %v25_v0  ;;  %v228_v4 = vcombine.low %v25_v0, %v25_v0  ;;  %v260_v6 = vld [vmem:[%s330_s1 + $0x34] ss:$12 sps:$4 sm:$0xff]   ;;  %249 = vmatprep.mubr.msk.bf16.mxu1 %vm274_vm1, %v272_v1  ;;  %v95_v8 = vsel %vm87_vm0, %v259_v5, 0  ;;  %v262_v9 = vld [vmem:[%s330_s1 + $0x30] ss:$12 sps:$4 sm:$0xff]  }
   0x3   :  { %242 = vmatpush3.bf16.msra.mxu1 %v95_v8  ;;  %v263_v10 = vld [vmem:[%s330_s1 + $0x38] ss:$12 sps:$4 sm:$0xff]   ;;  %v264_v11 = vld [vmem:[%s330_s1 + $0x1c] ss:$12 sps:$4 sm:$0xff]   ;;  %v267_v13 = vld [vmem:[%s330_s1 + $0x20] ss:$12 sps:$4 sm:$0xff]  }
   0x4   :  { %231 = vmatprep.subr.msk.bf16.mxu0 %vm87_vm0, %v229_v3  ;;  %v89_v7 = vsel %vm87_vm0, %v228_v4, 0  ;;  %243 = vmatprep.subr.bf16.mxu1 %v272_v1  ;;  %v266_v12 = vld [vmem:[%s330_s1 + $0x18] ss:$12 sps:$4 sm:$0xff]   ;;  %v270_v15 = vld [vmem:[%s330_s1] ss:$12 sps:$4 sm:$0xff]   ;;  %v195_v22 = vshrl.u32 %v194_v20, 7 }
   0x5   :  { %106 = vmatpush1.bf16.msra.mxu0 %v89_v7  ;;  %v268_v14 = vld [vmem:[%s330_s1 + $0x4] ss:$12 sps:$4 sm:$0xff]   ;;  %v271_v16 = vld [vmem:[%s330_s1 + $0x8] ss:$12 sps:$4 sm:$0xff]   ;;  %v12_v17 = vld [vmem:[%s331_s0] sm:$0x1] }
   0x6   :  { %107 = vmatprep.subr.bf16.mxu0 %v260_v6  ;;  %v275_v18 = vmov 1966171168  }
   0x7   :  { %244 = vmatpush3.bf16.msra.mxu1 %v263_v10  ;;  %v192_v19 = vunpack.c.l.s4 %v275_v18 }
   0x8   :  { %245 = vmatprep.subr.bf16.mxu1 %v272_v1 }
   0x9   :  { %108 = vmatpush1.bf16.msra.mxu0 %v262_v9  ;;  %v193_v21 = vunpack.c.0.s8 %v192_v19 }
   0xa   :  { %109 = vmatprep.subr.bf16.mxu0 %v264_v11 }
   0xb   :  { %246 = vmatpush3.bf16.msra.mxu1 %v267_v13  ;;  %v196_v30 = vsub.s32 %v193_v21, %v195_v22 }
   0xc   :  { %247 = vmatprep.subr.bf16.mxu1 %v272_v1 }
   0xd   :  { %110 = vmatpush1.bf16.msra.mxu0 %v266_v12 }
   0xe   :  { %111 = vmatprep.subr.bf16.mxu0 %v268_v14 }
   0xf   :  { %248 = vmatpush3.bf16.msra.mxu1 %v271_v16 }
  0x11   :  { %112 = vmatpush1.bf16.msra.mxu0 %v270_v15 }
  0x12   :  { %250 = vmatmul.mubr.msk.bf16.vlgmr.msra.gmra.mxu1 %vm83_vm2, %v12_v17 }
  0x14   :  { %232 = vmatmul.mubr.msk.bf16.vlgmr.msra.gmra.mxu0 %vm83_vm2, %v12_v17 }
  0xd2   :  { %v172_v24 = vpop.f32.mrf.mxu1 }
  0xd3   :  { %v180_v26 = vmul.f32 0.999995, %v172_v24 }
  0xd4   :  { %v131_v23 = vpop.f32.mrf.mxu0  ;;  %v251_v28 = vpop.f32.mrf.mxu1 }
  0xd5   :  { %v178_v25 = vmul.f32 0.999995, %v131_v23  ;;  %v183_v29 = vmax.f32 %v180_v26, 0.0 }
  0xd6   :  { %v133_v27 = vpop.f32.mrf.mxu0  ;;  %v175_v33 = vpop.f32.mrf.mxu1 }
  0xd7   :  { %v179_v31 = vmul.f32 0.999995, %v133_v27  ;;  %v181_v34 = vmax.f32 %v178_v25, 0.0  ;;  %v186_v35 = vpack.c.bf16 %v183_v29, %v183_v29 }
  0xd8   :  { %v135_v32 = vpop.f32.mrf.mxu0  ;;  %v252_v38 = vpop.f32.mrf.mxu1 }
  0xd9   :  { %v182_v36 = vmax.f32 %v179_v31, 0.0  ;;  %v204_v39 = vrot.slane %v186_v35, %v196_v30 }
  0xda   :  { %v136_v37 = vpop.f32.mrf.mxu0 }
  0xdb   :  { %v234_v40 = vpack.c.bf16 %v182_v36, %v181_v34 }
  0xdd   :  { %v197_v41 = vrot.slane %v234_v40, %v196_v30 }
  0xdf   :  { %v205_v42 = vcombine.low %v197_v41, %v204_v39 }
  0xe1   :  { %235 = vst.sshfl [vmem:[%s332_s2] sm:$0x15 pattern:$0x73625140] %v205_v42 }

// kernel: _lambda_.31
= control target key start
LH: loop header
LB: loop body
LE: loop exit
PB: predicated region body
PF: predicated region fallthrough
CT: control target
= control target key end

     0   :  { %vm87_vm0 = vcmask 1042432   ;;  %v265_v1 = vmov 0.0   ;;  %v266_v2 = vmov 0   ;;  %vm267_vm1 = vmmov 0   ;;  %s323_s1 = inlined_call_operand.vmem [shape: bf16[54,384], index: 1, kind: input, shape index: {}]   ;;  %s324_s0 = inlined_call_operand.vmem [shape: bf16[1,54], index: 0, kind: input, shape index: {}]   ;;  %s325_s2 = inlined_call_operand.vmem [shape: f32[1,384], index: 2, kind: output, shape index: {}]  }
   0x1   :  { %v25_v0 = vld [vmem:[%s323_s1 + $0x48] sm:$0x77]  ;;  %234 = vmatprep.subr.bf16.mxu1 %v265_v1  ;;  %129 = vmatprep.mubr.bf16.mxu0 %v266_v2  ;;  %v252_v5 = vld [vmem:[%s323_s1 + $0x50] ss:$0 sps:$4 sm:$0x77]   ;;  %vm83_vm2 = vcmask 441344   ;;  %v185_v20 = vlaneseq }
   0x2   :  { %v224_v3 = vcombine.high %v25_v0, %v25_v0  ;;  %v223_v4 = vcombine.low %v25_v0, %v25_v0  ;;  %v253_v6 = vld [vmem:[%s323_s1 + $0x34] ss:$12 sps:$4 sm:$0xff]   ;;  %242 = vmatprep.mubr.msk.bf16.mxu1 %vm267_vm1, %v265_v1  ;;  %v95_v8 = vsel %vm87_vm0, %v252_v5, 0  ;;  %v255_v9 = vld [vmem:[%s323_s1 + $0x30] ss:$12 sps:$4 sm:$0xff]  }
   0x3   :  { %235 = vmatpush3.bf16.msra.mxu1 %v95_v8  ;;  %v256_v10 = vld [vmem:[%s323_s1 + $0x38] ss:$12 sps:$4 sm:$0xff]   ;;  %v257_v11 = vld [vmem:[%s323_s1 + $0x1c] ss:$12 sps:$4 sm:$0xff]   ;;  %v260_v13 = vld [vmem:[%s323_s1 + $0x20] ss:$12 sps:$4 sm:$0xff]  }
   0x4   :  { %226 = vmatprep.subr.msk.bf16.mxu0 %vm87_vm0, %v224_v3  ;;  %v89_v7 = vsel %vm87_vm0, %v223_v4, 0  ;;  %236 = vmatprep.subr.bf16.mxu1 %v265_v1  ;;  %v259_v12 = vld [vmem:[%s323_s1 + $0x18] ss:$12 sps:$4 sm:$0xff]   ;;  %v263_v15 = vld [vmem:[%s323_s1] ss:$12 sps:$4 sm:$0xff]   ;;  %v186_v22 = vshrl.u32 %v185_v20, 7 }
   0x5   :  { %106 = vmatpush1.bf16.msra.mxu0 %v89_v7  ;;  %v261_v14 = vld [vmem:[%s323_s1 + $0x4] ss:$12 sps:$4 sm:$0xff]   ;;  %v264_v16 = vld [vmem:[%s323_s1 + $0x8] ss:$12 sps:$4 sm:$0xff]   ;;  %v12_v17 = vld [vmem:[%s324_s0] sm:$0x1] }
   0x6   :  { %107 = vmatprep.subr.bf16.mxu0 %v253_v6  ;;  %v268_v18 = vmov 1966171168   ;;  %vm207_vm3 = vcmp.lt.s32.totalorder %v185_v20, 384 }
   0x7   :  { %237 = vmatpush3.bf16.msra.mxu1 %v256_v10  ;;  %v183_v19 = vunpack.c.l.s4 %v268_v18 }
   0x8   :  { %238 = vmatprep.subr.bf16.mxu1 %v265_v1 }
   0x9   :  { %108 = vmatpush1.bf16.msra.mxu0 %v255_v9  ;;  %v184_v21 = vunpack.c.0.s8 %v183_v19 }
   0xa   :  { %109 = vmatprep.subr.bf16.mxu0 %v257_v11 }
   0xb   :  { %239 = vmatpush3.bf16.msra.mxu1 %v260_v13  ;;  %v187_v23 = vsub.s32 %v184_v21, %v186_v22 }
   0xc   :  { %240 = vmatprep.subr.bf16.mxu1 %v265_v1 }
   0xd   :  { %110 = vmatpush1.bf16.msra.mxu0 %v259_v12 }
   0xe   :  { %111 = vmatprep.subr.bf16.mxu0 %v261_v14 }
   0xf   :  { %241 = vmatpush3.bf16.msra.mxu1 %v264_v16 }
  0x11   :  { %112 = vmatpush1.bf16.msra.mxu0 %v263_v15 }
  0x12   :  { %243 = vmatmul.mubr.msk.bf16.vlgmr.msra.gmra.mxu1 %vm83_vm2, %v12_v17 }
  0x14   :  { %227 = vmatmul.mubr.msk.bf16.vlgmr.msra.gmra.mxu0 %vm83_vm2, %v12_v17 }
  0xd2   :  { %v172_v25 = vpop.f32.mrf.mxu1 }
  0xd3   :  { %v195_v28 = vrot.slane %v172_v25, %v187_v23 }
  0xd4   :  { %v131_v24 = vpop.f32.mrf.mxu0  ;;  %v244_v27 = vpop.f32.mrf.mxu1 }
  0xd6   :  { %v133_v26 = vpop.f32.mrf.mxu0  ;;  %v175_v31 = vpop.f32.mrf.mxu1 }
  0xd7   :  { %v181_v29 = vcombine.low %v131_v24, %v133_v26 }
  0xd8   :  { %v135_v30 = vpop.f32.mrf.mxu0  ;;  %v245_v34 = vpop.f32.mrf.mxu1 }
  0xd9   :  { %v188_v32 = vrot.slane %v181_v29, %v187_v23 }
  0xda   :  { %v136_v33 = vpop.f32.mrf.mxu0 }
  0xdb   :  { %v196_v35 = vcombine.low %v188_v32, %v195_v28 }
  0xdd   :  { %v203_v36 = vrot.slane %v196_v35, %v187_v23 }
  0xdf   :  { %209 = vst.msk [vmem:[%s325_s2] sm:$0x7] %vm207_vm3, %v203_v36 }

// kernel: _lambda_.32
= control target key start
LH: loop header
LB: loop body
LE: loop exit
PB: predicated region body
PF: predicated region fallthrough
CT: control target
= control target key end

     0   :  { %s232_s6 = smov 0   ;;  %s256_s0 = inlined_call_operand.vmem [shape: f32[2,3,64], index: 0, kind: input, shape index: {}]   ;;  %s257_s1 = inlined_call_operand.vmem [shape: f32[2,1,64], index: 1, kind: output, shape index: {}]  }
   0x1 LB: > { %s194_s7 = sadd.s32 4294967295, %s220_s6   ;;  %p198_p0 = scmp.ge.s32.totalorder %s220_s6, 1  ;;  %s220_s6 = sphi %s232_s6, %s11_s6  }
   0x2   : > { %p86_p1 = scmp.lt.s32.totalorder %s220_s6, 3 }
   0x4   : > { %p87_p2 = pnand %p198_p0, %p86_p1 }
   0x5   : > { %p103_p3 = scmp.lt.s32.totalorder (!%p87_p2), %s194_s7, 1 }
   0x6   : > { %90 = sbr.rel (%p87_p2) target bundleno = 80 (0x50), region = 24 }
   0xb   : > { %s259_s7 = smov (!%p103_p3, %s194_s7), 1  ;;  %vm112_vm0 = vcmask 518144   ;;  %v130_v11 = vlaneseq  ;;  %vm145_vm1 = vcmask 516096  }
   0xc   : > { %s199_s8 = sshll.u32 %s259_s7, 2  ;;  %s109_s14 = scalar_lea.vmem %s257_s1, %s259_s7 }
   0xd   : > { %s106_s11 = scalar_lea.vmem %s256_s0, %s199_s8  ;;  %v131_v12 = vshrl.u32 %v130_v11, 7 }
   0xe   : > { %v110_v0 = vld [vmem:[%s106_s11] sm:$0x7] }
   0xf   : > { %v111_v1 = vsub.f32 0.0, %v110_v0  ;;  %v132_v13 = vcvt.s32.f32 %v131_v12 }
  0x11   : > { %v113_v2 = vsel %vm112_vm0, %v111_v1, -inf  ;;  %v133_v14 = vadd.f32 -1.0, %v132_v13 }
  0x12   : > { %v114_v3 = vrot.slane %v113_v2, 4 }
  0x14   : > { %v115_v4 = vmax.f32 %v113_v2, %v114_v3 }
  0x16   : > { %v116_v5 = vrot.slane %v115_v4, 2 }
  0x18   : > { %v117_v6 = vmax.f32 %v115_v4, %v116_v5 }
  0x1a   : > { %v118_v7 = vrot.slane %v117_v6, 1 }
  0x1c   : > { %v119_v8 = vmax.f32 %v117_v6, %v118_v7 }
  0x1e   : > { %v120_v9 = vsub.f32 %v111_v1, %v119_v8 }
  0x20   : > { %v121_v10 = vmul.f32 1.442695, %v120_v9 }
  0x22   : > { %210 = vpow2.f32 %v121_v10 }
  0x2f   : > { %v211_v15 = vpop.eup %210 }
  0x30   : > { %v123_v16 = vsel %vm112_vm0, %v211_v15, 0.0  ;;  %v134_v17 = vmul.f32 %v211_v15, %v133_v14 }
  0x31   : > { %v124_v18 = vrot.slane %v123_v16, 4 }
  0x32   : > { %v135_v19 = vsel %vm112_vm0, %v134_v17, 0.0 }
  0x33   : > { %v125_v20 = vadd.f32 %v124_v18, %v123_v16  ;;  %v136_v21 = vrot.slane %v135_v19, 4 }
  0x35   : > { %v126_v22 = vrot.slane %v125_v20, 2  ;;  %v137_v24 = vadd.f32 %v136_v21, %v135_v19 }
  0x37   : > { %v127_v23 = vadd.f32 %v126_v22, %v125_v20  ;;  %v138_v27 = vrot.slane %v137_v24, 2 }
  0x39   : > { %v128_v25 = vrot.slane %v127_v23, 1  ;;  %v139_v28 = vadd.f32 %v138_v27, %v137_v24 }
  0x3b   : > { %v129_v26 = vadd.f32 %v128_v25, %v127_v23  ;;  %v140_v29 = vrot.slane %v139_v28, 1 }
  0x3d   : > { %212 = vrcp.f32 %v129_v26  ;;  %v141_v30 = vadd.f32 %v140_v29, %v139_v28 }
  0x4a   : > { %v213_v31 = vpop.eup %212 }
  0x4b   : > { %v143_v32 = vmul.f32 %v213_v31, %v141_v30 }
  0x4d   : > { %v144_v33 = vmul.f32 8.0, %v143_v32 }
  0x4f   : > { %146 = vst.msk [vmem:[%s109_s14] sm:$0x1] %vm145_vm1, %v144_v33 }
  0x50 PF: > { %s11_s6 = sadd.s32 1, %s220_s6  }
  0x51   : > { %p8_p4 = scmp.ge.s32.totalorder %s11_s6, 4  }
  0x53   :  { %10 = sbr.rel (!%p8_p4) target bundleno = 1 (0x1), region = 54 }

// kernel: _lambda_.34
= control target key start
LH: loop header
LB: loop body
LE: loop exit
PB: predicated region body
PF: predicated region fallthrough
CT: control target
= control target key end

     0   :  { %vm149_vm0 = vcmask 1044480   ;;  %vm150_vm1 = vcmask 1045504   ;;  %v640_v1 = vmov 0   ;;  %v641_v2 = vmov 65535   ;;  %s751_s1 = inlined_call_operand.vmem [shape: bf16[27,1536], index: 1, kind: input, shape index: {}]   ;;  %s752_s0 = inlined_call_operand.vmem [shape: bf16[2,27], index: 0, kind: input, shape index: {}]   ;;  %s753_s2 = inlined_call_operand.vmem [shape: bf16[2,1536], index: 2, kind: output, shape index: {}]  }
   0x1   :  { %v604_v0 = vld [vmem:[%s751_s1 + $0x64] ss:$48 sps:$4 sm:$0x3f]   ;;  %221 = vmatprep.mubr.bf16.mxu0 %v640_v1  ;;  %262 = vmatprep.mubr.bf16.mxu1 %v640_v1  ;;  %v151_v3 = vsel %vm149_vm0, 4294967295, %v641_v2  ;;  %v612_v11 = vld [vmem:[%s751_s1 + $0xc] ss:$48 sps:$4 sm:$0xff]   ;;  %v490_v46 = vlaneseq }
   0x2   :  { %v152_v4 = vsel %vm150_vm1, %v151_v3, 0  ;;  %v606_v5 = vld [vmem:[%s751_s1 + $0x6c] ss:$48 sps:$4 sm:$0x3f]   ;;  %v610_v10 = vld [vmem:[%s751_s1 + $0x4] ss:$48 sps:$4 sm:$0xff]  }
   0x3   :  { %v157_v6 = vand.u32 %v604_v0, %v152_v4  ;;  %v608_v7 = vld [vmem:[%s751_s1 + $0x60] ss:$48 sps:$4 sm:$0x3f]   ;;  %v609_v8 = vld [vmem:[%s751_s1 + $0x68] ss:$48 sps:$4 sm:$0x3f]   ;;  %v163_v9 = vand.u32 %v606_v5, %v152_v4 }
   0x4   :  { %v154_v12 = vand.u32 %v608_v7, %v152_v4  ;;  %v160_v13 = vand.u32 %v609_v8, %v152_v4  ;;  %v614_v14 = vld [vmem:[%s751_s1] ss:$48 sps:$4 sm:$0xff]   ;;  %v615_v15 = vld [vmem:[%s751_s1 + $0x8] ss:$48 sps:$4 sm:$0xff]   ;;  %vm145_vm2 = vcmask 220160   ;;  %v491_v56 = vshrl.u32 %v490_v46, 7 }
   0x5   :  { %201 = vmatprep.subr.bf16.mxu0 %v157_v6  ;;  %242 = vmatprep.subr.bf16.mxu1 %v163_v9  ;;  %v616_v16 = vld [vmem:[%s751_s1 + $0x70] ss:$48 sps:$4 sm:$0x3f]   ;;  %v618_v17 = vld [vmem:[%s751_s1 + $0x74] ss:$48 sps:$4 sm:$0x3f]  }
   0x6   :  { %202 = vmatpush1.bf16.msra.mxu0 %v154_v12  ;;  %243 = vmatpush1.bf16.msra.mxu1 %v160_v13  ;;  %v619_v18 = vld [vmem:[%s751_s1 + $0x78] ss:$48 sps:$4 sm:$0x3f]   ;;  %v621_v19 = vld [vmem:[%s751_s1 + $0x7c] ss:$48 sps:$4 sm:$0x3f]   ;;  %v169_v20 = vand.u32 %v618_v17, %v152_v4  ;;  %v166_v23 = vand.u32 %v616_v16, %v152_v4 }
   0x7   :  { %203 = vmatprep.subr.bf16.mxu0 %v610_v10  ;;  %244 = vmatprep.subr.bf16.mxu1 %v612_v11  ;;  %v175_v21 = vand.u32 %v621_v19, %v152_v4  ;;  %v12_v22 = vld [vmem:[%s752_s0] sm:$0x1]  ;;  %v172_v24 = vand.u32 %v619_v18, %v152_v4  ;;  %v624_v25 = vld [vmem:[%s751_s1 + $0x14] ss:$48 sps:$4 sm:$0xff]   ;;  %v627_v26 = vld [vmem:[%s751_s1 + $0x1c] ss:$48 sps:$4 sm:$0xff]  }
   0x8   :  { %v622_v27 = vld [vmem:[%s751_s1 + $0x10] ss:$48 sps:$4 sm:$0xff]   ;;  %v630_v28 = vld [vmem:[%s751_s1 + $0x84] ss:$48 sps:$4 sm:$0x3f]  }
   0x9   :  { %v628_v29 = vld [vmem:[%s751_s1 + $0x80] ss:$48 sps:$4 sm:$0x3f]   ;;  %v633_v30 = vld [vmem:[%s751_s1 + $0x8c] ss:$48 sps:$4 sm:$0x3f]   ;;  %v181_v33 = vand.u32 %v630_v28, %v152_v4 }
   0xa   :  { %204 = vmatpush1.bf16.msra.mxu0 %v614_v14  ;;  %245 = vmatpush1.bf16.msra.mxu1 %v615_v15  ;;  %v625_v31 = vld [vmem:[%s751_s1 + $0x18] ss:$48 sps:$4 sm:$0xff]   ;;  %v187_v34 = vand.u32 %v633_v30, %v152_v4  ;;  %v178_v35 = vand.u32 %v628_v29, %v152_v4  ;;  %v636_v37 = vld [vmem:[%s751_s1 + $0x24] ss:$48 sps:$4 sm:$0xff]   ;;  %v639_v38 = vld [vmem:[%s751_s1 + $0x2c] ss:$48 sps:$4 sm:$0xff]  }
   0xb   :  { %283 = vmatprep.subr.bf16.mxu0 %v169_v20  ;;  %324 = vmatprep.subr.bf16.mxu1 %v175_v21  ;;  %v631_v32 = vld [vmem:[%s751_s1 + $0x88] ss:$48 sps:$4 sm:$0x3f]   ;;  %v634_v39 = vld [vmem:[%s751_s1 + $0x20] ss:$48 sps:$4 sm:$0xff]  }
   0xc   :  { %v184_v36 = vand.u32 %v631_v32, %v152_v4  ;;  %v637_v40 = vld [vmem:[%s751_s1 + $0x28] ss:$48 sps:$4 sm:$0xff]   ;;  %v642_v44 = vmov 1966171168  }
   0xd   :  { %588 = vmatmul.mubr.msk.bf16.vlgmr.msra.gmra.mxu0 %vm145_vm2, %v12_v22  ;;  %589 = vmatmul.mubr.msk.bf16.vlgmr.msra.gmra.mxu1 %vm145_vm2, %v12_v22  ;;  %v488_v45 = vunpack.c.l.s4 %v642_v44 }
   0xe   :  { %284 = vmatpush1.bf16.msra.mxu0 %v166_v23  ;;  %325 = vmatpush1.bf16.msra.mxu1 %v172_v24 }
   0xf   :  { %285 = vmatprep.subr.bf16.mxu0 %v624_v25  ;;  %326 = vmatprep.subr.bf16.mxu1 %v627_v26  ;;  %v489_v55 = vunpack.c.0.s8 %v488_v45 }
  0x10   :  { %303 = vmatprep.mubr.bf16.mxu0 %v640_v1  ;;  %344 = vmatprep.mubr.bf16.mxu1 %v640_v1 }
  0x11   :  { %v492_v2 = vsub.s32 %v489_v55, %v491_v56 }
  0x12   :  { %286 = vmatpush1.bf16.msra.mxu0 %v622_v27  ;;  %327 = vmatpush1.bf16.msra.mxu1 %v625_v31 }
  0x13   :  { %365 = vmatprep.subr.bf16.mxu0 %v181_v33  ;;  %406 = vmatprep.subr.bf16.mxu1 %v187_v34 }
  0x15   :  { %590 = vmatmul.mubr.msk.bf16.vlgmr.msra.gmra.mxu0 %vm145_vm2, %v12_v22  ;;  %591 = vmatmul.mubr.msk.bf16.vlgmr.msra.gmra.mxu1 %vm145_vm2, %v12_v22 }
  0x16   :  { %366 = vmatpush1.bf16.msra.mxu0 %v178_v35  ;;  %407 = vmatpush1.bf16.msra.mxu1 %v184_v36 }
  0x17   :  { %367 = vmatprep.subr.bf16.mxu0 %v636_v37  ;;  %408 = vmatprep.subr.bf16.mxu1 %v639_v38 }
  0x18   :  { %385 = vmatprep.mubr.bf16.mxu0 %v640_v1  ;;  %426 = vmatprep.mubr.bf16.mxu1 %v640_v1 }
  0x1a   :  { %368 = vmatpush1.bf16.msra.mxu0 %v634_v39  ;;  %409 = vmatpush1.bf16.msra.mxu1 %v637_v40 }
  0x1d   :  { %592 = vmatmul.mubr.msk.bf16.vlgmr.msra.gmra.mxu0 %vm145_vm2, %v12_v22  ;;  %593 = vmatmul.mubr.msk.bf16.vlgmr.msra.gmra.mxu1 %vm145_vm2, %v12_v22 }
  0xcd   :  { %v223_v41 = vpop.f32.mrf.mxu0  ;;  %v264_v42 = vpop.f32.mrf.mxu1 }
  0xce   :  { %v435_v50 = vmul.f32 0.999995, %v223_v41  ;;  %v437_v51 = vmul.f32 0.999995, %v264_v42 }
  0xcf   :  { %v225_v43 = vpop.f32.mrf.mxu0  ;;  %v266_v47 = vpop.f32.mrf.mxu1 }
  0xd0   :  { %v436_v48 = vmul.f32 0.999995, %v225_v43  ;;  %v438_v49 = vmul.f32 0.999995, %v266_v47  ;;  %v447_v60 = vmax.f32 %v435_v50, 0.0  ;;  %v449_v61 = vmax.f32 %v437_v51, 0.0 }
  0xd1   :  { %v227_v52 = vpop.f32.mrf.mxu0  ;;  %v268_v53 = vpop.f32.mrf.mxu1 }
  0xd2   :  { %v448_v54 = vmax.f32 %v436_v48, 0.0  ;;  %v450_v57 = vmax.f32 %v438_v49, 0.0 }
  0xd3   :  { %v228_v58 = vpop.f32.mrf.mxu0  ;;  %v269_v59 = vpop.f32.mrf.mxu1 }
  0xd4   :  { %v594_v1 = vpack.c.bf16 %v448_v54, %v447_v60  ;;  %v595_v3 = vpack.c.bf16 %v450_v57, %v449_v61 }
  0xd5   :  { %v305_v62 = vpop.f32.mrf.mxu0  ;;  %v346_v63 = vpop.f32.mrf.mxu1 }
  0xd6   :  { %v439_v0 = vmul.f32 0.999995, %v305_v62  ;;  %v441_v4 = vmul.f32 0.999995, %v346_v63  ;;  %v493_v13 = vrot.slane %v594_v1, %v492_v2  ;;  %v500_v14 = vrot.slane %v595_v3, %v492_v2 }
  0xd7   :  { %v307_v5 = vpop.f32.mrf.mxu0  ;;  %v348_v6 = vpop.f32.mrf.mxu1 }
  0xd8   :  { %v440_v7 = vmul.f32 0.999995, %v307_v5  ;;  %v442_v8 = vmul.f32 0.999995, %v348_v6  ;;  %v451_v11 = vmax.f32 %v439_v0, 0.0  ;;  %v453_v15 = vmax.f32 %v441_v4, 0.0 }
  0xd9   :  { %v309_v9 = vpop.f32.mrf.mxu0  ;;  %v350_v10 = vpop.f32.mrf.mxu1  ;;  %v515_v26 = vcombine.low %v493_v13, %v500_v14 }
  0xda   :  { %v452_v12 = vmax.f32 %v440_v7, 0.0  ;;  %v454_v16 = vmax.f32 %v442_v8, 0.0 }
  0xdb   :  { %v310_v17 = vpop.f32.mrf.mxu0  ;;  %v351_v18 = vpop.f32.mrf.mxu1  ;;  %v523_v39 = vrot.slane %v515_v26, %v492_v2 }
  0xdc   :  { %v596_v19 = vpack.c.bf16 %v452_v12, %v451_v11  ;;  %v597_v20 = vpack.c.bf16 %v454_v16, %v453_v15 }
  0xdd   :  { %v387_v21 = vpop.f32.mrf.mxu0  ;;  %v428_v22 = vpop.f32.mrf.mxu1 }
  0xde   :  { %v507_v23 = vrot.slane %v596_v19, %v492_v2  ;;  %v443_v24 = vmul.f32 0.999995, %v387_v21  ;;  %v445_v25 = vmul.f32 0.999995, %v428_v22  ;;  %v514_v27 = vrot.slane %v597_v20, %v492_v2 }
  0xdf   :  { %v389_v28 = vpop.f32.mrf.mxu0  ;;  %v430_v29 = vpop.f32.mrf.mxu1 }
  0xe0   :  { %v444_v30 = vmul.f32 0.999995, %v389_v28  ;;  %v446_v31 = vmul.f32 0.999995, %v430_v29  ;;  %v516_v32 = vcombine.low %v507_v23, %v514_v27  ;;  %v455_v35 = vmax.f32 %v443_v24, 0.0 }
  0xe1   :  { %v391_v33 = vpop.f32.mrf.mxu0  ;;  %v432_v34 = vpop.f32.mrf.mxu1  ;;  %v457_v36 = vmax.f32 %v445_v25, 0.0 }
  0xe2   :  { %v456_v37 = vmax.f32 %v444_v30, 0.0  ;;  %v458_v38 = vmax.f32 %v446_v31, 0.0  ;;  %v530_v40 = vrot.slane %v516_v32, %v492_v2 }
  0xe3   :  { %v392_v41 = vpop.f32.mrf.mxu0  ;;  %v433_v42 = vpop.f32.mrf.mxu1 }
  0xe4   :  { %v598_v43 = vpack.c.bf16 %v456_v37, %v455_v35  ;;  %v599_v44 = vpack.c.bf16 %v458_v38, %v457_v36  ;;  %v531_v45 = vcombine.low %v523_v39, %v530_v40 }
  0xe6   :  { %v540_v46 = vrot.slane %v598_v43, %v492_v2  ;;  %v547_v47 = vrot.slane %v599_v44, %v492_v2  ;;  %558 = vst [vmem:[%s753_s2] sm:$0xff] %v531_v45 }
  0xe8   :  { %v548_v48 = vcombine.low %v540_v46, %v547_v47 }
  0xea   :  { %600 = vst.sshfl [vmem:[%s753_s2 + $0x8] sm:$0x55 pattern:$0x73625140] %v548_v48 }

// kernel: _lambda_.33
= control target key start
LH: loop header
LB: loop body
LE: loop exit
PB: predicated region body
PF: predicated region fallthrough
CT: control target
= control target key end

     0   :  { %s4533_s12 = smov 0   ;;  %s5403_s0 = inlined_call_operand.vmem [shape: bf16[2,16,4,16], index: 0, kind: input, shape index: {}]   ;;  %s5404_s1 = inlined_call_operand.vmem [shape: bf16[2,16,4,16], index: 1, kind: input, shape index: {}]   ;;  %s5405_s2 = inlined_call_operand.vmem [shape: f32[2,16,16], index: 2, kind: input, shape index: {}]   ;;  %s5406_s3 = inlined_call_operand.vmem [shape: bf16[2,3,256], index: 3, kind: output, shape index: {}]  }
   0x1 LB: > { %s3980_s13 = sadd.s32 4294967295, %s4498_s12   ;;  %p3984_p0 = scmp.ge.s32.totalorder %s4498_s12, 1  ;;  %s4498_s12 = sphi %s4533_s12, %s13_s12  }
   0x2   : > { %p157_p1 = scmp.lt.s32.totalorder %s4498_s12, 3 }
   0x4   : > { %p158_p2 = pnand %p3984_p0, %p157_p1 }
   0x5   : > { %p191_p3 = scmp.lt.s32.totalorder (!%p158_p2), %s3980_s13, 1  ;;  %s4502_s18 = smov (!%p158_p2), 126  }
   0x6   : > { %161 = sbr.rel (%p158_p2) target bundleno = 883 (0x373), region = 32  ;;  %s4503_s19 = smov (!%p158_p2), 127  }
   0x7   : > { %s4506_s27 = smov (!%p158_p2), 32   ;;  %s4507_s28 = smov (!%p158_p2), 16  }
   0x8   : > { %s4508_s29 = smov (!%p158_p2), 64   ;;  %s4509_s30 = smov (!%p158_p2), 48  }
   0x9   : > { %s4510_s4 = smov (!%p158_p2), 96   ;;  %s4511_s5 = smov (!%p158_p2), 80  }
   0xa   : > { %s4512_s6 = smov (!%p158_p2), 112  }
   0xb   : > { %v262_v0 = vlaneseq  ;;  %s5408_s13 = smov (!%p191_p3, %s3980_s13), 1  ;;  %vm4501_vm8 = vmmov 0  }
   0xc   : > { %s4046_s14 = sshll.u32 %s5408_s13, 4  ;;  %s4044_s20 = sshll.u32 %s5408_s13, 5 }
   0xd   : > { %v4543_v1 = vand.u32 127, %v262_v0  ;;  %s4550_s17 = scalar_lea.vmem %s5405_s2, %s4046_s14  ;;  %v4552_v3 = vshrl.u32 %v262_v0, 7  ;;  %s4762_s23 = scalar_lea.vmem %s5404_s1, %s4044_s20 }
   0xe   : > { %v260_v4 = vld [vmem:[%s4550_s17] sm:$0xff]  ;;  %v261_v29 = vld [vmem:[%s4550_s17 + $0x8] sm:$0xff]  ;;  %s5050_s26 = scalar_lea.vmem %s5403_s0, %s4044_s20  ;;  %s4047_s7 = sshll.u32 %s5408_s13, 2 }
   0xf   : > { %v264_v2 = vcvt.s32.f32 %v4543_v1  ;;  %v4556_v7 = vsub.s32 0, %v4552_v3  ;;  %v4559_v9 = vsub.s32 1, %v4552_v3  ;;  %v4566_v16 = vsub.s32 2, %v4552_v3  ;;  %s210_s10 = scalar_lea.vmem %s5406_s3, %s4047_s7 }
  0x10   : > { %v4570_v18 = vsub.s32 3, %v4552_v3  ;;  %v4576_v22 = vsub.s32 4, %v4552_v3  ;;  %v4580_v24 = vsub.s32 5, %v4552_v3  ;;  %v4586_v28 = vsub.s32 6, %v4552_v3 }
  0x11   : > { %v265_v5 = vsub.f32 %v264_v2, %v260_v4  ;;  %v4591_v31 = vsub.s32 7, %v4552_v3  ;;  %v266_v32 = vsub.f32 %v264_v2, %v261_v29  ;;  %v4500_v4 = vmov 0.0  }
  0x12   : > { %4144 = vmatprep.subr.bf16.mxu0 %v4500_v4  ;;  %4150 = vmatprep.subr.bf16.mxu1 %v4500_v4 }
  0x13   : > { %v267_v6 = vfloor.f32 %v265_v5  ;;  %v268_v34 = vfloor.f32 %v266_v32  ;;  %4146 = vmatprep.mubr.msk.bf16.mxu0 %vm4501_vm8, %v4500_v4  ;;  %4152 = vmatprep.mubr.msk.bf16.mxu1 %vm4501_vm8, %v4500_v4 }
  0x15   : > { %v269_v8 = vsub.f32 %v265_v5, %v267_v6  ;;  %v4432_v10 = vtrunc.f32 %v267_v6  ;;  %v4434_v36 = vtrunc.f32 %v268_v34  ;;  %v270_v41 = vsub.f32 %v266_v32, %v268_v34 }
  0x17   : > { %v274_v11 = vrot.slane %v269_v8, %v4556_v7  ;;  %v285_v12 = vrot.slane %v269_v8, %v4559_v9  ;;  %v4433_v13 = vcvt.f32.s32 %v4432_v10  ;;  %v296_v20 = vrot.slane %v269_v8, %v4566_v16 }
  0x18   : > { %v307_v21 = vrot.slane %v269_v8, %v4570_v18  ;;  %v318_v26 = vrot.slane %v269_v8, %v4576_v22  ;;  %v329_v27 = vrot.slane %v269_v8, %v4580_v24  ;;  %v340_v35 = vrot.slane %v269_v8, %v4586_v28 }
  0x19   : > { %280 = vbcast.lane.b32.xlu1 %v274_v11, 264  ;;  %276 = vbcast.lane.b32.xlu0 %v274_v11, 256  ;;  %v463_v14 = vrot.slane %v4433_v13, %v4559_v9  ;;  %v452_v15 = vrot.slane %v4433_v13, %v4556_v7  ;;  %v474_v17 = vrot.slane %v4433_v13, %v4566_v16  ;;  %v4435_v38 = vcvt.f32.s32 %v4434_v36 }
  0x1a   : > { %v485_v19 = vrot.slane %v4433_v13, %v4570_v18  ;;  %v496_v23 = vrot.slane %v4433_v13, %v4576_v22  ;;  %v507_v25 = vrot.slane %v4433_v13, %v4580_v24  ;;  %v518_v30 = vrot.slane %v4433_v13, %v4586_v28 }
  0x1b   : > { %v529_v33 = vrot.slane %v4433_v13, %v4591_v31  ;;  %v351_v37 = vrot.slane %v269_v8, %v4591_v31  ;;  %v540_v39 = vrot.slane %v4435_v38, %v4556_v7  ;;  %v551_v40 = vrot.slane %v4435_v38, %v4559_v9 }
  0x1c   : > { %v362_v42 = vrot.slane %v270_v41, %v4556_v7  ;;  %v373_v43 = vrot.slane %v270_v41, %v4559_v9  ;;  %v562_v44 = vrot.slane %v4435_v38, %v4566_v16  ;;  %v573_v45 = vrot.slane %v4435_v38, %v4570_v18 }
  0x1d   : > { %291 = vbcast.lane.b32.xlu1 %v285_v12, 264  ;;  %287 = vbcast.lane.b32.xlu0 %v285_v12, 256  ;;  %v384_v46 = vrot.slane %v270_v41, %v4566_v16  ;;  %v395_v47 = vrot.slane %v270_v41, %v4570_v18  ;;  %v584_v48 = vrot.slane %v4435_v38, %v4576_v22 }
  0x1e   : > { %v595_v49 = vrot.slane %v4435_v38, %v4580_v24  ;;  %v406_v50 = vrot.slane %v270_v41, %v4576_v22  ;;  %v417_v51 = vrot.slane %v270_v41, %v4580_v24  ;;  %v606_v52 = vrot.slane %v4435_v38, %v4586_v28 }
  0x1f   : > { %v617_v53 = vrot.slane %v4435_v38, %v4591_v31  ;;  %v428_v56 = vrot.slane %v270_v41, %v4586_v28  ;;  %v439_v59 = vrot.slane %v270_v41, %v4591_v31 }
  0x21   : > { %465 = vbcast.lane.b32.xlu1 %v463_v14, 256  ;;  %454 = vbcast.lane.b32.xlu0 %v452_v15, 256 }
  0x25   : > { %469 = vbcast.lane.b32.xlu1 %v463_v14, 264  ;;  %458 = vbcast.lane.b32.xlu0 %v452_v15, 264 }
  0x29   : > { %480 = vbcast.lane.b32.xlu1 %v474_v17, 264  ;;  %476 = vbcast.lane.b32.xlu0 %v474_v17, 256 }
  0x2d   : > { %491 = vbcast.lane.b32.xlu1 %v485_v19, 264  ;;  %487 = vbcast.lane.b32.xlu0 %v485_v19, 256 }
  0x31   : > { %302 = vbcast.lane.b32.xlu1 %v296_v20, 264  ;;  %298 = vbcast.lane.b32.xlu0 %v296_v20, 256 }
  0x35   : > { %313 = vbcast.lane.b32.xlu1 %v307_v21, 264  ;;  %309 = vbcast.lane.b32.xlu0 %v307_v21, 256 }
  0x39   : > { %502 = vbcast.lane.b32.xlu1 %v496_v23, 264  ;;  %498 = vbcast.lane.b32.xlu0 %v496_v23, 256 }
  0x3d   : > { %513 = vbcast.lane.b32.xlu1 %v507_v25, 264  ;;  %509 = vbcast.lane.b32.xlu0 %v507_v25, 256 }
  0x41   : > { %324 = vbcast.lane.b32.xlu1 %v318_v26, 264  ;;  %320 = vbcast.lane.b32.xlu0 %v318_v26, 256 }
  0x45   : > { %335 = vbcast.lane.b32.xlu1 %v329_v27, 264  ;;  %331 = vbcast.lane.b32.xlu0 %v329_v27, 256 }
  0x49   : > { %524 = vbcast.lane.b32.xlu1 %v518_v30, 264  ;;  %520 = vbcast.lane.b32.xlu0 %v518_v30, 256 }
  0x4d   : > { %535 = vbcast.lane.b32.xlu1 %v529_v33, 264  ;;  %531 = vbcast.lane.b32.xlu0 %v529_v33, 256 }
  0x51   : > { %346 = vbcast.lane.b32.xlu1 %v340_v35, 264  ;;  %342 = vbcast.lane.b32.xlu0 %v340_v35, 256 }
  0x55   : > { %357 = vbcast.lane.b32.xlu1 %v351_v37, 264  ;;  %353 = vbcast.lane.b32.xlu0 %v351_v37, 256 }
  0x59   : > { %546 = vbcast.lane.b32.xlu1 %v540_v39, 264  ;;  %542 = vbcast.lane.b32.xlu0 %v540_v39, 256 }
  0x5d   : > { %557 = vbcast.lane.b32.xlu1 %v551_v40, 264  ;;  %553 = vbcast.lane.b32.xlu0 %v551_v40, 256 }
  0x61   : > { %368 = vbcast.lane.b32.xlu1 %v362_v42, 264  ;;  %364 = vbcast.lane.b32.xlu0 %v362_v42, 256 }
  0x65   : > { %379 = vbcast.lane.b32.xlu1 %v373_v43, 264  ;;  %375 = vbcast.lane.b32.xlu0 %v373_v43, 256 }
  0x69   : > { %568 = vbcast.lane.b32.xlu1 %v562_v44, 264  ;;  %564 = vbcast.lane.b32.xlu0 %v562_v44, 256 }
  0x6d   : > { %579 = vbcast.lane.b32.xlu1 %v573_v45, 264  ;;  %575 = vbcast.lane.b32.xlu0 %v573_v45, 256 }
  0x71   : > { %390 = vbcast.lane.b32.xlu1 %v384_v46, 264  ;;  %386 = vbcast.lane.b32.xlu0 %v384_v46, 256 }
  0x75   : > { %401 = vbcast.lane.b32.xlu1 %v395_v47, 264  ;;  %397 = vbcast.lane.b32.xlu0 %v395_v47, 256 }
  0x79   : > { %590 = vbcast.lane.b32.xlu1 %v584_v48, 264  ;;  %586 = vbcast.lane.b32.xlu0 %v584_v48, 256 }
  0x7d   : > { %601 = vbcast.lane.b32.xlu1 %v595_v49, 264  ;;  %597 = vbcast.lane.b32.xlu0 %v595_v49, 256 }
  0x81   : > { %412 = vbcast.lane.b32.xlu1 %v406_v50, 264  ;;  %408 = vbcast.lane.b32.xlu0 %v406_v50, 256 }
  0x85   : > { %423 = vbcast.lane.b32.xlu1 %v417_v51, 264  ;;  %419 = vbcast.lane.b32.xlu0 %v417_v51, 256 }
  0x89   : > { %612 = vbcast.lane.b32.xlu1 %v606_v52, 264  ;;  %608 = vbcast.lane.b32.xlu0 %v606_v52, 256 }
  0x8b   : > { %v281_v54 = vpop.permute.xlu1 %280  ;;  %v277_v55 = vpop.permute.xlu0 %276 }
  0x8c   : > { %v690_v9 = vsub.f32 1.0, %v281_v54  ;;  %v689_v11 = vsub.f32 1.0, %v277_v55 }
  0x8d   : > { %623 = vbcast.lane.b32.xlu1 %v617_v53, 264  ;;  %619 = vbcast.lane.b32.xlu0 %v617_v53, 256 }
  0x8f   : > { %v292_v57 = vpop.permute.xlu1 %291  ;;  %v288_v58 = vpop.permute.xlu0 %287 }
  0x90   : > { %v691_v10 = vsub.f32 1.0, %v288_v58  ;;  %v692_v12 = vsub.f32 1.0, %v292_v57 }
  0x91   : > { %434 = vbcast.lane.b32.xlu1 %v428_v56, 264  ;;  %430 = vbcast.lane.b32.xlu0 %v428_v56, 256 }
  0x93   : > { %v466_v60 = vpop.permute.xlu1 %465  ;;  %v455_v61 = vpop.permute.xlu0 %454 }
  0x94   : > { %v627_v62 = vadd.s32 1, %v466_v60  ;;  %v625_v63 = vadd.s32 1, %v455_v61 }
  0x95   : > { %445 = vbcast.lane.b32.xlu1 %v439_v59, 264  ;;  %441 = vbcast.lane.b32.xlu0 %v439_v59, 256 }
  0x96   : > { %v755_v0 = vadd.s32 1, %v627_v62  ;;  %v753_v2 = vadd.s32 1, %v625_v63  ;;  %vm659_vm0 = vcmp.eq.s32.totalorder %v4543_v1, %v627_v62  ;;  %vm657_vm2 = vcmp.eq.s32.totalorder %v4543_v1, %v625_v63 }
  0x97   : > { %v470_v5 = vpop.permute.xlu1 %469  ;;  %v459_v6 = vpop.permute.xlu0 %458  ;;  %v723_v14 = vsel %vm659_vm0, %v691_v10, 0.0  ;;  %v721_v19 = vsel %vm657_vm2, %v689_v11, 0.0 }
  0x98   : > { %vm787_vm1 = vcmp.eq.s32.totalorder %v4543_v1, %v755_v0  ;;  %v628_v7 = vadd.s32 1, %v470_v5  ;;  %v626_v8 = vadd.s32 1, %v459_v6  ;;  %vm785_vm3 = vcmp.eq.s32.totalorder %v4543_v1, %v753_v2 }
  0x99   : > { %v819_v15 = vsel %vm787_vm1, %v288_v58, 0.0  ;;  %v817_v20 = vsel %vm785_vm3, %v277_v55, 0.0 }
  0x9a   : > { %vm660_vm4 = vcmp.eq.s32.totalorder %v4543_v1, %v628_v7  ;;  %v756_v13 = vadd.s32 1, %v628_v7  ;;  %vm658_vm5 = vcmp.eq.s32.totalorder %v4543_v1, %v626_v8  ;;  %v754_v16 = vadd.s32 1, %v626_v8 }
  0x9b   : > { %v481_v17 = vpop.permute.xlu1 %480  ;;  %v477_v18 = vpop.permute.xlu0 %476  ;;  %v724_v22 = vsel %vm660_vm4, %v692_v12, 0.0  ;;  %v851_v25 = vadd.f32 %v819_v15, %v723_v14  ;;  %v722_v27 = vsel %vm658_vm5, %v690_v9, 0.0  ;;  %v849_v29 = vadd.f32 %v817_v20, %v721_v19 }
  0x9c   : > { %vm788_vm6 = vcmp.eq.s32.totalorder %v4543_v1, %v756_v13  ;;  %v630_v21 = vadd.s32 1, %v481_v17  ;;  %vm786_vm7 = vcmp.eq.s32.totalorder %v4543_v1, %v754_v16  ;;  %v629_v24 = vadd.s32 1, %v477_v18 }
  0x9d   : > { %v820_v23 = vsel %vm788_vm6, %v292_v57, 0.0  ;;  %v818_v28 = vsel %vm786_vm7, %v281_v54, 0.0 }
  0x9e   : > { %v852_v26 = vadd.f32 %v820_v23, %v724_v22  ;;  %v850_v30 = vadd.f32 %v818_v28, %v722_v27  ;;  %v758_v33 = vadd.s32 1, %v630_v21  ;;  %v757_v35 = vadd.s32 1, %v629_v24 }
  0x9f   : > { %v492_v31 = vpop.permute.xlu1 %491  ;;  %v488_v32 = vpop.permute.xlu0 %487  ;;  %vm662_vm9 = vcmp.eq.s32.totalorder %v4543_v1, %v630_v21  ;;  %vm661_vm10 = vcmp.eq.s32.totalorder %v4543_v1, %v629_v24 }
  0xa0   : > { %v4622_v34 = vpack.c.bf16 %v852_v26, %v851_v25  ;;  %v632_v36 = vadd.s32 1, %v492_v31  ;;  %v631_v37 = vadd.s32 1, %v488_v32  ;;  %v4628_v38 = vpack.c.bf16 %v850_v30, %v849_v29 }
  0xa1   : > { %vm790_vm11 = vcmp.eq.s32.totalorder %v4543_v1, %v758_v33  ;;  %vm789_vm12 = vcmp.eq.s32.totalorder %v4543_v1, %v757_v35 }
  0xa2   : > { %948 = vrot.lane.b32.xlu1 %v4622_v34, %s4502_s18  ;;  %898 = vrot.lane.b32.xlu0 %v4628_v38, %s4502_s18  ;;  %v760_v43 = vadd.s32 1, %v632_v36  ;;  %v759_v44 = vadd.s32 1, %v631_v37  ;;  %vm664_vm13 = vcmp.eq.s32.totalorder %v4543_v1, %v632_v36  ;;  %vm663_vm14 = vcmp.eq.s32.totalorder %v4543_v1, %v631_v37 }
  0xa3   : > { %v303_v39 = vpop.permute.xlu1 %302  ;;  %v299_v40 = vpop.permute.xlu0 %298 }
  0xa4   : > { %v694_v41 = vsub.f32 1.0, %v303_v39  ;;  %v693_v42 = vsub.f32 1.0, %v299_v40  ;;  %v822_v46 = vsel %vm790_vm11, %v303_v39, 0.0  ;;  %v821_v48 = vsel %vm789_vm12, %v299_v40, 0.0 }
  0xa5   : > { %vm792_vm15 = vcmp.eq.s32.totalorder %v4543_v1, %v760_v43  ;;  %vm791_vm0 = vcmp.eq.s32.totalorder %v4543_v1, %v759_v44 }
  0xa6   : > { %v726_v45 = vsel %vm662_vm9, %v694_v41, 0.0  ;;  %v725_v47 = vsel %vm661_vm10, %v693_v42, 0.0 }
  0xa7   : > { %v854_v49 = vadd.f32 %v822_v46, %v726_v45  ;;  %v853_v50 = vadd.f32 %v821_v48, %v725_v47  ;;  %v314_v51 = vpop.permute.xlu1 %313  ;;  %v310_v52 = vpop.permute.xlu0 %309 }
  0xa8   : > { %v696_v53 = vsub.f32 1.0, %v314_v51  ;;  %v695_v54 = vsub.f32 1.0, %v310_v52  ;;  %v824_v57 = vsel %vm792_vm15, %v314_v51, 0.0  ;;  %v823_v59 = vsel %vm791_vm0, %v310_v52, 0.0 }
  0xa9   : > { %v4642_v55 = vpack.c.bf16 %v854_v49, %v853_v50 }
  0xaa   : > { %v728_v56 = vsel %vm664_vm13, %v696_v53, 0.0  ;;  %v727_v58 = vsel %vm663_vm14, %v695_v54, 0.0 }
  0xab   : > { %v856_v60 = vadd.f32 %v824_v57, %v728_v56  ;;  %v855_v61 = vadd.f32 %v823_v59, %v727_v58  ;;  %v503_v62 = vpop.permute.xlu1 %502  ;;  %997 = vrot.lane.b32.xlu0 %v4642_v55, %s4502_s18  ;;  %v499_v63 = vpop.permute.xlu0 %498 }
  0xac   : > { %v634_v0 = vadd.s32 1, %v503_v62  ;;  %v633_v2 = vadd.s32 1, %v499_v63 }
  0xad   : > { %v4646_v5 = vpack.c.bf16 %v856_v60, %v855_v61 }
  0xae   : > { %v762_v8 = vadd.s32 1, %v634_v0  ;;  %v761_v9 = vadd.s32 1, %v633_v2  ;;  %vm666_vm1 = vcmp.eq.s32.totalorder %v4543_v1, %v634_v0  ;;  %vm665_vm2 = vcmp.eq.s32.totalorder %v4543_v1, %v633_v2 }
  0xaf   : > { %v514_v6 = vpop.permute.xlu1 %513  ;;  %1046 = vrot.lane.b32.xlu1 %v4646_v5, %s4502_s18  ;;  %v510_v7 = vpop.permute.xlu0 %509 }
  0xb0   : > { %v636_v10 = vadd.s32 1, %v514_v6  ;;  %v635_v11 = vadd.s32 1, %v510_v7  ;;  %vm794_vm3 = vcmp.eq.s32.totalorder %v4543_v1, %v762_v8  ;;  %vm793_vm4 = vcmp.eq.s32.totalorder %v4543_v1, %v761_v9 }
  0xb2   : > { %v764_v16 = vadd.s32 1, %v636_v10  ;;  %v763_v17 = vadd.s32 1, %v635_v11  ;;  %vm668_vm5 = vcmp.eq.s32.totalorder %v4543_v1, %v636_v10  ;;  %vm667_vm6 = vcmp.eq.s32.totalorder %v4543_v1, %v635_v11 }
  0xb3   : > { %v325_v12 = vpop.permute.xlu1 %324  ;;  %v321_v13 = vpop.permute.xlu0 %320 }
  0xb4   : > { %v698_v14 = vsub.f32 1.0, %v325_v12  ;;  %v697_v15 = vsub.f32 1.0, %v321_v13  ;;  %v826_v19 = vsel %vm794_vm3, %v325_v12, 0.0  ;;  %v825_v21 = vsel %vm793_vm4, %v321_v13, 0.0 }
  0xb5   : > { %vm796_vm7 = vcmp.eq.s32.totalorder %v4543_v1, %v764_v16  ;;  %vm795_vm9 = vcmp.eq.s32.totalorder %v4543_v1, %v763_v17 }
  0xb6   : > { %v730_v18 = vsel %vm666_vm1, %v698_v14, 0.0  ;;  %v729_v20 = vsel %vm665_vm2, %v697_v15, 0.0 }
  0xb7   : > { %v858_v22 = vadd.f32 %v826_v19, %v730_v18  ;;  %v857_v23 = vadd.f32 %v825_v21, %v729_v20  ;;  %v336_v24 = vpop.permute.xlu1 %335  ;;  %v332_v25 = vpop.permute.xlu0 %331 }
  0xb8   : > { %v700_v26 = vsub.f32 1.0, %v336_v24  ;;  %v699_v27 = vsub.f32 1.0, %v332_v25  ;;  %v828_v30 = vsel %vm796_vm7, %v336_v24, 0.0  ;;  %v827_v32 = vsel %vm795_vm9, %v332_v25, 0.0 }
  0xb9   : > { %v4658_v28 = vpack.c.bf16 %v858_v22, %v857_v23 }
  0xba   : > { %v732_v29 = vsel %vm668_vm5, %v700_v26, 0.0  ;;  %v731_v31 = vsel %vm667_vm6, %v699_v27, 0.0 }
  0xbb   : > { %v860_v33 = vadd.f32 %v828_v30, %v732_v29  ;;  %v859_v35 = vadd.f32 %v827_v32, %v731_v31  ;;  %v525_v36 = vpop.permute.xlu1 %524  ;;  %1095 = vrot.lane.b32.xlu0 %v4658_v28, %s4502_s18  ;;  %v521_v37 = vpop.permute.xlu0 %520 }
  0xbc   : > { %v638_v39 = vadd.s32 1, %v525_v36  ;;  %v637_v40 = vadd.s32 1, %v521_v37 }
  0xbd   : > { %v4662_v41 = vpack.c.bf16 %v860_v33, %v859_v35 }
  0xbe   : > { %v766_v44 = vadd.s32 1, %v638_v39  ;;  %v765_v45 = vadd.s32 1, %v637_v40  ;;  %vm670_vm10 = vcmp.eq.s32.totalorder %v4543_v1, %v638_v39  ;;  %vm669_vm11 = vcmp.eq.s32.totalorder %v4543_v1, %v637_v40 }
  0xbf   : > { %v536_v42 = vpop.permute.xlu1 %535  ;;  %1144 = vrot.lane.b32.xlu1 %v4662_v41, %s4502_s18  ;;  %v532_v43 = vpop.permute.xlu0 %531 }
  0xc0   : > { %v640_v46 = vadd.s32 1, %v536_v42  ;;  %v639_v47 = vadd.s32 1, %v532_v43  ;;  %vm798_vm12 = vcmp.eq.s32.totalorder %v4543_v1, %v766_v44  ;;  %vm797_vm13 = vcmp.eq.s32.totalorder %v4543_v1, %v765_v45 }
  0xc2   : > { %v768_v52 = vadd.s32 1, %v640_v46  ;;  %v767_v53 = vadd.s32 1, %v639_v47  ;;  %vm672_vm14 = vcmp.eq.s32.totalorder %v4543_v1, %v640_v46  ;;  %vm671_vm15 = vcmp.eq.s32.totalorder %v4543_v1, %v639_v47 }
  0xc3   : > { %v347_v48 = vpop.permute.xlu1 %346  ;;  %v343_v49 = vpop.permute.xlu0 %342 }
  0xc4   : > { %v702_v50 = vsub.f32 1.0, %v347_v48  ;;  %v701_v51 = vsub.f32 1.0, %v343_v49  ;;  %v830_v56 = vsel %vm798_vm12, %v347_v48, 0.0  ;;  %v829_v58 = vsel %vm797_vm13, %v343_v49, 0.0 }
  0xc5   : > { %vm800_vm0 = vcmp.eq.s32.totalorder %v4543_v1, %v768_v52  ;;  %vm799_vm1 = vcmp.eq.s32.totalorder %v4543_v1, %v767_v53 }
  0xc6   : > { %v734_v54 = vsel %vm670_vm10, %v702_v50, 0.0  ;;  %v733_v57 = vsel %vm669_vm11, %v701_v51, 0.0 }
  0xc7   : > { %v862_v59 = vadd.f32 %v830_v56, %v734_v54  ;;  %v861_v60 = vadd.f32 %v829_v58, %v733_v57  ;;  %v358_v61 = vpop.permute.xlu1 %357  ;;  %v354_v62 = vpop.permute.xlu0 %353 }
  0xc8   : > { %v704_v63 = vsub.f32 1.0, %v358_v61  ;;  %v703_v0 = vsub.f32 1.0, %v354_v62  ;;  %v832_v7 = vsel %vm800_vm0, %v358_v61, 0.0  ;;  %v831_v9 = vsel %vm799_vm1, %v354_v62, 0.0 }
  0xc9   : > { %v4674_v2 = vpack.c.bf16 %v862_v59, %v861_v60 }
  0xca   : > { %v736_v6 = vsel %vm672_vm14, %v704_v63, 0.0  ;;  %v735_v8 = vsel %vm671_vm15, %v703_v0, 0.0 }
  0xcb   : > { %v864_v10 = vadd.f32 %v832_v7, %v736_v6  ;;  %v863_v11 = vadd.f32 %v831_v9, %v735_v8  ;;  %v547_v12 = vpop.permute.xlu1 %546  ;;  %1193 = vrot.lane.b32.xlu0 %v4674_v2, %s4502_s18  ;;  %v543_v13 = vpop.permute.xlu0 %542 }
  0xcc   : > { %v642_v14 = vadd.s32 1, %v547_v12  ;;  %v641_v15 = vadd.s32 1, %v543_v13 }
  0xcd   : > { %v4678_v16 = vpack.c.bf16 %v864_v10, %v863_v11 }
  0xce   : > { %v770_v19 = vadd.s32 1, %v642_v14  ;;  %v769_v20 = vadd.s32 1, %v641_v15  ;;  %vm674_vm2 = vcmp.eq.s32.totalorder %v4543_v1, %v642_v14  ;;  %vm673_vm3 = vcmp.eq.s32.totalorder %v4543_v1, %v641_v15 }
  0xcf   : > { %v558_v17 = vpop.permute.xlu1 %557  ;;  %1242 = vrot.lane.b32.xlu1 %v4678_v16, %s4502_s18  ;;  %v554_v18 = vpop.permute.xlu0 %553 }
  0xd0   : > { %v644_v21 = vadd.s32 1, %v558_v17  ;;  %v643_v22 = vadd.s32 1, %v554_v18  ;;  %vm802_vm4 = vcmp.eq.s32.totalorder %v4543_v1, %v770_v19  ;;  %vm801_vm5 = vcmp.eq.s32.totalorder %v4543_v1, %v769_v20 }
  0xd2   : > { %v772_v27 = vadd.s32 1, %v644_v21  ;;  %v771_v29 = vadd.s32 1, %v643_v22  ;;  %vm676_vm6 = vcmp.eq.s32.totalorder %v4543_v1, %v644_v21  ;;  %vm675_vm7 = vcmp.eq.s32.totalorder %v4543_v1, %v643_v22 }
  0xd3   : > { %v369_v23 = vpop.permute.xlu1 %368  ;;  %v365_v24 = vpop.permute.xlu0 %364 }
  0xd4   : > { %v706_v25 = vsub.f32 1.0, %v369_v23  ;;  %v705_v26 = vsub.f32 1.0, %v365_v24  ;;  %v834_v31 = vsel %vm802_vm4, %v369_v23, 0.0  ;;  %v833_v33 = vsel %vm801_vm5, %v365_v24, 0.0 }
  0xd5   : > { %vm804_vm9 = vcmp.eq.s32.totalorder %v4543_v1, %v772_v27  ;;  %vm803_vm10 = vcmp.eq.s32.totalorder %v4543_v1, %v771_v29 }
  0xd6   : > { %v738_v30 = vsel %vm674_vm2, %v706_v25, 0.0  ;;  %v737_v32 = vsel %vm673_vm3, %v705_v26, 0.0 }
  0xd7   : > { %v866_v35 = vadd.f32 %v834_v31, %v738_v30  ;;  %v865_v36 = vadd.f32 %v833_v33, %v737_v32  ;;  %v380_v37 = vpop.permute.xlu1 %379  ;;  %v376_v39 = vpop.permute.xlu0 %375 }
  0xd8   : > { %v708_v40 = vsub.f32 1.0, %v380_v37  ;;  %v707_v42 = vsub.f32 1.0, %v376_v39  ;;  %v836_v45 = vsel %vm804_vm9, %v380_v37, 0.0  ;;  %v835_v47 = vsel %vm803_vm10, %v376_v39, 0.0 }
  0xd9   : > { %v4690_v43 = vpack.c.bf16 %v866_v35, %v865_v36 }
  0xda   : > { %v740_v44 = vsel %vm676_vm6, %v708_v40, 0.0  ;;  %v739_v46 = vsel %vm675_vm7, %v707_v42, 0.0 }
  0xdb   : > { %v868_v48 = vadd.f32 %v836_v45, %v740_v44  ;;  %v867_v49 = vadd.f32 %v835_v47, %v739_v46  ;;  %v569_v50 = vpop.permute.xlu1 %568  ;;  %1291 = vrot.lane.b32.xlu0 %v4690_v43, %s4502_s18  ;;  %v565_v51 = vpop.permute.xlu0 %564 }
  0xdc   : > { %v646_v52 = vadd.s32 1, %v569_v50  ;;  %v645_v53 = vadd.s32 1, %v565_v51 }
  0xdd   : > { %v4694_v54 = vpack.c.bf16 %v868_v48, %v867_v49 }
  0xde   : > { %v774_v58 = vadd.s32 1, %v646_v52  ;;  %v773_v59 = vadd.s32 1, %v645_v53  ;;  %vm678_vm11 = vcmp.eq.s32.totalorder %v4543_v1, %v646_v52  ;;  %vm677_vm12 = vcmp.eq.s32.totalorder %v4543_v1, %v645_v53 }
  0xdf   : > { %v580_v56 = vpop.permute.xlu1 %579  ;;  %1340 = vrot.lane.b32.xlu1 %v4694_v54, %s4502_s18  ;;  %v576_v57 = vpop.permute.xlu0 %575 }
  0xe0   : > { %v648_v60 = vadd.s32 1, %v580_v56  ;;  %v647_v61 = vadd.s32 1, %v576_v57  ;;  %vm806_vm13 = vcmp.eq.s32.totalorder %v4543_v1, %v774_v58  ;;  %vm805_vm14 = vcmp.eq.s32.totalorder %v4543_v1, %v773_v59 }
  0xe2   : > { %v776_v7 = vadd.s32 1, %v648_v60  ;;  %v775_v8 = vadd.s32 1, %v647_v61  ;;  %vm680_vm15 = vcmp.eq.s32.totalorder %v4543_v1, %v648_v60  ;;  %vm679_vm0 = vcmp.eq.s32.totalorder %v4543_v1, %v647_v61 }
  0xe3   : > { %v391_v62 = vpop.permute.xlu1 %390  ;;  %v387_v63 = vpop.permute.xlu0 %386 }
  0xe4   : > { %v710_v0 = vsub.f32 1.0, %v391_v62  ;;  %v709_v6 = vsub.f32 1.0, %v387_v63  ;;  %v838_v10 = vsel %vm806_vm13, %v391_v62, 0.0  ;;  %v837_v12 = vsel %vm805_vm14, %v387_v63, 0.0 }
  0xe5   : > { %vm808_vm1 = vcmp.eq.s32.totalorder %v4543_v1, %v776_v7  ;;  %vm807_vm2 = vcmp.eq.s32.totalorder %v4543_v1, %v775_v8 }
  0xe6   : > { %v742_v9 = vsel %vm678_vm11, %v710_v0, 0.0  ;;  %v741_v11 = vsel %vm677_vm12, %v709_v6, 0.0 }
  0xe7   : > { %v870_v13 = vadd.f32 %v838_v10, %v742_v9  ;;  %v869_v14 = vadd.f32 %v837_v12, %v741_v11  ;;  %v402_v15 = vpop.permute.xlu1 %401  ;;  %v398_v17 = vpop.permute.xlu0 %397 }
  0xe8   : > { %v712_v18 = vsub.f32 1.0, %v402_v15  ;;  %v711_v19 = vsub.f32 1.0, %v398_v17  ;;  %v840_v22 = vsel %vm808_vm1, %v402_v15, 0.0  ;;  %v839_v24 = vsel %vm807_vm2, %v398_v17, 0.0 }
  0xe9   : > { %v4706_v20 = vpack.c.bf16 %v870_v13, %v869_v14 }
  0xea   : > { %v744_v21 = vsel %vm680_vm15, %v712_v18, 0.0  ;;  %v743_v23 = vsel %vm679_vm0, %v711_v19, 0.0 }
  0xeb   : > { %v872_v25 = vadd.f32 %v840_v22, %v744_v21  ;;  %v871_v26 = vadd.f32 %v839_v24, %v743_v23  ;;  %v591_v27 = vpop.permute.xlu1 %590  ;;  %1389 = vrot.lane.b32.xlu0 %v4706_v20, %s4502_s18  ;;  %v587_v29 = vpop.permute.xlu0 %586 }
  0xec   : > { %v650_v30 = vadd.s32 1, %v591_v27  ;;  %v649_v31 = vadd.s32 1, %v587_v29 }
  0xed   : > { %v4710_v32 = vpack.c.bf16 %v872_v25, %v871_v26 }
  0xee   : > { %v778_v36 = vadd.s32 1, %v650_v30  ;;  %v777_v37 = vadd.s32 1, %v649_v31  ;;  %vm682_vm3 = vcmp.eq.s32.totalorder %v4543_v1, %v650_v30  ;;  %vm681_vm4 = vcmp.eq.s32.totalorder %v4543_v1, %v649_v31 }
  0xef   : > { %v602_v33 = vpop.permute.xlu1 %601  ;;  %1438 = vrot.lane.b32.xlu1 %v4710_v32, %s4502_s18  ;;  %v598_v35 = vpop.permute.xlu0 %597 }
  0xf0   : > { %v652_v39 = vadd.s32 1, %v602_v33  ;;  %v651_v40 = vadd.s32 1, %v598_v35  ;;  %vm810_vm5 = vcmp.eq.s32.totalorder %v4543_v1, %v778_v36  ;;  %vm809_vm6 = vcmp.eq.s32.totalorder %v4543_v1, %v777_v37 }
  0xf2   : > { %v780_v47 = vadd.s32 1, %v652_v39  ;;  %v779_v48 = vadd.s32 1, %v651_v40  ;;  %vm684_vm7 = vcmp.eq.s32.totalorder %v4543_v1, %v652_v39  ;;  %vm683_vm9 = vcmp.eq.s32.totalorder %v4543_v1, %v651_v40 }
  0xf3   : > { %v413_v42 = vpop.permute.xlu1 %412  ;;  %v409_v44 = vpop.permute.xlu0 %408 }
  0xf4   : > { %v714_v45 = vsub.f32 1.0, %v413_v42  ;;  %v713_v46 = vsub.f32 1.0, %v409_v44  ;;  %v842_v50 = vsel %vm810_vm5, %v413_v42, 0.0  ;;  %v841_v52 = vsel %vm809_vm6, %v409_v44, 0.0 }
  0xf5   : > { %vm812_vm10 = vcmp.eq.s32.totalorder %v4543_v1, %v780_v47  ;;  %vm811_vm11 = vcmp.eq.s32.totalorder %v4543_v1, %v779_v48  ;;  %vm1714_vm5 = vcmask 125952   ;;  %vm3572_vm6 = vcmask 1041409  }
  0xf6   : > { %v746_v49 = vsel %vm682_vm3, %v714_v45, 0.0  ;;  %v745_v51 = vsel %vm681_vm4, %v713_v46, 0.0  ;;  %vm900_vm4 = vcmask 130048  }
  0xf7   : > { %v874_v53 = vadd.f32 %v842_v50, %v746_v49  ;;  %v873_v56 = vadd.f32 %v841_v52, %v745_v51  ;;  %v424_v57 = vpop.permute.xlu1 %423  ;;  %v420_v58 = vpop.permute.xlu0 %419 }
  0xf8   : > { %v716_v59 = vsub.f32 1.0, %v424_v57  ;;  %v715_v60 = vsub.f32 1.0, %v420_v58  ;;  %v844_v63 = vsel %vm812_vm10, %v424_v57, 0.0  ;;  %v843_v6 = vsel %vm811_vm11, %v420_v58, 0.0  ;;  %v4769_v57 = vld [vmem:[%s4762_s23 + $0x2] sm:$0x3] }
  0xf9   : > { %v4722_v61 = vpack.c.bf16 %v874_v53, %v873_v56  ;;  %v4774_v58 = vld [vmem:[%s4762_s23] sm:$0x3]  ;;  %vm3581_vm10 = vcmask 1044484   ;;  %vm3587_vm11 = vcmask 1046534  }
  0xfa   : > { %v748_v62 = vsel %vm684_vm7, %v716_v59, 0.0  ;;  %v747_v0 = vsel %vm683_vm9, %v715_v60, 0.0  ;;  %vm3575_vm7 = vcmask 1042434   ;;  %vm3578_vm9 = vcmask 1043459  }
  0xfb   : > { %v876_v7 = vadd.f32 %v844_v63, %v748_v62  ;;  %v875_v8 = vadd.f32 %v843_v6, %v747_v0  ;;  %v613_v9 = vpop.permute.xlu1 %612  ;;  %1487 = vrot.lane.b32.xlu0 %v4722_v61, %s4502_s18  ;;  %v609_v10 = vpop.permute.xlu0 %608  ;;  %v4796_v0 = vld [vmem:[%s4762_s23 + $0x4] sm:$0x3]  ;;  %v4806_v6 = vld [vmem:[%s4762_s23 + $0x6] sm:$0x3] }
  0xfc   : > { %v654_v11 = vadd.s32 1, %v613_v9  ;;  %v653_v12 = vadd.s32 1, %v609_v10 }
  0xfd   : > { %v4726_v13 = vpack.c.bf16 %v876_v7, %v875_v8 }
  0xfe   : > { %v782_v17 = vadd.s32 1, %v654_v11  ;;  %v781_v18 = vadd.s32 1, %v653_v12  ;;  %vm686_vm12 = vcmp.eq.s32.totalorder %v4543_v1, %v654_v11  ;;  %vm685_vm13 = vcmp.eq.s32.totalorder %v4543_v1, %v653_v12  ;;  %v4826_v11 = vld [vmem:[%s4762_s23 + $0x8] sm:$0x3]  ;;  %v4832_v12 = vld [vmem:[%s4762_s23 + $0xa] sm:$0x3] }
  0xff   : > { %v624_v14 = vpop.permute.xlu1 %623  ;;  %1536 = vrot.lane.b32.xlu1 %v4726_v13, %s4502_s18  ;;  %v620_v15 = vpop.permute.xlu0 %619 }
 0x100   : > { %v656_v19 = vadd.s32 1, %v624_v14  ;;  %v655_v21 = vadd.s32 1, %v620_v15  ;;  %vm814_vm14 = vcmp.eq.s32.totalorder %v4543_v1, %v782_v17  ;;  %vm813_vm15 = vcmp.eq.s32.totalorder %v4543_v1, %v781_v18 }
 0x102   : > { %v784_v26 = vadd.s32 1, %v656_v19  ;;  %v783_v27 = vadd.s32 1, %v655_v21  ;;  %vm688_vm0 = vcmp.eq.s32.totalorder %v4543_v1, %v656_v19  ;;  %vm687_vm1 = vcmp.eq.s32.totalorder %v4543_v1, %v655_v21  ;;  %v4844_v19 = vld [vmem:[%s4762_s23 + $0xc] sm:$0x3]  ;;  %v4850_v21 = vld [vmem:[%s4762_s23 + $0xe] sm:$0x3] }
 0x103   : > { %v435_v22 = vpop.permute.xlu1 %434  ;;  %v431_v23 = vpop.permute.xlu0 %430 }
 0x104   : > { %v718_v24 = vsub.f32 1.0, %v435_v22  ;;  %v717_v25 = vsub.f32 1.0, %v431_v23  ;;  %v846_v30 = vsel %vm814_vm14, %v435_v22, 0.0  ;;  %v845_v33 = vsel %vm813_vm15, %v431_v23, 0.0 }
 0x105   : > { %vm816_vm2 = vcmp.eq.s32.totalorder %v4543_v1, %v784_v26  ;;  %vm815_vm3 = vcmp.eq.s32.totalorder %v4543_v1, %v783_v27  ;;  %v4862_v26 = vld [vmem:[%s4762_s23 + $0x10] sm:$0x3]  ;;  %v4868_v27 = vld [vmem:[%s4762_s23 + $0x12] sm:$0x3]  ;;  %vm3861_vm14 = vcmask 392192   ;;  %vm3863_vm15 = vcmask 523264  }
 0x106   : > { %v750_v29 = vsel %vm686_vm12, %v718_v24, 0.0  ;;  %v749_v31 = vsel %vm685_vm13, %v717_v25, 0.0  ;;  %vm3590_vm12 = vcmask 1047559   ;;  %vm3859_vm13 = vcmask 261120  }
 0x107   : > { %v878_v35 = vadd.f32 %v846_v30, %v750_v29  ;;  %v877_v36 = vadd.f32 %v845_v33, %v749_v31  ;;  %v446_v37 = vpop.permute.xlu1 %445  ;;  %v442_v39 = vpop.permute.xlu0 %441 }
 0x108   : > { %v720_v40 = vsub.f32 1.0, %v446_v37  ;;  %v719_v42 = vsub.f32 1.0, %v442_v39  ;;  %v848_v46 = vsel %vm816_vm2, %v446_v37, 0.0  ;;  %v847_v48 = vsel %vm815_vm3, %v442_v39, 0.0 }
 0x109   : > { %v4738_v44 = vpack.c.bf16 %v878_v35, %v877_v36  ;;  %v4880_v35 = vld [vmem:[%s4762_s23 + $0x14] sm:$0x3]  ;;  %v4886_v36 = vld [vmem:[%s4762_s23 + $0x16] sm:$0x3]  ;;  %vm3891_vm2 = vcmask 1041408  }
 0x10a   : > { %v752_v45 = vsel %vm688_vm0, %v720_v40, 0.0  ;;  %v751_v47 = vsel %vm687_vm1, %v719_v42, 0.0  ;;  %vm3865_vm0 = vcmask 654336   ;;  %vm3867_vm1 = vcmask 785408  }
 0x10b   : > { %v880_v49 = vadd.f32 %v848_v46, %v752_v45  ;;  %v879_v50 = vadd.f32 %v847_v48, %v751_v47  ;;  %1585 = vrot.lane.b32.xlu0 %v4738_v44, %s4502_s18  ;;  %v4898_v45 = vld [vmem:[%s4762_s23 + $0x18] sm:$0x3]  ;;  %v4904_v46 = vld [vmem:[%s4762_s23 + $0x1a] sm:$0x3]  ;;  %vm3892_vm3 = vsmask.f32 1280 }
 0x10d   : > { %v4742_v51 = vpack.c.bf16 %v880_v49, %v879_v50 }
 0x10f   : > { %1827 = vrot.lane.b32.xlu0 %v4628_v38, %s4503_s19  ;;  %1634 = vrot.lane.b32.xlu1 %v4742_v51, %s4502_s18 }
 0x113   : > { %1917 = vrot.lane.b32.xlu0 %v4642_v55, %s4503_s19  ;;  %1872 = vrot.lane.b32.xlu1 %v4622_v34, %s4503_s19 }
 0x114   : > { %v949_v1 = vpop.permute.xlu1 %948  ;;  %v899_v52 = vpop.permute.xlu0 %898 }
 0x115   : > { %v954_v53 = vsel %vm900_vm4, %v949_v1, 0  ;;  %v905_v56 = vsel %vm900_vm4, %v899_v52, 0  ;;  %v4916_v52 = vld [vmem:[%s4762_s23 + $0x1c] sm:$0x3] }
 0x116   : > { %4151 = vmatpush3.bf16.xpose.msra.mxu1 %v954_v53  ;;  %4145 = vmatpush3.bf16.xpose.msra.mxu0 %v905_v56 }
 0x117   : > { %2007 = vrot.lane.b32.xlu0 %v4658_v28, %s4503_s19  ;;  %1962 = vrot.lane.b32.xlu1 %v4646_v5, %s4503_s19 }
 0x118   : > { %4156 = vmatprep.subr.bf16.mxu0 %v4500_v4  ;;  %4162 = vmatprep.subr.bf16.mxu1 %v4500_v4 }
 0x11b   : > { %2097 = vrot.lane.b32.xlu0 %v4674_v2, %s4503_s19  ;;  %2052 = vrot.lane.b32.xlu1 %v4662_v41, %s4503_s19 }
 0x11d   : > { %v998_v59 = vpop.permute.xlu0 %997  ;;  %4153 = vmatmul.mubr.msk.bf16.vlgmr.msra.gmra.mxu1 %vm900_vm4, %v4769_v57  ;;  %4147 = vmatmul.mubr.msk.bf16.vlgmr.msra.gmra.mxu0 %vm900_vm4, %v4774_v58 }
 0x11e   : > { %v1003_v60 = vsel %vm900_vm4, %v998_v59, 0  ;;  %4164 = vmatprep.mubr.msk.bf16.mxu1 %vm4501_vm8, %v4500_v4  ;;  %4158 = vmatprep.mubr.msk.bf16.mxu0 %vm4501_vm8, %v4500_v4  ;;  %v4923_v59 = vld [vmem:[%s4762_s23 + $0x1e] sm:$0x3] }
 0x11f   : > { %2187 = vrot.lane.b32.xlu0 %v4690_v43, %s4503_s19  ;;  %4157 = vmatpush3.bf16.xpose.msra.mxu0 %v1003_v60 }
 0x120   : > { %2142 = vrot.lane.b32.xlu1 %v4678_v16, %s4503_s19  ;;  %4168 = vmatprep.subr.bf16.mxu0 %v4500_v4 }
 0x121   : > { %v1047_v62 = vpop.permute.xlu1 %1046 }
 0x122   : > { %v1052_v63 = vsel %vm900_vm4, %v1047_v62, 0 }
 0x123   : > { %2277 = vrot.lane.b32.xlu0 %v4706_v20, %s4503_s19  ;;  %4163 = vmatpush3.bf16.xpose.msra.mxu1 %v1052_v63 }
 0x124   : > { %2232 = vrot.lane.b32.xlu1 %v4694_v54, %s4503_s19  ;;  %4174 = vmatprep.subr.bf16.mxu1 %v4500_v4 }
 0x126   : > { %4159 = vmatmul.mubr.msk.bf16.vlgmr.msra.gmra.mxu0 %vm900_vm4, %v4796_v0 }
 0x127   : > { %2367 = vrot.lane.b32.xlu0 %v4722_v61, %s4503_s19  ;;  %4170 = vmatprep.mubr.msk.bf16.mxu0 %vm4501_vm8, %v4500_v4 }
 0x128   : > { %2322 = vrot.lane.b32.xlu1 %v4710_v32, %s4503_s19 }
 0x12a   : > { %4165 = vmatmul.mubr.msk.bf16.vlgmr.msra.gmra.mxu1 %vm900_vm4, %v4806_v6 }
 0x12b   : > { %2457 = vrot.lane.b32.xlu0 %v4738_v44, %s4503_s19  ;;  %4176 = vmatprep.mubr.msk.bf16.mxu1 %vm4501_vm8, %v4500_v4 }
 0x12c   : > { %2412 = vrot.lane.b32.xlu1 %v4726_v13, %s4503_s19 }
 0x12d   : > { %v1096_v7 = vpop.permute.xlu0 %1095 }
 0x12e   : > { %v1101_v8 = vsel %vm900_vm4, %v1096_v7, 0 }
 0x12f   : > { %4169 = vmatpush3.bf16.xpose.msra.mxu0 %v1101_v8 }
 0x130   : > { %2502 = vrot.lane.b32.xlu1 %v4742_v51, %s4503_s19  ;;  %4180 = vmatprep.subr.bf16.mxu0 %v4500_v4 }
 0x131   : > { %v1145_v9 = vpop.permute.xlu1 %1144 }
 0x132   : > { %v1150_v10 = vsel %vm900_vm4, %v1145_v9, 0 }
 0x133   : > { %4175 = vmatpush3.bf16.xpose.msra.mxu1 %v1150_v10 }
 0x134   : > { %4186 = vmatprep.subr.bf16.mxu1 %v4500_v4 }
 0x136   : > { %4171 = vmatmul.mubr.msk.bf16.vlgmr.msra.gmra.mxu0 %vm900_vm4, %v4826_v11 }
 0x137   : > { %4182 = vmatprep.mubr.msk.bf16.mxu0 %vm4501_vm8, %v4500_v4 }
 0x13a   : > { %4177 = vmatmul.mubr.msk.bf16.vlgmr.msra.gmra.mxu1 %vm900_vm4, %v4832_v12 }
 0x13b   : > { %4188 = vmatprep.mubr.msk.bf16.mxu1 %vm4501_vm8, %v4500_v4 }
 0x13d   : > { %v1194_v14 = vpop.permute.xlu0 %1193 }
 0x13e   : > { %v1199_v15 = vsel %vm900_vm4, %v1194_v14, 0 }
 0x13f   : > { %4181 = vmatpush3.bf16.xpose.msra.mxu0 %v1199_v15 }
 0x140   : > { %4192 = vmatprep.subr.bf16.mxu0 %v4500_v4 }
 0x141   : > { %v1243_v17 = vpop.permute.xlu1 %1242 }
 0x142   : > { %v1248_v18 = vsel %vm900_vm4, %v1243_v17, 0 }
 0x143   : > { %4187 = vmatpush3.bf16.xpose.msra.mxu1 %v1248_v18 }
 0x144   : > { %4198 = vmatprep.subr.bf16.mxu1 %v4500_v4 }
 0x146   : > { %4183 = vmatmul.mubr.msk.bf16.vlgmr.msra.gmra.mxu0 %vm900_vm4, %v4844_v19 }
 0x147   : > { %4194 = vmatprep.mubr.msk.bf16.mxu0 %vm4501_vm8, %v4500_v4 }
 0x14a   : > { %4189 = vmatmul.mubr.msk.bf16.vlgmr.msra.gmra.mxu1 %vm900_vm4, %v4850_v21 }
 0x14b   : > { %4200 = vmatprep.mubr.msk.bf16.mxu1 %vm4501_vm8, %v4500_v4 }
 0x14d   : > { %v1292_v22 = vpop.permute.xlu0 %1291 }
 0x14e   : > { %v1297_v23 = vsel %vm900_vm4, %v1292_v22, 0 }
 0x14f   : > { %4193 = vmatpush3.bf16.xpose.msra.mxu0 %v1297_v23 }
 0x150   : > { %4204 = vmatprep.subr.bf16.mxu0 %v4500_v4 }
 0x151   : > { %v1341_v24 = vpop.permute.xlu1 %1340 }
 0x152   : > { %v1346_v25 = vsel %vm900_vm4, %v1341_v24, 0 }
 0x153   : > { %4199 = vmatpush3.bf16.xpose.msra.mxu1 %v1346_v25 }
 0x154   : > { %4210 = vmatprep.subr.bf16.mxu1 %v4500_v4 }
 0x156   : > { %4195 = vmatmul.mubr.msk.bf16.vlgmr.msra.gmra.mxu0 %vm900_vm4, %v4862_v26 }
 0x157   : > { %4206 = vmatprep.mubr.msk.bf16.mxu0 %vm4501_vm8, %v4500_v4 }
 0x15a   : > { %4201 = vmatmul.mubr.msk.bf16.vlgmr.msra.gmra.mxu1 %vm900_vm4, %v4868_v27 }
 0x15b   : > { %4212 = vmatprep.mubr.msk.bf16.mxu1 %vm4501_vm8, %v4500_v4 }
 0x15d   : > { %v1390_v29 = vpop.permute.xlu0 %1389 }
 0x15e   : > { %v1395_v30 = vsel %vm900_vm4, %v1390_v29, 0 }
 0x15f   : > { %4205 = vmatpush3.bf16.xpose.msra.mxu0 %v1395_v30 }
 0x160   : > { %4216 = vmatprep.subr.bf16.mxu0 %v4500_v4 }
 0x161   : > { %v1439_v31 = vpop.permute.xlu1 %1438 }
 0x162   : > { %v1444_v33 = vsel %vm900_vm4, %v1439_v31, 0 }
 0x163   : > { %4211 = vmatpush3.bf16.xpose.msra.mxu1 %v1444_v33 }
 0x164   : > { %4222 = vmatprep.subr.bf16.mxu1 %v4500_v4 }
 0x166   : > { %4207 = vmatmul.mubr.msk.bf16.vlgmr.msra.gmra.mxu0 %vm900_vm4, %v4880_v35 }
 0x167   : > { %4218 = vmatprep.mubr.msk.bf16.mxu0 %vm4501_vm8, %v4500_v4 }
 0x16a   : > { %4213 = vmatmul.mubr.msk.bf16.vlgmr.msra.gmra.mxu1 %vm900_vm4, %v4886_v36 }
 0x16b   : > { %4224 = vmatprep.mubr.msk.bf16.mxu1 %vm4501_vm8, %v4500_v4 }
 0x16d   : > { %v1488_v37 = vpop.permute.xlu0 %1487 }
 0x16e   : > { %v1493_v39 = vsel %vm900_vm4, %v1488_v37, 0 }
 0x16f   : > { %4217 = vmatpush3.bf16.xpose.msra.mxu0 %v1493_v39 }
 0x170   : > { %4228 = vmatprep.subr.bf16.mxu0 %v4500_v4 }
 0x171   : > { %v1537_v40 = vpop.permute.xlu1 %1536 }
 0x172   : > { %v1542_v42 = vsel %vm900_vm4, %v1537_v40, 0 }
 0x173   : > { %4223 = vmatpush3.bf16.xpose.msra.mxu1 %v1542_v42 }
 0x174   : > { %4234 = vmatprep.subr.bf16.mxu1 %v4500_v4 }
 0x176   : > { %4219 = vmatmul.mubr.msk.bf16.vlgmr.msra.gmra.mxu0 %vm900_vm4, %v4898_v45 }
 0x177   : > { %4230 = vmatprep.mubr.msk.bf16.mxu0 %vm4501_vm8, %v4500_v4 }
 0x17a   : > { %4225 = vmatmul.mubr.msk.bf16.vlgmr.msra.gmra.mxu1 %vm900_vm4, %v4904_v46 }
 0x17b   : > { %4236 = vmatprep.mubr.msk.bf16.mxu1 %vm4501_vm8, %v4500_v4 }
 0x17d   : > { %v1586_v47 = vpop.permute.xlu0 %1585 }
 0x17e   : > { %v1591_v48 = vsel %vm900_vm4, %v1586_v47, 0 }
 0x17f   : > { %4229 = vmatpush3.bf16.xpose.msra.mxu0 %v1591_v48 }
 0x180   : > { %4240 = vmatprep.subr.bf16.mxu0 %v4500_v4 }
 0x181   : > { %v1635_v49 = vpop.permute.xlu1 %1634  ;;  %v1828_v1 = vpop.permute.xlu0 %1827 }
 0x182   : > { %v1640_v50 = vsel %vm900_vm4, %v1635_v49, 0  ;;  %v1830_v53 = vsel %vm900_vm4, %v1828_v1, 0 }
 0x183   : > { %4235 = vmatpush3.bf16.xpose.msra.mxu1 %v1640_v50 }
 0x184   : > { %4246 = vmatprep.subr.bf16.mxu1 %v4500_v4 }
 0x185   : > { %v1873_v56 = vpop.permute.xlu1 %1872  ;;  %v1918_v62 = vpop.permute.xlu0 %1917 }
 0x186   : > { %4231 = vmatmul.mubr.msk.bf16.vlgmr.msra.gmra.mxu0 %vm900_vm4, %v4916_v52  ;;  %v1875_v60 = vsel %vm900_vm4, %v1873_v56, 0  ;;  %v1920_v63 = vsel %vm900_vm4, %v1918_v62, 0  ;;  %v2692_v56 = vsel %vm900_vm4, %v4628_v38, 0  ;;  %v2778_v38 = vsel %vm900_vm4, %v4642_v55, 0 }
 0x187   : > { %4241 = vmatpush3.bf16.xpose.msra.mxu0 %v1830_v53  ;;  %4242 = vmatprep.mubr.msk.bf16.mxu0 %vm4501_vm8, %v4500_v4  ;;  %v2864_v55 = vsel %vm900_vm4, %v4658_v28, 0 }
 0x188   : > { %4252 = vmatprep.subr.bf16.mxu0 %v4500_v4 }
 0x189   : > { %v1963_v7 = vpop.permute.xlu1 %1962  ;;  %v2008_v9 = vpop.permute.xlu0 %2007 }
 0x18a   : > { %4237 = vmatmul.mubr.msk.bf16.vlgmr.msra.gmra.mxu1 %vm900_vm4, %v4923_v59  ;;  %v1965_v8 = vsel %vm900_vm4, %v1963_v7, 0  ;;  %v2010_v10 = vsel %vm900_vm4, %v2008_v9, 0 }
 0x18b   : > { %4247 = vmatpush3.bf16.xpose.msra.mxu1 %v1875_v60  ;;  %4248 = vmatprep.mubr.msk.bf16.mxu1 %vm4501_vm8, %v4500_v4  ;;  %v2735_v60 = vsel %vm900_vm4, %v4622_v34, 0  ;;  %v2821_v34 = vsel %vm900_vm4, %v4646_v5, 0  ;;  %v213_v5 = vld [vmem:[%s5050_s26 + $0x2] sm:$0x3] }
 0x18c   : > { %4258 = vmatprep.subr.bf16.mxu1 %v4500_v4  ;;  %v5066_v62 = vunpack.c.l.bf16 %v213_v5 }
 0x18d   : > { %v2053_v14 = vpop.permute.xlu1 %2052  ;;  %v2098_v17 = vpop.permute.xlu0 %2097 }
 0x18e   : > { %4243 = vmatmul.mubr.msk.bf16.vlgmr.msra.gmra.mxu0 %vm900_vm4, %v4774_v58  ;;  %v2055_v15 = vsel %vm900_vm4, %v2053_v14, 0  ;;  %v2100_v18 = vsel %vm900_vm4, %v2098_v17, 0  ;;  %v214_v14 = vld [vmem:[%s5050_s26 + $0x4] sm:$0x3] }
 0x18f   : > { %4253 = vmatpush3.bf16.xpose.msra.mxu0 %v1920_v63  ;;  %4254 = vmatprep.mubr.msk.bf16.mxu0 %vm4501_vm8, %v4500_v4 }
 0x190   : > { %4264 = vmatprep.subr.bf16.mxu0 %v4500_v4 }
 0x191   : > { %v2188_v24 = vpop.permute.xlu0 %2187 }
 0x192   : > { %4249 = vmatmul.mubr.msk.bf16.vlgmr.msra.gmra.mxu1 %vm900_vm4, %v4769_v57  ;;  %v2143_v22 = vpop.permute.xlu1 %2142  ;;  %v2190_v25 = vsel %vm900_vm4, %v2188_v24, 0 }
 0x193   : > { %4259 = vmatpush3.bf16.xpose.msra.mxu1 %v1965_v8  ;;  %4260 = vmatprep.mubr.msk.bf16.mxu1 %vm4501_vm8, %v4500_v4  ;;  %v2145_v23 = vsel %vm900_vm4, %v2143_v22, 0 }
 0x194   : > { %4270 = vmatprep.subr.bf16.mxu1 %v4500_v4 }
 0x195   : > { %v2278_v31 = vpop.permute.xlu0 %2277 }
 0x196   : > { %4255 = vmatmul.mubr.msk.bf16.vlgmr.msra.gmra.mxu0 %vm900_vm4, %v4796_v0  ;;  %v2233_v29 = vpop.permute.xlu1 %2232  ;;  %v2280_v33 = vsel %vm900_vm4, %v2278_v31, 0 }
 0x197   : > { %4265 = vmatpush3.bf16.xpose.msra.mxu0 %v2010_v10  ;;  %4266 = vmatprep.mubr.msk.bf16.mxu0 %vm4501_vm8, %v4500_v4  ;;  %v2235_v30 = vsel %vm900_vm4, %v2233_v29, 0 }
 0x198   : > { %4276 = vmatprep.subr.bf16.mxu0 %v4500_v4 }
 0x199   : > { %v2368_v40 = vpop.permute.xlu0 %2367 }
 0x19a   : > { %4261 = vmatmul.mubr.msk.bf16.vlgmr.msra.gmra.mxu1 %vm900_vm4, %v4806_v6  ;;  %v2323_v37 = vpop.permute.xlu1 %2322  ;;  %v2370_v42 = vsel %vm900_vm4, %v2368_v40, 0 }
 0x19b   : > { %4271 = vmatpush3.bf16.xpose.msra.mxu1 %v2055_v15  ;;  %4272 = vmatprep.mubr.msk.bf16.mxu1 %vm4501_vm8, %v4500_v4  ;;  %v2325_v39 = vsel %vm900_vm4, %v2323_v37, 0 }
 0x19c   : > { %4282 = vmatprep.subr.bf16.mxu1 %v4500_v4 }
 0x19d   : > { %v2458_v49 = vpop.permute.xlu0 %2457 }
 0x19e   : > { %4267 = vmatmul.mubr.msk.bf16.vlgmr.msra.gmra.mxu0 %vm900_vm4, %v4826_v11  ;;  %v2413_v47 = vpop.permute.xlu1 %2412  ;;  %v2460_v50 = vsel %vm900_vm4, %v2458_v49, 0 }
 0x19f   : > { %4277 = vmatpush3.bf16.xpose.msra.mxu0 %v2100_v18  ;;  %4278 = vmatprep.mubr.msk.bf16.mxu0 %vm4501_vm8, %v4500_v4  ;;  %v2415_v48 = vsel %vm900_vm4, %v2413_v47, 0 }
 0x1a0   : > { %4288 = vmatprep.subr.bf16.mxu0 %v4500_v4 }
 0x1a2   : > { %4273 = vmatmul.mubr.msk.bf16.vlgmr.msra.gmra.mxu1 %vm900_vm4, %v4832_v12  ;;  %v2503_v1 = vpop.permute.xlu1 %2502 }
 0x1a3   : > { %4283 = vmatpush3.bf16.xpose.msra.mxu1 %v2145_v23  ;;  %4284 = vmatprep.mubr.msk.bf16.mxu1 %vm4501_vm8, %v4500_v4  ;;  %v2505_v53 = vsel %vm900_vm4, %v2503_v1, 0 }
 0x1a4   : > { %4294 = vmatprep.subr.bf16.mxu1 %v4500_v4 }
 0x1a6   : > { %4279 = vmatmul.mubr.msk.bf16.vlgmr.msra.gmra.mxu0 %vm900_vm4, %v4844_v19 }
 0x1a7   : > { %4289 = vmatpush3.bf16.xpose.msra.mxu0 %v2190_v25  ;;  %4290 = vmatprep.mubr.msk.bf16.mxu0 %vm4501_vm8, %v4500_v4  ;;  %v5091_v25 = vunpack.c.l.bf16 %v214_v14  ;;  %v3165_v14 = vsel %vm900_vm4, %v4710_v32, 0 }
 0x1a8   : > { %4300 = vmatprep.subr.bf16.mxu0 %v4500_v4 }
 0x1aa   : > { %4285 = vmatmul.mubr.msk.bf16.vlgmr.msra.gmra.mxu1 %vm900_vm4, %v4850_v21 }
 0x1ab   : > { %4295 = vmatpush3.bf16.xpose.msra.mxu1 %v2235_v30  ;;  %4296 = vmatprep.mubr.msk.bf16.mxu1 %vm4501_vm8, %v4500_v4  ;;  %v215_v30 = vld [vmem:[%s5050_s26 + $0x6] sm:$0x3] }
 0x1ac   : > { %4306 = vmatprep.subr.bf16.mxu1 %v4500_v4 }
 0x1ae   : > { %4291 = vmatmul.mubr.msk.bf16.vlgmr.msra.gmra.mxu0 %vm900_vm4, %v4862_v26 }
 0x1af   : > { %4301 = vmatpush3.bf16.xpose.msra.mxu0 %v2280_v33  ;;  %4302 = vmatprep.mubr.msk.bf16.mxu0 %vm4501_vm8, %v4500_v4 }
 0x1b0   : > { %4312 = vmatprep.subr.bf16.mxu0 %v4500_v4 }
 0x1b2   : > { %4297 = vmatmul.mubr.msk.bf16.vlgmr.msra.gmra.mxu1 %vm900_vm4, %v4868_v27 }
 0x1b3   : > { %4307 = vmatpush3.bf16.xpose.msra.mxu1 %v2325_v39  ;;  %4308 = vmatprep.mubr.msk.bf16.mxu1 %vm4501_vm8, %v4500_v4 }
 0x1b4   : > { %4318 = vmatprep.subr.bf16.mxu1 %v4500_v4 }
 0x1b6   : > { %4303 = vmatmul.mubr.msk.bf16.vlgmr.msra.gmra.mxu0 %vm900_vm4, %v4880_v35 }
 0x1b7   : > { %4313 = vmatpush3.bf16.xpose.msra.mxu0 %v2370_v42  ;;  %4314 = vmatprep.mubr.msk.bf16.mxu0 %vm4501_vm8, %v4500_v4  ;;  %v5102_v42 = vunpack.c.l.bf16 %v215_v30 }
 0x1b8   : > { %4324 = vmatprep.subr.bf16.mxu0 %v4500_v4 }
 0x1ba   : > { %4309 = vmatmul.mubr.msk.bf16.vlgmr.msra.gmra.mxu1 %vm900_vm4, %v4886_v36 }
 0x1bb   : > { %4319 = vmatpush3.bf16.xpose.msra.mxu1 %v2415_v48  ;;  %4320 = vmatprep.mubr.msk.bf16.mxu1 %vm4501_vm8, %v4500_v4 }
 0x1bc   : > { %4330 = vmatprep.subr.bf16.mxu1 %v4500_v4 }
 0x1be   : > { %4315 = vmatmul.mubr.msk.bf16.vlgmr.msra.gmra.mxu0 %vm900_vm4, %v4898_v45 }
 0x1bf   : > { %4325 = vmatpush3.bf16.xpose.msra.mxu0 %v2460_v50  ;;  %4326 = vmatprep.mubr.msk.bf16.mxu0 %vm4501_vm8, %v4500_v4 }
 0x1c0   : > { %4336 = vmatprep.subr.bf16.mxu0 %v4500_v4 }
 0x1c2   : > { %4321 = vmatmul.mubr.msk.bf16.vlgmr.msra.gmra.mxu1 %vm900_vm4, %v4904_v46 }
 0x1c3   : > { %4331 = vmatpush3.bf16.xpose.msra.mxu1 %v2505_v53  ;;  %4332 = vmatprep.mubr.msk.bf16.mxu1 %vm4501_vm8, %v4500_v4 }
 0x1c4   : > { %4342 = vmatprep.subr.bf16.mxu1 %v4500_v4 }
 0x1c6   : > { %4327 = vmatmul.mubr.msk.bf16.vlgmr.msra.gmra.mxu0 %vm900_vm4, %v4916_v52 }
 0x1c7   : > { %4337 = vmatpush3.bf16.xpose.msra.mxu0 %v2692_v56  ;;  %4338 = vmatprep.mubr.msk.bf16.mxu0 %vm4501_vm8, %v4500_v4 }
 0x1c8   : > { %4348 = vmatprep.subr.bf16.mxu0 %v4500_v4 }
 0x1ca   : > { %4333 = vmatmul.mubr.msk.bf16.vlgmr.msra.gmra.mxu1 %vm900_vm4, %v4923_v59 }
 0x1cb   : > { %4343 = vmatpush3.bf16.xpose.msra.mxu1 %v2735_v60  ;;  %4344 = vmatprep.mubr.msk.bf16.mxu1 %vm4501_vm8, %v4500_v4 }
 0x1cc   : > { %4354 = vmatprep.subr.bf16.mxu1 %v4500_v4 }
 0x1ce   : > { %4339 = vmatmul.mubr.msk.bf16.vlgmr.msra.gmra.mxu0 %vm900_vm4, %v4774_v58  ;;  %v2907_v58 = vsel %vm900_vm4, %v4662_v41, 0 }
 0x1cf   : > { %4349 = vmatpush3.bf16.xpose.msra.mxu0 %v2778_v38  ;;  %4350 = vmatprep.mubr.msk.bf16.mxu0 %vm4501_vm8, %v4500_v4 }
 0x1d0   : > { %4360 = vmatprep.subr.bf16.mxu0 %v4500_v4 }
 0x1d2   : > { %4345 = vmatmul.mubr.msk.bf16.vlgmr.msra.gmra.mxu1 %vm900_vm4, %v4769_v57  ;;  %v212_v57 = vld [vmem:[%s5050_s26] sm:$0x3] }
 0x1d3   : > { %4355 = vmatpush3.bf16.xpose.msra.mxu1 %v2821_v34  ;;  %4356 = vmatprep.mubr.msk.bf16.mxu1 %vm4501_vm8, %v4500_v4  ;;  %v5070_v28 = vunpack.c.l.bf16 %v212_v57 }
 0x1d4   : > { %4366 = vmatprep.subr.bf16.mxu1 %v4500_v4 }
 0x1d6   : > { %4351 = vmatmul.mubr.msk.bf16.vlgmr.msra.gmra.mxu0 %vm900_vm4, %v4796_v0 }
 0x1d7   : > { %4361 = vmatpush3.bf16.xpose.msra.mxu0 %v2864_v55  ;;  %4362 = vmatprep.mubr.msk.bf16.mxu0 %vm4501_vm8, %v4500_v4 }
 0x1d8   : > { %4372 = vmatprep.subr.bf16.mxu0 %v4500_v4 }
 0x1da   : > { %4357 = vmatmul.mubr.msk.bf16.vlgmr.msra.gmra.mxu1 %vm900_vm4, %v4806_v6  ;;  %v2950_v6 = vsel %vm900_vm4, %v4674_v2, 0  ;;  %v2993_v2 = vsel %vm900_vm4, %v4678_v16, 0  ;;  %v3036_v16 = vsel %vm900_vm4, %v4690_v43, 0  ;;  %v3079_v43 = vsel %vm900_vm4, %v4694_v54, 0 }
 0x1db   : > { %4367 = vmatpush3.bf16.xpose.msra.mxu1 %v2907_v58  ;;  %4368 = vmatprep.mubr.msk.bf16.mxu1 %vm4501_vm8, %v4500_v4  ;;  %v3122_v58 = vsel %vm900_vm4, %v4706_v20, 0 }
 0x1dc   : > { %4378 = vmatprep.subr.bf16.mxu1 %v4500_v4 }
 0x1dd   : > { %v990_v0 = vpop.f32.mrf.mxu1  ;;  %v941_v63 = vpop.f32.mrf.mxu0 }
 0x1de   : > { %4363 = vmatmul.mubr.msk.bf16.vlgmr.msra.gmra.mxu0 %vm900_vm4, %v4826_v11  ;;  %v1683_v41 = vsub.f32 %v5066_v62, %v990_v0  ;;  %v1682_v7 = vsub.f32 %v5070_v28, %v941_v63 }
 0x1df   : > { %4373 = vmatpush3.bf16.xpose.msra.mxu0 %v2950_v6  ;;  %4374 = vmatprep.mubr.msk.bf16.mxu0 %vm4501_vm8, %v4500_v4  ;;  %v4154_v8 = vpop.f32.mrf.mxu1  ;;  %v4148_v10 = vpop.f32.mrf.mxu0 }
 0x1e0   : > { %4384 = vmatprep.subr.bf16.mxu0 %v4500_v4  ;;  %v1699_v9 = vand.u32 2147483647, %v1683_v41  ;;  %v1698_v11 = vand.u32 2147483647, %v1682_v7  ;;  %v216_v10 = vld [vmem:[%s5050_s26 + $0x8] sm:$0x3] }
 0x1e1   : > { %v993_v15 = vpop.f32.mrf.mxu1  ;;  %v944_v18 = vpop.f32.mrf.mxu0 }
 0x1e2   : > { %4369 = vmatmul.mubr.msk.bf16.vlgmr.msra.gmra.mxu1 %vm900_vm4, %v4832_v12  ;;  %v1722_v17 = vsel %vm1714_vm5, %v1699_v9, 0.0  ;;  %v1715_v22 = vsel %vm1714_vm5, %v1698_v11, 0.0 }
 0x1e3   : > { %4379 = vmatpush3.bf16.xpose.msra.mxu1 %v2993_v2  ;;  %4380 = vmatprep.mubr.msk.bf16.mxu1 %vm4501_vm8, %v4500_v4  ;;  %v1723_v23 = vrot.slane %v1722_v17, 4  ;;  %v4155_v24 = vpop.f32.mrf.mxu1  ;;  %v1716_v29 = vrot.slane %v1715_v22, 4  ;;  %v4149_v12 = vpop.f32.mrf.mxu0  ;;  %v5130_v2 = vunpack.c.l.bf16 %v216_v10 }
 0x1e4   : > { %4390 = vmatprep.subr.bf16.mxu1 %v4500_v4 }
 0x1e5   : > { %v1724_v31 = vadd.f32 %v1723_v23, %v1722_v17  ;;  %v1717_v33 = vadd.f32 %v1716_v29, %v1715_v22  ;;  %v217_v22 = vld [vmem:[%s5050_s26 + $0xa] sm:$0x3] }
 0x1e6   : > { %4375 = vmatmul.mubr.msk.bf16.vlgmr.msra.gmra.mxu0 %vm900_vm4, %v4844_v19  ;;  %v1039_v37 = vpop.f32.mrf.mxu0  ;;  %v5141_v12 = vunpack.c.l.bf16 %v217_v22 }
 0x1e7   : > { %4385 = vmatpush3.bf16.xpose.msra.mxu0 %v3036_v16  ;;  %4386 = vmatprep.mubr.msk.bf16.mxu0 %vm4501_vm8, %v4500_v4  ;;  %v1725_v39 = vrot.slane %v1724_v31, 2  ;;  %v1684_v40 = vsub.f32 %v5091_v25, %v1039_v37  ;;  %v1718_v47 = vrot.slane %v1717_v33, 2 }
 0x1e8   : > { %4396 = vmatprep.subr.bf16.mxu0 %v4500_v4  ;;  %v4160_v48 = vpop.f32.mrf.mxu0 }
 0x1e9   : > { %v1726_v49 = vadd.f32 %v1725_v39, %v1724_v31  ;;  %v1700_v19 = vand.u32 2147483647, %v1684_v40  ;;  %v1719_v50 = vadd.f32 %v1718_v47, %v1717_v33 }
 0x1ea   : > { %4381 = vmatmul.mubr.msk.bf16.vlgmr.msra.gmra.mxu1 %vm900_vm4, %v4850_v21  ;;  %v1088_v1 = vpop.f32.mrf.mxu1  ;;  %v1042_v53 = vpop.f32.mrf.mxu0 }
 0x1eb   : > { %4391 = vmatpush3.bf16.xpose.msra.mxu1 %v3079_v43  ;;  %4392 = vmatprep.mubr.msk.bf16.mxu1 %vm4501_vm8, %v4500_v4  ;;  %v1727_v56 = vrot.slane %v1726_v49, 1  ;;  %v1729_v60 = vsel %vm1714_vm5, %v1700_v19, 0.0  ;;  %v1685_v38 = vsub.f32 %v5102_v42, %v1088_v1  ;;  %v1720_v34 = vrot.slane %v1719_v50, 1 }
 0x1ec   : > { %4402 = vmatprep.subr.bf16.mxu1 %v4500_v4  ;;  %v1730_v55 = vrot.slane %v1729_v60, 4  ;;  %v4166_v21 = vpop.f32.mrf.mxu1  ;;  %v4161_v5 = vpop.f32.mrf.mxu0 }
 0x1ed   : > { %v1728_v57 = vadd.f32 %v1727_v56, %v1726_v49  ;;  %v1701_v54 = vand.u32 2147483647, %v1685_v38  ;;  %v1721_v0 = vadd.f32 %v1720_v34, %v1719_v50  ;;  %v3294_v50 = vsel %vm900_vm4, %v4738_v44, 0  ;;  %v218_v21 = vld [vmem:[%s5050_s26 + $0xc] sm:$0x3] }
 0x1ee   : > { %4387 = vmatmul.mubr.msk.bf16.vlgmr.msra.gmra.mxu0 %vm900_vm4, %v4862_v26  ;;  %v1731_v6 = vadd.f32 %v1730_v55, %v1729_v60  ;;  %v1091_v63 = vpop.f32.mrf.mxu1  ;;  %v3337_v44 = vsel %vm900_vm4, %v4742_v51, 0 }
 0x1ef   : > { %4397 = vmatpush3.bf16.xpose.msra.mxu0 %v3122_v58  ;;  %4398 = vmatprep.mubr.msk.bf16.mxu0 %vm4501_vm8, %v4500_v4  ;;  %v3571_v41 = vrot.slane %v1728_v57, 7  ;;  %v1736_v7 = vsel %vm1714_vm5, %v1701_v54, 0.0  ;;  %v5169_v57 = vunpack.c.l.bf16 %v218_v21 }
 0x1f0   : > { %4408 = vmatprep.subr.bf16.mxu0 %v4500_v4  ;;  %v1732_v8 = vrot.slane %v1731_v6, 2  ;;  %v1737_v9 = vrot.slane %v1736_v7, 4  ;;  %v4167_v26 = vpop.f32.mrf.mxu1 }
 0x1f1   : > { %v3573_v20 = vsel %vm3572_vm6, %v3571_v41, %v1721_v0  ;;  %v219_v0 = vld [vmem:[%s5050_s26 + $0xe] sm:$0x3] }
 0x1f2   : > { %4393 = vmatmul.mubr.msk.bf16.vlgmr.msra.gmra.mxu1 %vm900_vm4, %v4868_v27  ;;  %v1733_v11 = vadd.f32 %v1732_v8, %v1731_v6  ;;  %v1738_v15 = vadd.f32 %v1737_v9, %v1736_v7  ;;  %v3208_v27 = vsel %vm900_vm4, %v4722_v61, 0  ;;  %v3251_v61 = vsel %vm900_vm4, %v4726_v13, 0 }
 0x1f3   : > { %4403 = vmatpush3.bf16.xpose.msra.mxu1 %v3165_v14  ;;  %4404 = vmatprep.mubr.msk.bf16.mxu1 %vm4501_vm8, %v4500_v4  ;;  %v5175_v41 = vunpack.c.l.bf16 %v219_v0 }
 0x1f4   : > { %4414 = vmatprep.subr.bf16.mxu1 %v4500_v4  ;;  %v1734_v17 = vrot.slane %v1733_v11, 1  ;;  %v1739_v18 = vrot.slane %v1738_v15, 2 }
 0x1f6   : > { %4399 = vmatmul.mubr.msk.bf16.vlgmr.msra.gmra.mxu0 %vm900_vm4, %v4880_v35  ;;  %v1735_v32 = vadd.f32 %v1734_v17, %v1733_v11  ;;  %v1740_v23 = vadd.f32 %v1739_v18, %v1738_v15  ;;  %v1137_v24 = vpop.f32.mrf.mxu0 }
 0x1f7   : > { %4409 = vmatpush3.bf16.xpose.msra.mxu0 %v3208_v27  ;;  %4410 = vmatprep.mubr.msk.bf16.mxu0 %vm4501_vm8, %v4500_v4  ;;  %v1686_v29 = vsub.f32 %v5130_v2, %v1137_v24 }
 0x1f8   : > { %4420 = vmatprep.subr.bf16.mxu0 %v4500_v4  ;;  %v3574_v30 = vrot.slane %v1735_v32, 6  ;;  %v1741_v31 = vrot.slane %v1740_v23, 1  ;;  %v4172_v35 = vpop.f32.mrf.mxu0 }
 0x1f9   : > { %v1702_v16 = vand.u32 2147483647, %v1686_v29 }
 0x1fa   : > { %4405 = vmatmul.mubr.msk.bf16.vlgmr.msra.gmra.mxu1 %vm900_vm4, %v4886_v36  ;;  %v3576_v33 = vsel %vm3575_vm7, %v3574_v30, %v3573_v20  ;;  %v1742_v37 = vadd.f32 %v1741_v31, %v1740_v23  ;;  %v1186_v39 = vpop.f32.mrf.mxu1  ;;  %v1140_v40 = vpop.f32.mrf.mxu0 }
 0x1fb   : > { %4415 = vmatpush3.bf16.xpose.msra.mxu1 %v3251_v61  ;;  %4416 = vmatprep.mubr.msk.bf16.mxu1 %vm4501_vm8, %v4500_v4  ;;  %v1743_v47 = vsel %vm1714_vm5, %v1702_v16, 0.0  ;;  %v1687_v48 = vsub.f32 %v5141_v12, %v1186_v39  ;;  %v220_v16 = vld [vmem:[%s5050_s26 + $0x10] sm:$0x3] }
 0x1fc   : > { %v3577_v49 = vrot.slane %v1742_v37, 5  ;;  %4426 = vmatprep.subr.bf16.mxu1 %v4500_v4  ;;  %v1744_v36 = vrot.slane %v1743_v47, 4  ;;  %v4178_v13 = vpop.f32.mrf.mxu1  ;;  %v4173_v19 = vpop.f32.mrf.mxu0  ;;  %v5185_v37 = vunpack.c.l.bf16 %v220_v16 }
 0x1fd   : > { %v1703_v43 = vand.u32 2147483647, %v1687_v48 }
 0x1fe   : > { %4411 = vmatmul.mubr.msk.bf16.vlgmr.msra.gmra.mxu0 %vm900_vm4, %v4898_v45  ;;  %v3579_v1 = vsel %vm3578_vm9, %v3577_v49, %v3576_v33  ;;  %v1745_v53 = vadd.f32 %v1744_v36, %v1743_v47  ;;  %v1189_v56 = vpop.f32.mrf.mxu1  ;;  %v221_v47 = vld [vmem:[%s5050_s26 + $0x12] sm:$0x3] }
 0x1ff   : > { %4421 = vmatpush3.bf16.xpose.msra.mxu0 %v3294_v50  ;;  %4422 = vmatprep.mubr.msk.bf16.mxu0 %vm4501_vm8, %v4500_v4  ;;  %v1750_v60 = vsel %vm1714_vm5, %v1703_v43, 0.0  ;;  %v5189_v19 = vunpack.c.l.bf16 %v221_v47 }
 0x200   : > { %v1746_v38 = vrot.slane %v1745_v53, 2  ;;  %v1751_v34 = vrot.slane %v1750_v60, 4  ;;  %v4179_v55 = vpop.f32.mrf.mxu1 }
 0x202   : > { %4417 = vmatmul.mubr.msk.bf16.vlgmr.msra.gmra.mxu1 %vm900_vm4, %v4904_v46  ;;  %v1747_v45 = vadd.f32 %v1746_v38, %v1745_v53  ;;  %v1752_v5 = vadd.f32 %v1751_v34, %v1750_v60 }
 0x203   : > { %4427 = vmatpush3.bf16.xpose.msra.mxu1 %v3337_v44  ;;  %4428 = vmatprep.mubr.msk.bf16.mxu1 %vm4501_vm8, %v4500_v4  ;;  %vm3584_vm8 = vcmask 1045509  }
 0x204   : > { %v1748_v54 = vrot.slane %v1747_v45, 1  ;;  %v1753_v58 = vrot.slane %v1752_v5, 2 }
 0x206   : > { %4423 = vmatmul.mubr.msk.bf16.vlgmr.msra.gmra.mxu0 %vm900_vm4, %v4916_v52  ;;  %v1749_v6 = vadd.f32 %v1748_v54, %v1747_v45  ;;  %v1754_v63 = vadd.f32 %v1753_v58, %v1752_v5  ;;  %v1235_v46 = vpop.f32.mrf.mxu0 }
 0x207   : > { %v1688_v51 = vsub.f32 %v5169_v57, %v1235_v46 }
 0x208   : > { %v3580_v7 = vrot.slane %v1749_v6, 4  ;;  %v1755_v8 = vrot.slane %v1754_v63, 1  ;;  %v4184_v9 = vpop.f32.mrf.mxu0 }
 0x209   : > { %v1704_v26 = vand.u32 2147483647, %v1688_v51  ;;  %v222_v9 = vld [vmem:[%s5050_s26 + $0x14] sm:$0x3] }
 0x20a   : > { %v3582_v10 = vsel %vm3581_vm10, %v3580_v7, %v3579_v1  ;;  %v1756_v20 = vadd.f32 %v1755_v8, %v1754_v63  ;;  %4429 = vmatmul.mubr.msk.bf16.vlgmr.msra.gmra.mxu1 %vm900_vm4, %v4923_v59  ;;  %v1284_v14 = vpop.f32.mrf.mxu1  ;;  %v1238_v52 = vpop.f32.mrf.mxu0 }
 0x20b   : > { %v1757_v11 = vsel %vm1714_vm5, %v1704_v26, 0.0  ;;  %v1689_v15 = vsub.f32 %v5175_v41, %v1284_v14  ;;  %v223_v52 = vld [vmem:[%s5050_s26 + $0x16] sm:$0x3] }
 0x20c   : > { %v3583_v17 = vrot.slane %v1756_v20, 3  ;;  %v1758_v18 = vrot.slane %v1757_v11, 4  ;;  %v4190_v22 = vpop.f32.mrf.mxu1  ;;  %v4185_v27 = vpop.f32.mrf.mxu0  ;;  %v5199_v20 = vunpack.c.l.bf16 %v222_v9 }
 0x20d   : > { %v1705_v32 = vand.u32 2147483647, %v1689_v15  ;;  %v5203_v22 = vunpack.c.l.bf16 %v223_v52 }
 0x20e   : > { %v3585_v23 = vsel %vm3584_vm8, %v3583_v17, %v3582_v10  ;;  %v1759_v24 = vadd.f32 %v1758_v18, %v1757_v11  ;;  %v1287_v29 = vpop.f32.mrf.mxu1 }
 0x20f   : > { %v1764_v59 = vsel %vm1714_vm5, %v1705_v32, 0.0 }
 0x210   : > { %v1760_v30 = vrot.slane %v1759_v24, 2  ;;  %v1765_v31 = vrot.slane %v1764_v59, 4  ;;  %v4191_v35 = vpop.f32.mrf.mxu1 }
 0x212   : > { %v1761_v61 = vadd.f32 %v1760_v30, %v1759_v24  ;;  %v1766_v33 = vadd.f32 %v1765_v31, %v1764_v59 }
 0x214   : > { %v1762_v39 = vrot.slane %v1761_v61, 1  ;;  %v1767_v40 = vrot.slane %v1766_v33, 2 }
 0x216   : > { %v1763_v48 = vadd.f32 %v1762_v39, %v1761_v61  ;;  %v1768_v49 = vadd.f32 %v1767_v40, %v1766_v33  ;;  %v1333_v36 = vpop.f32.mrf.mxu0 }
 0x217   : > { %v1690_v13 = vsub.f32 %v5185_v37, %v1333_v36 }
 0x218   : > { %v3586_v43 = vrot.slane %v1763_v48, 2  ;;  %v1769_v50 = vrot.slane %v1768_v49, 1  ;;  %v4196_v1 = vpop.f32.mrf.mxu0 }
 0x219   : > { %v1706_v53 = vand.u32 2147483647, %v1690_v13 }
 0x21a   : > { %v3588_v56 = vsel %vm3587_vm11, %v3586_v43, %v3585_v23  ;;  %v1770_v60 = vadd.f32 %v1769_v50, %v1768_v49  ;;  %v1382_v38 = vpop.f32.mrf.mxu1  ;;  %v1336_v34 = vpop.f32.mrf.mxu0  ;;  %v224_v50 = vld [vmem:[%s5050_s26 + $0x18] sm:$0x3] }
 0x21b   : > { %v1771_v55 = vsel %vm1714_vm5, %v1706_v53, 0.0  ;;  %v1691_v21 = vsub.f32 %v5189_v19, %v1382_v38 }
 0x21c   : > { %v3589_v44 = vrot.slane %v1770_v60, 1  ;;  %v1772_v45 = vrot.slane %v1771_v55, 4  ;;  %v4202_v5 = vpop.f32.mrf.mxu1  ;;  %v4197_v54 = vpop.f32.mrf.mxu0  ;;  %v5210_v60 = vunpack.c.l.bf16 %v224_v50 }
 0x21d   : > { %v1707_v58 = vand.u32 2147483647, %v1691_v21 }
 0x21e   : > { %v1773_v0 = vadd.f32 %v1772_v45, %v1771_v55  ;;  %v1385_v6 = vpop.f32.mrf.mxu1  ;;  %v5195_v63 = vsel %vm3590_vm12, %v3589_v44, %v3588_v56  ;;  %v225_v55 = vld [vmem:[%s5050_s26 + $0x1a] sm:$0x3] }
 0x21f   : > { %v1778_v46 = vsel %vm1714_vm5, %v1707_v58, 0.0  ;;  %v5214_v54 = vunpack.c.l.bf16 %v225_v55 }
 0x220   : > { %v1774_v51 = vrot.slane %v1773_v0, 2  ;;  %v1779_v7 = vrot.slane %v1778_v46, 4  ;;  %v4203_v8 = vpop.f32.mrf.mxu1 }
 0x222   : > { %v1775_v26 = vadd.f32 %v1774_v51, %v1773_v0  ;;  %v1780_v10 = vadd.f32 %v1779_v7, %v1778_v46 }
 0x224   : > { %v1781_v14 = vrot.slane %v1780_v10, 2  ;;  %v1776_v11 = vrot.slane %v1775_v26, 1 }
 0x226   : > { %v1782_v15 = vadd.f32 %v1781_v14, %v1780_v10  ;;  %v1431_v17 = vpop.f32.mrf.mxu0  ;;  %v1777_v24 = vadd.f32 %v1776_v11, %v1775_v26 }
 0x227   : > { %v1692_v18 = vsub.f32 %v5199_v20, %v1431_v17 }
 0x228   : > { %v1783_v27 = vrot.slane %v1782_v15, 1  ;;  %v4208_v32 = vpop.f32.mrf.mxu0 }
 0x229   : > { %v1708_v23 = vand.u32 2147483647, %v1692_v18 }
 0x22a   : > { %v1784_v29 = vadd.f32 %v1783_v27, %v1782_v15  ;;  %v1480_v59 = vpop.f32.mrf.mxu1  ;;  %v1434_v30 = vpop.f32.mrf.mxu0 }
 0x22b   : > { %v1785_v31 = vsel %vm1714_vm5, %v1708_v23, 0.0  ;;  %v1693_v35 = vsub.f32 %v5203_v22, %v1480_v59  ;;  %v226_v30 = vld [vmem:[%s5050_s26 + $0x1c] sm:$0x3] }
 0x22c   : > { %v3592_v16 = vrot.slane %v1784_v29, 7  ;;  %v1786_v61 = vrot.slane %v1785_v31, 4  ;;  %v4209_v33 = vpop.f32.mrf.mxu0  ;;  %v4214_v39 = vpop.f32.mrf.mxu1 }
 0x22d   : > { %v1709_v40 = vand.u32 2147483647, %v1693_v35  ;;  %v227_v39 = vld [vmem:[%s5050_s26 + $0x1e] sm:$0x3] }
 0x22e   : > { %v3593_v47 = vsel %vm3572_vm6, %v3592_v16, %v1777_v24  ;;  %v1787_v48 = vadd.f32 %v1786_v61, %v1785_v31  ;;  %v1483_v49 = vpop.f32.mrf.mxu1  ;;  %v5222_v16 = vunpack.c.l.bf16 %v226_v30 }
 0x22f   : > { %v1792_v36 = vsel %vm1714_vm5, %v1709_v40, 0.0 }
 0x230   : > { %v1788_v13 = vrot.slane %v1787_v48, 2  ;;  %v1793_v43 = vrot.slane %v1792_v36, 4  ;;  %v4215_v1 = vpop.f32.mrf.mxu1 }
 0x232   : > { %v1789_v53 = vadd.f32 %v1788_v13, %v1787_v48  ;;  %v1794_v56 = vadd.f32 %v1793_v43, %v1792_v36  ;;  %v5226_v36 = vunpack.c.l.bf16 %v227_v39 }
 0x234   : > { %v1790_v38 = vrot.slane %v1789_v53, 1  ;;  %v1795_v34 = vrot.slane %v1794_v56, 2 }
 0x236   : > { %v1791_v21 = vadd.f32 %v1790_v38, %v1789_v53  ;;  %v1796_v44 = vadd.f32 %v1795_v34, %v1794_v56  ;;  %v1529_v45 = vpop.f32.mrf.mxu0 }
 0x237   : > { %v1694_v5 = vsub.f32 %v5210_v60, %v1529_v45 }
 0x238   : > { %v3594_v58 = vrot.slane %v1791_v21, 6  ;;  %v1797_v0 = vrot.slane %v1796_v44, 1  ;;  %v4220_v6 = vpop.f32.mrf.mxu0 }
 0x239   : > { %v1710_v46 = vand.u32 2147483647, %v1694_v5 }
 0x23a   : > { %v3595_v51 = vsel %vm3575_vm7, %v3594_v58, %v3593_v47  ;;  %v1798_v7 = vadd.f32 %v1797_v0, %v1796_v44  ;;  %v1578_v8 = vpop.f32.mrf.mxu1  ;;  %v1532_v9 = vpop.f32.mrf.mxu0 }
 0x23b   : > { %v1799_v26 = vsel %vm1714_vm5, %v1710_v46, 0.0  ;;  %v1695_v10 = vsub.f32 %v5214_v54, %v1578_v8 }
 0x23c   : > { %v3596_v14 = vrot.slane %v1798_v7, 5  ;;  %v1800_v52 = vrot.slane %v1799_v26, 4  ;;  %v4226_v11 = vpop.f32.mrf.mxu1  ;;  %v4221_v15 = vpop.f32.mrf.mxu0 }
 0x23d   : > { %v1711_v17 = vand.u32 2147483647, %v1695_v10 }
 0x23e   : > { %v3597_v18 = vsel %vm3578_vm9, %v3596_v14, %v3595_v51  ;;  %v1801_v27 = vadd.f32 %v1800_v52, %v1799_v26  ;;  %v1581_v32 = vpop.f32.mrf.mxu1 }
 0x23f   : > { %v1806_v23 = vsel %vm1714_vm5, %v1711_v17, 0.0 }
 0x240   : > { %v1802_v24 = vrot.slane %v1801_v27, 2  ;;  %v1807_v29 = vrot.slane %v1806_v23, 4  ;;  %v4227_v59 = vpop.f32.mrf.mxu1 }
 0x242   : > { %v1803_v31 = vadd.f32 %v1802_v24, %v1801_v27  ;;  %v1808_v35 = vadd.f32 %v1807_v29, %v1806_v23 }
 0x244   : > { %v1804_v61 = vrot.slane %v1803_v31, 1  ;;  %v1809_v33 = vrot.slane %v1808_v35, 2 }
 0x246   : > { %v1805_v40 = vadd.f32 %v1804_v61, %v1803_v31  ;;  %v1810_v47 = vadd.f32 %v1809_v33, %v1808_v35  ;;  %v1627_v48 = vpop.f32.mrf.mxu0 }
 0x247   : > { %v1696_v49 = vsub.f32 %v5222_v16, %v1627_v48 }
 0x248   : > { %v3598_v13 = vrot.slane %v1805_v40, 4  ;;  %v1811_v43 = vrot.slane %v1810_v47, 1  ;;  %v4232_v50 = vpop.f32.mrf.mxu0 }
 0x249   : > { %v1712_v1 = vand.u32 2147483647, %v1696_v49 }
 0x24a   : > { %v3599_v53 = vsel %vm3581_vm10, %v3598_v13, %v3597_v18  ;;  %v1812_v56 = vadd.f32 %v1811_v43, %v1810_v47  ;;  %v1630_v38 = vpop.f32.mrf.mxu0  ;;  %v1676_v34 = vpop.f32.mrf.mxu1 }
 0x24b   : > { %v1813_v55 = vsel %vm1714_vm5, %v1712_v1, 0.0  ;;  %v1697_v21 = vsub.f32 %v5226_v36, %v1676_v34 }
 0x24c   : > { %v3600_v44 = vrot.slane %v1812_v56, 3  ;;  %v1814_v45 = vrot.slane %v1813_v55, 4  ;;  %v4233_v5 = vpop.f32.mrf.mxu0  ;;  %v4238_v58 = vpop.f32.mrf.mxu1 }
 0x24d   : > { %v1713_v0 = vand.u32 2147483647, %v1697_v21 }
 0x24e   : > { %v3601_v6 = vsel %vm3584_vm8, %v3600_v44, %v3599_v53  ;;  %v1815_v46 = vadd.f32 %v1814_v45, %v1813_v55  ;;  %v1679_v51 = vpop.f32.mrf.mxu1  ;;  %v1866_v7 = vpop.f32.mrf.mxu0 }
 0x24f   : > { %v1820_v8 = vsel %vm1714_vm5, %v1713_v0, 0.0  ;;  %v2547_v9 = vsub.f32 %v5070_v28, %v1866_v7 }
 0x250   : > { %v1816_v26 = vrot.slane %v1815_v46, 2  ;;  %v1821_v10 = vrot.slane %v1820_v8, 4  ;;  %v4239_v14 = vpop.f32.mrf.mxu1  ;;  %v4244_v52 = vpop.f32.mrf.mxu0 }
 0x251   : > { %v2563_v11 = vand.u32 2147483647, %v2547_v9 }
 0x252   : > { %v1817_v15 = vadd.f32 %v1816_v26, %v1815_v46  ;;  %v1822_v17 = vadd.f32 %v1821_v10, %v1820_v8  ;;  %v1869_v18 = vpop.f32.mrf.mxu0  ;;  %v1911_v27 = vpop.f32.mrf.mxu1 }
 0x253   : > { %v2579_v32 = vsel %vm1714_vm5, %v2563_v11, 0.0  ;;  %v2548_v23 = vsub.f32 %v5066_v62, %v1911_v27 }
 0x254   : > { %v1818_v24 = vrot.slane %v1817_v15, 1  ;;  %v1823_v29 = vrot.slane %v1822_v17, 2  ;;  %v2580_v59 = vrot.slane %v2579_v32, 4  ;;  %v4245_v30 = vpop.f32.mrf.mxu0  ;;  %v4250_v31 = vpop.f32.mrf.mxu1 }
 0x255   : > { %v2564_v35 = vand.u32 2147483647, %v2548_v23 }
 0x256   : > { %v1819_v61 = vadd.f32 %v1818_v24, %v1817_v15  ;;  %v1824_v33 = vadd.f32 %v1823_v29, %v1822_v17  ;;  %v2581_v39 = vadd.f32 %v2580_v59, %v2579_v32  ;;  %v1914_v40 = vpop.f32.mrf.mxu1  ;;  %v1956_v47 = vpop.f32.mrf.mxu0 }
 0x257   : > { %v2586_v48 = vsel %vm1714_vm5, %v2564_v35, 0.0  ;;  %v2549_v49 = vsub.f32 %v5091_v25, %v1956_v47 }
 0x258   : > { %v3602_v13 = vrot.slane %v1819_v61, 2  ;;  %v1825_v43 = vrot.slane %v1824_v33, 1  ;;  %v2582_v50 = vrot.slane %v2581_v39, 2  ;;  %v2587_v1 = vrot.slane %v2586_v48, 4  ;;  %v4251_v53 = vpop.f32.mrf.mxu1  ;;  %v4256_v56 = vpop.f32.mrf.mxu0 }
 0x259   : > { %v2565_v38 = vand.u32 2147483647, %v2549_v49 }
 0x25a   : > { %v3603_v34 = vsel %vm3587_vm11, %v3602_v13, %v3601_v6  ;;  %v1826_v55 = vadd.f32 %v1825_v43, %v1824_v33  ;;  %v2588_v21 = vadd.f32 %v2587_v1, %v2586_v48  ;;  %v1959_v44 = vpop.f32.mrf.mxu0  ;;  %v2001_v45 = vpop.f32.mrf.mxu1  ;;  %v2583_v5 = vadd.f32 %v2582_v50, %v2581_v39 }
 0x25b   : > { %v2593_v58 = vsel %vm1714_vm5, %v2565_v38, 0.0  ;;  %v2550_v0 = vsub.f32 %v5102_v42, %v2001_v45 }
 0x25c   : > { %v3604_v46 = vrot.slane %v1826_v55, 1  ;;  %v2589_v51 = vrot.slane %v2588_v21, 2  ;;  %v2594_v7 = vrot.slane %v2593_v58, 4  ;;  %v4257_v8 = vpop.f32.mrf.mxu0  ;;  %v4262_v9 = vpop.f32.mrf.mxu1  ;;  %v2584_v15 = vrot.slane %v2583_v5, 1 }
 0x25d   : > { %v2566_v26 = vand.u32 2147483647, %v2550_v0 }
 0x25e   : > { %v2590_v10 = vadd.f32 %v2589_v51, %v2588_v21  ;;  %v2595_v14 = vadd.f32 %v2594_v7, %v2593_v58  ;;  %v2004_v52 = vpop.f32.mrf.mxu1  ;;  %v2046_v11 = vpop.f32.mrf.mxu0  ;;  %v5242_v6 = vsel %vm3590_vm12, %v3604_v46, %v3603_v34  ;;  %v2585_v39 = vadd.f32 %v2584_v15, %v2583_v5 }
 0x25f   : > { %v2600_v17 = vsel %vm1714_vm5, %v2566_v26, 0.0  ;;  %v2551_v18 = vsub.f32 %v5130_v2, %v2046_v11 }
 0x260   : > { %v2591_v27 = vrot.slane %v2590_v10, 1  ;;  %v2596_v32 = vrot.slane %v2595_v14, 2  ;;  %v2601_v23 = vrot.slane %v2600_v17, 4  ;;  %v4263_v24 = vpop.f32.mrf.mxu1  ;;  %v4268_v29 = vpop.f32.mrf.mxu0 }
 0x261   : > { %v2567_v59 = vand.u32 2147483647, %v2551_v18 }
 0x262   : > { %v2592_v30 = vadd.f32 %v2591_v27, %v2590_v10  ;;  %v2597_v31 = vadd.f32 %v2596_v32, %v2595_v14  ;;  %v2602_v35 = vadd.f32 %v2601_v23, %v2600_v17  ;;  %v2049_v61 = vpop.f32.mrf.mxu0  ;;  %v2091_v33 = vpop.f32.mrf.mxu1 }
 0x263   : > { %v2607_v40 = vsel %vm1714_vm5, %v2567_v59, 0.0  ;;  %v2552_v47 = vsub.f32 %v5141_v12, %v2091_v33 }
 0x264   : > { %v3606_v48 = vrot.slane %v2592_v30, 7  ;;  %v2598_v49 = vrot.slane %v2597_v31, 1  ;;  %v2603_v13 = vrot.slane %v2602_v35, 2  ;;  %v2608_v43 = vrot.slane %v2607_v40, 4  ;;  %v4269_v50 = vpop.f32.mrf.mxu0  ;;  %v4274_v1 = vpop.f32.mrf.mxu1 }
 0x265   : > { %v2568_v53 = vand.u32 2147483647, %v2552_v47 }
 0x266   : > { %v3607_v56 = vsel %vm3572_vm6, %v3606_v48, %v2585_v39  ;;  %v2599_v38 = vadd.f32 %v2598_v49, %v2597_v31  ;;  %v2604_v34 = vadd.f32 %v2603_v13, %v2602_v35  ;;  %v2609_v55 = vadd.f32 %v2608_v43, %v2607_v40  ;;  %v2094_v21 = vpop.f32.mrf.mxu1  ;;  %v2136_v44 = vpop.f32.mrf.mxu0 }
 0x267   : > { %v2614_v45 = vsel %vm1714_vm5, %v2568_v53, 0.0  ;;  %v2553_v5 = vsub.f32 %v5169_v57, %v2136_v44 }
 0x268   : > { %v3608_v58 = vrot.slane %v2599_v38, 6  ;;  %v2605_v0 = vrot.slane %v2604_v34, 1  ;;  %v2610_v46 = vrot.slane %v2609_v55, 2  ;;  %v2615_v51 = vrot.slane %v2614_v45, 4  ;;  %v4275_v7 = vpop.f32.mrf.mxu1  ;;  %v4280_v8 = vpop.f32.mrf.mxu0 }
 0x269   : > { %v2569_v9 = vand.u32 2147483647, %v2553_v5 }
 0x26a   : > { %v3609_v26 = vsel %vm3575_vm7, %v3608_v58, %v3607_v56  ;;  %v2606_v10 = vadd.f32 %v2605_v0, %v2604_v34  ;;  %v2611_v14 = vadd.f32 %v2610_v46, %v2609_v55  ;;  %v2616_v52 = vadd.f32 %v2615_v51, %v2614_v45  ;;  %v2139_v11 = vpop.f32.mrf.mxu0  ;;  %v2181_v15 = vpop.f32.mrf.mxu1 }
 0x26b   : > { %v2621_v17 = vsel %vm1714_vm5, %v2569_v9, 0.0  ;;  %v2554_v18 = vsub.f32 %v5175_v41, %v2181_v15 }
 0x26c   : > { %v3610_v27 = vrot.slane %v2606_v10, 5  ;;  %v2612_v32 = vrot.slane %v2611_v14, 1  ;;  %v2617_v23 = vrot.slane %v2616_v52, 2  ;;  %v2622_v24 = vrot.slane %v2621_v17, 4  ;;  %v4281_v29 = vpop.f32.mrf.mxu0  ;;  %v4286_v59 = vpop.f32.mrf.mxu1 }
 0x26d   : > { %v2570_v30 = vand.u32 2147483647, %v2554_v18 }
 0x26e   : > { %v3611_v31 = vsel %vm3578_vm9, %v3610_v27, %v3609_v26  ;;  %v2613_v35 = vadd.f32 %v2612_v32, %v2611_v14  ;;  %v2618_v61 = vadd.f32 %v2617_v23, %v2616_v52  ;;  %v2623_v33 = vadd.f32 %v2622_v24, %v2621_v17  ;;  %v2184_v39 = vpop.f32.mrf.mxu1  ;;  %v2226_v40 = vpop.f32.mrf.mxu0 }
 0x26f   : > { %v2628_v47 = vsel %vm1714_vm5, %v2570_v30, 0.0  ;;  %v2555_v48 = vsub.f32 %v5185_v37, %v2226_v40 }
 0x270   : > { %v3612_v49 = vrot.slane %v2613_v35, 4  ;;  %v2619_v13 = vrot.slane %v2618_v61, 1  ;;  %v2624_v43 = vrot.slane %v2623_v33, 2  ;;  %v2629_v50 = vrot.slane %v2628_v47, 4  ;;  %v4287_v1 = vpop.f32.mrf.mxu1  ;;  %v4292_v53 = vpop.f32.mrf.mxu0 }
 0x271   : > { %v2571_v56 = vand.u32 2147483647, %v2555_v48 }
 0x272   : > { %v3613_v38 = vsel %vm3581_vm10, %v3612_v49, %v3611_v31  ;;  %v2620_v34 = vadd.f32 %v2619_v13, %v2618_v61  ;;  %v2625_v55 = vadd.f32 %v2624_v43, %v2623_v33  ;;  %v2630_v21 = vadd.f32 %v2629_v50, %v2628_v47  ;;  %v2229_v44 = vpop.f32.mrf.mxu0  ;;  %v2271_v45 = vpop.f32.mrf.mxu1 }
 0x273   : > { %v2635_v5 = vsel %vm1714_vm5, %v2571_v56, 0.0  ;;  %v2556_v58 = vsub.f32 %v5189_v19, %v2271_v45 }
 0x274   : > { %v3614_v0 = vrot.slane %v2620_v34, 3  ;;  %v2626_v46 = vrot.slane %v2625_v55, 1  ;;  %v2631_v51 = vrot.slane %v2630_v21, 2  ;;  %v2636_v7 = vrot.slane %v2635_v5, 4  ;;  %v4293_v8 = vpop.f32.mrf.mxu0  ;;  %v4298_v9 = vpop.f32.mrf.mxu1 }
 0x275   : > { %v2572_v26 = vand.u32 2147483647, %v2556_v58 }
 0x276   : > { %v3615_v10 = vsel %vm3584_vm8, %v3614_v0, %v3613_v38  ;;  %v2627_v14 = vadd.f32 %v2626_v46, %v2625_v55  ;;  %v2632_v52 = vadd.f32 %v2631_v51, %v2630_v21  ;;  %v2637_v11 = vadd.f32 %v2636_v7, %v2635_v5  ;;  %v2274_v15 = vpop.f32.mrf.mxu1  ;;  %v2316_v17 = vpop.f32.mrf.mxu0 }
 0x277   : > { %v2642_v18 = vsel %vm1714_vm5, %v2572_v26, 0.0  ;;  %v2557_v27 = vsub.f32 %v5199_v20, %v2316_v17 }
 0x278   : > { %v3616_v32 = vrot.slane %v2627_v14, 2  ;;  %v2633_v23 = vrot.slane %v2632_v52, 1  ;;  %v2638_v24 = vrot.slane %v2637_v11, 2  ;;  %v2643_v29 = vrot.slane %v2642_v18, 4  ;;  %v4299_v59 = vpop.f32.mrf.mxu1  ;;  %v4304_v30 = vpop.f32.mrf.mxu0 }
 0x279   : > { %v2573_v31 = vand.u32 2147483647, %v2557_v27 }
 0x27a   : > { %v3617_v35 = vsel %vm3587_vm11, %v3616_v32, %v3615_v10  ;;  %v2634_v61 = vadd.f32 %v2633_v23, %v2632_v52  ;;  %v2644_v33 = vadd.f32 %v2643_v29, %v2642_v18  ;;  %v2319_v39 = vpop.f32.mrf.mxu0  ;;  %v2361_v40 = vpop.f32.mrf.mxu1  ;;  %v2639_v47 = vadd.f32 %v2638_v24, %v2637_v11 }
 0x27b   : > { %v2649_v48 = vsel %vm1714_vm5, %v2573_v31, 0.0  ;;  %v2558_v49 = vsub.f32 %v5203_v22, %v2361_v40 }
 0x27c   : > { %v3618_v13 = vrot.slane %v2634_v61, 1  ;;  %v2645_v43 = vrot.slane %v2644_v33, 2  ;;  %v2650_v50 = vrot.slane %v2649_v48, 4  ;;  %v4305_v1 = vpop.f32.mrf.mxu0  ;;  %v4310_v53 = vpop.f32.mrf.mxu1  ;;  %v2640_v45 = vrot.slane %v2639_v47, 1 }
 0x27d   : > { %v2574_v56 = vand.u32 2147483647, %v2558_v49 }
 0x27e   : > { %v2646_v38 = vadd.f32 %v2645_v43, %v2644_v33  ;;  %v2651_v34 = vadd.f32 %v2650_v50, %v2649_v48  ;;  %v2364_v55 = vpop.f32.mrf.mxu1  ;;  %v2406_v21 = vpop.f32.mrf.mxu0  ;;  %v5267_v44 = vsel %vm3590_vm12, %v3618_v13, %v3617_v35  ;;  %v2641_v15 = vadd.f32 %v2640_v45, %v2639_v47 }
 0x27f   : > { %v2656_v5 = vsel %vm1714_vm5, %v2574_v56, 0.0  ;;  %v2559_v58 = vsub.f32 %v5210_v60, %v2406_v21 }
 0x280   : > { %v2647_v0 = vrot.slane %v2646_v38, 1  ;;  %v2652_v46 = vrot.slane %v2651_v34, 2  ;;  %v2657_v51 = vrot.slane %v2656_v5, 4  ;;  %v4311_v7 = vpop.f32.mrf.mxu1  ;;  %v4316_v8 = vpop.f32.mrf.mxu0 }
 0x281   : > { %v2575_v9 = vand.u32 2147483647, %v2559_v58 }
 0x282   : > { %v2648_v26 = vadd.f32 %v2647_v0, %v2646_v38  ;;  %v2653_v10 = vadd.f32 %v2652_v46, %v2651_v34  ;;  %v2658_v14 = vadd.f32 %v2657_v51, %v2656_v5  ;;  %v2409_v52 = vpop.f32.mrf.mxu0  ;;  %v2451_v11 = vpop.f32.mrf.mxu1 }
 0x283   : > { %v2663_v17 = vsel %vm1714_vm5, %v2575_v9, 0.0  ;;  %v2560_v18 = vsub.f32 %v5214_v54, %v2451_v11 }
 0x284   : > { %v3620_v27 = vrot.slane %v2648_v26, 7  ;;  %v2654_v32 = vrot.slane %v2653_v10, 1  ;;  %v2659_v23 = vrot.slane %v2658_v14, 2  ;;  %v2664_v24 = vrot.slane %v2663_v17, 4  ;;  %v4317_v29 = vpop.f32.mrf.mxu0  ;;  %v4322_v59 = vpop.f32.mrf.mxu1 }
 0x285   : > { %v2576_v30 = vand.u32 2147483647, %v2560_v18 }
 0x286   : > { %v3621_v31 = vsel %vm3572_vm6, %v3620_v27, %v2641_v15  ;;  %v2655_v35 = vadd.f32 %v2654_v32, %v2653_v10  ;;  %v2660_v61 = vadd.f32 %v2659_v23, %v2658_v14  ;;  %v2665_v33 = vadd.f32 %v2664_v24, %v2663_v17  ;;  %v2454_v39 = vpop.f32.mrf.mxu1  ;;  %v2496_v40 = vpop.f32.mrf.mxu0 }
 0x287   : > { %v2670_v47 = vsel %vm1714_vm5, %v2576_v30, 0.0  ;;  %v2561_v48 = vsub.f32 %v5222_v16, %v2496_v40 }
 0x288   : > { %v3622_v49 = vrot.slane %v2655_v35, 6  ;;  %v2661_v13 = vrot.slane %v2660_v61, 1  ;;  %v2666_v43 = vrot.slane %v2665_v33, 2  ;;  %v2671_v50 = vrot.slane %v2670_v47, 4  ;;  %v4323_v1 = vpop.f32.mrf.mxu1  ;;  %v4328_v53 = vpop.f32.mrf.mxu0 }
 0x289   : > { %v2577_v56 = vand.u32 2147483647, %v2561_v48 }
 0x28a   : > { %v3623_v38 = vsel %vm3575_vm7, %v3622_v49, %v3621_v31  ;;  %v2662_v34 = vadd.f32 %v2661_v13, %v2660_v61  ;;  %v2667_v55 = vadd.f32 %v2666_v43, %v2665_v33  ;;  %v2672_v21 = vadd.f32 %v2671_v50, %v2670_v47  ;;  %v2499_v45 = vpop.f32.mrf.mxu0  ;;  %v2541_v5 = vpop.f32.mrf.mxu1 }
 0x28b   : > { %v2677_v58 = vsel %vm1714_vm5, %v2577_v56, 0.0  ;;  %v2562_v0 = vsub.f32 %v5226_v36, %v2541_v5 }
 0x28c   : > { %v3624_v46 = vrot.slane %v2662_v34, 5  ;;  %v2668_v51 = vrot.slane %v2667_v55, 1  ;;  %v2673_v7 = vrot.slane %v2672_v21, 2  ;;  %v2678_v8 = vrot.slane %v2677_v58, 4  ;;  %v4329_v9 = vpop.f32.mrf.mxu0  ;;  %v4334_v26 = vpop.f32.mrf.mxu1 }
 0x28d   : > { %v2578_v10 = vand.u32 2147483647, %v2562_v0 }
 0x28e   : > { %v3625_v14 = vsel %vm3578_vm9, %v3624_v46, %v3623_v38  ;;  %v2669_v52 = vadd.f32 %v2668_v51, %v2667_v55  ;;  %v2674_v11 = vadd.f32 %v2673_v7, %v2672_v21  ;;  %v2679_v15 = vadd.f32 %v2678_v8, %v2677_v58  ;;  %v2544_v17 = vpop.f32.mrf.mxu1  ;;  %v2728_v18 = vpop.f32.mrf.mxu0 }
 0x28f   : > { %v2684_v27 = vsel %vm1714_vm5, %v2578_v10, 0.0  ;;  %v3379_v34 = vsub.f32 %v5070_v28, %v2728_v18 }
 0x290   : > { %v3626_v32 = vrot.slane %v2669_v52, 4  ;;  %v2675_v23 = vrot.slane %v2674_v11, 1  ;;  %v2680_v24 = vrot.slane %v2679_v15, 2  ;;  %v2685_v29 = vrot.slane %v2684_v27, 4  ;;  %v4335_v59 = vpop.f32.mrf.mxu1  ;;  %v4340_v30 = vpop.f32.mrf.mxu0 }
 0x291   : > { %v3395_v9 = vand.u32 2147483647, %v3379_v34 }
 0x292   : > { %v3627_v31 = vsel %vm3581_vm10, %v3626_v32, %v3625_v14  ;;  %v2676_v35 = vadd.f32 %v2675_v23, %v2674_v11  ;;  %v2681_v61 = vadd.f32 %v2680_v24, %v2679_v15  ;;  %v2686_v33 = vadd.f32 %v2685_v29, %v2684_v27  ;;  %v2731_v39 = vpop.f32.mrf.mxu0  ;;  %v2771_v40 = vpop.f32.mrf.mxu1 }
 0x293   : > { %v3380_v47 = vsub.f32 %v5066_v62, %v2771_v40  ;;  %v3411_v27 = vsel %vm1714_vm5, %v3395_v9, 0.0 }
 0x294   : > { %v3628_v48 = vrot.slane %v2676_v35, 3  ;;  %v2682_v49 = vrot.slane %v2681_v61, 1  ;;  %v2687_v13 = vrot.slane %v2686_v33, 2  ;;  %v4341_v43 = vpop.f32.mrf.mxu0  ;;  %v4346_v50 = vpop.f32.mrf.mxu1 }
 0x295   : > { %v3396_v1 = vand.u32 2147483647, %v3380_v47 }
 0x296   : > { %v3629_v53 = vsel %vm3584_vm8, %v3628_v48, %v3627_v31  ;;  %v2683_v56 = vadd.f32 %v2682_v49, %v2681_v61  ;;  %v2688_v38 = vadd.f32 %v2687_v13, %v2686_v33  ;;  %v2774_v55 = vpop.f32.mrf.mxu1  ;;  %v2814_v21 = vpop.f32.mrf.mxu0  ;;  %v3412_v61 = vrot.slane %v3411_v27, 4 }
 0x297   : > { %v3381_v45 = vsub.f32 %v5091_v25, %v2814_v21  ;;  %v3418_v46 = vsel %vm1714_vm5, %v3396_v1, 0.0 }
 0x298   : > { %v3630_v5 = vrot.slane %v2683_v56, 2  ;;  %v2689_v58 = vrot.slane %v2688_v38, 1  ;;  %v4347_v0 = vpop.f32.mrf.mxu1  ;;  %v4352_v62 = vpop.f32.mrf.mxu0  ;;  %v3419_v11 = vrot.slane %v3418_v46, 4  ;;  %v3413_v56 = vadd.f32 %v3412_v61, %v3411_v27 }
 0x299   : > { %v3397_v51 = vand.u32 2147483647, %v3381_v45 }
 0x29a   : > { %v3631_v7 = vsel %vm3587_vm11, %v3630_v5, %v3629_v53  ;;  %v2690_v8 = vadd.f32 %v2689_v58, %v2688_v38  ;;  %v2817_v26 = vpop.f32.mrf.mxu0  ;;  %v2857_v10 = vpop.f32.mrf.mxu1  ;;  %v3420_v30 = vadd.f32 %v3419_v11, %v3418_v46 }
 0x29b   : > { %v3425_v14 = vsel %vm1714_vm5, %v3397_v51, 0.0  ;;  %v3382_v28 = vsub.f32 %v5102_v42, %v2857_v10 }
 0x29c   : > { %v3632_v52 = vrot.slane %v2690_v8, 1  ;;  %v4353_v25 = vpop.f32.mrf.mxu0  ;;  %v4358_v15 = vpop.f32.mrf.mxu1  ;;  %v3426_v17 = vrot.slane %v3425_v14, 4  ;;  %v3421_v43 = vrot.slane %v3420_v30, 2 }
 0x29d   : > { %v3398_v18 = vand.u32 2147483647, %v3382_v28 }
 0x29e   : > { %v2860_v32 = vpop.f32.mrf.mxu1  ;;  %v2900_v23 = vpop.f32.mrf.mxu0  ;;  %v5292_v24 = vsel %vm3590_vm12, %v3632_v52, %v3631_v7  ;;  %v3427_v33 = vadd.f32 %v3426_v17, %v3425_v14  ;;  %v3422_v0 = vadd.f32 %v3421_v43, %v3420_v30  ;;  %v3414_v7 = vrot.slane %v3413_v56, 2 }
 0x29f   : > { %v3432_v29 = vsel %vm1714_vm5, %v3398_v18, 0.0  ;;  %v3383_v59 = vsub.f32 %v5130_v2, %v2900_v23 }
 0x2a0   : > { %v3433_v31 = vrot.slane %v3432_v29, 4  ;;  %v4359_v42 = vpop.f32.mrf.mxu1  ;;  %v4364_v35 = vpop.f32.mrf.mxu0  ;;  %v3428_v2 = vrot.slane %v3427_v33, 2  ;;  %v3423_v15 = vrot.slane %v3422_v0, 1  ;;  %v3415_v32 = vadd.f32 %v3414_v7, %v3413_v56 }
 0x2a1   : > { %v3399_v39 = vand.u32 2147483647, %v3383_v59 }
 0x2a2   : > { %v3434_v40 = vadd.f32 %v3433_v31, %v3432_v29  ;;  %v2903_v47 = vpop.f32.mrf.mxu0  ;;  %v2943_v48 = vpop.f32.mrf.mxu1  ;;  %v3429_v8 = vadd.f32 %v3428_v2, %v3427_v33 }
 0x2a3   : > { %v3439_v49 = vsel %vm1714_vm5, %v3399_v39, 0.0  ;;  %v3384_v13 = vsub.f32 %v5141_v12, %v2943_v48  ;;  %v3424_v39 = vadd.f32 %v3423_v15, %v3422_v0 }
 0x2a4   : > { %v3440_v50 = vrot.slane %v3439_v49, 4  ;;  %v4365_v1 = vpop.f32.mrf.mxu0  ;;  %v4370_v53 = vpop.f32.mrf.mxu1  ;;  %v3435_v34 = vrot.slane %v3434_v40, 2  ;;  %v3430_v23 = vrot.slane %v3429_v8, 1 }
 0x2a5   : > { %v3400_v38 = vand.u32 2147483647, %v3384_v13  ;;  %v3416_v13 = vrot.slane %v3415_v32, 1 }
 0x2a6   : > { %v3441_v55 = vadd.f32 %v3440_v50, %v3439_v49  ;;  %v2946_v21 = vpop.f32.mrf.mxu1  ;;  %v2986_v45 = vpop.f32.mrf.mxu0  ;;  %v3436_v26 = vadd.f32 %v3435_v34, %v3434_v40  ;;  %v3431_v43 = vadd.f32 %v3430_v23, %v3429_v8 }
 0x2a7   : > { %v3446_v5 = vsel %vm1714_vm5, %v3400_v38, 0.0  ;;  %v3385_v58 = vsub.f32 %v5169_v57, %v2986_v45  ;;  %v3634_v45 = vrot.slane %v3424_v39, 7 }
 0x2a8   : > { %v3442_v62 = vrot.slane %v3441_v55, 2  ;;  %v3447_v46 = vrot.slane %v3446_v5, 4  ;;  %v4371_v51 = vpop.f32.mrf.mxu1  ;;  %v4376_v12 = vpop.f32.mrf.mxu0  ;;  %v3437_v59 = vrot.slane %v3436_v26, 1 }
 0x2a9   : > { %v3401_v9 = vand.u32 2147483647, %v3385_v58  ;;  %v3417_v51 = vadd.f32 %v3416_v13, %v3415_v32  ;;  %v3636_v12 = vrot.slane %v3431_v43, 6 }
 0x2aa   : > { %v3448_v10 = vadd.f32 %v3447_v46, %v3446_v5  ;;  %v2989_v14 = vpop.f32.mrf.mxu0  ;;  %v3029_v28 = vpop.f32.mrf.mxu1  ;;  %v3443_v52 = vadd.f32 %v3442_v62, %v3441_v55  ;;  %v3438_v50 = vadd.f32 %v3437_v59, %v3436_v26  ;;  %v4504_v55 = vmov 1983009808  }
 0x2ab   : > { %v3453_v11 = vsel %vm1714_vm5, %v3401_v9, 0.0  ;;  %v3386_v25 = vsub.f32 %v5175_v41, %v3029_v28  ;;  %v3671_v21 = vunpack.c.l.s4 %v4504_v55 }
 0x2ac   : > { %v3449_v17 = vrot.slane %v3448_v10, 2  ;;  %v3454_v57 = vrot.slane %v3453_v11, 4  ;;  %v4377_v18 = vpop.f32.mrf.mxu0  ;;  %v4382_v27 = vpop.f32.mrf.mxu1  ;;  %v3444_v61 = vrot.slane %v3443_v52, 1  ;;  %v3638_v8 = vrot.slane %v3438_v50, 5 }
 0x2ad   : > { %v3402_v29 = vand.u32 2147483647, %v3386_v25  ;;  %v3672_v18 = vunpack.c.0.s8 %v3671_v21 }
 0x2ae   : > { %v3450_v30 = vadd.f32 %v3449_v17, %v3448_v10  ;;  %v3455_v31 = vadd.f32 %v3454_v57, %v3453_v11  ;;  %v3032_v42 = vpop.f32.mrf.mxu1  ;;  %v3072_v35 = vpop.f32.mrf.mxu0  ;;  %v3445_v38 = vadd.f32 %v3444_v61, %v3443_v52  ;;  %v3635_v11 = vsel %vm3572_vm6, %v3634_v45, %v3417_v51 }
 0x2af   : > { %v3460_v33 = vsel %vm1714_vm5, %v3402_v29, 0.0  ;;  %v3387_v10 = vsub.f32 %v5185_v37, %v3072_v35  ;;  %v3637_v27 = vsel %vm3575_vm7, %v3636_v12, %v3635_v11 }
 0x2b0   : > { %v3451_v40 = vrot.slane %v3450_v30, 1  ;;  %v3456_v47 = vrot.slane %v3455_v31, 2  ;;  %v3461_v41 = vrot.slane %v3460_v33, 4  ;;  %v4383_v48 = vpop.f32.mrf.mxu1  ;;  %v4388_v49 = vpop.f32.mrf.mxu0  ;;  %v3640_v52 = vrot.slane %v3445_v38, 4 }
 0x2b1   : > { %v3639_v37 = vsel %vm3578_vm9, %v3638_v8, %v3637_v27  ;;  %v5315_v48 = vsub.s32 %v3672_v18, %v4552_v3 }
 0x2b2   : > { %v3457_v1 = vadd.f32 %v3456_v47, %v3455_v31  ;;  %v3462_v53 = vadd.f32 %v3461_v41, %v3460_v33  ;;  %v3075_v56 = vpop.f32.mrf.mxu0  ;;  %v3115_v2 = vpop.f32.mrf.mxu1  ;;  %v3452_v5 = vadd.f32 %v3451_v40, %v3450_v30  ;;  %v3403_v30 = vand.u32 2147483647, %v3387_v10 }
 0x2b3   : > { %v3388_v34 = vsub.f32 %v5189_v19, %v3115_v2 }
 0x2b4   : > { %v3458_v58 = vrot.slane %v3457_v1, 1  ;;  %v3463_v0 = vrot.slane %v3462_v53, 2  ;;  %v4389_v62 = vpop.f32.mrf.mxu0  ;;  %v4394_v46 = vpop.f32.mrf.mxu1  ;;  %v3642_v25 = vrot.slane %v3452_v5, 3  ;;  %v3467_v50 = vsel %vm1714_vm5, %v3403_v30, 0.0 }
 0x2b5   : > { %v3404_v7 = vand.u32 2147483647, %v3388_v34 }
 0x2b6   : > { %v3459_v9 = vadd.f32 %v3458_v58, %v3457_v1  ;;  %v3464_v26 = vadd.f32 %v3463_v0, %v3462_v53  ;;  %v3118_v14 = vpop.f32.mrf.mxu1  ;;  %v3158_v28 = vpop.f32.mrf.mxu0  ;;  %v5328_v0 = vrot.slane %v5267_v44, %v5315_v48 }
 0x2b7   : > { %v3389_v19 = vsub.f32 %v5199_v20, %v3158_v28  ;;  %v3474_v23 = vsel %vm1714_vm5, %v3404_v7, 0.0  ;;  %v3641_v20 = vsel %vm3581_vm10, %v3640_v52, %v3639_v37 }
 0x2b8   : > { %v3465_v15 = vrot.slane %v3464_v26, 1  ;;  %v4395_v17 = vpop.f32.mrf.mxu1  ;;  %v4400_v57 = vpop.f32.mrf.mxu0  ;;  %v3644_v32 = vrot.slane %v3459_v9, 2  ;;  %v3643_v33 = vsel %vm3584_vm8, %v3642_v25, %v3641_v20  ;;  %v3475_v40 = vrot.slane %v3474_v23, 4 }
 0x2b9   : > { %v3405_v29 = vand.u32 2147483647, %v3389_v19 }
 0x2ba   : > { %v3466_v59 = vadd.f32 %v3465_v15, %v3464_v26  ;;  %v3161_v31 = vpop.f32.mrf.mxu0  ;;  %v3201_v42 = vpop.f32.mrf.mxu1  ;;  %v3645_v49 = vsel %vm3587_vm11, %v3644_v32, %v3643_v33  ;;  %v3476_v21 = vadd.f32 %v3475_v40, %v3474_v23 }
 0x2bb   : > { %v3481_v35 = vsel %vm1714_vm5, %v3405_v29, 0.0  ;;  %v3390_v61 = vsub.f32 %v5203_v22, %v3201_v42  ;;  %v3684_v22 = vcombine.high %v5267_v44, %v4500_v4 }
 0x2bc   : > { %v3646_v39 = vrot.slane %v3466_v59, 1  ;;  %v4401_v47 = vpop.f32.mrf.mxu0  ;;  %v4406_v41 = vpop.f32.mrf.mxu1  ;;  %v3482_v13 = vrot.slane %v3481_v35, 4  ;;  %v3477_v28 = vrot.slane %v3476_v21, 2 }
 0x2bd   : > { %v3406_v43 = vand.u32 2147483647, %v3390_v61  ;;  %v5337_v9 = vrot.slane %v3684_v22, %v5315_v48 }
 0x2be   : > { %v3204_v1 = vpop.f32.mrf.mxu1  ;;  %v3244_v53 = vpop.f32.mrf.mxu0  ;;  %v3647_v56 = vsel %vm3590_vm12, %v3646_v39, %v3645_v49  ;;  %v3483_v62 = vadd.f32 %v3482_v13, %v3481_v35  ;;  %v3478_v37 = vadd.f32 %v3477_v28, %v3476_v21 }
 0x2bf   : > { %v3488_v2 = vsel %vm1714_vm5, %v3406_v43, 0.0  ;;  %v3391_v38 = vsub.f32 %v5210_v60, %v3244_v53  ;;  %v3668_v34 = vcombine.low %v5195_v63, %v3647_v56  ;;  %v3669_v55 = vcombine.high %v5195_v63, %v3647_v56 }
 0x2c0   : > { %v3489_v45 = vrot.slane %v3488_v2, 4  ;;  %v4407_v5 = vpop.f32.mrf.mxu1  ;;  %v4412_v58 = vpop.f32.mrf.mxu0  ;;  %v3468_v60 = vrot.slane %v3467_v50, 4  ;;  %v3484_v25 = vrot.slane %v3483_v62, 2  ;;  %v3479_v43 = vrot.slane %v3478_v37, 1 }
 0x2c1   : > { %v3407_v46 = vand.u32 2147483647, %v3391_v38  ;;  %v5331_v51 = vrot.slane %v3668_v34, %v5315_v48  ;;  %v5334_v12 = vrot.slane %v3669_v55, %v5315_v48 }
 0x2c2   : > { %v3490_v7 = vadd.f32 %v3489_v45, %v3488_v2  ;;  %v3247_v8 = vpop.f32.mrf.mxu0  ;;  %v3287_v63 = vpop.f32.mrf.mxu1  ;;  %v3469_v57 = vadd.f32 %v3468_v60, %v3467_v50  ;;  %v3485_v20 = vadd.f32 %v3484_v25, %v3483_v62  ;;  %v3480_v62 = vadd.f32 %v3479_v43, %v3478_v37 }
 0x2c3   : > { %v3495_v26 = vsel %vm1714_vm5, %v3407_v46, 0.0  ;;  %v3392_v44 = vsub.f32 %v5214_v54, %v3287_v63  ;;  %v3700_v10 = vcombine.high %v5331_v51, %v5328_v0  ;;  %v3699_v14 = vcombine.low %v5331_v51, %v5328_v0 }
 0x2c4   : > { %v3496_v52 = vrot.slane %v3495_v26, 4  ;;  %v4413_v19 = vpop.f32.mrf.mxu0  ;;  %v4418_v11 = vpop.f32.mrf.mxu1  ;;  %v3715_v17 = vcombine.low %v5334_v12, %v5337_v9  ;;  %v3491_v18 = vrot.slane %v3490_v7, 2  ;;  %v3716_v61 = vcombine.high %v5334_v12, %v5337_v9 }
 0x2c5   : > { %v3408_v15 = vand.u32 2147483647, %v3392_v44  ;;  %v3470_v33 = vrot.slane %v3469_v57, 2  ;;  %v3486_v22 = vrot.slane %v3485_v20, 1  ;;  %v3648_v19 = vrot.slane %v3480_v62, 7 }
 0x2c6   : > { %v3497_v27 = vadd.f32 %v3496_v52, %v3495_v26  ;;  %v3290_v32 = vpop.f32.mrf.mxu1  ;;  %v3330_v54 = vpop.f32.mrf.mxu0  ;;  %v3492_v39 = vadd.f32 %v3491_v18, %v3490_v7  ;;  %v4505_v18 = vmov 1934713408  }
 0x2c7   : > { %v3502_v23 = vsel %vm1714_vm5, %v3408_v15, 0.0  ;;  %v3393_v29 = vsub.f32 %v5222_v16, %v3330_v54  ;;  %v3471_v38 = vadd.f32 %v3470_v33, %v3469_v57  ;;  %v3487_v8 = vadd.f32 %v3486_v22, %v3485_v20 }
 0x2c8   : > { %v3498_v59 = vrot.slane %v3497_v27, 2  ;;  %v3503_v30 = vrot.slane %v3502_v23, 4  ;;  %v4419_v31 = vpop.f32.mrf.mxu1  ;;  %v4424_v42 = vpop.f32.mrf.mxu0  ;;  %v3493_v34 = vrot.slane %v3492_v39, 1 }
 0x2c9   : > { %v3409_v35 = vand.u32 2147483647, %v3393_v29  ;;  %v3472_v63 = vrot.slane %v3471_v38, 1  ;;  %v3650_v57 = vrot.slane %v3487_v8, 6 }
 0x2ca   : > { %v3504_v40 = vadd.f32 %v3503_v30, %v3502_v23  ;;  %v3333_v47 = vpop.f32.mrf.mxu0  ;;  %v3373_v41 = vpop.f32.mrf.mxu1  ;;  %v3499_v49 = vadd.f32 %v3498_v59, %v3497_v27  ;;  %v3494_v26 = vadd.f32 %v3493_v34, %v3492_v39  ;;  %v3702_v27 = vunpack.c.l.s4 %v4505_v18 }
 0x2cb   : > { %v3509_v13 = vsel %vm1714_vm5, %v3409_v35, 0.0  ;;  %v3394_v16 = vsub.f32 %v5226_v36, %v3373_v41  ;;  %v3473_v32 = vadd.f32 %v3472_v63, %v3471_v38 }
 0x2cc   : > { %v3505_v50 = vrot.slane %v3504_v40, 2  ;;  %v3510_v1 = vrot.slane %v3509_v13, 4  ;;  %v4425_v53 = vpop.f32.mrf.mxu0  ;;  %v4430_v56 = vpop.f32.mrf.mxu1  ;;  %v3500_v5 = vrot.slane %v3499_v49, 1  ;;  %v3652_v54 = vrot.slane %v3494_v26, 5 }
 0x2cd   : > { %v3410_v2 = vand.u32 2147483647, %v3394_v16  ;;  %v3649_v59 = vsel %vm3572_vm6, %v3648_v19, %v3473_v32  ;;  %v3703_v39 = vunpack.c.0.s8 %v3702_v27  ;;  %v3758_v56 = vrot.slane %v5292_v24, %v5315_v48 }
 0x2ce   : > { %v3506_v55 = vadd.f32 %v3505_v50, %v3504_v40  ;;  %v3511_v21 = vadd.f32 %v3510_v1, %v3509_v13  ;;  %v3376_v45 = vpop.f32.mrf.mxu1  ;;  %v3501_v52 = vadd.f32 %v3500_v5, %v3499_v49  ;;  %v3651_v42 = vsel %vm3575_vm7, %v3650_v57, %v3649_v59  ;;  %vm3893_vm7 = vmand %vm3891_vm2, %vm3892_vm3 }
 0x2cf   : > { %v3516_v58 = vsel %vm1714_vm5, %v3410_v2, 0.0  ;;  %v3653_v35 = vsel %vm3578_vm9, %v3652_v54, %v3651_v42  ;;  %v3751_v13 = vcombine.high %v5292_v24, %v4500_v4  ;;  %v3706_v43 = vsub.s32 %v3703_v39, %v4552_v3 }
 0x2d0   : > { %v3507_v46 = vrot.slane %v3506_v55, 1  ;;  %v3512_v60 = vrot.slane %v3511_v21, 2  ;;  %v3517_v7 = vrot.slane %v3516_v58, 4  ;;  %v4431_v36 = vpop.f32.mrf.mxu1  ;;  %v3654_v37 = vrot.slane %v3501_v52, 4 }
 0x2d1   : > { %v3765_v2 = vrot.slane %v3751_v13, %v5315_v48  ;;  %v3714_v38 = vrot.slane %v3700_v10, %v3706_v43  ;;  %v3707_v3 = vrot.slane %v3699_v14, %v3706_v43  ;;  %v3730_v45 = vrot.slane %v3716_v61, %v3706_v43 }
 0x2d2   : > { %v3513_v44 = vadd.f32 %v3512_v60, %v3511_v21  ;;  %v3518_v28 = vadd.f32 %v3517_v7, %v3516_v58  ;;  %v3508_v11 = vadd.f32 %v3507_v46, %v3506_v55  ;;  %v3655_v40 = vsel %vm3581_vm10, %v3654_v37, %v3653_v35 }
 0x2d3   : > { %v3732_v46 = vcombine.high %v3714_v38, %v4500_v4  ;;  %v3731_v0 = vcombine.high %v3707_v3, %v4500_v4  ;;  %v3734_v9 = vcombine.high %v3730_v45, %v4500_v4  ;;  %vm3895_vm5 = vsmask.f32 3328 }
 0x2d4   : > { %v3514_v25 = vrot.slane %v3513_v44, 1  ;;  %v3519_v15 = vrot.slane %v3518_v28, 2  ;;  %v3656_v30 = vrot.slane %v3508_v11, 3  ;;  %vm3869_vm6 = vcmask 916480  }
 0x2d6   : > { %v3515_v23 = vadd.f32 %v3514_v25, %v3513_v44  ;;  %v3520_v29 = vadd.f32 %v3519_v15, %v3518_v28  ;;  %v3657_v47 = vsel %vm3584_vm8, %v3656_v30, %v3655_v40 }
 0x2d8   : > { %v3521_v31 = vrot.slane %v3520_v29, 1  ;;  %v3658_v20 = vrot.slane %v3515_v23, 2 }
 0x2da   : > { %v3522_v33 = vadd.f32 %v3521_v31, %v3520_v29  ;;  %v3659_v49 = vsel %vm3587_vm11, %v3658_v20, %v3657_v47 }
 0x2dc   : > { %v3660_v41 = vrot.slane %v3522_v33, 1 }
 0x2de   : > { %v3661_v16 = vsel %vm3590_vm12, %v3660_v41, %v3659_v49 }
 0x2df   : > { %v3735_v50 = vcombine.low %v5242_v6, %v3661_v16  ;;  %v3736_v1 = vcombine.high %v5242_v6, %v3661_v16  ;;  %v3723_v6 = vrot.slane %v3715_v17, %v3706_v43 }
 0x2e1   : > { %v3743_v53 = vrot.slane %v3735_v50, %v5315_v48  ;;  %v3750_v22 = vrot.slane %v3736_v1, %v5315_v48  ;;  %v3733_v51 = vcombine.high %v3723_v6, %v4500_v4 }
 0x2e3   : > { %v3767_v34 = vcombine.high %v3743_v53, %v3758_v56  ;;  %v3766_v55 = vcombine.low %v3743_v53, %v3758_v56  ;;  %v3782_v21 = vcombine.low %v3750_v22, %v3765_v2  ;;  %v3783_v24 = vcombine.high %v3750_v22, %v3765_v2 }
 0x2e5   : > { %v3781_v5 = vrot.slane %v3767_v34, %v3706_v43  ;;  %v3774_v58 = vrot.slane %v3766_v55, %v3706_v43  ;;  %v3790_v62 = vrot.slane %v3782_v21, %v3706_v43  ;;  %v3797_v10 = vrot.slane %v3783_v24, %v3706_v43 }
 0x2e7   : > { %v3799_v14 = vcombine.high %v3781_v5, %v4500_v4  ;;  %v4457_v17 = vpack.i.bf16 %v3781_v5, %v3714_v38  ;;  %v3798_v60 = vcombine.high %v3774_v58, %v4500_v4  ;;  %v4462_v7 = vpack.i.bf16 %v3790_v62, %v3723_v6  ;;  %v3898_v38 = vld [vmem:[%s210_s10] sm:$0xf] }
 0x2e8   : > { %v4482_v36 = vpack.i.bf16 %v3797_v10, %v3730_v45  ;;  %v3800_v12 = vcombine.high %v3790_v62, %v4500_v4  ;;  %v3801_v61 = vcombine.high %v3797_v10, %v4500_v4 }
 0x2e9   : > { %4458 = vrot.lane.b32.xlu1 %v4457_v17, %s4506_s27  ;;  %v4467_v8 = vpack.i.bf16 %v3798_v60, %v3731_v0  ;;  %v4472_v63 = vpack.i.bf16 %v3799_v14, %v3732_v46 }
 0x2ea   : > { %v4477_v26 = vpack.i.bf16 %v3800_v12, %v3733_v51  ;;  %v4487_v44 = vpack.i.bf16 %v3801_v61, %v3734_v9 }
 0x2eb   : > { %4468 = vrot.lane.b32.xlu0 %v4467_v8, %s4507_s28 }
 0x2ed   : > { %4463 = vrot.lane.b32.xlu1 %v4462_v7, %s4508_s29 }
 0x2ef   : > { %4473 = vrot.lane.b32.xlu0 %v4472_v63, %s4509_s30 }
 0x2f1   : > { %4483 = vrot.lane.b32.xlu1 %v4482_v36, %s4510_s4 }
 0x2f3   : > { %4478 = vrot.lane.b32.xlu0 %v4477_v26, %s4511_s5 }
 0x2f7   : > { %4488 = vrot.lane.b32.xlu0 %v4487_v44, %s4512_s6 }
 0x35b   : > { %v4459_v28 = vpop.permute.xlu1 %4458 }
 0x35c   : > { %v4461_v57 = vunpack.i.h.bf16 %v4459_v28  ;;  %v4460_v18 = vunpack.i.l.bf16 %v4459_v28 }
 0x35d   : > { %v4469_v4 = vpop.permute.xlu0 %4468 }
 0x35e   : > { %v4471_v52 = vunpack.i.h.bf16 %v4469_v4  ;;  %v4470_v19 = vunpack.i.l.bf16 %v4469_v4 }
 0x35f   : > { %v4464_v15 = vpop.permute.xlu1 %4463 }
 0x360   : > { %v3871_v11 = vsel %vm900_vm4, %v3774_v58, %v4471_v52  ;;  %v3858_v25 = vsel %vm900_vm4, %v3707_v3, %v4470_v19  ;;  %v4466_v30 = vunpack.i.h.bf16 %v4464_v15  ;;  %v4465_v31 = vunpack.i.l.bf16 %v4464_v15 }
 0x361   : > { %v4474_v27 = vpop.permute.xlu0 %4473  ;;  %v3860_v23 = vsel %vm3859_vm13, %v3858_v25, %v4460_v18  ;;  %v3872_v29 = vsel %vm3859_vm13, %v3871_v11, %v4461_v57  ;;  %vm3894_vm4 = vcmask 1043458  }
 0x362   : > { %v4476_v32 = vunpack.i.h.bf16 %v4474_v27  ;;  %v4475_v54 = vunpack.i.l.bf16 %v4474_v27  ;;  %vm3896_vm9 = vmand %vm3894_vm4, %vm3895_vm5 }
 0x363   : > { %v4484_v20 = vpop.permute.xlu1 %4483  ;;  %vm3897_vm10 = vmor %vm3896_vm9, %vm3893_vm7 }
 0x364   : > { %v3862_v37 = vsel %vm3861_vm14, %v3860_v23, %v4475_v54  ;;  %v3873_v59 = vsel %vm3861_vm14, %v3872_v29, %v4476_v32  ;;  %v4486_v49 = vunpack.i.h.bf16 %v4484_v20  ;;  %v4485_v13 = vunpack.i.l.bf16 %v4484_v20 }
 0x365   : > { %v4479_v42 = vpop.permute.xlu0 %4478  ;;  %v3864_v39 = vsel %vm3863_vm15, %v3862_v37, %v4465_v31  ;;  %v3874_v40 = vsel %vm3863_vm15, %v3873_v59, %v4466_v30 }
 0x366   : > { %v4481_v35 = vunpack.i.h.bf16 %v4479_v42  ;;  %v4480_v33 = vunpack.i.l.bf16 %v4479_v42 }
 0x368   : > { %v3866_v47 = vsel %vm3865_vm0, %v3864_v39, %v4480_v33  ;;  %v3875_v41 = vsel %vm3865_vm0, %v3874_v40, %v4481_v35 }
 0x369   : > { %v4489_v16 = vpop.permute.xlu0 %4488  ;;  %v3868_v1 = vsel %vm3867_vm1, %v3866_v47, %v4485_v13  ;;  %v3876_v53 = vsel %vm3867_vm1, %v3875_v41, %v4486_v49 }
 0x36a   : > { %v4491_v43 = vunpack.i.h.bf16 %v4489_v16  ;;  %v4490_v50 = vunpack.i.l.bf16 %v4489_v16 }
 0x36c   : > { %v3870_v56 = vsel %vm3869_vm6, %v3868_v1, %v4490_v50  ;;  %v3877_v22 = vsel %vm3869_vm6, %v3876_v53, %v4491_v43 }
 0x36d   : > { %v4041_v2 = vpack.c.bf16 %v3877_v22, %v3870_v56 }
 0x36f   : > { %v3889_v3 = vrot.slane %v4041_v2, %v5315_v48 }
 0x371   : > { %v3899_v6 = vsel %vm3897_vm10, %v3889_v3, %v3898_v38 }
 0x372   : > { %3900 = vst [vmem:[%s210_s10] sm:$0xf] %v3899_v6 }
 0x373 PF: > { %s13_s12 = sadd.s32 1, %s4498_s12  }
 0x374   : > { %p10_p4 = scmp.ge.s32.totalorder %s13_s12, 4  }
 0x376   :  { %12 = sbr.rel (!%p10_p4) target bundleno = 1 (0x1), region = 68 }

// kernel: _lambda_.35
= control target key start
LH: loop header
LB: loop body
LE: loop exit
PB: predicated region body
PF: predicated region fallthrough
CT: control target
= control target key end

     0   :  { %vm269_vm0 = vcmask 1042432   ;;  %v816_v2 = vmov 0   ;;  %vm265_vm1 = vcmask 441344   ;;  %s1000_s1 = inlined_call_operand.vmem [shape: bf16[54,1536], index: 1, kind: input, shape index: {}]   ;;  %s1001_s0 = inlined_call_operand.vmem [shape: bf16[2,54], index: 0, kind: input, shape index: {}]   ;;  %s1002_s2 = inlined_call_operand.vmem [shape: bf16[2,1536], index: 2, kind: output, shape index: {}]  }
   0x1   :  { %v49_v0 = vld [vmem:[%s1000_s1 + $0x120] sm:$0x77]  ;;  %v50_v1 = vld [vmem:[%s1000_s1 + $0x128] sm:$0x77]  ;;  %338 = vmatprep.mubr.bf16.mxu0 %v816_v2  ;;  %379 = vmatprep.mubr.bf16.mxu1 %v816_v2  ;;  %v51_v19 = vld [vmem:[%s1000_s1 + $0x130] sm:$0x77] }
   0x2   :  { %v718_v3 = vcombine.high %v49_v0, %v49_v0  ;;  %v720_v4 = vcombine.high %v50_v1, %v50_v1  ;;  %v717_v5 = vcombine.low %v49_v0, %v49_v0  ;;  %v719_v6 = vcombine.low %v50_v1, %v50_v1  ;;  %v754_v7 = vld [vmem:[%s1000_s1 + $0xc4] ss:$48 sps:$4 sm:$0xff]   ;;  %v756_v8 = vld [vmem:[%s1000_s1 + $0xcc] ss:$48 sps:$4 sm:$0xff]   ;;  %v758_v11 = vld [vmem:[%s1000_s1 + $0xc0] ss:$48 sps:$4 sm:$0xff]  }
   0x3   :  { %v759_v12 = vld [vmem:[%s1000_s1 + $0xc8] ss:$48 sps:$4 sm:$0xff]   ;;  %v760_v13 = vld [vmem:[%s1000_s1 + $0x64] ss:$48 sps:$4 sm:$0xff]   ;;  %v762_v14 = vld [vmem:[%s1000_s1 + $0x6c] ss:$48 sps:$4 sm:$0xff]   ;;  %v722_v23 = vcombine.high %v51_v19, %v51_v19  ;;  %v721_v25 = vcombine.low %v51_v19, %v51_v19 }
   0x4   :  { %729 = vmatprep.subr.msk.bf16.mxu0 %vm269_vm0, %v718_v3  ;;  %731 = vmatprep.subr.msk.bf16.mxu1 %vm269_vm0, %v720_v4  ;;  %v271_v9 = vsel %vm269_vm0, %v717_v5, 0  ;;  %v277_v10 = vsel %vm269_vm0, %v719_v6, 0  ;;  %v764_v15 = vld [vmem:[%s1000_s1 + $0x60] ss:$48 sps:$4 sm:$0xff]   ;;  %v765_v16 = vld [vmem:[%s1000_s1 + $0x68] ss:$48 sps:$4 sm:$0xff]  }
   0x5   :  { %315 = vmatpush1.bf16.msra.mxu0 %v271_v9  ;;  %356 = vmatpush1.bf16.msra.mxu1 %v277_v10  ;;  %v766_v17 = vld [vmem:[%s1000_s1 + $0x4] ss:$48 sps:$4 sm:$0xff]   ;;  %v768_v18 = vld [vmem:[%s1000_s1 + $0xc] ss:$48 sps:$4 sm:$0xff]   ;;  %v770_v21 = vld [vmem:[%s1000_s1] ss:$48 sps:$4 sm:$0xff]   ;;  %v607_v9 = vlaneseq }
   0x6   :  { %316 = vmatprep.subr.bf16.mxu0 %v754_v7  ;;  %357 = vmatprep.subr.bf16.mxu1 %v756_v8  ;;  %v52_v20 = vld [vmem:[%s1000_s1 + $0x138] sm:$0x77]  ;;  %v890_v27 = vld [vmem:[%s1001_s0] sm:$0x1]  ;;  %v283_v28 = vsel %vm269_vm0, %v721_v25, 0 }
   0x7   :  { %v771_v22 = vld [vmem:[%s1000_s1 + $0x8] ss:$48 sps:$4 sm:$0xff]   ;;  %v724_v24 = vcombine.high %v52_v20, %v52_v20  ;;  %v723_v26 = vcombine.low %v52_v20, %v52_v20  ;;  %v778_v30 = vld [vmem:[%s1000_s1 + $0xd4] ss:$48 sps:$4 sm:$0xff]   ;;  %v781_v31 = vld [vmem:[%s1000_s1 + $0xdc] ss:$48 sps:$4 sm:$0xff]  }
   0x8   :  { %v776_v32 = vld [vmem:[%s1000_s1 + $0xd0] ss:$48 sps:$4 sm:$0xff]   ;;  %v779_v33 = vld [vmem:[%s1000_s1 + $0xd8] ss:$48 sps:$4 sm:$0xff]   ;;  %v784_v34 = vld [vmem:[%s1000_s1 + $0x74] ss:$48 sps:$4 sm:$0xff]  }
   0x9   :  { %317 = vmatpush1.bf16.msra.mxu0 %v758_v11  ;;  %358 = vmatpush1.bf16.msra.mxu1 %v759_v12  ;;  %v289_v29 = vsel %vm269_vm0, %v723_v26, 0  ;;  %v787_v35 = vld [vmem:[%s1000_s1 + $0x7c] ss:$48 sps:$4 sm:$0xff]   ;;  %v782_v36 = vld [vmem:[%s1000_s1 + $0x70] ss:$48 sps:$4 sm:$0xff]  }
   0xa   :  { %318 = vmatprep.subr.bf16.mxu0 %v760_v13  ;;  %359 = vmatprep.subr.bf16.mxu1 %v762_v14  ;;  %v785_v37 = vld [vmem:[%s1000_s1 + $0x78] ss:$48 sps:$4 sm:$0xff]   ;;  %v790_v38 = vld [vmem:[%s1000_s1 + $0x14] ss:$48 sps:$4 sm:$0xff]   ;;  %v793_v39 = vld [vmem:[%s1000_s1 + $0x1c] ss:$48 sps:$4 sm:$0xff]  }
   0xb   :  { %v53_v40 = vld [vmem:[%s1000_s1 + $0x140] sm:$0x77]  ;;  %v54_v41 = vld [vmem:[%s1000_s1 + $0x148] sm:$0x77]  ;;  %v817_v7 = vmov 1966171168  }
   0xc   :  { %v788_v42 = vld [vmem:[%s1000_s1 + $0x10] ss:$48 sps:$4 sm:$0xff]   ;;  %v791_v43 = vld [vmem:[%s1000_s1 + $0x18] ss:$48 sps:$4 sm:$0xff]   ;;  %v726_v44 = vcombine.high %v53_v40, %v53_v40  ;;  %v728_v45 = vcombine.high %v54_v41, %v54_v41  ;;  %v725_v46 = vcombine.low %v53_v40, %v53_v40  ;;  %v727_v47 = vcombine.low %v54_v41, %v54_v41  ;;  %v800_v50 = vld [vmem:[%s1000_s1 + $0xe4] ss:$48 sps:$4 sm:$0xff]  }
   0xd   :  { %319 = vmatpush1.bf16.msra.mxu0 %v764_v15  ;;  %360 = vmatpush1.bf16.msra.mxu1 %v765_v16  ;;  %v803_v51 = vld [vmem:[%s1000_s1 + $0xec] ss:$48 sps:$4 sm:$0xff]   ;;  %v798_v52 = vld [vmem:[%s1000_s1 + $0xe0] ss:$48 sps:$4 sm:$0xff]   ;;  %v801_v53 = vld [vmem:[%s1000_s1 + $0xe8] ss:$48 sps:$4 sm:$0xff]   ;;  %v605_v8 = vunpack.c.l.s4 %v817_v7 }
   0xe   :  { %320 = vmatprep.subr.bf16.mxu0 %v766_v17  ;;  %361 = vmatprep.subr.bf16.mxu1 %v768_v18  ;;  %v295_v48 = vsel %vm269_vm0, %v725_v46, 0  ;;  %v301_v49 = vsel %vm269_vm0, %v727_v47, 0  ;;  %v806_v54 = vld [vmem:[%s1000_s1 + $0x84] ss:$48 sps:$4 sm:$0xff]   ;;  %v809_v55 = vld [vmem:[%s1000_s1 + $0x8c] ss:$48 sps:$4 sm:$0xff]  }
   0xf   :  { %v804_v56 = vld [vmem:[%s1000_s1 + $0x80] ss:$48 sps:$4 sm:$0xff]   ;;  %v807_v57 = vld [vmem:[%s1000_s1 + $0x88] ss:$48 sps:$4 sm:$0xff]   ;;  %v812_v58 = vld [vmem:[%s1000_s1 + $0x24] ss:$48 sps:$4 sm:$0xff]   ;;  %v606_v13 = vunpack.c.0.s8 %v605_v8 }
  0x10   :  { %v815_v59 = vld [vmem:[%s1000_s1 + $0x2c] ss:$48 sps:$4 sm:$0xff]   ;;  %v810_v60 = vld [vmem:[%s1000_s1 + $0x20] ss:$48 sps:$4 sm:$0xff]   ;;  %v813_v61 = vld [vmem:[%s1000_s1 + $0x28] ss:$48 sps:$4 sm:$0xff]  }
  0x11   :  { %321 = vmatpush1.bf16.msra.mxu0 %v770_v21  ;;  %362 = vmatpush1.bf16.msra.mxu1 %v771_v22  ;;  %v608_v14 = vshrl.u32 %v607_v9, 7 }
  0x12   :  { %733 = vmatprep.subr.msk.bf16.mxu0 %vm269_vm0, %v722_v23  ;;  %735 = vmatprep.subr.msk.bf16.mxu1 %vm269_vm0, %v724_v24 }
  0x13   :  { %v609_v19 = vsub.s32 %v606_v13, %v608_v14 }
  0x14   :  { %730 = vmatmul.mubr.msk.bf16.vlgmr.msra.gmra.mxu0 %vm265_vm1, %v890_v27  ;;  %732 = vmatmul.mubr.msk.bf16.vlgmr.msra.gmra.mxu1 %vm265_vm1, %v890_v27 }
  0x15   :  { %397 = vmatpush1.bf16.msra.mxu0 %v283_v28  ;;  %438 = vmatpush1.bf16.msra.mxu1 %v289_v29 }
  0x16   :  { %398 = vmatprep.subr.bf16.mxu0 %v778_v30  ;;  %439 = vmatprep.subr.bf16.mxu1 %v781_v31 }
  0x17   :  { %420 = vmatprep.mubr.bf16.mxu0 %v816_v2  ;;  %461 = vmatprep.mubr.bf16.mxu1 %v816_v2 }
  0x19   :  { %399 = vmatpush1.bf16.msra.mxu0 %v776_v32  ;;  %440 = vmatpush1.bf16.msra.mxu1 %v779_v33 }
  0x1a   :  { %400 = vmatprep.subr.bf16.mxu0 %v784_v34  ;;  %441 = vmatprep.subr.bf16.mxu1 %v787_v35 }
  0x1d   :  { %401 = vmatpush1.bf16.msra.mxu0 %v782_v36  ;;  %442 = vmatpush1.bf16.msra.mxu1 %v785_v37 }
  0x1e   :  { %402 = vmatprep.subr.bf16.mxu0 %v790_v38  ;;  %443 = vmatprep.subr.bf16.mxu1 %v793_v39 }
  0x21   :  { %403 = vmatpush1.bf16.msra.mxu0 %v788_v42  ;;  %444 = vmatpush1.bf16.msra.mxu1 %v791_v43 }
  0x22   :  { %737 = vmatprep.subr.msk.bf16.mxu0 %vm269_vm0, %v726_v44  ;;  %739 = vmatprep.subr.msk.bf16.mxu1 %vm269_vm0, %v728_v45 }
  0x24   :  { %734 = vmatmul.mubr.msk.bf16.vlgmr.msra.gmra.mxu0 %vm265_vm1, %v890_v27  ;;  %736 = vmatmul.mubr.msk.bf16.vlgmr.msra.gmra.mxu1 %vm265_vm1, %v890_v27 }
  0x25   :  { %479 = vmatpush1.bf16.msra.mxu0 %v295_v48  ;;  %520 = vmatpush1.bf16.msra.mxu1 %v301_v49 }
  0x26   :  { %480 = vmatprep.subr.bf16.mxu0 %v800_v50  ;;  %521 = vmatprep.subr.bf16.mxu1 %v803_v51 }
  0x27   :  { %502 = vmatprep.mubr.bf16.mxu0 %v816_v2  ;;  %543 = vmatprep.mubr.bf16.mxu1 %v816_v2 }
  0x29   :  { %481 = vmatpush1.bf16.msra.mxu0 %v798_v52  ;;  %522 = vmatpush1.bf16.msra.mxu1 %v801_v53 }
  0x2a   :  { %482 = vmatprep.subr.bf16.mxu0 %v806_v54  ;;  %523 = vmatprep.subr.bf16.mxu1 %v809_v55 }
  0x2d   :  { %483 = vmatpush1.bf16.msra.mxu0 %v804_v56  ;;  %524 = vmatpush1.bf16.msra.mxu1 %v807_v57 }
  0x2e   :  { %484 = vmatprep.subr.bf16.mxu0 %v812_v58  ;;  %525 = vmatprep.subr.bf16.mxu1 %v815_v59 }
  0x31   :  { %485 = vmatpush1.bf16.msra.mxu0 %v810_v60  ;;  %526 = vmatpush1.bf16.msra.mxu1 %v813_v61 }
  0x34   :  { %738 = vmatmul.mubr.msk.bf16.vlgmr.msra.gmra.mxu0 %vm265_vm1, %v890_v27  ;;  %740 = vmatmul.mubr.msk.bf16.vlgmr.msra.gmra.mxu1 %vm265_vm1, %v890_v27 }
  0xd4   :  { %v340_v62 = vpop.f32.mrf.mxu0  ;;  %v381_v63 = vpop.f32.mrf.mxu1 }
  0xd5   :  { %v552_v6 = vmul.f32 0.999995, %v340_v62  ;;  %v554_v10 = vmul.f32 0.999995, %v381_v63 }
  0xd6   :  { %v342_v0 = vpop.f32.mrf.mxu0  ;;  %v383_v1 = vpop.f32.mrf.mxu1 }
  0xd7   :  { %v553_v11 = vmul.f32 0.999995, %v342_v0  ;;  %v555_v12 = vmul.f32 0.999995, %v383_v1  ;;  %v564_v15 = vmax.f32 %v552_v6, 0.0  ;;  %v566_v16 = vmax.f32 %v554_v10, 0.0 }
  0xd8   :  { %v344_v2 = vpop.f32.mrf.mxu0  ;;  %v385_v3 = vpop.f32.mrf.mxu1 }
  0xd9   :  { %v565_v17 = vmax.f32 %v553_v11, 0.0  ;;  %v567_v18 = vmax.f32 %v555_v12, 0.0 }
  0xda   :  { %v345_v4 = vpop.f32.mrf.mxu0  ;;  %v386_v5 = vpop.f32.mrf.mxu1 }
  0xdb   :  { %v741_v22 = vpack.c.bf16 %v565_v17, %v564_v15  ;;  %v742_v23 = vpack.c.bf16 %v567_v18, %v566_v16 }
  0xdd   :  { %v610_v34 = vrot.slane %v741_v22, %v609_v19  ;;  %v617_v35 = vrot.slane %v742_v23, %v609_v19 }
  0xdf   :  { %v632_v42 = vcombine.low %v610_v34, %v617_v35 }
  0xe1   :  { %v640_v46 = vrot.slane %v632_v42, %v609_v19 }
  0xe4   :  { %v422_v20 = vpop.f32.mrf.mxu0  ;;  %v463_v21 = vpop.f32.mrf.mxu1 }
  0xe5   :  { %v556_v24 = vmul.f32 0.999995, %v422_v20  ;;  %v558_v25 = vmul.f32 0.999995, %v463_v21 }
  0xe6   :  { %v424_v26 = vpop.f32.mrf.mxu0  ;;  %v465_v27 = vpop.f32.mrf.mxu1 }
  0xe7   :  { %v568_v28 = vmax.f32 %v556_v24, 0.0  ;;  %v570_v29 = vmax.f32 %v558_v25, 0.0  ;;  %v557_v30 = vmul.f32 0.999995, %v424_v26  ;;  %v559_v31 = vmul.f32 0.999995, %v465_v27 }
  0xe8   :  { %v426_v32 = vpop.f32.mrf.mxu0  ;;  %v467_v33 = vpop.f32.mrf.mxu1 }
  0xe9   :  { %v569_v36 = vmax.f32 %v557_v30, 0.0  ;;  %v571_v37 = vmax.f32 %v559_v31, 0.0 }
  0xea   :  { %v427_v38 = vpop.f32.mrf.mxu0  ;;  %v468_v39 = vpop.f32.mrf.mxu1 }
  0xeb   :  { %v743_v40 = vpack.c.bf16 %v569_v36, %v568_v28  ;;  %v744_v41 = vpack.c.bf16 %v571_v37, %v570_v29 }
  0xed   :  { %v624_v43 = vrot.slane %v743_v40, %v609_v19  ;;  %v631_v44 = vrot.slane %v744_v41, %v609_v19 }
  0xef   :  { %v633_v45 = vcombine.low %v624_v43, %v631_v44 }
  0xf1   :  { %v647_v47 = vrot.slane %v633_v45, %v609_v19 }
  0xf3   :  { %v648_v48 = vcombine.low %v640_v46, %v647_v47 }
  0xf4   :  { %v504_v49 = vpop.f32.mrf.mxu0  ;;  %v545_v50 = vpop.f32.mrf.mxu1 }
  0xf5   :  { %v560_v51 = vmul.f32 0.999995, %v504_v49  ;;  %v562_v52 = vmul.f32 0.999995, %v545_v50  ;;  %675 = vst [vmem:[%s1002_s2] sm:$0xff] %v648_v48 }
  0xf6   :  { %v506_v53 = vpop.f32.mrf.mxu0  ;;  %v547_v54 = vpop.f32.mrf.mxu1 }
  0xf7   :  { %v561_v55 = vmul.f32 0.999995, %v506_v53  ;;  %v563_v56 = vmul.f32 0.999995, %v547_v54  ;;  %v572_v59 = vmax.f32 %v560_v51, 0.0  ;;  %v574_v60 = vmax.f32 %v562_v52, 0.0 }
  0xf8   :  { %v508_v57 = vpop.f32.mrf.mxu0  ;;  %v549_v58 = vpop.f32.mrf.mxu1 }
  0xf9   :  { %v573_v61 = vmax.f32 %v561_v55, 0.0  ;;  %v575_v62 = vmax.f32 %v563_v56, 0.0 }
  0xfa   :  { %v509_v63 = vpop.f32.mrf.mxu0  ;;  %v550_v0 = vpop.f32.mrf.mxu1 }
  0xfb   :  { %v745_v1 = vpack.c.bf16 %v573_v61, %v572_v59  ;;  %v746_v2 = vpack.c.bf16 %v575_v62, %v574_v60 }
  0xfd   :  { %v657_v3 = vrot.slane %v745_v1, %v609_v19  ;;  %v664_v4 = vrot.slane %v746_v2, %v609_v19 }
  0xff   :  { %v665_v5 = vcombine.low %v657_v3, %v664_v4 }
 0x101   :  { %747 = vst.sshfl [vmem:[%s1002_s2 + $0x8] sm:$0x55 pattern:$0x73625140] %v665_v5 }

// kernel: _lambda_.36
= control target key start
LH: loop header
LB: loop body
LE: loop exit
PB: predicated region body
PF: predicated region fallthrough
CT: control target
= control target key end

     0   :  { %vm269_vm0 = vcmask 1042432   ;;  %v777_v2 = vmov 0   ;;  %vm265_vm1 = vcmask 441344   ;;  %s961_s1 = inlined_call_operand.vmem [shape: bf16[54,1536], index: 1, kind: input, shape index: {}]   ;;  %s962_s0 = inlined_call_operand.vmem [shape: bf16[1,54], index: 0, kind: input, shape index: {}]   ;;  %s963_s2 = inlined_call_operand.vmem [shape: f32[1,1536], index: 2, kind: output, shape index: {}]  }
   0x1   :  { %v49_v0 = vld [vmem:[%s961_s1 + $0x120] sm:$0x77]  ;;  %v50_v1 = vld [vmem:[%s961_s1 + $0x128] sm:$0x77]  ;;  %338 = vmatprep.mubr.bf16.mxu0 %v777_v2  ;;  %379 = vmatprep.mubr.bf16.mxu1 %v777_v2  ;;  %v51_v19 = vld [vmem:[%s961_s1 + $0x130] sm:$0x77] }
   0x2   :  { %v686_v3 = vcombine.high %v49_v0, %v49_v0  ;;  %v688_v4 = vcombine.high %v50_v1, %v50_v1  ;;  %v685_v5 = vcombine.low %v49_v0, %v49_v0  ;;  %v687_v6 = vcombine.low %v50_v1, %v50_v1  ;;  %v715_v7 = vld [vmem:[%s961_s1 + $0xc4] ss:$48 sps:$4 sm:$0xff]   ;;  %v717_v8 = vld [vmem:[%s961_s1 + $0xcc] ss:$48 sps:$4 sm:$0xff]   ;;  %v719_v11 = vld [vmem:[%s961_s1 + $0xc0] ss:$48 sps:$4 sm:$0xff]  }
   0x3   :  { %v720_v12 = vld [vmem:[%s961_s1 + $0xc8] ss:$48 sps:$4 sm:$0xff]   ;;  %v721_v13 = vld [vmem:[%s961_s1 + $0x64] ss:$48 sps:$4 sm:$0xff]   ;;  %v723_v14 = vld [vmem:[%s961_s1 + $0x6c] ss:$48 sps:$4 sm:$0xff]   ;;  %v690_v23 = vcombine.high %v51_v19, %v51_v19  ;;  %v689_v25 = vcombine.low %v51_v19, %v51_v19 }
   0x4   :  { %697 = vmatprep.subr.msk.bf16.mxu0 %vm269_vm0, %v686_v3  ;;  %699 = vmatprep.subr.msk.bf16.mxu1 %vm269_vm0, %v688_v4  ;;  %v271_v9 = vsel %vm269_vm0, %v685_v5, 0  ;;  %v277_v10 = vsel %vm269_vm0, %v687_v6, 0  ;;  %v725_v15 = vld [vmem:[%s961_s1 + $0x60] ss:$48 sps:$4 sm:$0xff]   ;;  %v726_v16 = vld [vmem:[%s961_s1 + $0x68] ss:$48 sps:$4 sm:$0xff]   ;;  %v571_v6 = vlaneseq }
   0x5   :  { %315 = vmatpush1.bf16.msra.mxu0 %v271_v9  ;;  %356 = vmatpush1.bf16.msra.mxu1 %v277_v10  ;;  %v727_v17 = vld [vmem:[%s961_s1 + $0x4] ss:$48 sps:$4 sm:$0xff]   ;;  %v729_v18 = vld [vmem:[%s961_s1 + $0xc] ss:$48 sps:$4 sm:$0xff]   ;;  %v731_v21 = vld [vmem:[%s961_s1] ss:$48 sps:$4 sm:$0xff]  }
   0x6   :  { %316 = vmatprep.subr.bf16.mxu0 %v715_v7  ;;  %357 = vmatprep.subr.bf16.mxu1 %v717_v8  ;;  %v52_v20 = vld [vmem:[%s961_s1 + $0x138] sm:$0x77]  ;;  %v851_v27 = vld [vmem:[%s962_s0] sm:$0x1]  ;;  %v283_v28 = vsel %vm269_vm0, %v689_v25, 0  ;;  %v572_v10 = vshrl.u32 %v571_v6, 7 }
   0x7   :  { %v732_v22 = vld [vmem:[%s961_s1 + $0x8] ss:$48 sps:$4 sm:$0xff]   ;;  %v692_v24 = vcombine.high %v52_v20, %v52_v20  ;;  %v691_v26 = vcombine.low %v52_v20, %v52_v20  ;;  %v739_v30 = vld [vmem:[%s961_s1 + $0xd4] ss:$48 sps:$4 sm:$0xff]   ;;  %v742_v31 = vld [vmem:[%s961_s1 + $0xdc] ss:$48 sps:$4 sm:$0xff]  }
   0x8   :  { %v737_v32 = vld [vmem:[%s961_s1 + $0xd0] ss:$48 sps:$4 sm:$0xff]   ;;  %v740_v33 = vld [vmem:[%s961_s1 + $0xd8] ss:$48 sps:$4 sm:$0xff]   ;;  %v745_v34 = vld [vmem:[%s961_s1 + $0x74] ss:$48 sps:$4 sm:$0xff]  }
   0x9   :  { %317 = vmatpush1.bf16.msra.mxu0 %v719_v11  ;;  %358 = vmatpush1.bf16.msra.mxu1 %v720_v12  ;;  %v289_v29 = vsel %vm269_vm0, %v691_v26, 0  ;;  %v748_v35 = vld [vmem:[%s961_s1 + $0x7c] ss:$48 sps:$4 sm:$0xff]   ;;  %v743_v36 = vld [vmem:[%s961_s1 + $0x70] ss:$48 sps:$4 sm:$0xff]   ;;  %vm642_vm2 = vcmp.lt.s32.totalorder %v571_v6, 512 }
   0xa   :  { %318 = vmatprep.subr.bf16.mxu0 %v721_v13  ;;  %359 = vmatprep.subr.bf16.mxu1 %v723_v14  ;;  %v746_v37 = vld [vmem:[%s961_s1 + $0x78] ss:$48 sps:$4 sm:$0xff]   ;;  %v751_v38 = vld [vmem:[%s961_s1 + $0x14] ss:$48 sps:$4 sm:$0xff]   ;;  %v754_v39 = vld [vmem:[%s961_s1 + $0x1c] ss:$48 sps:$4 sm:$0xff]  }
   0xb   :  { %v53_v40 = vld [vmem:[%s961_s1 + $0x140] sm:$0x77]  ;;  %v54_v41 = vld [vmem:[%s961_s1 + $0x148] sm:$0x77]  ;;  %v778_v4 = vmov 1966171168  }
   0xc   :  { %v749_v42 = vld [vmem:[%s961_s1 + $0x10] ss:$48 sps:$4 sm:$0xff]   ;;  %v752_v43 = vld [vmem:[%s961_s1 + $0x18] ss:$48 sps:$4 sm:$0xff]   ;;  %v694_v44 = vcombine.high %v53_v40, %v53_v40  ;;  %v696_v45 = vcombine.high %v54_v41, %v54_v41  ;;  %v693_v46 = vcombine.low %v53_v40, %v53_v40  ;;  %v695_v47 = vcombine.low %v54_v41, %v54_v41  ;;  %v761_v50 = vld [vmem:[%s961_s1 + $0xe4] ss:$48 sps:$4 sm:$0xff]  }
   0xd   :  { %319 = vmatpush1.bf16.msra.mxu0 %v725_v15  ;;  %360 = vmatpush1.bf16.msra.mxu1 %v726_v16  ;;  %v764_v51 = vld [vmem:[%s961_s1 + $0xec] ss:$48 sps:$4 sm:$0xff]   ;;  %v759_v52 = vld [vmem:[%s961_s1 + $0xe0] ss:$48 sps:$4 sm:$0xff]   ;;  %v762_v53 = vld [vmem:[%s961_s1 + $0xe8] ss:$48 sps:$4 sm:$0xff]   ;;  %v569_v5 = vunpack.c.l.s4 %v778_v4 }
   0xe   :  { %320 = vmatprep.subr.bf16.mxu0 %v727_v17  ;;  %361 = vmatprep.subr.bf16.mxu1 %v729_v18  ;;  %v295_v48 = vsel %vm269_vm0, %v693_v46, 0  ;;  %v301_v49 = vsel %vm269_vm0, %v695_v47, 0  ;;  %v767_v54 = vld [vmem:[%s961_s1 + $0x84] ss:$48 sps:$4 sm:$0xff]   ;;  %v770_v55 = vld [vmem:[%s961_s1 + $0x8c] ss:$48 sps:$4 sm:$0xff]  }
   0xf   :  { %v765_v56 = vld [vmem:[%s961_s1 + $0x80] ss:$48 sps:$4 sm:$0xff]   ;;  %v768_v57 = vld [vmem:[%s961_s1 + $0x88] ss:$48 sps:$4 sm:$0xff]   ;;  %v773_v58 = vld [vmem:[%s961_s1 + $0x24] ss:$48 sps:$4 sm:$0xff]   ;;  %v570_v9 = vunpack.c.0.s8 %v569_v5 }
  0x10   :  { %v776_v59 = vld [vmem:[%s961_s1 + $0x2c] ss:$48 sps:$4 sm:$0xff]   ;;  %v771_v60 = vld [vmem:[%s961_s1 + $0x20] ss:$48 sps:$4 sm:$0xff]   ;;  %v774_v61 = vld [vmem:[%s961_s1 + $0x28] ss:$48 sps:$4 sm:$0xff]  }
  0x11   :  { %321 = vmatpush1.bf16.msra.mxu0 %v731_v21  ;;  %362 = vmatpush1.bf16.msra.mxu1 %v732_v22  ;;  %v573_v12 = vsub.s32 %v570_v9, %v572_v10 }
  0x12   :  { %701 = vmatprep.subr.msk.bf16.mxu0 %vm269_vm0, %v690_v23  ;;  %703 = vmatprep.subr.msk.bf16.mxu1 %vm269_vm0, %v692_v24 }
  0x14   :  { %698 = vmatmul.mubr.msk.bf16.vlgmr.msra.gmra.mxu0 %vm265_vm1, %v851_v27  ;;  %700 = vmatmul.mubr.msk.bf16.vlgmr.msra.gmra.mxu1 %vm265_vm1, %v851_v27 }
  0x15   :  { %397 = vmatpush1.bf16.msra.mxu0 %v283_v28  ;;  %438 = vmatpush1.bf16.msra.mxu1 %v289_v29 }
  0x16   :  { %398 = vmatprep.subr.bf16.mxu0 %v739_v30  ;;  %439 = vmatprep.subr.bf16.mxu1 %v742_v31 }
  0x17   :  { %420 = vmatprep.mubr.bf16.mxu0 %v777_v2  ;;  %461 = vmatprep.mubr.bf16.mxu1 %v777_v2 }
  0x19   :  { %399 = vmatpush1.bf16.msra.mxu0 %v737_v32  ;;  %440 = vmatpush1.bf16.msra.mxu1 %v740_v33 }
  0x1a   :  { %400 = vmatprep.subr.bf16.mxu0 %v745_v34  ;;  %441 = vmatprep.subr.bf16.mxu1 %v748_v35 }
  0x1d   :  { %401 = vmatpush1.bf16.msra.mxu0 %v743_v36  ;;  %442 = vmatpush1.bf16.msra.mxu1 %v746_v37 }
  0x1e   :  { %402 = vmatprep.subr.bf16.mxu0 %v751_v38  ;;  %443 = vmatprep.subr.bf16.mxu1 %v754_v39 }
  0x21   :  { %403 = vmatpush1.bf16.msra.mxu0 %v749_v42  ;;  %444 = vmatpush1.bf16.msra.mxu1 %v752_v43 }
  0x22   :  { %705 = vmatprep.subr.msk.bf16.mxu0 %vm269_vm0, %v694_v44  ;;  %707 = vmatprep.subr.msk.bf16.mxu1 %vm269_vm0, %v696_v45 }
  0x24   :  { %702 = vmatmul.mubr.msk.bf16.vlgmr.msra.gmra.mxu0 %vm265_vm1, %v851_v27  ;;  %704 = vmatmul.mubr.msk.bf16.vlgmr.msra.gmra.mxu1 %vm265_vm1, %v851_v27 }
  0x25   :  { %479 = vmatpush1.bf16.msra.mxu0 %v295_v48  ;;  %520 = vmatpush1.bf16.msra.mxu1 %v301_v49 }
  0x26   :  { %480 = vmatprep.subr.bf16.mxu0 %v761_v50  ;;  %521 = vmatprep.subr.bf16.mxu1 %v764_v51 }
  0x27   :  { %502 = vmatprep.mubr.bf16.mxu0 %v777_v2  ;;  %543 = vmatprep.mubr.bf16.mxu1 %v777_v2 }
  0x29   :  { %481 = vmatpush1.bf16.msra.mxu0 %v759_v52  ;;  %522 = vmatpush1.bf16.msra.mxu1 %v762_v53 }
  0x2a   :  { %482 = vmatprep.subr.bf16.mxu0 %v767_v54  ;;  %523 = vmatprep.subr.bf16.mxu1 %v770_v55 }
  0x2d   :  { %483 = vmatpush1.bf16.msra.mxu0 %v765_v56  ;;  %524 = vmatpush1.bf16.msra.mxu1 %v768_v57 }
  0x2e   :  { %484 = vmatprep.subr.bf16.mxu0 %v773_v58  ;;  %525 = vmatprep.subr.bf16.mxu1 %v776_v59 }
  0x31   :  { %485 = vmatpush1.bf16.msra.mxu0 %v771_v60  ;;  %526 = vmatpush1.bf16.msra.mxu1 %v774_v61 }
  0x34   :  { %706 = vmatmul.mubr.msk.bf16.vlgmr.msra.gmra.mxu0 %vm265_vm1, %v851_v27  ;;  %708 = vmatmul.mubr.msk.bf16.vlgmr.msra.gmra.mxu1 %vm265_vm1, %v851_v27 }
  0xd4   :  { %v340_v62 = vpop.f32.mrf.mxu0  ;;  %v381_v63 = vpop.f32.mrf.mxu1 }
  0xd6   :  { %v342_v0 = vpop.f32.mrf.mxu0  ;;  %v383_v1 = vpop.f32.mrf.mxu1 }
  0xd7   :  { %v564_v11 = vcombine.low %v340_v62, %v342_v0  ;;  %v565_v13 = vcombine.low %v381_v63, %v383_v1 }
  0xd8   :  { %v344_v2 = vpop.f32.mrf.mxu0  ;;  %v385_v3 = vpop.f32.mrf.mxu1 }
  0xd9   :  { %v574_v16 = vrot.slane %v564_v11, %v573_v12  ;;  %v581_v17 = vrot.slane %v565_v13, %v573_v12 }
  0xda   :  { %v345_v7 = vpop.f32.mrf.mxu0  ;;  %v386_v8 = vpop.f32.mrf.mxu1 }
  0xdb   :  { %v596_v24 = vcombine.low %v574_v16, %v581_v17 }
  0xdd   :  { %v604_v30 = vrot.slane %v596_v24, %v573_v12 }
  0xe4   :  { %v422_v14 = vpop.f32.mrf.mxu0  ;;  %v463_v15 = vpop.f32.mrf.mxu1 }
  0xe6   :  { %v424_v18 = vpop.f32.mrf.mxu0  ;;  %v465_v19 = vpop.f32.mrf.mxu1 }
  0xe7   :  { %v566_v20 = vcombine.low %v422_v14, %v424_v18  ;;  %v567_v21 = vcombine.low %v463_v15, %v465_v19 }
  0xe8   :  { %v426_v22 = vpop.f32.mrf.mxu0  ;;  %v467_v23 = vpop.f32.mrf.mxu1 }
  0xe9   :  { %v588_v25 = vrot.slane %v566_v20, %v573_v12  ;;  %v595_v26 = vrot.slane %v567_v21, %v573_v12 }
  0xea   :  { %v427_v27 = vpop.f32.mrf.mxu0  ;;  %v468_v28 = vpop.f32.mrf.mxu1 }
  0xeb   :  { %v597_v29 = vcombine.low %v588_v25, %v595_v26 }
  0xed   :  { %v611_v31 = vrot.slane %v597_v29, %v573_v12 }
  0xef   :  { %v612_v32 = vcombine.low %v604_v30, %v611_v31 }
  0xf1   :  { %639 = vst [vmem:[%s963_s2] sm:$0xff] %v612_v32 }
  0xf4   :  { %v504_v33 = vpop.f32.mrf.mxu0  ;;  %v545_v34 = vpop.f32.mrf.mxu1 }
  0xf6   :  { %v506_v35 = vpop.f32.mrf.mxu0  ;;  %v547_v36 = vpop.f32.mrf.mxu1 }
  0xf7   :  { %v613_v37 = vcombine.low %v504_v33, %v506_v35  ;;  %v614_v38 = vcombine.low %v545_v34, %v547_v36 }
  0xf8   :  { %v508_v39 = vpop.f32.mrf.mxu0  ;;  %v549_v40 = vpop.f32.mrf.mxu1 }
  0xf9   :  { %v621_v41 = vrot.slane %v613_v37, %v573_v12  ;;  %v628_v42 = vrot.slane %v614_v38, %v573_v12 }
  0xfa   :  { %v509_v43 = vpop.f32.mrf.mxu0  ;;  %v550_v44 = vpop.f32.mrf.mxu1 }
  0xfb   :  { %v629_v45 = vcombine.low %v621_v41, %v628_v42 }
  0xfd   :  { %v636_v46 = vrot.slane %v629_v45, %v573_v12 }
  0xff   :  { %644 = vst.msk [vmem:[%s963_s2 + $0x8] sm:$0xf] %vm642_vm2, %v636_v46 }

// kernel: _lambda_.37
= control target key start
LH: loop header
LB: loop body
LE: loop exit
PB: predicated region body
PF: predicated region fallthrough
CT: control target
= control target key end

     0   :  { %s319_s6 = smov 0   ;;  %s346_s0 = inlined_call_operand.vmem [shape: f32[2,3,256], index: 0, kind: input, shape index: {}]   ;;  %s347_s1 = inlined_call_operand.vmem [shape: f32[2,1,256], index: 1, kind: output, shape index: {}]  }
   0x1 LB: > { %s272_s7 = sadd.s32 4294967295, %s305_s6   ;;  %p276_p0 = scmp.ge.s32.totalorder %s305_s6, 1  ;;  %s305_s6 = sphi %s319_s6, %s11_s6  }
   0x2   : > { %p87_p1 = scmp.lt.s32.totalorder %s305_s6, 3 }
   0x4   : > { %p88_p2 = pnand %p276_p0, %p87_p1 }
   0x5   : > { %p106_p3 = scmp.lt.s32.totalorder (!%p88_p2), %s272_s7, 1 }
   0x6   : > { %91 = sbr.rel (%p88_p2) target bundleno = 92 (0x5c), region = 24 }
   0xb   : > { %s349_s7 = smov (!%p106_p3, %s272_s7), 1  ;;  %vm120_vm0 = vcmask 1042432   ;;  %v159_v18 = vlaneseq  ;;  %v307_v22 = vmov 839922192   ;;  %v308_v60 = vmov 1966171168  }
   0xc   : > { %s282_s8 = sshll.u32 %s349_s7, 3  ;;  %v165_v23 = vunpack.c.l.s4 %v307_v22  ;;  %v200_v61 = vunpack.c.l.s4 %v308_v60  ;;  %s279_s12 = sshll.u32 %s349_s7, 1 }
   0xd   : > { %s110_s11 = scalar_lea.vmem %s346_s0, %s282_s8  ;;  %v160_v21 = vshrl.u32 %v159_v18, 7  ;;  %s114_s15 = scalar_lea.vmem %s347_s1, %s279_s12  ;;  %vm216_vm1 = vcmp.lt.s32.totalorder %v159_v18, 256 }
   0xe   : > { %v115_v0 = vld [vmem:[%s110_s11] sm:$0x77]  ;;  %v166_v25 = vunpack.c.0.s8 %v165_v23 }
   0xf   : > { %v116_v1 = vsub.f32 0.0, %v115_v0  ;;  %v161_v24 = vcvt.s32.f32 %v160_v21 }
  0x10   : > { %v169_v27 = vsub.s32 %v166_v25, %v160_v21 }
  0x11   : > { %v118_v2 = vcombine.high %v116_v1, %v116_v1  ;;  %v121_v3 = vsel %vm120_vm0, %v116_v1, -inf  ;;  %v162_v26 = vadd.f32 -1.0, %v161_v24 }
  0x12   : > { %v122_v4 = vrot.slane %v121_v3, 4 }
  0x13   : > { %v128_v5 = vsel %vm120_vm0, %v118_v2, -inf  ;;  %v170_v28 = vrot.slane %v162_v26, %v169_v27 }
  0x14   : > { %v123_v6 = vmax.f32 %v121_v3, %v122_v4  ;;  %v129_v7 = vrot.slane %v128_v5, 4 }
  0x16   : > { %v124_v8 = vrot.slane %v123_v6, 2  ;;  %v130_v9 = vmax.f32 %v128_v5, %v129_v7 }
  0x18   : > { %v125_v10 = vmax.f32 %v123_v6, %v124_v8  ;;  %v131_v11 = vrot.slane %v130_v9, 2 }
  0x1a   : > { %v126_v12 = vrot.slane %v125_v10, 1  ;;  %v132_v13 = vmax.f32 %v130_v9, %v131_v11 }
  0x1c   : > { %v127_v14 = vmax.f32 %v125_v10, %v126_v12  ;;  %v133_v15 = vrot.slane %v132_v13, 1 }
  0x1e   : > { %v134_v16 = vmax.f32 %v132_v13, %v133_v15 }
  0x20   : > { %v137_v17 = vcombine.low %v127_v14, %v134_v16 }
  0x22   : > { %v139_v19 = vsub.f32 %v116_v1, %v137_v17  ;;  %v201_v1 = vunpack.c.0.s8 %v200_v61 }
  0x24   : > { %v140_v20 = vmul.f32 1.442695, %v139_v19  ;;  %v204_v6 = vsub.s32 %v201_v1, %v160_v21 }
  0x26   : > { %293 = vpow2.f32 %v140_v20 }
  0x33   : > { %v294_v29 = vpop.eup %293 }
  0x34   : > { %v143_v30 = vcombine.high %v294_v29, %v294_v29  ;;  %v145_v31 = vsel %vm120_vm0, %v294_v29, 0.0  ;;  %v172_v32 = vmul.f32 %v294_v29, %v170_v28 }
  0x35   : > { %v146_v33 = vrot.slane %v145_v31, 4 }
  0x36   : > { %v152_v34 = vsel %vm120_vm0, %v143_v30, 0.0  ;;  %v174_v35 = vcombine.high %v172_v32, %v172_v32  ;;  %v176_v36 = vsel %vm120_vm0, %v172_v32, 0.0 }
  0x37   : > { %v147_v37 = vadd.f32 %v146_v33, %v145_v31  ;;  %v153_v38 = vrot.slane %v152_v34, 4  ;;  %v177_v39 = vrot.slane %v176_v36, 4 }
  0x38   : > { %v183_v40 = vsel %vm120_vm0, %v174_v35, 0.0 }
  0x39   : > { %v148_v41 = vrot.slane %v147_v37, 2  ;;  %v154_v42 = vadd.f32 %v153_v38, %v152_v34  ;;  %v184_v43 = vrot.slane %v183_v40, 4  ;;  %v178_v46 = vadd.f32 %v177_v39, %v176_v36 }
  0x3b   : > { %v149_v44 = vadd.f32 %v148_v41, %v147_v37  ;;  %v155_v45 = vrot.slane %v154_v42, 2  ;;  %v185_v49 = vadd.f32 %v184_v43, %v183_v40  ;;  %v179_v52 = vrot.slane %v178_v46, 2 }
  0x3d   : > { %v150_v47 = vrot.slane %v149_v44, 1  ;;  %v156_v48 = vadd.f32 %v155_v45, %v154_v42  ;;  %v186_v54 = vrot.slane %v185_v49, 2  ;;  %v180_v55 = vadd.f32 %v179_v52, %v178_v46 }
  0x3f   : > { %v151_v50 = vadd.f32 %v150_v47, %v149_v44  ;;  %v157_v51 = vrot.slane %v156_v48, 1  ;;  %v187_v56 = vadd.f32 %v186_v54, %v185_v49  ;;  %v181_v57 = vrot.slane %v180_v55, 1 }
  0x41   : > { %v158_v53 = vadd.f32 %v157_v51, %v156_v48  ;;  %295 = vrcp.f32 %v151_v50  ;;  %v188_v58 = vrot.slane %v187_v56, 1  ;;  %v182_v59 = vadd.f32 %v181_v57, %v180_v55 }
  0x43   : > { %297 = vrcp.f32 %v158_v53  ;;  %v189_v62 = vadd.f32 %v188_v58, %v187_v56 }
  0x4e   : > { %v296_v63 = vpop.eup %295 }
  0x4f   : > { %v192_v0 = vmul.f32 %v296_v63, %v182_v59 }
  0x50   : > { %v298_v2 = vpop.eup %297 }
  0x51   : > { %v193_v3 = vmul.f32 %v298_v2, %v189_v62  ;;  %v194_v4 = vmul.f32 4.0, %v192_v0 }
  0x53   : > { %v195_v5 = vmul.f32 4.0, %v193_v3 }
  0x55   : > { %v198_v7 = vcombine.low %v194_v4, %v195_v5 }
  0x57   : > { %v205_v8 = vrot.slane %v198_v7, %v204_v6 }
  0x59   : > { %v212_v9 = vrot.slane %v205_v8, %v204_v6 }
  0x5b   : > { %218 = vst.msk [vmem:[%s114_s15] sm:$0x3] %vm216_vm1, %v212_v9 }
  0x5c PF: > { %s11_s6 = sadd.s32 1, %s305_s6  }
  0x5d   : > { %p8_p4 = scmp.ge.s32.totalorder %s11_s6, 4  }
  0x5f   :  { %10 = sbr.rel (!%p8_p4) target bundleno = 1 (0x1), region = 54 }

</bundles_post_ra>
